<compile_context>
chip_gen: v6e
topology: v6e:2x2x1
jax: 0.10.0
libtpu: 0.0.40
codegen_flags: <defaults>
</compile_context>

<pallas_src>
import functools

import jax
import jax.numpy as jnp
from jax.experimental import pallas as pl
from jax.experimental.pallas import tpu as pltpu

LANE = 128        # pad channel dims to multiples of the lane width
_HALO_PAD = 8     # zero rows before/after the padded flat image in the buffer


def _round_up(x, m):
    return (x + m - 1) // m * m


# ------------------------------ fused kernel --------------------------------


def _decoder_block_kernel(x_ref, ml_ref, mr_ref,
                          wi_ref, bi_ref, w1_ref, b1_ref,
                          w2_ref, b2_ref, w3_ref, b3_ref, w4_ref, b4_ref,
                          o_ref, pbuf,
                          *, W, HW, CHP, COP, post_gain):
    f32 = jnp.float32
    bf16 = jnp.bfloat16

    # Zero the halo buffer every step so the border reads as conv zero-padding.
    # (Re-zeroing per step keeps the kernel correct under any grid->core split.)
    pbuf[...] = jnp.zeros_like(pbuf)

    x = x_ref[0]                                           # (HW, CIP) bf16
    ml = ml_ref[...]                                       # (HW, 1)   bf16
    mr = mr_ref[...]                                       # (HW, 1)   bf16

    # residual path: relu_1 -> conv_1 (1x1), f32 accumulation on the MXU
    h = jnp.dot(jnp.maximum(x, 0), w1_ref[...],
                preferred_element_type=f32) + b1_ref[...]  # (HW, CHP) f32

    base = _HALO_PAD + W        # flat offset of pixel (0, 0) inside pbuf

    def conv3x3(h_in, w_ref, b_ref, cout):
        # ReLU once on the compact activation, then stage it into the padded
        # flat buffer.  The 3x3 conv is 9 shifted, masked, accumulating dots.
        pbuf[pl.ds(base, HW), :] = jnp.maximum(h_in, 0.0)
        acc = jnp.zeros((HW, cout), f32)
        for dy in (-1, 0, 1):
            for dx in (-1, 0, 1):
                t = (dy + 1) * 3 + (dx + 1)                # == kh*3 + kw
                tap = pbuf[pl.ds(base + dy * W + dx, HW), :].astype(bf16)
                if dx == -1:
                    tap = tap * ml                         # kill x-1 < 0 wrap
                elif dx == 1:
                    tap = tap * mr                         # kill x+1 >= W wrap
                acc = acc + jnp.dot(tap, w_ref[t], preferred_element_type=f32)
        return acc + b_ref[...]

    h = conv3x3(h, w2_ref, b2_ref, CHP)       # relu_2 -> conv_2
    h = conv3x3(h, w3_ref, b3_ref, CHP)       # relu_3 -> conv_3
    res = conv3x3(h, w4_ref, b4_ref, COP)     # relu_4 -> conv_4

    # identity path last (keeps register pressure low during the residual chain)
    ident = jnp.dot(x, wi_ref[...], preferred_element_type=f32) + bi_ref[...]

    o_ref[0] = (ident + post_gain * res).astype(o_ref.dtype)


# ------------------------------ JAX wrapper ----------------------------------


def decoder_block_forward(x_nchw, params, *, post_gain, in_channels, out_channels):
    n, cin, hgt, wid = x_nchw.shape
    assert cin == in_channels
    hid = params["conv_1.weight"].shape[0]
    HW = hgt * wid
    CIP = _round_up(cin, LANE)
    CHP = _round_up(hid, LANE)
    COP = _round_up(out_channels, LANE)

    # activations: NCHW -> (N, H*W, Cin) channels-last, channel-pad, bf16
    x = jnp.transpose(x_nchw, (0, 2, 3, 1)).reshape(n, HW, cin)
    x = jnp.pad(x, ((0, 0), (0, 0), (0, CIP - cin))).astype(jnp.bfloat16)

    def pad2(w, r, c):
        return jnp.pad(w, ((0, r - w.shape[0]), (0, c - w.shape[1])))

    def w1x1(w, r, c):      # (Cout, Cin, 1, 1) -> (r, c) bf16
        return pad2(w[:, :, 0, 0].T, r, c).astype(jnp.bfloat16)

    def w3x3(w, r, c):      # (Cout, Cin, 3, 3) -> (9, r, c) bf16, t = kh*3 + kw
        wt = jnp.transpose(w, (2, 3, 1, 0)).reshape(9, w.shape[1], w.shape[0])
        return jnp.pad(wt, ((0, 0), (0, r - wt.shape[1]),
                            (0, c - wt.shape[2]))).astype(jnp.bfloat16)

    def bias(b, c):
        return jnp.pad(b, (0, c - b.shape[0])).reshape(1, c).astype(jnp.float32)

    if in_channels == out_channels:
        # Identity() path: exact pass-through expressed as a dot with I (padded
        # lanes are zero), so the fused kernel has a single code path.
        wi = pad2(jnp.eye(cin, dtype=jnp.float32), CIP, COP).astype(jnp.bfloat16)
        bi = jnp.zeros((1, COP), jnp.float32)
    else:
        wi = w1x1(params["identity.weight"], CIP, COP)
        bi = bias(params["identity.bias"], COP)

    w1 = w1x1(params["conv_1.weight"], CIP, CHP); b1 = bias(params["conv_1.bias"], CHP)
    w2 = w3x3(params["conv_2.weight"], CHP, CHP); b2 = bias(params["conv_2.bias"], CHP)
    w3 = w3x3(params["conv_3.weight"], CHP, CHP); b3 = bias(params["conv_3.bias"], CHP)
    w4 = w3x3(params["conv_4.weight"], CHP, COP); b4 = bias(params["conv_4.bias"], COP)

    # column-wrap masks for the flat-shifted 3x3 taps
    col = jnp.arange(HW, dtype=jnp.int32) % wid
    ml = (col != 0).astype(jnp.bfloat16).reshape(HW, 1)        # dx = -1 valid
    mr = (col != wid - 1).astype(jnp.bfloat16).reshape(HW, 1)  # dx = +1 valid

    pbuf_rows = 2 * _HALO_PAD + (hgt + 2) * wid

    kernel = functools.partial(
        _decoder_block_kernel,
        W=wid, HW=HW, CHP=CHP, COP=COP, post_gain=float(post_gain))

    flops = 2 * n * HW * (CIP * COP + CIP * CHP + 9 * CHP * (2 * CHP + COP))
    bytes_accessed = (x.size * 2 + n * HW * COP * 4
                      + (wi.size + w1.size + w2.size + w3.size + w4.size) * 2
                      + (bi.size + b1.size + b2.size + b3.size + b4.size) * 4)

    out = pl.pallas_call(
        kernel,
        out_shape=jax.ShapeDtypeStruct((n, HW, COP), jnp.float32),
        grid=(n,),
        in_specs=[
            pl.BlockSpec((1, HW, CIP), lambda b: (b, 0, 0)),     # x
            pl.BlockSpec((HW, 1), lambda b: (0, 0)),             # mask left
            pl.BlockSpec((HW, 1), lambda b: (0, 0)),             # mask right
            pl.BlockSpec((CIP, COP), lambda b: (0, 0)),          # identity W
            pl.BlockSpec((1, COP), lambda b: (0, 0)),            # identity b
            pl.BlockSpec((CIP, CHP), lambda b: (0, 0)),          # conv_1 W
            pl.BlockSpec((1, CHP), lambda b: (0, 0)),            # conv_1 b
            pl.BlockSpec((9, CHP, CHP), lambda b: (0, 0, 0)),    # conv_2 W
            pl.BlockSpec((1, CHP), lambda b: (0, 0)),            # conv_2 b
            pl.BlockSpec((9, CHP, CHP), lambda b: (0, 0, 0)),    # conv_3 W
            pl.BlockSpec((1, CHP), lambda b: (0, 0)),            # conv_3 b
            pl.BlockSpec((9, CHP, COP), lambda b: (0, 0, 0)),    # conv_4 W
            pl.BlockSpec((1, COP), lambda b: (0, 0)),            # conv_4 b
        ],
        out_specs=pl.BlockSpec((1, HW, COP), lambda b: (b, 0, 0)),
        scratch_shapes=[pltpu.VMEM((pbuf_rows, CHP), jnp.float32)],
        compiler_params=pltpu.CompilerParams(dimension_semantics=("parallel",)),
        cost_estimate=pl.CostEstimate(flops=flops, transcendentals=0,
                                      bytes_accessed=bytes_accessed),
    )(x, ml, mr, wi, bi, w1, b1, w2, b2, w3, b3, w4, b4)

    out = out[:, :, :out_channels].reshape(n, hgt, wid, out_channels)
    return jnp.transpose(out, (0, 3, 1, 2))                  # NHWC -> NCHW


# ------------------------- pure-JAX reference --------------------------------


def _conv2d_ref(x, w, b, padding):
    out = jax.lax.conv_general_dilated(
        x, w, window_strides=(1, 1), padding=padding,
        dimension_numbers=("NCHW", "OIHW", "NCHW"))
    return out + b.reshape(1, -1, 1, 1)


def decoder_block_ref(x, params, post_gain, in_c, out_c):
    if in_c == out_c:
        ident = x
    else:
        ident = _conv2d_ref(x, params["identity.weight"], params["identity.bias"], "VALID")
    h = jax.nn.relu(x)
    h = _conv2d_ref(h, params["conv_1.weight"], params["conv_1.bias"], "VALID")
    h = jax.nn.relu(h)
    h = _conv2d_ref(h, params["conv_2.weight"], params["conv_2.bias"], "SAME")
    h = jax.nn.relu(h)
    h = _conv2d_ref(h, params["conv_3.weight"], params["conv_3.bias"], "SAME")
    h = jax.nn.relu(h)
    h = _conv2d_ref(h, params["conv_4.weight"], params["conv_4.bias"], "SAME")
    return ident + post_gain * h


# --------------------------------- main ---------------------------------------

if __name__ == "__main__":
    N, Cin, Cout, H, W = 2, 4, 8, 16, 16
    num_layers = 2
    hid = Cout // 4
    post_gain = 1.0 / num_layers ** 2

    key = jax.random.PRNGKey(0)
    keys = jax.random.split(key, 11)
    params = {
        "identity.weight": 0.2 * jax.random.normal(keys[0], (Cout, Cin, 1, 1), jnp.float32),
        "identity.bias":   0.1 * jax.random.normal(keys[1], (Cout,), jnp.float32),
        "conv_1.weight":   0.2 * jax.random.normal(keys[2], (hid, Cin, 1, 1), jnp.float32),
        "conv_1.bias":     0.1 * jax.random.normal(keys[3], (hid,), jnp.float32),
        "conv_2.weight":   0.2 * jax.random.normal(keys[4], (hid, hid, 3, 3), jnp.float32),
        "conv_2.bias":     0.1 * jax.random.normal(keys[5], (hid,), jnp.float32),
        "conv_3.weight":   0.2 * jax.random.normal(keys[6], (hid, hid, 3, 3), jnp.float32),
        "conv_3.bias":     0.1 * jax.random.normal(keys[7], (hid,), jnp.float32),
        "conv_4.weight":   0.2 * jax.random.normal(keys[8], (Cout, hid, 3, 3), jnp.float32),
        "conv_4.bias":     0.1 * jax.random.normal(keys[9], (Cout,), jnp.float32),
    }
    x = jax.random.normal(keys[10], (N, Cin, H, W), jnp.float32)

    fwd = jax.jit(functools.partial(
        decoder_block_forward, post_gain=post_gain,
        in_channels=Cin, out_channels=Cout))
    out = jax.block_until_ready(fwd(x, params))

    ref = decoder_block_ref(x, params, post_gain, Cin, Cout)
    assert out.shape == (N, Cout, H, W), out.shape
    max_err = float(jnp.max(jnp.abs(out - ref)))
    # bf16 MXU inputs with f32 accumulation -> loosened tolerance vs f32 reference
    assert jnp.allclose(out, ref, atol=3e-2, rtol=3e-2), max_err

    print("KERNEL_OK")
</pallas_src>

<mosaic_0001>
module attributes {stable_mosaic.version = 11 : i64} {
  func.func @_decoder_block_kernel(%arg0: i32, %arg1: memref<1x256x128xbf16, #tpu.memory_space<vmem>>, %arg2: memref<256x1xbf16, #tpu.memory_space<vmem>>, %arg3: memref<256x1xbf16, #tpu.memory_space<vmem>>, %arg4: memref<128x128xbf16, #tpu.memory_space<vmem>>, %arg5: memref<1x128xf32, #tpu.memory_space<vmem>>, %arg6: memref<128x128xbf16, #tpu.memory_space<vmem>>, %arg7: memref<1x128xf32, #tpu.memory_space<vmem>>, %arg8: memref<9x128x128xbf16, #tpu.memory_space<vmem>>, %arg9: memref<1x128xf32, #tpu.memory_space<vmem>>, %arg10: memref<9x128x128xbf16, #tpu.memory_space<vmem>>, %arg11: memref<1x128xf32, #tpu.memory_space<vmem>>, %arg12: memref<9x128x128xbf16, #tpu.memory_space<vmem>>, %arg13: memref<1x128xf32, #tpu.memory_space<vmem>>, %arg14: memref<1x256x128xf32, #tpu.memory_space<vmem>>, %arg15: memref<304x128xf32, #tpu.memory_space<vmem>>) attributes {dimension_semantics = [#tpu.dimension_semantics<parallel>], iteration_bounds = array<i64: 2>, scalar_prefetch = 0 : i64, scratch_operands = 1 : i64, tpu.core_type = #tpu.core_type<tc>, window_params = [{transform_indices = @transform_0, window_bounds = array<i64: 1, 256, 128>}, {pipeline_mode = #tpu.pipeline_mode<synchronous>, transform_indices = @transform_1, window_bounds = array<i64: 256, 1>}, {pipeline_mode = #tpu.pipeline_mode<synchronous>, transform_indices = @transform_2, window_bounds = array<i64: 256, 1>}, {pipeline_mode = #tpu.pipeline_mode<synchronous>, transform_indices = @transform_3, window_bounds = array<i64: 128, 128>}, {pipeline_mode = #tpu.pipeline_mode<synchronous>, transform_indices = @transform_4, window_bounds = array<i64: 1, 128>}, {pipeline_mode = #tpu.pipeline_mode<synchronous>, transform_indices = @transform_5, window_bounds = array<i64: 128, 128>}, {pipeline_mode = #tpu.pipeline_mode<synchronous>, transform_indices = @transform_6, window_bounds = array<i64: 1, 128>}, {pipeline_mode = #tpu.pipeline_mode<synchronous>, transform_indices = @transform_7, window_bounds = array<i64: 9, 128, 128>}, {pipeline_mode = #tpu.pipeline_mode<synchronous>, transform_indices = @transform_8, window_bounds = array<i64: 1, 128>}, {pipeline_mode = #tpu.pipeline_mode<synchronous>, transform_indices = @transform_9, window_bounds = array<i64: 9, 128, 128>}, {pipeline_mode = #tpu.pipeline_mode<synchronous>, transform_indices = @transform_10, window_bounds = array<i64: 1, 128>}, {pipeline_mode = #tpu.pipeline_mode<synchronous>, transform_indices = @transform_11, window_bounds = array<i64: 9, 128, 128>}, {pipeline_mode = #tpu.pipeline_mode<synchronous>, transform_indices = @transform_12, window_bounds = array<i64: 1, 128>}, {transform_indices = @transform_13, window_bounds = array<i64: 1, 256, 128>}]} {
    %cst = arith.constant 0.000000e+00 : f32
    %0 = vector.broadcast %cst : f32 to vector<304x128xf32>
    %c0 = arith.constant 0 : index
    %c0_0 = arith.constant 0 : index
    %1 = vector.load %arg15[%c0, %c0_0] : memref<304x128xf32, #tpu.memory_space<vmem>>, vector<304x128xf32>
    tpu.vector_store %arg15[%c0, %c0_0], %0 {strides = array<i32>} : memref<304x128xf32, #tpu.memory_space<vmem>>, vector<304x128xf32>,
    %c0_1 = arith.constant 0 : index
    %c0_2 = arith.constant 0 : index
    %c0_3 = arith.constant 0 : index
    %2 = vector.load %arg1[%c0_1, %c0_2, %c0_3] : memref<1x256x128xbf16, #tpu.memory_space<vmem>>, vector<1x256x128xbf16>
    %3 = vector.shape_cast %2 : vector<1x256x128xbf16> to vector<256x128xbf16>
    %c0_4 = arith.constant 0 : index
    %c0_5 = arith.constant 0 : index
    %4 = vector.load %arg2[%c0_4, %c0_5] : memref<256x1xbf16, #tpu.memory_space<vmem>>, vector<256x1xbf16>
    %c0_6 = arith.constant 0 : index
    %c0_7 = arith.constant 0 : index
    %5 = vector.load %arg3[%c0_6, %c0_7] : memref<256x1xbf16, #tpu.memory_space<vmem>>, vector<256x1xbf16>
    %cst_8 = arith.constant 0.000000e+00 : bf16
    %6 = vector.broadcast %cst_8 : bf16 to vector<256x128xbf16>
    %7 = arith.maximumf %3, %6 : vector<256x128xbf16>
    %c0_9 = arith.constant 0 : index
    %c0_10 = arith.constant 0 : index
    %8 = vector.load %arg6[%c0_9, %c0_10] : memref<128x128xbf16, #tpu.memory_space<vmem>>, vector<128x128xbf16>
    %cst_11 = arith.constant dense<0.000000e+00> : vector<256x128xf32>
    %9 = tpu.matmul %7, %8, %cst_11 {dimension_numbers = #tpu.dot_dimension_numbers<[1], [0], [0], [1], [0, 0, 1, 1], [], []>} : vector<256x128xbf16>, vector<128x128xbf16>, vector<256x128xf32> -> vector<256x128xf32>
    %c0_12 = arith.constant 0 : index
    %c0_13 = arith.constant 0 : index
    %10 = vector.load %arg7[%c0_12, %c0_13] : memref<1x128xf32, #tpu.memory_space<vmem>>, vector<1x128xf32>
    %11 = vector.broadcast %10 : vector<1x128xf32> to vector<256x128xf32>
    %12 = arith.addf %9, %11 : vector<256x128xf32>
    %cst_14 = arith.constant 0.000000e+00 : f32
    %13 = vector.broadcast %cst_14 : f32 to vector<256x128xf32>
    %14 = arith.maximumf %12, %13 : vector<256x128xf32>
    %c24 = arith.constant 24 : index
    %c0_15 = arith.constant 0 : index
    %15 = vector.load %arg15[%c24, %c0_15] : memref<304x128xf32, #tpu.memory_space<vmem>>, vector<256x128xf32>
    tpu.vector_store %arg15[%c24, %c0_15], %14 {strides = array<i32>} : memref<304x128xf32, #tpu.memory_space<vmem>>, vector<256x128xf32>,
    %cst_16 = arith.constant 0.000000e+00 : f32
    %16 = vector.broadcast %cst_16 : f32 to vector<256x128xf32>
    %c7 = arith.constant 7 : index
    %c0_17 = arith.constant 0 : index
    %17 = vector.load %arg15[%c7, %c0_17] : memref<304x128xf32, #tpu.memory_space<vmem>>, vector<256x128xf32>
    %18 = arith.truncf %17 : vector<256x128xf32> to vector<256x128xbf16>
    %19 = vector.broadcast %4 : vector<256x1xbf16> to vector<256x128xbf16>
    %20 = arith.mulf %18, %19 : vector<256x128xbf16>
    %c0_18 = arith.constant 0 : index
    %c0_19 = arith.constant 0 : index
    %c0_20 = arith.constant 0 : index
    %21 = vector.load %arg8[%c0_18, %c0_19, %c0_20] : memref<9x128x128xbf16, #tpu.memory_space<vmem>>, vector<1x128x128xbf16>
    %22 = vector.shape_cast %21 : vector<1x128x128xbf16> to vector<128x128xbf16>
    %cst_21 = arith.constant dense<0.000000e+00> : vector<256x128xf32>
    %23 = tpu.matmul %20, %22, %cst_21 {dimension_numbers = #tpu.dot_dimension_numbers<[1], [0], [0], [1], [0, 0, 1, 1], [], []>} : vector<256x128xbf16>, vector<128x128xbf16>, vector<256x128xf32> -> vector<256x128xf32>
    %24 = arith.addf %16, %23 : vector<256x128xf32>
    %c8 = arith.constant 8 : index
    %c0_22 = arith.constant 0 : index
    %25 = vector.load %arg15[%c8, %c0_22] : memref<304x128xf32, #tpu.memory_space<vmem>>, vector<256x128xf32>
    %26 = arith.truncf %25 : vector<256x128xf32> to vector<256x128xbf16>
    %c1 = arith.constant 1 : index
    %c0_23 = arith.constant 0 : index
    %c0_24 = arith.constant 0 : index
    %27 = vector.load %arg8[%c1, %c0_23, %c0_24] : memref<9x128x128xbf16, #tpu.memory_space<vmem>>, vector<1x128x128xbf16>
    %28 = vector.shape_cast %27 : vector<1x128x128xbf16> to vector<128x128xbf16>
    %cst_25 = arith.constant dense<0.000000e+00> : vector<256x128xf32>
    %29 = tpu.matmul %26, %28, %cst_25 {dimension_numbers = #tpu.dot_dimension_numbers<[1], [0], [0], [1], [0, 0, 1, 1], [], []>} : vector<256x128xbf16>, vector<128x128xbf16>, vector<256x128xf32> -> vector<256x128xf32>
    %30 = arith.addf %24, %29 : vector<256x128xf32>
    %c9 = arith.constant 9 : index
    %c0_26 = arith.constant 0 : index
    %31 = vector.load %arg15[%c9, %c0_26] : memref<304x128xf32, #tpu.memory_space<vmem>>, vector<256x128xf32>
    %32 = arith.truncf %31 : vector<256x128xf32> to vector<256x128xbf16>
    %33 = vector.broadcast %5 : vector<256x1xbf16> to vector<256x128xbf16>
    %34 = arith.mulf %32, %33 : vector<256x128xbf16>
    %c2 = arith.constant 2 : index
    %c0_27 = arith.constant 0 : index
    %c0_28 = arith.constant 0 : index
    %35 = vector.load %arg8[%c2, %c0_27, %c0_28] : memref<9x128x128xbf16, #tpu.memory_space<vmem>>, vector<1x128x128xbf16>
    %36 = vector.shape_cast %35 : vector<1x128x128xbf16> to vector<128x128xbf16>
    %cst_29 = arith.constant dense<0.000000e+00> : vector<256x128xf32>
    %37 = tpu.matmul %34, %36, %cst_29 {dimension_numbers = #tpu.dot_dimension_numbers<[1], [0], [0], [1], [0, 0, 1, 1], [], []>} : vector<256x128xbf16>, vector<128x128xbf16>, vector<256x128xf32> -> vector<256x128xf32>
    %38 = arith.addf %30, %37 : vector<256x128xf32>
    %c23 = arith.constant 23 : index
    %c0_30 = arith.constant 0 : index
    %39 = vector.load %arg15[%c23, %c0_30] : memref<304x128xf32, #tpu.memory_space<vmem>>, vector<256x128xf32>
    %40 = arith.truncf %39 : vector<256x128xf32> to vector<256x128xbf16>
    %41 = vector.broadcast %4 : vector<256x1xbf16> to vector<256x128xbf16>
    %42 = arith.mulf %40, %41 : vector<256x128xbf16>
    %c3 = arith.constant 3 : index
    %c0_31 = arith.constant 0 : index
    %c0_32 = arith.constant 0 : index
    %43 = vector.load %arg8[%c3, %c0_31, %c0_32] : memref<9x128x128xbf16, #tpu.memory_space<vmem>>, vector<1x128x128xbf16>
    %44 = vector.shape_cast %43 : vector<1x128x128xbf16> to vector<128x128xbf16>
    %cst_33 = arith.constant dense<0.000000e+00> : vector<256x128xf32>
    %45 = tpu.matmul %42, %44, %cst_33 {dimension_numbers = #tpu.dot_dimension_numbers<[1], [0], [0], [1], [0, 0, 1, 1], [], []>} : vector<256x128xbf16>, vector<128x128xbf16>, vector<256x128xf32> -> vector<256x128xf32>
    %46 = arith.addf %38, %45 : vector<256x128xf32>
    %c24_34 = arith.constant 24 : index
    %c0_35 = arith.constant 0 : index
    %47 = vector.load %arg15[%c24_34, %c0_35] : memref<304x128xf32, #tpu.memory_space<vmem>>, vector<256x128xf32>
    %48 = arith.truncf %47 : vector<256x128xf32> to vector<256x128xbf16>
    %c4 = arith.constant 4 : index
    %c0_36 = arith.constant 0 : index
    %c0_37 = arith.constant 0 : index
    %49 = vector.load %arg8[%c4, %c0_36, %c0_37] : memref<9x128x128xbf16, #tpu.memory_space<vmem>>, vector<1x128x128xbf16>
    %50 = vector.shape_cast %49 : vector<1x128x128xbf16> to vector<128x128xbf16>
    %cst_38 = arith.constant dense<0.000000e+00> : vector<256x128xf32>
    %51 = tpu.matmul %48, %50, %cst_38 {dimension_numbers = #tpu.dot_dimension_numbers<[1], [0], [0], [1], [0, 0, 1, 1], [], []>} : vector<256x128xbf16>, vector<128x128xbf16>, vector<256x128xf32> -> vector<256x128xf32>
    %52 = arith.addf %46, %51 : vector<256x128xf32>
    %c25 = arith.constant 25 : index
    %c0_39 = arith.constant 0 : index
    %53 = vector.load %arg15[%c25, %c0_39] : memref<304x128xf32, #tpu.memory_space<vmem>>, vector<256x128xf32>
    %54 = arith.truncf %53 : vector<256x128xf32> to vector<256x128xbf16>
    %55 = vector.broadcast %5 : vector<256x1xbf16> to vector<256x128xbf16>
    %56 = arith.mulf %54, %55 : vector<256x128xbf16>
    %c5 = arith.constant 5 : index
    %c0_40 = arith.constant 0 : index
    %c0_41 = arith.constant 0 : index
    %57 = vector.load %arg8[%c5, %c0_40, %c0_41] : memref<9x128x128xbf16, #tpu.memory_space<vmem>>, vector<1x128x128xbf16>
    %58 = vector.shape_cast %57 : vector<1x128x128xbf16> to vector<128x128xbf16>
    %cst_42 = arith.constant dense<0.000000e+00> : vector<256x128xf32>
    %59 = tpu.matmul %56, %58, %cst_42 {dimension_numbers = #tpu.dot_dimension_numbers<[1], [0], [0], [1], [0, 0, 1, 1], [], []>} : vector<256x128xbf16>, vector<128x128xbf16>, vector<256x128xf32> -> vector<256x128xf32>
    %60 = arith.addf %52, %59 : vector<256x128xf32>
    %c39 = arith.constant 39 : index
    %c0_43 = arith.constant 0 : index
    %61 = vector.load %arg15[%c39, %c0_43] : memref<304x128xf32, #tpu.memory_space<vmem>>, vector<256x128xf32>
    %62 = arith.truncf %61 : vector<256x128xf32> to vector<256x128xbf16>
    %63 = vector.broadcast %4 : vector<256x1xbf16> to vector<256x128xbf16>
    %64 = arith.mulf %62, %63 : vector<256x128xbf16>
    %c6 = arith.constant 6 : index
    %c0_44 = arith.constant 0 : index
    %c0_45 = arith.constant 0 : index
    %65 = vector.load %arg8[%c6, %c0_44, %c0_45] : memref<9x128x128xbf16, #tpu.memory_space<vmem>>, vector<1x128x128xbf16>
    %66 = vector.shape_cast %65 : vector<1x128x128xbf16> to vector<128x128xbf16>
    %cst_46 = arith.constant dense<0.000000e+00> : vector<256x128xf32>
    %67 = tpu.matmul %64, %66, %cst_46 {dimension_numbers = #tpu.dot_dimension_numbers<[1], [0], [0], [1], [0, 0, 1, 1], [], []>} : vector<256x128xbf16>, vector<128x128xbf16>, vector<256x128xf32> -> vector<256x128xf32>
    %68 = arith.addf %60, %67 : vector<256x128xf32>
    %c40 = arith.constant 40 : index
    %c0_47 = arith.constant 0 : index
    %69 = vector.load %arg15[%c40, %c0_47] : memref<304x128xf32, #tpu.memory_space<vmem>>, vector<256x128xf32>
    %70 = arith.truncf %69 : vector<256x128xf32> to vector<256x128xbf16>
    %c7_48 = arith.constant 7 : index
    %c0_49 = arith.constant 0 : index
    %c0_50 = arith.constant 0 : index
    %71 = vector.load %arg8[%c7_48, %c0_49, %c0_50] : memref<9x128x128xbf16, #tpu.memory_space<vmem>>, vector<1x128x128xbf16>
    %72 = vector.shape_cast %71 : vector<1x128x128xbf16> to vector<128x128xbf16>
    %cst_51 = arith.constant dense<0.000000e+00> : vector<256x128xf32>
    %73 = tpu.matmul %70, %72, %cst_51 {dimension_numbers = #tpu.dot_dimension_numbers<[1], [0], [0], [1], [0, 0, 1, 1], [], []>} : vector<256x128xbf16>, vector<128x128xbf16>, vector<256x128xf32> -> vector<256x128xf32>
    %74 = arith.addf %68, %73 : vector<256x128xf32>
    %c41 = arith.constant 41 : index
    %c0_52 = arith.constant 0 : index
    %75 = vector.load %arg15[%c41, %c0_52] : memref<304x128xf32, #tpu.memory_space<vmem>>, vector<256x128xf32>
    %76 = arith.truncf %75 : vector<256x128xf32> to vector<256x128xbf16>
    %77 = vector.broadcast %5 : vector<256x1xbf16> to vector<256x128xbf16>
    %78 = arith.mulf %76, %77 : vector<256x128xbf16>
    %c8_53 = arith.constant 8 : index
    %c0_54 = arith.constant 0 : index
    %c0_55 = arith.constant 0 : index
    %79 = vector.load %arg8[%c8_53, %c0_54, %c0_55] : memref<9x128x128xbf16, #tpu.memory_space<vmem>>, vector<1x128x128xbf16>
    %80 = vector.shape_cast %79 : vector<1x128x128xbf16> to vector<128x128xbf16>
    %cst_56 = arith.constant dense<0.000000e+00> : vector<256x128xf32>
    %81 = tpu.matmul %78, %80, %cst_56 {dimension_numbers = #tpu.dot_dimension_numbers<[1], [0], [0], [1], [0, 0, 1, 1], [], []>} : vector<256x128xbf16>, vector<128x128xbf16>, vector<256x128xf32> -> vector<256x128xf32>
    %82 = arith.addf %74, %81 : vector<256x128xf32>
    %c0_57 = arith.constant 0 : index
    %c0_58 = arith.constant 0 : index
    %83 = vector.load %arg9[%c0_57, %c0_58] : memref<1x128xf32, #tpu.memory_space<vmem>>, vector<1x128xf32>
    %84 = vector.broadcast %83 : vector<1x128xf32> to vector<256x128xf32>
    %85 = arith.addf %82, %84 : vector<256x128xf32>
    %cst_59 = arith.constant 0.000000e+00 : f32
    %86 = vector.broadcast %cst_59 : f32 to vector<256x128xf32>
    %87 = arith.maximumf %85, %86 : vector<256x128xf32>
    %c24_60 = arith.constant 24 : index
    %c0_61 = arith.constant 0 : index
    %88 = vector.load %arg15[%c24_60, %c0_61] : memref<304x128xf32, #tpu.memory_space<vmem>>, vector<256x128xf32>
    tpu.vector_store %arg15[%c24_60, %c0_61], %87 {strides = array<i32>} : memref<304x128xf32, #tpu.memory_space<vmem>>, vector<256x128xf32>,
    %cst_62 = arith.constant 0.000000e+00 : f32
    %89 = vector.broadcast %cst_62 : f32 to vector<256x128xf32>
    %c7_63 = arith.constant 7 : index
    %c0_64 = arith.constant 0 : index
    %90 = vector.load %arg15[%c7_63, %c0_64] : memref<304x128xf32, #tpu.memory_space<vmem>>, vector<256x128xf32>
    %91 = arith.truncf %90 : vector<256x128xf32> to vector<256x128xbf16>
    %92 = vector.broadcast %4 : vector<256x1xbf16> to vector<256x128xbf16>
    %93 = arith.mulf %91, %92 : vector<256x128xbf16>
    %c0_65 = arith.constant 0 : index
    %c0_66 = arith.constant 0 : index
    %c0_67 = arith.constant 0 : index
    %94 = vector.load %arg10[%c0_65, %c0_66, %c0_67] : memref<9x128x128xbf16, #tpu.memory_space<vmem>>, vector<1x128x128xbf16>
    %95 = vector.shape_cast %94 : vector<1x128x128xbf16> to vector<128x128xbf16>
    %cst_68 = arith.constant dense<0.000000e+00> : vector<256x128xf32>
    %96 = tpu.matmul %93, %95, %cst_68 {dimension_numbers = #tpu.dot_dimension_numbers<[1], [0], [0], [1], [0, 0, 1, 1], [], []>} : vector<256x128xbf16>, vector<128x128xbf16>, vector<256x128xf32> -> vector<256x128xf32>
    %97 = arith.addf %89, %96 : vector<256x128xf32>
    %c8_69 = arith.constant 8 : index
    %c0_70 = arith.constant 0 : index
    %98 = vector.load %arg15[%c8_69, %c0_70] : memref<304x128xf32, #tpu.memory_space<vmem>>, vector<256x128xf32>
    %99 = arith.truncf %98 : vector<256x128xf32> to vector<256x128xbf16>
    %c1_71 = arith.constant 1 : index
    %c0_72 = arith.constant 0 : index
    %c0_73 = arith.constant 0 : index
    %100 = vector.load %arg10[%c1_71, %c0_72, %c0_73] : memref<9x128x128xbf16, #tpu.memory_space<vmem>>, vector<1x128x128xbf16>
    %101 = vector.shape_cast %100 : vector<1x128x128xbf16> to vector<128x128xbf16>
    %cst_74 = arith.constant dense<0.000000e+00> : vector<256x128xf32>
    %102 = tpu.matmul %99, %101, %cst_74 {dimension_numbers = #tpu.dot_dimension_numbers<[1], [0], [0], [1], [0, 0, 1, 1], [], []>} : vector<256x128xbf16>, vector<128x128xbf16>, vector<256x128xf32> -> vector<256x128xf32>
    %103 = arith.addf %97, %102 : vector<256x128xf32>
    %c9_75 = arith.constant 9 : index
    %c0_76 = arith.constant 0 : index
    %104 = vector.load %arg15[%c9_75, %c0_76] : memref<304x128xf32, #tpu.memory_space<vmem>>, vector<256x128xf32>
    %105 = arith.truncf %104 : vector<256x128xf32> to vector<256x128xbf16>
    %106 = vector.broadcast %5 : vector<256x1xbf16> to vector<256x128xbf16>
    %107 = arith.mulf %105, %106 : vector<256x128xbf16>
    %c2_77 = arith.constant 2 : index
    %c0_78 = arith.constant 0 : index
    %c0_79 = arith.constant 0 : index
    %108 = vector.load %arg10[%c2_77, %c0_78, %c0_79] : memref<9x128x128xbf16, #tpu.memory_space<vmem>>, vector<1x128x128xbf16>
    %109 = vector.shape_cast %108 : vector<1x128x128xbf16> to vector<128x128xbf16>
    %cst_80 = arith.constant dense<0.000000e+00> : vector<256x128xf32>
    %110 = tpu.matmul %107, %109, %cst_80 {dimension_numbers = #tpu.dot_dimension_numbers<[1], [0], [0], [1], [0, 0, 1, 1], [], []>} : vector<256x128xbf16>, vector<128x128xbf16>, vector<256x128xf32> -> vector<256x128xf32>
    %111 = arith.addf %103, %110 : vector<256x128xf32>
    %c23_81 = arith.constant 23 : index
    %c0_82 = arith.constant 0 : index
    %112 = vector.load %arg15[%c23_81, %c0_82] : memref<304x128xf32, #tpu.memory_space<vmem>>, vector<256x128xf32>
    %113 = arith.truncf %112 : vector<256x128xf32> to vector<256x128xbf16>
    %114 = vector.broadcast %4 : vector<256x1xbf16> to vector<256x128xbf16>
    %115 = arith.mulf %113, %114 : vector<256x128xbf16>
    %c3_83 = arith.constant 3 : index
    %c0_84 = arith.constant 0 : index
    %c0_85 = arith.constant 0 : index
    %116 = vector.load %arg10[%c3_83, %c0_84, %c0_85] : memref<9x128x128xbf16, #tpu.memory_space<vmem>>, vector<1x128x128xbf16>
    %117 = vector.shape_cast %116 : vector<1x128x128xbf16> to vector<128x128xbf16>
    %cst_86 = arith.constant dense<0.000000e+00> : vector<256x128xf32>
    %118 = tpu.matmul %115, %117, %cst_86 {dimension_numbers = #tpu.dot_dimension_numbers<[1], [0], [0], [1], [0, 0, 1, 1], [], []>} : vector<256x128xbf16>, vector<128x128xbf16>, vector<256x128xf32> -> vector<256x128xf32>
    %119 = arith.addf %111, %118 : vector<256x128xf32>
    %c24_87 = arith.constant 24 : index
    %c0_88 = arith.constant 0 : index
    %120 = vector.load %arg15[%c24_87, %c0_88] : memref<304x128xf32, #tpu.memory_space<vmem>>, vector<256x128xf32>
    %121 = arith.truncf %120 : vector<256x128xf32> to vector<256x128xbf16>
    %c4_89 = arith.constant 4 : index
    %c0_90 = arith.constant 0 : index
    %c0_91 = arith.constant 0 : index
    %122 = vector.load %arg10[%c4_89, %c0_90, %c0_91] : memref<9x128x128xbf16, #tpu.memory_space<vmem>>, vector<1x128x128xbf16>
    %123 = vector.shape_cast %122 : vector<1x128x128xbf16> to vector<128x128xbf16>
    %cst_92 = arith.constant dense<0.000000e+00> : vector<256x128xf32>
    %124 = tpu.matmul %121, %123, %cst_92 {dimension_numbers = #tpu.dot_dimension_numbers<[1], [0], [0], [1], [0, 0, 1, 1], [], []>} : vector<256x128xbf16>, vector<128x128xbf16>, vector<256x128xf32> -> vector<256x128xf32>
    %125 = arith.addf %119, %124 : vector<256x128xf32>
    %c25_93 = arith.constant 25 : index
    %c0_94 = arith.constant 0 : index
    %126 = vector.load %arg15[%c25_93, %c0_94] : memref<304x128xf32, #tpu.memory_space<vmem>>, vector<256x128xf32>
    %127 = arith.truncf %126 : vector<256x128xf32> to vector<256x128xbf16>
    %128 = vector.broadcast %5 : vector<256x1xbf16> to vector<256x128xbf16>
    %129 = arith.mulf %127, %128 : vector<256x128xbf16>
    %c5_95 = arith.constant 5 : index
    %c0_96 = arith.constant 0 : index
    %c0_97 = arith.constant 0 : index
    %130 = vector.load %arg10[%c5_95, %c0_96, %c0_97] : memref<9x128x128xbf16, #tpu.memory_space<vmem>>, vector<1x128x128xbf16>
    %131 = vector.shape_cast %130 : vector<1x128x128xbf16> to vector<128x128xbf16>
    %cst_98 = arith.constant dense<0.000000e+00> : vector<256x128xf32>
    %132 = tpu.matmul %129, %131, %cst_98 {dimension_numbers = #tpu.dot_dimension_numbers<[1], [0], [0], [1], [0, 0, 1, 1], [], []>} : vector<256x128xbf16>, vector<128x128xbf16>, vector<256x128xf32> -> vector<256x128xf32>
    %133 = arith.addf %125, %132 : vector<256x128xf32>
    %c39_99 = arith.constant 39 : index
    %c0_100 = arith.constant 0 : index
    %134 = vector.load %arg15[%c39_99, %c0_100] : memref<304x128xf32, #tpu.memory_space<vmem>>, vector<256x128xf32>
    %135 = arith.truncf %134 : vector<256x128xf32> to vector<256x128xbf16>
    %136 = vector.broadcast %4 : vector<256x1xbf16> to vector<256x128xbf16>
    %137 = arith.mulf %135, %136 : vector<256x128xbf16>
    %c6_101 = arith.constant 6 : index
    %c0_102 = arith.constant 0 : index
    %c0_103 = arith.constant 0 : index
    %138 = vector.load %arg10[%c6_101, %c0_102, %c0_103] : memref<9x128x128xbf16, #tpu.memory_space<vmem>>, vector<1x128x128xbf16>
    %139 = vector.shape_cast %138 : vector<1x128x128xbf16> to vector<128x128xbf16>
    %cst_104 = arith.constant dense<0.000000e+00> : vector<256x128xf32>
    %140 = tpu.matmul %137, %139, %cst_104 {dimension_numbers = #tpu.dot_dimension_numbers<[1], [0], [0], [1], [0, 0, 1, 1], [], []>} : vector<256x128xbf16>, vector<128x128xbf16>, vector<256x128xf32> -> vector<256x128xf32>
    %141 = arith.addf %133, %140 : vector<256x128xf32>
    %c40_105 = arith.constant 40 : index
    %c0_106 = arith.constant 0 : index
    %142 = vector.load %arg15[%c40_105, %c0_106] : memref<304x128xf32, #tpu.memory_space<vmem>>, vector<256x128xf32>
    %143 = arith.truncf %142 : vector<256x128xf32> to vector<256x128xbf16>
    %c7_107 = arith.constant 7 : index
    %c0_108 = arith.constant 0 : index
    %c0_109 = arith.constant 0 : index
    %144 = vector.load %arg10[%c7_107, %c0_108, %c0_109] : memref<9x128x128xbf16, #tpu.memory_space<vmem>>, vector<1x128x128xbf16>
    %145 = vector.shape_cast %144 : vector<1x128x128xbf16> to vector<128x128xbf16>
    %cst_110 = arith.constant dense<0.000000e+00> : vector<256x128xf32>
    %146 = tpu.matmul %143, %145, %cst_110 {dimension_numbers = #tpu.dot_dimension_numbers<[1], [0], [0], [1], [0, 0, 1, 1], [], []>} : vector<256x128xbf16>, vector<128x128xbf16>, vector<256x128xf32> -> vector<256x128xf32>
    %147 = arith.addf %141, %146 : vector<256x128xf32>
    %c41_111 = arith.constant 41 : index
    %c0_112 = arith.constant 0 : index
    %148 = vector.load %arg15[%c41_111, %c0_112] : memref<304x128xf32, #tpu.memory_space<vmem>>, vector<256x128xf32>
    %149 = arith.truncf %148 : vector<256x128xf32> to vector<256x128xbf16>
    %150 = vector.broadcast %5 : vector<256x1xbf16> to vector<256x128xbf16>
    %151 = arith.mulf %149, %150 : vector<256x128xbf16>
    %c8_113 = arith.constant 8 : index
    %c0_114 = arith.constant 0 : index
    %c0_115 = arith.constant 0 : index
    %152 = vector.load %arg10[%c8_113, %c0_114, %c0_115] : memref<9x128x128xbf16, #tpu.memory_space<vmem>>, vector<1x128x128xbf16>
    %153 = vector.shape_cast %152 : vector<1x128x128xbf16> to vector<128x128xbf16>
    %cst_116 = arith.constant dense<0.000000e+00> : vector<256x128xf32>
    %154 = tpu.matmul %151, %153, %cst_116 {dimension_numbers = #tpu.dot_dimension_numbers<[1], [0], [0], [1], [0, 0, 1, 1], [], []>} : vector<256x128xbf16>, vector<128x128xbf16>, vector<256x128xf32> -> vector<256x128xf32>
    %155 = arith.addf %147, %154 : vector<256x128xf32>
    %c0_117 = arith.constant 0 : index
    %c0_118 = arith.constant 0 : index
    %156 = vector.load %arg11[%c0_117, %c0_118] : memref<1x128xf32, #tpu.memory_space<vmem>>, vector<1x128xf32>
    %157 = vector.broadcast %156 : vector<1x128xf32> to vector<256x128xf32>
    %158 = arith.addf %155, %157 : vector<256x128xf32>
    %cst_119 = arith.constant 0.000000e+00 : f32
    %159 = vector.broadcast %cst_119 : f32 to vector<256x128xf32>
    %160 = arith.maximumf %158, %159 : vector<256x128xf32>
    %c24_120 = arith.constant 24 : index
    %c0_121 = arith.constant 0 : index
    %161 = vector.load %arg15[%c24_120, %c0_121] : memref<304x128xf32, #tpu.memory_space<vmem>>, vector<256x128xf32>
    tpu.vector_store %arg15[%c24_120, %c0_121], %160 {strides = array<i32>} : memref<304x128xf32, #tpu.memory_space<vmem>>, vector<256x128xf32>,
    %cst_122 = arith.constant 0.000000e+00 : f32
    %162 = vector.broadcast %cst_122 : f32 to vector<256x128xf32>
    %c7_123 = arith.constant 7 : index
    %c0_124 = arith.constant 0 : index
    %163 = vector.load %arg15[%c7_123, %c0_124] : memref<304x128xf32, #tpu.memory_space<vmem>>, vector<256x128xf32>
    %164 = arith.truncf %163 : vector<256x128xf32> to vector<256x128xbf16>
    %165 = vector.broadcast %4 : vector<256x1xbf16> to vector<256x128xbf16>
    %166 = arith.mulf %164, %165 : vector<256x128xbf16>
    %c0_125 = arith.constant 0 : index
    %c0_126 = arith.constant 0 : index
    %c0_127 = arith.constant 0 : index
    %167 = vector.load %arg12[%c0_125, %c0_126, %c0_127] : memref<9x128x128xbf16, #tpu.memory_space<vmem>>, vector<1x128x128xbf16>
    %168 = vector.shape_cast %167 : vector<1x128x128xbf16> to vector<128x128xbf16>
    %cst_128 = arith.constant dense<0.000000e+00> : vector<256x128xf32>
    %169 = tpu.matmul %166, %168, %cst_128 {dimension_numbers = #tpu.dot_dimension_numbers<[1], [0], [0], [1], [0, 0, 1, 1], [], []>} : vector<256x128xbf16>, vector<128x128xbf16>, vector<256x128xf32> -> vector<256x128xf32>
    %170 = arith.addf %162, %169 : vector<256x128xf32>
    %c8_129 = arith.constant 8 : index
    %c0_130 = arith.constant 0 : index
    %171 = vector.load %arg15[%c8_129, %c0_130] : memref<304x128xf32, #tpu.memory_space<vmem>>, vector<256x128xf32>
    %172 = arith.truncf %171 : vector<256x128xf32> to vector<256x128xbf16>
    %c1_131 = arith.constant 1 : index
    %c0_132 = arith.constant 0 : index
    %c0_133 = arith.constant 0 : index
    %173 = vector.load %arg12[%c1_131, %c0_132, %c0_133] : memref<9x128x128xbf16, #tpu.memory_space<vmem>>, vector<1x128x128xbf16>
    %174 = vector.shape_cast %173 : vector<1x128x128xbf16> to vector<128x128xbf16>
    %cst_134 = arith.constant dense<0.000000e+00> : vector<256x128xf32>
    %175 = tpu.matmul %172, %174, %cst_134 {dimension_numbers = #tpu.dot_dimension_numbers<[1], [0], [0], [1], [0, 0, 1, 1], [], []>} : vector<256x128xbf16>, vector<128x128xbf16>, vector<256x128xf32> -> vector<256x128xf32>
    %176 = arith.addf %170, %175 : vector<256x128xf32>
    %c9_135 = arith.constant 9 : index
    %c0_136 = arith.constant 0 : index
    %177 = vector.load %arg15[%c9_135, %c0_136] : memref<304x128xf32, #tpu.memory_space<vmem>>, vector<256x128xf32>
    %178 = arith.truncf %177 : vector<256x128xf32> to vector<256x128xbf16>
    %179 = vector.broadcast %5 : vector<256x1xbf16> to vector<256x128xbf16>
    %180 = arith.mulf %178, %179 : vector<256x128xbf16>
    %c2_137 = arith.constant 2 : index
    %c0_138 = arith.constant 0 : index
    %c0_139 = arith.constant 0 : index
    %181 = vector.load %arg12[%c2_137, %c0_138, %c0_139] : memref<9x128x128xbf16, #tpu.memory_space<vmem>>, vector<1x128x128xbf16>
    %182 = vector.shape_cast %181 : vector<1x128x128xbf16> to vector<128x128xbf16>
    %cst_140 = arith.constant dense<0.000000e+00> : vector<256x128xf32>
    %183 = tpu.matmul %180, %182, %cst_140 {dimension_numbers = #tpu.dot_dimension_numbers<[1], [0], [0], [1], [0, 0, 1, 1], [], []>} : vector<256x128xbf16>, vector<128x128xbf16>, vector<256x128xf32> -> vector<256x128xf32>
    %184 = arith.addf %176, %183 : vector<256x128xf32>
    %c23_141 = arith.constant 23 : index
    %c0_142 = arith.constant 0 : index
    %185 = vector.load %arg15[%c23_141, %c0_142] : memref<304x128xf32, #tpu.memory_space<vmem>>, vector<256x128xf32>
    %186 = arith.truncf %185 : vector<256x128xf32> to vector<256x128xbf16>
    %187 = vector.broadcast %4 : vector<256x1xbf16> to vector<256x128xbf16>
    %188 = arith.mulf %186, %187 : vector<256x128xbf16>
    %c3_143 = arith.constant 3 : index
    %c0_144 = arith.constant 0 : index
    %c0_145 = arith.constant 0 : index
    %189 = vector.load %arg12[%c3_143, %c0_144, %c0_145] : memref<9x128x128xbf16, #tpu.memory_space<vmem>>, vector<1x128x128xbf16>
    %190 = vector.shape_cast %189 : vector<1x128x128xbf16> to vector<128x128xbf16>
    %cst_146 = arith.constant dense<0.000000e+00> : vector<256x128xf32>
    %191 = tpu.matmul %188, %190, %cst_146 {dimension_numbers = #tpu.dot_dimension_numbers<[1], [0], [0], [1], [0, 0, 1, 1], [], []>} : vector<256x128xbf16>, vector<128x128xbf16>, vector<256x128xf32> -> vector<256x128xf32>
    %192 = arith.addf %184, %191 : vector<256x128xf32>
    %c24_147 = arith.constant 24 : index
    %c0_148 = arith.constant 0 : index
    %193 = vector.load %arg15[%c24_147, %c0_148] : memref<304x128xf32, #tpu.memory_space<vmem>>, vector<256x128xf32>
    %194 = arith.truncf %193 : vector<256x128xf32> to vector<256x128xbf16>
    %c4_149 = arith.constant 4 : index
    %c0_150 = arith.constant 0 : index
    %c0_151 = arith.constant 0 : index
    %195 = vector.load %arg12[%c4_149, %c0_150, %c0_151] : memref<9x128x128xbf16, #tpu.memory_space<vmem>>, vector<1x128x128xbf16>
    %196 = vector.shape_cast %195 : vector<1x128x128xbf16> to vector<128x128xbf16>
    %cst_152 = arith.constant dense<0.000000e+00> : vector<256x128xf32>
    %197 = tpu.matmul %194, %196, %cst_152 {dimension_numbers = #tpu.dot_dimension_numbers<[1], [0], [0], [1], [0, 0, 1, 1], [], []>} : vector<256x128xbf16>, vector<128x128xbf16>, vector<256x128xf32> -> vector<256x128xf32>
    %198 = arith.addf %192, %197 : vector<256x128xf32>
    %c25_153 = arith.constant 25 : index
    %c0_154 = arith.constant 0 : index
    %199 = vector.load %arg15[%c25_153, %c0_154] : memref<304x128xf32, #tpu.memory_space<vmem>>, vector<256x128xf32>
    %200 = arith.truncf %199 : vector<256x128xf32> to vector<256x128xbf16>
    %201 = vector.broadcast %5 : vector<256x1xbf16> to vector<256x128xbf16>
    %202 = arith.mulf %200, %201 : vector<256x128xbf16>
    %c5_155 = arith.constant 5 : index
    %c0_156 = arith.constant 0 : index
    %c0_157 = arith.constant 0 : index
    %203 = vector.load %arg12[%c5_155, %c0_156, %c0_157] : memref<9x128x128xbf16, #tpu.memory_space<vmem>>, vector<1x128x128xbf16>
    %204 = vector.shape_cast %203 : vector<1x128x128xbf16> to vector<128x128xbf16>
    %cst_158 = arith.constant dense<0.000000e+00> : vector<256x128xf32>
    %205 = tpu.matmul %202, %204, %cst_158 {dimension_numbers = #tpu.dot_dimension_numbers<[1], [0], [0], [1], [0, 0, 1, 1], [], []>} : vector<256x128xbf16>, vector<128x128xbf16>, vector<256x128xf32> -> vector<256x128xf32>
    %206 = arith.addf %198, %205 : vector<256x128xf32>
    %c39_159 = arith.constant 39 : index
    %c0_160 = arith.constant 0 : index
    %207 = vector.load %arg15[%c39_159, %c0_160] : memref<304x128xf32, #tpu.memory_space<vmem>>, vector<256x128xf32>
    %208 = arith.truncf %207 : vector<256x128xf32> to vector<256x128xbf16>
    %209 = vector.broadcast %4 : vector<256x1xbf16> to vector<256x128xbf16>
    %210 = arith.mulf %208, %209 : vector<256x128xbf16>
    %c6_161 = arith.constant 6 : index
    %c0_162 = arith.constant 0 : index
    %c0_163 = arith.constant 0 : index
    %211 = vector.load %arg12[%c6_161, %c0_162, %c0_163] : memref<9x128x128xbf16, #tpu.memory_space<vmem>>, vector<1x128x128xbf16>
    %212 = vector.shape_cast %211 : vector<1x128x128xbf16> to vector<128x128xbf16>
    %cst_164 = arith.constant dense<0.000000e+00> : vector<256x128xf32>
    %213 = tpu.matmul %210, %212, %cst_164 {dimension_numbers = #tpu.dot_dimension_numbers<[1], [0], [0], [1], [0, 0, 1, 1], [], []>} : vector<256x128xbf16>, vector<128x128xbf16>, vector<256x128xf32> -> vector<256x128xf32>
    %214 = arith.addf %206, %213 : vector<256x128xf32>
    %c40_165 = arith.constant 40 : index
    %c0_166 = arith.constant 0 : index
    %215 = vector.load %arg15[%c40_165, %c0_166] : memref<304x128xf32, #tpu.memory_space<vmem>>, vector<256x128xf32>
    %216 = arith.truncf %215 : vector<256x128xf32> to vector<256x128xbf16>
    %c7_167 = arith.constant 7 : index
    %c0_168 = arith.constant 0 : index
    %c0_169 = arith.constant 0 : index
    %217 = vector.load %arg12[%c7_167, %c0_168, %c0_169] : memref<9x128x128xbf16, #tpu.memory_space<vmem>>, vector<1x128x128xbf16>
    %218 = vector.shape_cast %217 : vector<1x128x128xbf16> to vector<128x128xbf16>
    %cst_170 = arith.constant dense<0.000000e+00> : vector<256x128xf32>
    %219 = tpu.matmul %216, %218, %cst_170 {dimension_numbers = #tpu.dot_dimension_numbers<[1], [0], [0], [1], [0, 0, 1, 1], [], []>} : vector<256x128xbf16>, vector<128x128xbf16>, vector<256x128xf32> -> vector<256x128xf32>
    %220 = arith.addf %214, %219 : vector<256x128xf32>
    %c41_171 = arith.constant 41 : index
    %c0_172 = arith.constant 0 : index
    %221 = vector.load %arg15[%c41_171, %c0_172] : memref<304x128xf32, #tpu.memory_space<vmem>>, vector<256x128xf32>
    %222 = arith.truncf %221 : vector<256x128xf32> to vector<256x128xbf16>
    %223 = vector.broadcast %5 : vector<256x1xbf16> to vector<256x128xbf16>
    %224 = arith.mulf %222, %223 : vector<256x128xbf16>
    %c8_173 = arith.constant 8 : index
    %c0_174 = arith.constant 0 : index
    %c0_175 = arith.constant 0 : index
    %225 = vector.load %arg12[%c8_173, %c0_174, %c0_175] : memref<9x128x128xbf16, #tpu.memory_space<vmem>>, vector<1x128x128xbf16>
    %226 = vector.shape_cast %225 : vector<1x128x128xbf16> to vector<128x128xbf16>
    %cst_176 = arith.constant dense<0.000000e+00> : vector<256x128xf32>
    %227 = tpu.matmul %224, %226, %cst_176 {dimension_numbers = #tpu.dot_dimension_numbers<[1], [0], [0], [1], [0, 0, 1, 1], [], []>} : vector<256x128xbf16>, vector<128x128xbf16>, vector<256x128xf32> -> vector<256x128xf32>
    %228 = arith.addf %220, %227 : vector<256x128xf32>
    %c0_177 = arith.constant 0 : index
    %c0_178 = arith.constant 0 : index
    %229 = vector.load %arg13[%c0_177, %c0_178] : memref<1x128xf32, #tpu.memory_space<vmem>>, vector<1x128xf32>
    %230 = vector.broadcast %229 : vector<1x128xf32> to vector<256x128xf32>
    %231 = arith.addf %228, %230 : vector<256x128xf32>
    %c0_179 = arith.constant 0 : index
    %c0_180 = arith.constant 0 : index
    %232 = vector.load %arg4[%c0_179, %c0_180] : memref<128x128xbf16, #tpu.memory_space<vmem>>, vector<128x128xbf16>
    %cst_181 = arith.constant dense<0.000000e+00> : vector<256x128xf32>
    %233 = tpu.matmul %3, %232, %cst_181 {dimension_numbers = #tpu.dot_dimension_numbers<[1], [0], [0], [1], [0, 0, 1, 1], [], []>} : vector<256x128xbf16>, vector<128x128xbf16>, vector<256x128xf32> -> vector<256x128xf32>
    %c0_182 = arith.constant 0 : index
    %c0_183 = arith.constant 0 : index
    %234 = vector.load %arg5[%c0_182, %c0_183] : memref<1x128xf32, #tpu.memory_space<vmem>>, vector<1x128xf32>
    %235 = vector.broadcast %234 : vector<1x128xf32> to vector<256x128xf32>
    %236 = arith.addf %233, %235 : vector<256x128xf32>
    %cst_184 = arith.constant 2.500000e-01 : f32
    %237 = vector.broadcast %cst_184 : f32 to vector<256x128xf32>
    %238 = arith.mulf %237, %231 : vector<256x128xf32>
    %239 = arith.addf %236, %238 : vector<256x128xf32>
    %c0_185 = arith.constant 0 : index
    %c0_186 = arith.constant 0 : index
    %c0_187 = arith.constant 0 : index
    %240 = vector.load %arg14[%c0_185, %c0_186, %c0_187] : memref<1x256x128xf32, #tpu.memory_space<vmem>>, vector<1x256x128xf32>
    %241 = vector.shape_cast %240 : vector<1x256x128xf32> to vector<256x128xf32>
    %242 = vector.shape_cast %239 : vector<256x128xf32> to vector<1x256x128xf32>
    tpu.vector_store %arg14[%c0_185, %c0_186, %c0_187], %242 {strides = array<i32>} : memref<1x256x128xf32, #tpu.memory_space<vmem>>, vector<1x256x128xf32>,
    return
  }
  func.func @transform_0(%arg0: i32) -> (i32, i32, i32) {
    %c0_i32 = arith.constant 0 : i32
    %c0_i32_0 = arith.constant 0 : i32
    %c0_i32_1 = arith.constant 0 : i32
    return %arg0, %c0_i32, %c0_i32_0 : i32, i32, i32
  }
  func.func @transform_1(%arg0: i32) -> (i32, i32) {
    %c0_i32 = arith.constant 0 : i32
    %c0_i32_0 = arith.constant 0 : i32
    %c0_i32_1 = arith.constant 0 : i32
    return %c0_i32, %c0_i32_0 : i32, i32
  }
  func.func @transform_2(%arg0: i32) -> (i32, i32) {
    %c0_i32 = arith.constant 0 : i32
    %c0_i32_0 = arith.constant 0 : i32
    %c0_i32_1 = arith.constant 0 : i32
    return %c0_i32, %c0_i32_0 : i32, i32
  }
  func.func @transform_3(%arg0: i32) -> (i32, i32) {
    %c0_i32 = arith.constant 0 : i32
    %c0_i32_0 = arith.constant 0 : i32
    %c0_i32_1 = arith.constant 0 : i32
    return %c0_i32, %c0_i32_0 : i32, i32
  }
  func.func @transform_4(%arg0: i32) -> (i32, i32) {
    %c0_i32 = arith.constant 0 : i32
    %c0_i32_0 = arith.constant 0 : i32
    %c0_i32_1 = arith.constant 0 : i32
    return %c0_i32, %c0_i32_0 : i32, i32
  }
  func.func @transform_5(%arg0: i32) -> (i32, i32) {
    %c0_i32 = arith.constant 0 : i32
    %c0_i32_0 = arith.constant 0 : i32
    %c0_i32_1 = arith.constant 0 : i32
    return %c0_i32, %c0_i32_0 : i32, i32
  }
  func.func @transform_6(%arg0: i32) -> (i32, i32) {
    %c0_i32 = arith.constant 0 : i32
    %c0_i32_0 = arith.constant 0 : i32
    %c0_i32_1 = arith.constant 0 : i32
    return %c0_i32, %c0_i32_0 : i32, i32
  }
  func.func @transform_7(%arg0: i32) -> (i32, i32, i32) {
    %c0_i32 = arith.constant 0 : i32
    %c0_i32_0 = arith.constant 0 : i32
    %c0_i32_1 = arith.constant 0 : i32
    %c0_i32_2 = arith.constant 0 : i32
    return %c0_i32, %c0_i32_0, %c0_i32_1 : i32, i32, i32
  }
  func.func @transform_8(%arg0: i32) -> (i32, i32) {
    %c0_i32 = arith.constant 0 : i32
    %c0_i32_0 = arith.constant 0 : i32
    %c0_i32_1 = arith.constant 0 : i32
    return %c0_i32, %c0_i32_0 : i32, i32
  }
  func.func @transform_9(%arg0: i32) -> (i32, i32, i32) {
    %c0_i32 = arith.constant 0 : i32
    %c0_i32_0 = arith.constant 0 : i32
    %c0_i32_1 = arith.constant 0 : i32
    %c0_i32_2 = arith.constant 0 : i32
    return %c0_i32, %c0_i32_0, %c0_i32_1 : i32, i32, i32
  }
  func.func @transform_10(%arg0: i32) -> (i32, i32) {
    %c0_i32 = arith.constant 0 : i32
    %c0_i32_0 = arith.constant 0 : i32
    %c0_i32_1 = arith.constant 0 : i32
    return %c0_i32, %c0_i32_0 : i32, i32
  }
  func.func @transform_11(%arg0: i32) -> (i32, i32, i32) {
    %c0_i32 = arith.constant 0 : i32
    %c0_i32_0 = arith.constant 0 : i32
    %c0_i32_1 = arith.constant 0 : i32
    %c0_i32_2 = arith.constant 0 : i32
    return %c0_i32, %c0_i32_0, %c0_i32_1 : i32, i32, i32
  }
  func.func @transform_12(%arg0: i32) -> (i32, i32) {
    %c0_i32 = arith.constant 0 : i32
    %c0_i32_0 = arith.constant 0 : i32
    %c0_i32_1 = arith.constant 0 : i32
    return %c0_i32, %c0_i32_0 : i32, i32
  }
  func.func @transform_13(%arg0: i32) -> (i32, i32, i32) {
    %c0_i32 = arith.constant 0 : i32
    %c0_i32_0 = arith.constant 0 : i32
    %c0_i32_1 = arith.constant 0 : i32
    return %arg0, %c0_i32, %c0_i32_0 : i32, i32, i32
  }
}

</mosaic_0001>

<bundles_post_ra>
// kernel: decoder_block_forward.1
= control target key start
LH: loop header
LB: loop body
LE: loop exit
PB: predicated region body
PF: predicated region fallthrough
CT: control target
= control target key end

     0   :  { %s14217_s25 = smov 0   ;;  %s18501_s0 = inlined_call_operand.vmem [shape: bf16[2,256,128], index: 0, kind: input, shape index: {}]   ;;  %s18502_s1 = inlined_call_operand.vmem [shape: bf16[256,1], index: 1, kind: input, shape index: {}]   ;;  %s18503_s2 = inlined_call_operand.vmem [shape: bf16[256,1], index: 2, kind: input, shape index: {}]   ;;  %s18504_s3 = inlined_call_operand.vmem [shape: bf16[128,128], index: 3, kind: input, shape index: {}]   ;;  %s18505_s4 = inlined_call_operand.vmem [shape: f32[1,128], index: 4, kind: input, shape index: {}]   ;;  %s18506_s5 = inlined_call_operand.vmem [shape: bf16[128,128], index: 5, kind: input, shape index: {}]   ;;  %s18507_s6 = inlined_call_operand.vmem [shape: f32[1,128], index: 6, kind: input, shape index: {}]   ;;  %s18508_s7 = inlined_call_operand.vmem [shape: bf16[9,128,128], index: 7, kind: input, shape index: {}]   ;;  %s18509_s8 = inlined_call_operand.vmem [shape: f32[1,128], index: 8, kind: input, shape index: {}]   ;;  %s18510_s9 = inlined_call_operand.vmem [shape: bf16[9,128,128], index: 9, kind: input, shape index: {}]   ;;  %s18511_s10 = inlined_call_operand.vmem [shape: f32[1,128], index: 10, kind: input, shape index: {}]   ;;  %s18512_s11 = inlined_call_operand.vmem [shape: bf16[9,128,128], index: 11, kind: input, shape index: {}]   ;;  %s18513_s12 = inlined_call_operand.vmem [shape: f32[1,128], index: 12, kind: input, shape index: {}]   ;;  %s18514_s13 = inlined_call_operand.vmem [shape: f32[2,256,128], index: 13, kind: output, shape index: {}]  }
   0x1 LB: > { %s11039_s26 = sadd.s32 4294967295, %s14141_s25   ;;  %p11043_p0 = scmp.ge.s32.totalorder %s14141_s25, 1  ;;  %s14141_s25 = sphi %s14217_s25, %s23_s25  }
   0x2   : > { %p387_p1 = scmp.lt.s32.totalorder %s14141_s25, 3 }
   0x4   : > { %p388_p2 = pnand %p11043_p0, %p387_p1 }
   0x6   : > { %391 = sbr.rel (%p388_p2) target bundleno = 1709 (0x6ad), region = 72 }
   0xb   : > { %v514_v0 = vld [vmem:[%s18502_s1 + $0x8] sm:$0xf]  ;;  %v512_v1 = vld [vmem:[%s18502_s1] sm:$0xf]  ;;  %v13854_v2 = vld [vmem:[%s18506_s5 + $0x38] sm:$0xff]   ;;  %v14143_v3 = vmov 0  }
   0xc   : > { %13853 = vset.pattern.permute.xlu1 %v14143_v3  ;;  %13852 = vset.pattern.permute.xlu0 %v14143_v3  ;;  %v515_v4 = vld [vmem:[%s18502_s1 + $0xc] sm:$0xf]  ;;  %v513_v5 = vld [vmem:[%s18502_s1 + $0x4] sm:$0xf]  ;;  %v13855_v6 = vld [vmem:[%s18506_s5 + $0x30] sm:$0xff]   ;;  %p431_p3 = scmp.lt.s32.totalorder %s11039_s26, 1 }
   0xd   : > { %1074 = vperm.xlu1 %13853, %v514_v0   ;;  %1050 = vperm.xlu0 %13852, %v512_v1   ;;  %v13856_v7 = vld [vmem:[%s18506_s5 + $0x28] sm:$0xff]   ;;  %v545_v8 = vld [vmem:[%s18503_s2 + $0x4] sm:$0xf]  ;;  %v544_v9 = vld [vmem:[%s18503_s2] sm:$0xf] }
   0xe   : > { %12433 = vmatprep.subr.bf16.mxu0 %v13854_v2  ;;  %13825 = vmatprep.subr.bf16.mxu1 %v13854_v2  ;;  %s19188_s26 = smov (!%p431_p3, %s11039_s26), 1  ;;  %v13857_v10 = vld [vmem:[%s18506_s5 + $0x20] sm:$0xff]   ;;  %v547_v11 = vld [vmem:[%s18503_s2 + $0xc] sm:$0xf]  ;;  %v546_v12 = vld [vmem:[%s18503_s2 + $0x8] sm:$0xf] }
   0xf   : > { %12434 = vmatpush3.bf16.msra.mxu0 %v13854_v2  ;;  %13833 = vmatpush3.bf16.msra.mxu1 %v13854_v2  ;;  %s11735_s30 = sshll.u32 %s19188_s26, 7  ;;  %v13858_v13 = vld [vmem:[%s18506_s5 + $0x18] sm:$0xff]   ;;  %v517_v17 = vld [vmem:[%s18502_s1 + $0x14] sm:$0xf]  ;;  %v516_v18 = vld [vmem:[%s18502_s1 + $0x10] sm:$0xf] }
  0x10   : > { %12435 = vmatprep.subr.bf16.mxu0 %v13855_v6  ;;  %13826 = vmatprep.subr.bf16.mxu1 %v13855_v6  ;;  %s14269_s22 = scalar_lea.vmem %s18501_s0, %s11735_s30  ;;  %v13859_v26 = vld [vmem:[%s18506_s5 + $0x10] sm:$0xff]   ;;  %v519_v29 = vld [vmem:[%s18502_s1 + $0x1c] sm:$0xf]  ;;  %v518_v30 = vld [vmem:[%s18502_s1 + $0x18] sm:$0xf]  ;;  %s11736_s28 = sshll.u32 %s19188_s26, 8 }
  0x11   : > { %1086 = vperm.xlu1 %13853, %v515_v4   ;;  %1062 = vperm.xlu0 %13852, %v513_v5   ;;  %v480_v14 = vld [vmem:[%s14269_s22] sm:$0xf]  ;;  %v481_v15 = vld [vmem:[%s14269_s22 + $0x4] sm:$0xf]  ;;  %v14289_v24 = vld [vmem:[%s14269_s22 + $0x8] sm:$0xf]  ;;  %s18331_s30 = scalar_lea.vmem %s18514_s13, %s11736_s28 }
  0x12   : > { %v496_v16 = vld [vmem:[%s14269_s22 + $0x40] sm:$0xf]  ;;  %v576_v19 = vmax.bf16 %v14143_v3, %v480_v14  ;;  %v577_v20 = vmax.bf16 %v14143_v3, %v481_v15  ;;  %v497_v21 = vld [vmem:[%s14269_s22 + $0x44] sm:$0xf]  ;;  %18633 = vst [vmem:[#allocation3_spill] sm:$0xff] %v14289_v24  ;;  %v13860_v32 = vld [vmem:[%s18506_s5 + $0x8] sm:$0xff]   ;;  %v578_v42 = vmax.bf16 %v14143_v3, %v14289_v24 }
  0x13   : > { %12436 = vmatpush3.bf16.msra.mxu0 %v13855_v6  ;;  %13834 = vmatpush3.bf16.msra.mxu1 %v13855_v6  ;;  %v592_v22 = vmax.bf16 %v14143_v3, %v496_v16  ;;  %v593_v23 = vmax.bf16 %v14143_v3, %v497_v21  ;;  %v14292_v25 = vld [vmem:[%s14269_s22 + $0xc] sm:$0xf]  ;;  %v549_v33 = vld [vmem:[%s18503_s2 + $0x14] sm:$0xf]  ;;  %v548_v34 = vld [vmem:[%s18503_s2 + $0x10] sm:$0xf] }
  0x14   : > { %12437 = vmatprep.subr.bf16.mxu0 %v13856_v7  ;;  %13827 = vmatprep.subr.bf16.mxu1 %v13856_v7  ;;  %18634 = vst [vmem:[#allocation4_spill] sm:$0xff] %v14292_v25  ;;  %v11049_v27 = vcombine.low %v576_v19, %v577_v20  ;;  %v13861_v35 = vld [vmem:[%s18506_s5] sm:$0xff]   ;;  %v498_v36 = vld [vmem:[%s14269_s22 + $0x48] sm:$0xf]  ;;  %v499_v37 = vld [vmem:[%s14269_s22 + $0x4c] sm:$0xf]  ;;  %v579_v45 = vmax.bf16 %v14143_v3, %v14292_v25 }
  0x15   : > { %2105 = vperm.xlu1 %13853, %v545_v8   ;;  %2093 = vperm.xlu0 %13852, %v544_v9   ;;  %v11057_v31 = vcombine.low %v592_v22, %v593_v23  ;;  %v484_v38 = vld [vmem:[%s14269_s22 + $0x10] sm:$0xf]  ;;  %v485_v39 = vld [vmem:[%s14269_s22 + $0x14] sm:$0xf]  ;;  %v551_v43 = vld [vmem:[%s18503_s2 + $0x1c] sm:$0xf]  ;;  %v594_v46 = vmax.bf16 %v14143_v3, %v498_v36  ;;  %v595_v47 = vmax.bf16 %v14143_v3, %v499_v37 }
  0x16   : > { %12449 = vmatprep.mubr.bf16.mxu0 %v11049_v27  ;;  %v500_v40 = vld [vmem:[%s14269_s22 + $0x50] sm:$0xf]  ;;  %v501_v41 = vld [vmem:[%s14269_s22 + $0x54] sm:$0xf]  ;;  %v550_v44 = vld [vmem:[%s18503_s2 + $0x18] sm:$0xf]  ;;  %v580_v48 = vmax.bf16 %v14143_v3, %v484_v38  ;;  %v581_v49 = vmax.bf16 %v14143_v3, %v485_v39  ;;  %v11050_v54 = vcombine.low %v578_v42, %v579_v45 }
  0x17   : > { %12438 = vmatpush3.bf16.msra.mxu0 %v13856_v7  ;;  %13835 = vmatpush3.bf16.msra.mxu1 %v13856_v7  ;;  %v596_v50 = vmax.bf16 %v14143_v3, %v500_v40  ;;  %v597_v51 = vmax.bf16 %v14143_v3, %v501_v41  ;;  %v521_v52 = vld [vmem:[%s18502_s1 + $0x24] sm:$0xf]  ;;  %v520_v53 = vld [vmem:[%s18502_s1 + $0x20] sm:$0xf]  ;;  %v11058_v55 = vcombine.low %v594_v46, %v595_v47  ;;  %v486_v56 = vld [vmem:[%s14269_s22 + $0x18] sm:$0xf] }
  0x18   : > { %12439 = vmatprep.subr.bf16.mxu0 %v13857_v10  ;;  %13828 = vmatprep.subr.bf16.mxu1 %v13857_v10  ;;  %v487_v57 = vld [vmem:[%s14269_s22 + $0x1c] sm:$0xf]  ;;  %v11051_v58 = vcombine.low %v580_v48, %v581_v49  ;;  %v502_v60 = vld [vmem:[%s14269_s22 + $0x58] sm:$0xf]  ;;  %v488_v62 = vld [vmem:[%s14269_s22 + $0x20] sm:$0xf]  ;;  %v582_v2 = vmax.bf16 %v14143_v3, %v486_v56 }
  0x19   : > { %2129 = vperm.xlu1 %13853, %v547_v11   ;;  %2117 = vperm.xlu0 %13852, %v546_v12   ;;  %v11059_v59 = vcombine.low %v596_v50, %v597_v51  ;;  %v503_v61 = vld [vmem:[%s14269_s22 + $0x5c] sm:$0xf]  ;;  %v489_v63 = vld [vmem:[%s14269_s22 + $0x24] sm:$0xf]  ;;  %v504_v0 = vld [vmem:[%s14269_s22 + $0x60] sm:$0xf]  ;;  %v583_v4 = vmax.bf16 %v14143_v3, %v487_v57  ;;  %v598_v7 = vmax.bf16 %v14143_v3, %v502_v60 }
  0x1a   : > { %12465 = vmatprep.mubr.bf16.mxu1 %v11057_v31  ;;  %v505_v1 = vld [vmem:[%s14269_s22 + $0x64] sm:$0xf]  ;;  %v523_v5 = vld [vmem:[%s18502_s1 + $0x2c] sm:$0xf]  ;;  %v522_v6 = vld [vmem:[%s18502_s1 + $0x28] sm:$0xf]  ;;  %v599_v8 = vmax.bf16 %v14143_v3, %v503_v61  ;;  %v584_v9 = vmax.bf16 %v14143_v3, %v488_v62  ;;  %v600_v11 = vmax.bf16 %v14143_v3, %v504_v0 }
  0x1b   : > { %12440 = vmatpush3.bf16.msra.mxu0 %v13857_v10  ;;  %13836 = vmatpush3.bf16.msra.mxu1 %v13857_v10  ;;  %v585_v10 = vmax.bf16 %v14143_v3, %v489_v63  ;;  %v601_v12 = vmax.bf16 %v14143_v3, %v505_v1  ;;  %v552_v14 = vld [vmem:[%s18503_s2 + $0x20] sm:$0xf]  ;;  %v490_v15 = vld [vmem:[%s14269_s22 + $0x28] sm:$0xf]  ;;  %v491_v16 = vld [vmem:[%s14269_s22 + $0x2c] sm:$0xf]  ;;  %v11052_v19 = vcombine.low %v582_v2, %v583_v4 }
  0x1c   : > { %12441 = vmatprep.subr.bf16.mxu0 %v13858_v13  ;;  %13829 = vmatprep.subr.bf16.mxu1 %v13858_v13  ;;  %v11060_v20 = vcombine.low %v598_v7, %v599_v8  ;;  %v492_v21 = vld [vmem:[%s14269_s22 + $0x30] sm:$0xf]  ;;  %v493_v22 = vld [vmem:[%s14269_s22 + $0x34] sm:$0xf]  ;;  %v554_v31 = vld [vmem:[%s18503_s2 + $0x28] sm:$0xf] }
  0x1d   : > { %1110 = vperm.xlu1 %13853, %v517_v17   ;;  %1098 = vperm.xlu0 %13852, %v516_v18   ;;  %v506_v17 = vld [vmem:[%s14269_s22 + $0x68] sm:$0xf]  ;;  %v507_v18 = vld [vmem:[%s14269_s22 + $0x6c] sm:$0xf]  ;;  %v508_v23 = vld [vmem:[%s14269_s22 + $0x70] sm:$0xf]  ;;  %v11061_v27 = vcombine.low %v600_v11, %v601_v12  ;;  %v588_v36 = vmax.bf16 %v14143_v3, %v492_v21  ;;  %v589_v37 = vmax.bf16 %v14143_v3, %v493_v22 }
  0x1e   : > { %v604_v38 = vmax.bf16 %v14143_v3, %v508_v23  ;;  %v525_v40 = vld [vmem:[%s18502_s1 + $0x34] sm:$0xf]  ;;  %v524_v41 = vld [vmem:[%s18502_s1 + $0x30] sm:$0xf]  ;;  %v494_v42 = vld [vmem:[%s14269_s22 + $0x38] sm:$0xf] }
  0x1f   : > { %12442 = vmatpush3.bf16.msra.mxu0 %v13858_v13  ;;  %13837 = vmatpush3.bf16.msra.mxu1 %v13858_v13  ;;  %v553_v13 = vld [vmem:[%s18503_s2 + $0x24] sm:$0xf]  ;;  %v511_v45 = vld [vmem:[%s14269_s22 + $0x7c] sm:$0xf]  ;;  %v11055_v48 = vcombine.low %v588_v36, %v589_v37  ;;  %v526_v51 = vld [vmem:[%s18502_s1 + $0x38] sm:$0xf] }
  0x20   : > { %12443 = vmatprep.subr.bf16.mxu0 %v13859_v26  ;;  %13830 = vmatprep.subr.bf16.mxu1 %v13859_v26  ;;  %v527_v50 = vld [vmem:[%s18502_s1 + $0x3c] sm:$0xf]  ;;  %v557_v56 = vld [vmem:[%s18503_s2 + $0x34] sm:$0xf]  ;;  %v556_v57 = vld [vmem:[%s18503_s2 + $0x30] sm:$0xf] }
  0x21   : > { %1134 = vperm.xlu1 %13853, %v519_v29   ;;  %1122 = vperm.xlu0 %13852, %v518_v30   ;;  %v509_v29 = vld [vmem:[%s14269_s22 + $0x74] sm:$0xf]  ;;  %v555_v30 = vld [vmem:[%s18503_s2 + $0x2c] sm:$0xf]  ;;  %v559_v60 = vld [vmem:[%s18503_s2 + $0x3c] sm:$0xf] }
  0x22   : > { %v605_v39 = vmax.bf16 %v14143_v3, %v509_v29  ;;  %v529_v61 = vld [vmem:[%s18502_s1 + $0x44] sm:$0xf]  ;;  %v528_v62 = vld [vmem:[%s18502_s1 + $0x40] sm:$0xf]  ;;  %v531_v63 = vld [vmem:[%s18502_s1 + $0x4c] sm:$0xf] }
  0x23   : > { %12444 = vmatpush3.bf16.msra.mxu0 %v13859_v26  ;;  %13838 = vmatpush3.bf16.msra.mxu1 %v13859_v26  ;;  %v11053_v26 = vcombine.low %v584_v9, %v585_v10  ;;  %v530_v0 = vld [vmem:[%s18502_s1 + $0x48] sm:$0xf]  ;;  %v561_v1 = vld [vmem:[%s18503_s2 + $0x44] sm:$0xf]  ;;  %v560_v2 = vld [vmem:[%s18503_s2 + $0x40] sm:$0xf] }
  0x24   : > { %12445 = vmatprep.subr.bf16.mxu0 %v13860_v32  ;;  %13831 = vmatprep.subr.bf16.mxu1 %v13860_v32  ;;  %v11063_v49 = vcombine.low %v604_v38, %v605_v39  ;;  %v563_v4 = vld [vmem:[%s18503_s2 + $0x4c] sm:$0xf]  ;;  %v532_v7 = vld [vmem:[%s18502_s1 + $0x50] sm:$0xf]  ;;  %v13863_v8 = vld [vmem:[%s18508_s7 + $0x78] sm:$0xff]  }
  0x25   : > { %2153 = vperm.xlu1 %13853, %v549_v33   ;;  %2141 = vperm.xlu0 %13852, %v548_v34   ;;  %v587_v33 = vmax.bf16 %v14143_v3, %v491_v16  ;;  %v602_v34 = vmax.bf16 %v14143_v3, %v506_v17  ;;  %v535_v9 = vld [vmem:[%s18502_s1 + $0x5c] sm:$0xf]  ;;  %v534_v10 = vld [vmem:[%s18502_s1 + $0x58] sm:$0xf]  ;;  %v13865_v11 = vld [vmem:[%s18508_s7 + $0x70] sm:$0xff]  }
  0x26   : > { %v565_v12 = vld [vmem:[%s18503_s2 + $0x54] sm:$0xf]  ;;  %v567_v16 = vld [vmem:[%s18503_s2 + $0x5c] sm:$0xf]  ;;  %v566_v17 = vld [vmem:[%s18503_s2 + $0x58] sm:$0xf] }
  0x27   : > { %12446 = vmatpush3.bf16.msra.mxu0 %v13860_v32  ;;  %13839 = vmatpush3.bf16.msra.mxu1 %v13860_v32  ;;  %v586_v32 = vmax.bf16 %v14143_v3, %v490_v15  ;;  %v13864_v15 = vld [vmem:[%s18508_s7 + $0x38] sm:$0xff]   ;;  %v536_v21 = vld [vmem:[%s18502_s1 + $0x60] sm:$0xf]  ;;  %v13868_v23 = vld [vmem:[%s18508_s7 + $0x28] sm:$0xff]  }
  0x28   : > { %12447 = vmatprep.subr.bf16.mxu0 %v13861_v35  ;;  %13832 = vmatprep.subr.bf16.mxu1 %v13861_v35  ;;  %v13871_v22 = vld [vmem:[%s18508_s7 + $0x58] sm:$0xff]   ;;  %v538_v29 = vld [vmem:[%s18502_s1 + $0x68] sm:$0xf]  ;;  %v13877_v38 = vld [vmem:[%s18508_s7 + $0x40] sm:$0xff]  }
  0x29   : > { %2177 = vperm.xlu1 %13853, %v551_v43   ;;  %2165 = vperm.xlu0 %13852, %v550_v44   ;;  %v495_v43 = vld [vmem:[%s14269_s22 + $0x3c] sm:$0xf]  ;;  %v510_v44 = vld [vmem:[%s14269_s22 + $0x78] sm:$0xf]  ;;  %v11054_v46 = vcombine.low %v586_v32, %v587_v33  ;;  %v568_v32 = vld [vmem:[%s18503_s2 + $0x60] sm:$0xf] }
  0x2a   : > { %v13870_v33 = vld [vmem:[%s18508_s7 + $0x20] sm:$0xff]   ;;  %v570_v36 = vld [vmem:[%s18503_s2 + $0x68] sm:$0xf]  ;;  %v13872_v37 = vld [vmem:[%s18508_s7 + $0x18] sm:$0xff]  }
  0x2b   : > { %12448 = vmatpush3.bf16.msra.mxu0 %v13861_v35  ;;  %13840 = vmatpush3.bf16.msra.mxu1 %v13861_v35  ;;  %v603_v35 = vmax.bf16 %v14143_v3, %v507_v18  ;;  %v13869_v18 = vld [vmem:[%s18508_s7 + $0x60] sm:$0xff]   ;;  %v541_v39 = vld [vmem:[%s18502_s1 + $0x74] sm:$0xf] }
  0x2c   : > { %12481 = vmatprep.subr.bf16.mxu1 %v13863_v8  ;;  %12529 = vmatprep.subr.bf16.mxu0 %v13864_v15 }
  0x2d   : > { %1158 = vperm.xlu1 %13853, %v521_v52   ;;  %1146 = vperm.xlu0 %13852, %v520_v53   ;;  %v11062_v47 = vcombine.low %v602_v34, %v603_v35  ;;  %v590_v52 = vmax.bf16 %v14143_v3, %v494_v42  ;;  %v591_v53 = vmax.bf16 %v14143_v3, %v495_v43  ;;  %v13875_v34 = vld [vmem:[%s18508_s7 + $0x48] sm:$0xff]   ;;  %v14145_v42 = vmov 0.0|0.0   ;;  %v543_v43 = vld [vmem:[%s18502_s1 + $0x7c] sm:$0xf] }
  0x2e   : > { %12450 = vmatmul.mubr.bf16.vlgmr.msra.gmra.mxu0 %v11050_v54  ;;  %12466 = vmatmul.mubr.bf16.vlgmr.msra.gmra.mxu1 %v11058_v55  ;;  %v606_v54 = vmax.bf16 %v14143_v3, %v510_v44  ;;  %v607_v55 = vmax.bf16 %v14143_v3, %v511_v45  ;;  %v558_v3 = vld [vmem:[%s18503_s2 + $0x38] sm:$0xf]  ;;  %v571_v35 = vld [vmem:[%s18503_s2 + $0x6c] sm:$0xf]  ;;  %v1056_v45 = vlaneseq }
  0x2f   : > { %12453 = vmatprep.mubr.bf16.mxu0 %v11051_v58  ;;  %12469 = vmatprep.mubr.bf16.mxu1 %v11059_v59  ;;  %v11056_v58 = vcombine.low %v590_v52, %v591_v53  ;;  %v542_v44 = vld [vmem:[%s18502_s1 + $0x78] sm:$0xf]  ;;  %v572_v52 = vld [vmem:[%s18503_s2 + $0x70] sm:$0xf] }
  0x30   : > { %v11064_v59 = vcombine.low %v606_v54, %v607_v55  ;;  %12482 = vmatpush3.bf16.msra.mxu1 %v13863_v8  ;;  %12530 = vmatpush3.bf16.msra.mxu0 %v13864_v15  ;;  %v575_v54 = vld [vmem:[%s18503_s2 + $0x7c] sm:$0xf]  ;;  %v574_v55 = vld [vmem:[%s18503_s2 + $0x78] sm:$0xf] }
  0x31   : > { %1182 = vperm.xlu1 %13853, %v523_v5   ;;  %1170 = vperm.xlu0 %13852, %v522_v6   ;;  %v562_v5 = vld [vmem:[%s18503_s2 + $0x48] sm:$0xf]  ;;  %v533_v6 = vld [vmem:[%s18502_s1 + $0x54] sm:$0xf] }
  0x32   : > { %12483 = vmatprep.subr.bf16.mxu1 %v13865_v11 }
  0x34   : > { %12484 = vmatpush3.bf16.msra.mxu1 %v13865_v11 }
  0x35   : > { %2201 = vperm.xlu1 %13853, %v553_v13   ;;  %2189 = vperm.xlu0 %13852, %v552_v14   ;;  %v564_v13 = vld [vmem:[%s18503_s2 + $0x50] sm:$0xf]  ;;  %v13867_v14 = vld [vmem:[%s18508_s7 + $0x68] sm:$0xff]  }
  0x36   : > { %12454 = vmatmul.mubr.bf16.gmra.mxu0 %v11052_v19  ;;  %12470 = vmatmul.mubr.bf16.gmra.mxu1 %v11060_v20  ;;  %v13866_v19 = vld [vmem:[%s18508_s7 + $0x30] sm:$0xff]   ;;  %v537_v20 = vld [vmem:[%s18502_s1 + $0x64] sm:$0xf] }
  0x37   : > { %12457 = vmatprep.mubr.bf16.mxu0 %v11053_v26  ;;  %12473 = vmatprep.mubr.bf16.mxu1 %v11061_v27  ;;  %v14144_v26 = vmov 0.0   ;;  %v539_v27 = vld [vmem:[%s18502_s1 + $0x6c] sm:$0xf] }
  0x38   : > { %12485 = vmatprep.subr.bf16.mxu1 %v13867_v14  ;;  %12531 = vmatprep.subr.bf16.mxu0 %v13866_v19  ;;  %442 = vst [vmem:[#allocation2] sm:$0xff] %v14144_v26  ;;  %443 = vst [vmem:[#allocation2 + $0x8] sm:$0xff] %v14144_v26 }
  0x39   : > { %2225 = vperm.xlu1 %13853, %v555_v30   ;;  %2213 = vperm.xlu0 %13852, %v554_v31   ;;  %444 = vst [vmem:[#allocation2 + $0x10] sm:$0xff] %v14144_v26  ;;  %477 = vst [vmem:[#allocation2 + $0x118] sm:$0xff] %v14144_v26  ;;  %v13873_v30 = vld [vmem:[%s18508_s7 + $0x50] sm:$0xff]   ;;  %v569_v31 = vld [vmem:[%s18503_s2 + $0x64] sm:$0xf] }
  0x3a   : > { %12486 = vmatpush3.bf16.msra.mxu1 %v13867_v14  ;;  %12532 = vmatpush3.bf16.msra.mxu0 %v13866_v19  ;;  %478 = vst [vmem:[#allocation2 + $0x120] sm:$0xff] %v14144_v26  ;;  %479 = vst [vmem:[#allocation2 + $0x128] sm:$0xff] %v14144_v26 }
  0x3b   : > { %12487 = vmatprep.subr.bf16.mxu1 %v13869_v18  ;;  %12533 = vmatprep.subr.bf16.mxu0 %v13868_v23 }
  0x3d   : > { %1206 = vperm.xlu1 %13853, %v525_v40   ;;  %1194 = vperm.xlu0 %13852, %v524_v41   ;;  %v540_v40 = vld [vmem:[%s18502_s1 + $0x70] sm:$0xf] }
  0x3e   : > { %12458 = vmatmul.mubr.bf16.gmra.mxu0 %v11054_v46  ;;  %12474 = vmatmul.mubr.bf16.gmra.mxu1 %v11062_v47  ;;  %v13874_v41 = vld [vmem:[%s18508_s7 + $0x10] sm:$0xff]   ;;  %v13876_v46 = vld [vmem:[%s18508_s7 + $0x8] sm:$0xff]   ;;  %v14146_v47 = vmov 839922192  }
  0x3f   : > { %12461 = vmatprep.mubr.bf16.mxu0 %v11055_v48  ;;  %12477 = vmatprep.mubr.bf16.mxu1 %v11063_v49  ;;  %v1054_v48 = vunpack.c.l.s4 %v14146_v47  ;;  %v573_v49 = vld [vmem:[%s18503_s2 + $0x74] sm:$0xf] }
  0x40   : > { %12488 = vmatpush3.bf16.msra.mxu1 %v13869_v18  ;;  %12534 = vmatpush3.bf16.msra.mxu0 %v13868_v23 }
  0x41   : > { %1230 = vperm.xlu1 %13853, %v527_v50   ;;  %1218 = vperm.xlu0 %13852, %v526_v51   ;;  %v1057_v50 = vshrl.u32 %v1056_v45, 7  ;;  %v13878_v51 = vld [vmem:[%s18508_s7] sm:$0xff]   ;;  %v1055_v53 = vunpack.c.0.s8 %v1054_v48 }
  0x42   : > { %12489 = vmatprep.subr.bf16.mxu1 %v13871_v22  ;;  %12535 = vmatprep.subr.bf16.mxu0 %v13870_v33 }
  0x44   : > { %12490 = vmatpush3.bf16.msra.mxu1 %v13871_v22  ;;  %12536 = vmatpush3.bf16.msra.mxu0 %v13870_v33 }
  0x45   : > { %2249 = vperm.xlu1 %13853, %v557_v56   ;;  %2237 = vperm.xlu0 %13852, %v556_v57   ;;  %v14571_v56 = vsub.s32 %v1055_v53, %v1057_v50 }
  0x46   : > { %12462 = vmatmul.mubr.bf16.gmra.mxu0 %v11056_v58  ;;  %12478 = vmatmul.mubr.bf16.gmra.mxu1 %v11064_v59  ;;  %v1000_v59 = vld [vmem:[#allocation2 + $0x7] sm:$0xff] }
  0x47   : > { %12491 = vmatprep.subr.bf16.mxu1 %v13873_v30  ;;  %12537 = vmatprep.subr.bf16.mxu0 %v13872_v37 }
  0x48   : > { %12492 = vmatpush3.bf16.msra.mxu1 %v13873_v30  ;;  %12538 = vmatpush3.bf16.msra.mxu0 %v13872_v37 }
  0x49   : > { %2273 = vperm.xlu1 %13853, %v559_v60   ;;  %2261 = vperm.xlu0 %13852, %v558_v3   ;;  %v1001_v60 = vld [vmem:[#allocation2 + $0xf] sm:$0xff]  ;;  %v14578_v3 = vld [vmem:[%s18508_s7 + $0xb8] sm:$0xff]  }
  0x4a   : > { %12493 = vmatprep.subr.bf16.mxu1 %v13875_v34  ;;  %12539 = vmatprep.subr.bf16.mxu0 %v13874_v41 }
  0x4b   : > { %12497 = vmatprep.mubr.bf16.mxu1 %v14145_v42 }
  0x4c   : > { %12494 = vmatpush3.bf16.msra.mxu1 %v13875_v34  ;;  %12540 = vmatpush3.bf16.msra.mxu0 %v13874_v41 }
  0x4d   : > { %1254 = vperm.xlu1 %13853, %v529_v61   ;;  %1242 = vperm.xlu0 %13852, %v528_v62  }
  0x4e   : > { %12495 = vmatprep.subr.bf16.mxu1 %v13877_v38  ;;  %12541 = vmatprep.subr.bf16.mxu0 %v13876_v46 }
  0x50   : > { %12496 = vmatpush3.bf16.msra.mxu1 %v13877_v38  ;;  %12542 = vmatpush3.bf16.msra.mxu0 %v13876_v46 }
  0x51   : > { %1278 = vperm.xlu1 %13853, %v531_v63   ;;  %1266 = vperm.xlu0 %13852, %v530_v0  }
  0x52   : > { %12543 = vmatprep.subr.bf16.mxu0 %v13878_v51  ;;  %12577 = vmatprep.subr.bf16.mxu1 %v14578_v3 }
  0x54   : > { %12544 = vmatpush3.bf16.msra.mxu0 %v13878_v51 }
  0x55   : > { %2297 = vperm.xlu1 %13853, %v561_v1   ;;  %2285 = vperm.xlu0 %13852, %v560_v2   ;;  %v1032_v1 = vpack.c.bf16 %v1001_v60, %v1000_v59 }
  0x59   : > { %2321 = vperm.xlu1 %13853, %v563_v4   ;;  %2309 = vperm.xlu0 %13852, %v562_v5  }
  0x5d   : > { %1302 = vperm.xlu1 %13853, %v533_v6   ;;  %1290 = vperm.xlu0 %13852, %v532_v7  }
  0x61   : > { %1326 = vperm.xlu1 %13853, %v535_v9   ;;  %1314 = vperm.xlu0 %13852, %v534_v10  }
  0x65   : > { %2345 = vperm.xlu1 %13853, %v565_v12   ;;  %2333 = vperm.xlu0 %13852, %v564_v13  }
  0x69   : > { %2369 = vperm.xlu1 %13853, %v567_v16   ;;  %2357 = vperm.xlu0 %13852, %v566_v17  }
  0x6d   : > { %1350 = vperm.xlu1 %13853, %v537_v20   ;;  %1338 = vperm.xlu0 %13852, %v536_v21  }
  0x71   : > { %1374 = vperm.xlu1 %13853, %v539_v27   ;;  %1362 = vperm.xlu0 %13852, %v538_v29  }
  0x75   : > { %2393 = vperm.xlu1 %13853, %v569_v31   ;;  %2381 = vperm.xlu0 %13852, %v568_v32   ;;  %v14613_v31 = vld [vmem:[%s18508_s7 + $0xf8] sm:$0xff]  }
  0x76   : > { %12625 = vmatprep.subr.bf16.mxu0 %v14613_v31 }
  0x79   : > { %2417 = vperm.xlu1 %13853, %v571_v35   ;;  %2405 = vperm.xlu0 %13852, %v570_v36  }
  0x7d   : > { %1398 = vperm.xlu1 %13853, %v541_v39   ;;  %1386 = vperm.xlu0 %13852, %v540_v40  }
  0x81   : > { %1422 = vperm.xlu1 %13853, %v543_v43   ;;  %1410 = vperm.xlu0 %13852, %v542_v44  }
  0x85   : > { %2441 = vperm.xlu1 %13853, %v573_v49   ;;  %2429 = vperm.xlu0 %13852, %v572_v52  }
  0x88   : > { %v14573_v57 = vpop.permute.xlu1 %1074  ;;  %v1051_v58 = vpop.permute.xlu0 %1050 }
  0x89   : > { %2465 = vperm.xlu1 %13853, %v575_v54   ;;  %2453 = vperm.xlu0 %13852, %v574_v55   ;;  %v1059_v61 = vrot.slane %v1051_v58, %v14571_v56 }
  0x8c   : > { %v14582_v62 = vpop.permute.xlu1 %1086  ;;  %v1063_v63 = vpop.permute.xlu0 %1062 }
  0x8d   : > { %v1071_v0 = vrot.slane %v1063_v63, %v14571_v56 }
  0x8f   : > { %v14585_v2 = vcombine.low %v1059_v61, %v1071_v0 }
  0x90   : > { %v2106_v4 = vpop.permute.xlu1 %2105  ;;  %v2094_v5 = vpop.permute.xlu0 %2093 }
  0x91   : > { %18635 = vst [vmem:[#allocation5_spill] sm:$0xff] %v14585_v2  ;;  %v2114_v6 = vrot.slane %v2106_v4, %v14571_v56  ;;  %v2102_v7 = vrot.slane %v2094_v5, %v14571_v56  ;;  %v1528_v8 = vmul.bf16 %v14585_v2, %v1032_v1 }
  0x93   : > { %v14590_v9 = vcombine.low %v2102_v7, %v2114_v6  ;;  %12545 = vmatprep.mubr.bf16.mxu0 %v1528_v8 }
  0x94   : > { %v2130_v10 = vpop.permute.xlu1 %2129  ;;  %v2118_v11 = vpop.permute.xlu0 %2117 }
  0x95   : > { %18636 = vst [vmem:[#allocation6_spill] sm:$0xff] %v14590_v9  ;;  %v2138_v12 = vrot.slane %v2130_v10, %v14571_v56  ;;  %v2126_v13 = vrot.slane %v2118_v11, %v14571_v56 }
  0x97   : > { %v14594_v14 = vcombine.low %v2126_v13, %v2138_v12 }
  0x98   : > { %v14596_v15 = vpop.permute.xlu1 %1110  ;;  %v14598_v16 = vpop.permute.xlu0 %1098 }
  0x99   : > { %18637 = vst [vmem:[#allocation7_spill] sm:$0xff] %v14594_v14 }
  0x9c   : > { %v14600_v17 = vpop.permute.xlu1 %1134  ;;  %v14602_v18 = vpop.permute.xlu0 %1122 }
  0x9d   : > { %v1143_v25 = vrot.slane %v14600_v17, %v14571_v56  ;;  %v1131_v24 = vrot.slane %v14602_v18, %v14571_v56 }
  0xa0   : > { %v2154_v19 = vpop.permute.xlu1 %2153  ;;  %v2142_v20 = vpop.permute.xlu0 %2141 }
  0xa1   : > { %v2162_v21 = vrot.slane %v2154_v19, %v14571_v56  ;;  %v2150_v22 = vrot.slane %v2142_v20, %v14571_v56 }
  0xa3   : > { %v14606_v23 = vcombine.low %v2150_v22, %v2162_v21 }
  0xa4   : > { %v2178_v26 = vpop.permute.xlu1 %2177  ;;  %v2166_v27 = vpop.permute.xlu0 %2165 }
  0xa5   : > { %18638 = vst [vmem:[#allocation8_spill] sm:$0xff] %v14606_v23  ;;  %v2186_v29 = vrot.slane %v2178_v26, %v14571_v56  ;;  %v2174_v30 = vrot.slane %v2166_v27, %v14571_v56 }
  0xa7   : > { %v14615_v32 = vcombine.low %v2174_v30, %v2186_v29 }
  0xa8   : > { %v14618_v33 = vpop.permute.xlu1 %1158  ;;  %v14620_v34 = vpop.permute.xlu0 %1146 }
  0xa9   : > { %18639 = vst [vmem:[#allocation9_spill] sm:$0xff] %v14615_v32 }
  0xac   : > { %v14622_v35 = vpop.permute.xlu1 %1182  ;;  %v14624_v36 = vpop.permute.xlu0 %1170 }
  0xb0   : > { %v2202_v37 = vpop.permute.xlu1 %2201  ;;  %v2190_v38 = vpop.permute.xlu0 %2189 }
  0xb1   : > { %v2210_v39 = vrot.slane %v2202_v37, %v14571_v56  ;;  %v2198_v40 = vrot.slane %v2190_v38, %v14571_v56 }
  0xb3   : > { %v14628_v41 = vcombine.low %v2198_v40, %v2210_v39 }
  0xb4   : > { %v2226_v42 = vpop.permute.xlu1 %2225  ;;  %v2214_v43 = vpop.permute.xlu0 %2213 }
  0xb5   : > { %18640 = vst [vmem:[#allocation10_spill] sm:$0xff] %v14628_v41  ;;  %v2234_v44 = vrot.slane %v2226_v42, %v14571_v56  ;;  %v2222_v45 = vrot.slane %v2214_v43, %v14571_v56 }
  0xb7   : > { %v14632_v46 = vcombine.low %v2222_v45, %v2234_v44  ;;  %v14685_v44 = vld [vmem:[%s18507_s6] ss:$0 sm:$0xff] }
  0xb8   : > { %v14634_v47 = vpop.permute.xlu1 %1206  ;;  %v14636_v48 = vpop.permute.xlu0 %1194 }
  0xb9   : > { %18641 = vst [vmem:[#allocation11_spill] sm:$0xff] %v14632_v46 }
  0xbc   : > { %v14638_v49 = vpop.permute.xlu1 %1230  ;;  %v14640_v50 = vpop.permute.xlu0 %1218 }
  0xc0   : > { %v2250_v51 = vpop.permute.xlu1 %2249  ;;  %v2238_v52 = vpop.permute.xlu0 %2237 }
  0xc1   : > { %v2258_v53 = vrot.slane %v2250_v51, %v14571_v56  ;;  %v2246_v54 = vrot.slane %v2238_v52, %v14571_v56 }
  0xc3   : > { %v14644_v55 = vcombine.low %v2246_v54, %v2258_v53 }
  0xc4   : > { %v2274_v58 = vpop.permute.xlu1 %2273  ;;  %v2262_v59 = vpop.permute.xlu0 %2261 }
  0xc5   : > { %18642 = vst [vmem:[#allocation12_spill] sm:$0xff] %v14644_v55  ;;  %v2282_v60 = vrot.slane %v2274_v58, %v14571_v56  ;;  %v2270_v61 = vrot.slane %v2262_v59, %v14571_v56 }
  0xc7   : > { %v14648_v63 = vcombine.low %v2270_v61, %v2282_v60 }
  0xc8   : > { %v14650_v0 = vpop.permute.xlu1 %1254  ;;  %v14652_v1 = vpop.permute.xlu0 %1242 }
  0xc9   : > { %18643 = vst [vmem:[#allocation13_spill] sm:$0xff] %v14648_v63 }
  0xcc   : > { %v14654_v4 = vpop.permute.xlu1 %1278  ;;  %v14656_v5 = vpop.permute.xlu0 %1266 }
  0xd0   : > { %v2298_v6 = vpop.permute.xlu1 %2297  ;;  %v2286_v7 = vpop.permute.xlu0 %2285 }
  0xd1   : > { %v2306_v8 = vrot.slane %v2298_v6, %v14571_v56  ;;  %v2294_v10 = vrot.slane %v2286_v7, %v14571_v56 }
  0xd3   : > { %v14660_v11 = vcombine.low %v2294_v10, %v2306_v8 }
  0xd4   : > { %v2322_v12 = vpop.permute.xlu1 %2321  ;;  %v2310_v13 = vpop.permute.xlu0 %2309 }
  0xd5   : > { %18644 = vst [vmem:[#allocation14_spill] sm:$0xff] %v14660_v11  ;;  %v2330_v19 = vrot.slane %v2322_v12, %v14571_v56  ;;  %v2318_v20 = vrot.slane %v2310_v13, %v14571_v56 }
  0xd7   : > { %v14664_v21 = vcombine.low %v2318_v20, %v2330_v19 }
  0xd8   : > { %v14666_v22 = vpop.permute.xlu1 %1302  ;;  %v14668_v26 = vpop.permute.xlu0 %1290 }
  0xd9   : > { %18645 = vst [vmem:[#allocation15_spill] sm:$0xff] %v14664_v21 }
  0xdc   : > { %v14670_v27 = vpop.permute.xlu1 %1326  ;;  %v14672_v29 = vpop.permute.xlu0 %1314 }
  0xe0   : > { %v14674_v30 = vpop.permute.xlu1 %2345  ;;  %v14676_v37 = vpop.permute.xlu0 %2333 }
  0xe1   : > { %18646 = vst [vmem:[#allocation16_spill] sm:$0xff] %v14674_v30  ;;  %18647 = vst [vmem:[#allocation17_spill] sm:$0xff] %v14676_v37 }
  0xe4   : > { %v2370_v38 = vpop.permute.xlu1 %2369  ;;  %v2358_v39 = vpop.permute.xlu0 %2357 }
  0xe5   : > { %v2378_v40 = vrot.slane %v2370_v38, %v14571_v56  ;;  %v2366_v42 = vrot.slane %v2358_v39, %v14571_v56 }
  0xe7   : > { %v14680_v43 = vcombine.low %v2366_v42, %v2378_v40 }
  0xe9   : > { %18648 = vst [vmem:[#allocation18_spill] sm:$0xff] %v14680_v43 }
  0xee   : > { %v12451_v45 = vpop.f32.mrf.mxu0  ;;  %v12467_v51 = vpop.f32.mrf.mxu1 }
  0xef   : > { %v818_v52 = vadd.f32 %v12451_v45, %v14685_v44  ;;  %v14689_v53 = vadd.f32 %v12467_v51, %v14685_v44 }
  0xf0   : > { %v809_v59 = vpop.f32.mrf.mxu0  ;;  %v873_v60 = vpop.f32.mrf.mxu1 }
  0xf1   : > { %v938_v54 = vmax.f32 %v818_v52, 0.0  ;;  %v18516_v58 = vmax.f32 %v14689_v53, 0.0  ;;  %v810_v61 = vadd.f32 %v14685_v44, %v809_v59  ;;  %v14694_v6 = vadd.f32 %v14685_v44, %v873_v60 }
  0xf2   : > { %v12452_v7 = vpop.f32.mrf.mxu0  ;;  %v12468_v8 = vpop.f32.mrf.mxu1 }
  0xf3   : > { %970 = vst [vmem:[#allocation2 + $0x28] sm:$0xff] %v938_v54  ;;  %986 = vst [vmem:[#allocation2 + $0xa8] sm:$0xff] %v18516_v58  ;;  %v936_v10 = vmax.f32 %v810_v61, 0.0  ;;  %v18517_v12 = vmax.f32 %v14694_v6, 0.0  ;;  %v821_v13 = vadd.f32 %v12452_v7, %v14685_v44  ;;  %v14701_v19 = vadd.f32 %v12468_v8, %v14685_v44 }
  0xf4   : > { %v812_v20 = vpop.f32.mrf.mxu0  ;;  %v876_v38 = vpop.f32.mrf.mxu1 }
  0xf5   : > { %968 = vst [vmem:[#allocation2 + $0x18] sm:$0xff] %v936_v10  ;;  %984 = vst [vmem:[#allocation2 + $0x98] sm:$0xff] %v18517_v12  ;;  %v939_v39 = vmax.f32 %v821_v13, 0.0  ;;  %v18515_v40 = vmax.f32 %v14701_v19, 0.0  ;;  %v813_v42 = vadd.f32 %v14685_v44, %v812_v20  ;;  %v14708_v45 = vadd.f32 %v14685_v44, %v876_v38  ;;  %v13880_v12 = vld [vmem:[%s18508_s7 + $0xb0] sm:$0xff]  }
  0xf6   : > { %v12455_v51 = vpop.f32.mrf.mxu0  ;;  %v12471_v52 = vpop.f32.mrf.mxu1 }
  0xf7   : > { %971 = vst [vmem:[#allocation2 + $0x30] sm:$0xff] %v939_v39  ;;  %987 = vst [vmem:[#allocation2 + $0xb0] sm:$0xff] %v18515_v40  ;;  %v937_v59 = vmax.f32 %v813_v42, 0.0  ;;  %v18518_v60 = vmax.f32 %v14708_v45, 0.0  ;;  %v14714_v61 = vadd.f32 %v12455_v51, %v14685_v44  ;;  %v14717_v7 = vadd.f32 %v12471_v52, %v14685_v44 }
  0xf8   : > { %v825_v8 = vpop.f32.mrf.mxu0  ;;  %v889_v13 = vpop.f32.mrf.mxu1  ;;  %v1594_v52 = vpack.c.bf16 %v939_v39, %v938_v54  ;;  %v1095_v54 = vrot.slane %v14582_v62, %v14571_v56  ;;  %v1119_v39 = vrot.slane %v14596_v15, %v14571_v56 }
  0xf9   : > { %969 = vst [vmem:[#allocation2 + $0x20] sm:$0xff] %v937_v59  ;;  %985 = vst [vmem:[#allocation2 + $0xa0] sm:$0xff] %v18518_v60  ;;  %v942_v20 = vmax.f32 %v14714_v61, 0.0  ;;  %v18519_v38 = vmax.f32 %v14717_v7, 0.0  ;;  %v826_v42 = vadd.f32 %v14685_v44, %v825_v8  ;;  %v14725_v28 = vadd.f32 %v14685_v44, %v889_v13 }
  0xfa   : > { %v12456_v51 = vpop.f32.mrf.mxu0  ;;  %v12472_v40 = vpop.f32.mrf.mxu1  ;;  %v1593_v58 = vpack.c.bf16 %v937_v59, %v936_v10  ;;  %v1083_v10 = vrot.slane %v14573_v57, %v14571_v56  ;;  %v1107_v59 = vrot.slane %v14598_v16, %v14571_v56 }
  0xfb   : > { %974 = vst [vmem:[#allocation2 + $0x48] sm:$0xff] %v942_v20  ;;  %990 = vst [vmem:[#allocation2 + $0xc8] sm:$0xff] %v18519_v38  ;;  %v940_v61 = vmax.f32 %v826_v42, 0.0  ;;  %v18520_v60 = vmax.f32 %v14725_v28, 0.0  ;;  %v837_v8 = vadd.f32 %v12456_v51, %v14685_v44  ;;  %v14735_v13 = vadd.f32 %v12472_v40, %v14685_v44 }
  0xfc   : > { %v828_v42 = vpop.f32.mrf.mxu0  ;;  %v892_v38 = vpop.f32.mrf.mxu1  ;;  %12498 = vmatmul.mubr.bf16.vlgmr.msra.gmra.mxu1 %v1593_v58  ;;  %v13881_v58 = vld [vmem:[%s18508_s7 + $0xa8] sm:$0xff]  }
  0xfd   : > { %972 = vst [vmem:[#allocation2 + $0x38] sm:$0xff] %v940_v61  ;;  %988 = vst [vmem:[#allocation2 + $0xb8] sm:$0xff] %v18520_v60  ;;  %v943_v40 = vmax.f32 %v837_v8, 0.0  ;;  %v18523_v51 = vmax.f32 %v14735_v13, 0.0  ;;  %v829_v57 = vadd.f32 %v14685_v44, %v828_v42  ;;  %v14750_v62 = vadd.f32 %v14685_v44, %v892_v38  ;;  %12578 = vmatpush3.bf16.msra.mxu1 %v14578_v3 }
  0xfe   : > { %12501 = vmatprep.mubr.bf16.mxu1 %v1594_v52  ;;  %v12459_v15 = vpop.f32.mrf.mxu0  ;;  %v12475_v16 = vpop.f32.mrf.mxu1  ;;  %12579 = vmatprep.subr.bf16.mxu1 %v13880_v12  ;;  %v14765_v52 = vcombine.low %v1083_v10, %v1095_v54  ;;  %v14767_v60 = vcombine.low %v1107_v59, %v1119_v39  ;;  %v1002_v39 = vld [vmem:[#allocation2 + $0x17] sm:$0xff]  ;;  %v1005_v18 = vld [vmem:[#allocation2 + $0x2f] sm:$0xff] }
  0xff   : > { %975 = vst [vmem:[#allocation2 + $0x50] sm:$0xff] %v943_v40  ;;  %991 = vst [vmem:[#allocation2 + $0xd0] sm:$0xff] %v18523_v51  ;;  %v941_v8 = vmax.f32 %v829_v57, 0.0  ;;  %v14760_v38 = vadd.f32 %v12459_v15, %v14685_v44  ;;  %v14763_v3 = vadd.f32 %v12475_v16, %v14685_v44  ;;  %v18651_v15 = vmax.f32 %v14750_v62, 0.0 }
 0x100   : > { %18649 = vst [vmem:[#allocation19_spill] sm:$0xff] %v14765_v52  ;;  %18650 = vst [vmem:[#allocation20_spill] sm:$0xff] %v14767_v60  ;;  %v841_v51 = vpop.f32.mrf.mxu0  ;;  %v905_v57 = vpop.f32.mrf.mxu1  ;;  %v1003_v43 = vld [vmem:[#allocation2 + $0x1f] sm:$0xff]  ;;  %v1004_v42 = vld [vmem:[#allocation2 + $0x27] sm:$0xff]  ;;  %v1596_v11 = vpack.c.bf16 %v943_v40, %v942_v20  ;;  %v1167_v20 = vrot.slane %v14618_v33, %v14571_v56  ;;  %v1155_v40 = vrot.slane %v14620_v34, %v14571_v56 }
 0x101   : > { %973 = vst [vmem:[#allocation2 + $0x40] sm:$0xff] %v941_v8  ;;  %989 = vst [vmem:[#allocation2 + $0xc0] sm:$0xff] %v18651_v15  ;;  %v18528_v16 = vmax.f32 %v14760_v38, 0.0  ;;  %v18527_v10 = vmax.f32 %v14763_v3, 0.0  ;;  %v14778_v54 = vadd.f32 %v14685_v44, %v841_v51  ;;  %v14781_v17 = vadd.f32 %v14685_v44, %v905_v57  ;;  %12580 = vmatpush3.bf16.msra.mxu1 %v13880_v12  ;;  %v13882_v51 = vld [vmem:[%s18508_s7 + $0xa0] sm:$0xff]  }
 0x102   : > { %v12460_v59 = vpop.f32.mrf.mxu0  ;;  %v12476_v21 = vpop.f32.mrf.mxu1  ;;  %v14783_v37 = vpack.c.bf16 %v1003_v43, %v1002_v39  ;;  %v14785_v30 = vpack.c.bf16 %v1005_v18, %v1004_v42  ;;  %v1595_v15 = vpack.c.bf16 %v941_v8, %v940_v61  ;;  %12581 = vmatprep.subr.bf16.mxu1 %v13881_v58 }
 0x103   : > { %978 = vst [vmem:[#allocation2 + $0x68] sm:$0xff] %v18528_v16  ;;  %994 = vst [vmem:[#allocation2 + $0xe8] sm:$0xff] %v18527_v10  ;;  %v944_v12 = vmax.f32 %v14778_v54, 0.0  ;;  %v18529_v43 = vmax.f32 %v14781_v17, 0.0  ;;  %v853_v42 = vadd.f32 %v12460_v59, %v14685_v44  ;;  %v14798_v61 = vadd.f32 %v12476_v21, %v14685_v44  ;;  %v13885_v21 = vld [vmem:[%s18508_s7 + $0xf0] sm:$0xff]  }
 0x104   : > { %18652 = vst [vmem:[#allocation21_spill] sm:$0xff] %v14785_v30  ;;  %v844_v8 = vpop.f32.mrf.mxu0  ;;  %v908_v57 = vpop.f32.mrf.mxu1  ;;  %v1529_v39 = vmul.bf16 %v14765_v52, %v14783_v37  ;;  %v1530_v54 = vmul.bf16 %v14767_v60, %v14785_v30  ;;  %12502 = vmatmul.mubr.bf16.gmra.mxu1 %v1595_v15  ;;  %v14818_v10 = vcombine.low %v1131_v24, %v1143_v25 }
 0x105   : > { %976 = vst [vmem:[#allocation2 + $0x58] sm:$0xff] %v944_v12  ;;  %992 = vst [vmem:[#allocation2 + $0xd8] sm:$0xff] %v18529_v43  ;;  %v947_v33 = vmax.f32 %v853_v42, 0.0  ;;  %v18530_v34 = vmax.f32 %v14798_v61, 0.0  ;;  %v845_v18 = vadd.f32 %v14685_v44, %v844_v8  ;;  %v14816_v59 = vadd.f32 %v14685_v44, %v908_v57  ;;  %12505 = vmatprep.mubr.bf16.mxu1 %v1596_v11  ;;  %v13883_v43 = vld [vmem:[%s18508_s7 + $0x98] sm:$0xff]  }
 0x106   : > { %12582 = vmatpush3.bf16.msra.mxu1 %v13881_v58  ;;  %18653 = vst [vmem:[#allocation22_spill] sm:$0xff] %v14818_v10  ;;  %12546 = vmatmul.mubr.bf16.vlgmr.msra.gmra.mxu0 %v1529_v39  ;;  %v12463_v15 = vpop.f32.mrf.mxu0  ;;  %v12479_v16 = vpop.f32.mrf.mxu1  ;;  %v14831_v25 = vcombine.low %v1155_v40, %v1167_v20  ;;  %v1191_v58 = vrot.slane %v14622_v35, %v14571_v56  ;;  %v1009_v39 = vld [vmem:[#allocation2 + $0x4f] sm:$0xff] }
 0x107   : > { %12583 = vmatprep.subr.bf16.mxu1 %v13882_v51  ;;  %979 = vst [vmem:[#allocation2 + $0x70] sm:$0xff] %v947_v33  ;;  %995 = vst [vmem:[#allocation2 + $0xf0] sm:$0xff] %v18530_v34  ;;  %v945_v42 = vmax.f32 %v845_v18, 0.0  ;;  %v14827_v11 = vadd.f32 %v12463_v15, %v14685_v44  ;;  %v930_v24 = vadd.f32 %v12479_v16, %v14685_v44  ;;  %12549 = vmatprep.mubr.bf16.mxu0 %v1530_v54  ;;  %v1006_v54 = vld [vmem:[#allocation2 + $0x37] sm:$0xff] }
 0x108   : > { %12626 = vmatpush3.bf16.msra.mxu0 %v14613_v31  ;;  %18654 = vst [vmem:[#allocation23_spill] sm:$0xff] %v14831_v25  ;;  %v1179_v57 = vrot.slane %v14624_v36, %v14571_v56  ;;  %v857_v18 = vpop.f32.mrf.mxu0  ;;  %v921_v34 = vpop.f32.mrf.mxu1  ;;  %v1007_v15 = vld [vmem:[#allocation2 + $0x3f] sm:$0xff]  ;;  %v1008_v8 = vld [vmem:[#allocation2 + $0x47] sm:$0xff]  ;;  %v18655_v16 = vmax.f32 %v14816_v59, 0.0 }
 0x109   : > { %12627 = vmatprep.subr.bf16.mxu0 %v13885_v21  ;;  %v13887_v31 = vld [vmem:[%s18508_s7 + $0xe8] sm:$0xff]   ;;  %977 = vst [vmem:[#allocation2 + $0x60] sm:$0xff] %v945_v42  ;;  %v950_v35 = vmax.f32 %v14827_v11, 0.0  ;;  %v966_v20 = vmax.f32 %v930_v24, 0.0  ;;  %v858_v36 = vadd.f32 %v14685_v44, %v857_v18  ;;  %v14847_v40 = vadd.f32 %v14685_v44, %v921_v34  ;;  %v13886_v24 = vld [vmem:[%s18508_s7 + $0x90] sm:$0xff]  }
 0x10a   : > { %993 = vst [vmem:[#allocation2 + $0xe0] sm:$0xff] %v18655_v16  ;;  %12584 = vmatpush3.bf16.msra.mxu1 %v13882_v51  ;;  %v12464_v63 = vpop.f32.mrf.mxu0  ;;  %v12480_v55 = vpop.f32.mrf.mxu1  ;;  %v14849_v46 = vpack.c.bf16 %v1007_v15, %v1006_v54  ;;  %v14851_v60 = vpack.c.bf16 %v1009_v39, %v1008_v8  ;;  %v1597_v52 = vpack.c.bf16 %v945_v42, %v944_v12  ;;  %v18656_v16 = vmax.f32 %v14760_v38, 0.0 }
 0x10b   : > { %12585 = vmatprep.subr.bf16.mxu1 %v13883_v43  ;;  %982 = vst [vmem:[#allocation2 + $0x88] sm:$0xff] %v950_v35  ;;  %998 = vst [vmem:[#allocation2 + $0x108] sm:$0xff] %v966_v20  ;;  %v948_v51 = vmax.f32 %v858_v36, 0.0  ;;  %v964_v34 = vmax.f32 %v14847_v40, 0.0  ;;  %v869_v18 = vadd.f32 %v12464_v63, %v14685_v44  ;;  %v933_v8 = vadd.f32 %v12480_v55, %v14685_v44  ;;  %v13888_v63 = vld [vmem:[%s18508_s7 + $0xe0] sm:$0xff]  }
 0x10c   : > { %v1598_v30 = vpack.c.bf16 %v947_v33, %v18656_v16  ;;  %12628 = vmatpush3.bf16.msra.mxu0 %v13885_v21  ;;  %v1203_v38 = vrot.slane %v14636_v48, %v14571_v56  ;;  %v860_v12 = vpop.f32.mrf.mxu0  ;;  %v924_v33 = vpop.f32.mrf.mxu1  ;;  %v1531_v42 = vmul.bf16 %v14818_v10, %v14849_v46  ;;  %v1532_v39 = vmul.bf16 %v14831_v25, %v14851_v60  ;;  %v1010_v54 = vld [vmem:[#allocation2 + $0x57] sm:$0xff] }
 0x10d   : > { %12506 = vmatmul.mubr.bf16.gmra.mxu1 %v1597_v52  ;;  %12629 = vmatprep.subr.bf16.mxu0 %v13887_v31  ;;  %980 = vst [vmem:[#allocation2 + $0x78] sm:$0xff] %v948_v51  ;;  %996 = vst [vmem:[#allocation2 + $0xf8] sm:$0xff] %v964_v34  ;;  %v951_v55 = vmax.f32 %v869_v18, 0.0  ;;  %v967_v48 = vmax.f32 %v933_v8, 0.0  ;;  %v861_v21 = vadd.f32 %v14685_v44, %v860_v12  ;;  %v13889_v52 = vld [vmem:[%s18508_s7 + $0x88] sm:$0xff]  }
 0x10e   : > { %v14876_v15 = vadd.f32 %v14685_v44, %v924_v33  ;;  %12509 = vmatprep.mubr.bf16.mxu1 %v1598_v30  ;;  %12586 = vmatpush3.bf16.msra.mxu1 %v13883_v43  ;;  %v13890_v30 = vld [vmem:[%s18508_s7 + $0xd8] sm:$0xff]   ;;  %v14887_v44 = vcombine.low %v1179_v57, %v1191_v58  ;;  %v1013_v18 = vld [vmem:[#allocation2 + $0x6f] sm:$0xff]  ;;  %v18658_v8 = vrot.slane %v14634_v47, %v14571_v56  ;;  %v13892_v57 = vld [vmem:[%s18508_s7 + $0x80] sm:$0xff]  }
 0x10f   : > { %12550 = vmatmul.mubr.bf16.gmra.mxu0 %v1531_v42  ;;  %12587 = vmatprep.subr.bf16.mxu1 %v13886_v24  ;;  %983 = vst [vmem:[#allocation2 + $0x90] sm:$0xff] %v951_v55  ;;  %999 = vst [vmem:[#allocation2 + $0x110] sm:$0xff] %v967_v48  ;;  %v14881_v20 = vmax.f32 %v861_v21, 0.0  ;;  %v1600_v42 = vpack.c.bf16 %v951_v55, %v950_v35  ;;  %v13891_v48 = vld [vmem:[%s18508_s7 + $0xd0] sm:$0xff]   ;;  %v1227_v21 = vrot.slane %v14640_v50, %v14571_v56  ;;  %v13893_v50 = vld [vmem:[%s18508_s7 + $0xc8] sm:$0xff]  }
 0x110   : > { %v965_v36 = vmax.f32 %v14876_v15, 0.0  ;;  %12553 = vmatprep.mubr.bf16.mxu0 %v1532_v39  ;;  %12630 = vmatpush3.bf16.msra.mxu0 %v13887_v31  ;;  %18657 = vst [vmem:[#allocation24_spill] sm:$0xff] %v14887_v44  ;;  %v1011_v43 = vld [vmem:[#allocation2 + $0x5f] sm:$0xff]  ;;  %v1012_v16 = vld [vmem:[#allocation2 + $0x67] sm:$0xff]  ;;  %v14892_v12 = vcombine.low %v1203_v38, %v18658_v8  ;;  %v1239_v39 = vrot.slane %v14638_v49, %v14571_v56  ;;  %v18662_v8 = vmax.f32 %v14694_v6, 0.0 }
 0x111   : > { %12631 = vmatprep.subr.bf16.mxu0 %v13888_v63  ;;  %981 = vst [vmem:[#allocation2 + $0x80] sm:$0xff] %v14881_v20  ;;  %v14897_v31 = vpack.c.bf16 %v1011_v43, %v1010_v54  ;;  %v14899_v33 = vpack.c.bf16 %v1013_v18, %v1012_v16  ;;  %v1599_v58 = vpack.c.bf16 %v14881_v20, %v948_v51  ;;  %v14913_v51 = vpop.permute.xlu1 %1350  ;;  %v14929_v49 = vld [vmem:[%s18508_s7 + $0x138] sm:$0xff]   ;;  %v13894_v6 = vld [vmem:[%s18508_s7 + $0xc0] sm:$0xff]  }
 0x112   : > { %18659 = vst [vmem:[#allocation25_spill] sm:$0xff] %v14892_v12  ;;  %997 = vst [vmem:[#allocation2 + $0x100] sm:$0xff] %v965_v36  ;;  %12588 = vmatpush3.bf16.msra.mxu1 %v13886_v24  ;;  %v14915_v24 = vpop.permute.xlu0 %1338  ;;  %v1263_v11 = vrot.slane %v14650_v0, %v14571_v56  ;;  %v1251_v35 = vrot.slane %v14652_v1, %v14571_v56  ;;  %v14934_v1 = vcombine.low %v1227_v21, %v1239_v39 }
 0x113   : > { %12589 = vmatprep.subr.bf16.mxu1 %v13889_v52  ;;  %v1533_v47 = vmul.bf16 %v14887_v44, %v14897_v31  ;;  %v1534_v38 = vmul.bf16 %v14892_v12, %v14899_v33  ;;  %v18664_v39 = vmax.f32 %v14689_v53, 0.0  ;;  %v1020_v53 = vld [vmem:[#allocation2 + $0xa7] sm:$0xff] }
 0x114   : > { %12632 = vmatpush3.bf16.msra.mxu0 %v13888_v63  ;;  %v1014_v63 = vld [vmem:[#allocation2 + $0x77] sm:$0xff]  ;;  %18660 = vst [vmem:[#allocation26_spill] sm:$0xff] %v14934_v1 }
 0x115   : > { %12510 = vmatmul.mubr.bf16.gmra.mxu1 %v1599_v58  ;;  %12633 = vmatprep.subr.bf16.mxu0 %v13890_v30  ;;  %v14942_v18 = vpop.permute.xlu1 %1374  ;;  %v18663_v58 = vmax.f32 %v14708_v45, 0.0  ;;  %v1030_v40 = vld [vmem:[#allocation2 + $0xf7] sm:$0xff] }
 0x116   : > { %12513 = vmatprep.mubr.bf16.mxu1 %v1600_v42  ;;  %12590 = vmatpush3.bf16.msra.mxu1 %v13889_v52  ;;  %v1017_v54 = vld [vmem:[#allocation2 + $0x8f] sm:$0xff]  ;;  %v14936_v52 = vcombine.low %v1251_v35, %v1263_v11  ;;  %v1018_v45 = vld [vmem:[#allocation2 + $0x97] sm:$0xff]  ;;  %v1019_v11 = vld [vmem:[#allocation2 + $0x9f] sm:$0xff]  ;;  %v1287_v35 = vrot.slane %v14654_v4, %v14571_v56 }
 0x117   : > { %12554 = vmatmul.mubr.bf16.gmra.mxu0 %v1533_v47  ;;  %12591 = vmatprep.subr.bf16.mxu1 %v13892_v57  ;;  %v1601_v47 = vpack.c.bf16 %v18663_v58, %v18662_v8  ;;  %v14974_v8 = vpack.c.bf16 %v1019_v11, %v1018_v45  ;;  %v14979_v4 = vld [vmem:[%s18508_s7 + $0x178] sm:$0xff]   ;;  %v1335_v45 = vrot.slane %v14670_v27, %v14571_v56  ;;  %v1024_v11 = vld [vmem:[#allocation2 + $0xc7] sm:$0xff] }
 0x118   : > { %12557 = vmatprep.mubr.bf16.mxu0 %v1534_v38  ;;  %12634 = vmatpush3.bf16.msra.mxu0 %v13890_v30  ;;  %v1015_v0 = vld [vmem:[#allocation2 + $0x7f] sm:$0xff]  ;;  %v1016_v55 = vld [vmem:[#allocation2 + $0x87] sm:$0xff]  ;;  %18661 = vst [vmem:[#allocation27_spill] sm:$0xff] %v14936_v52  ;;  %v14944_v30 = vpop.permute.xlu0 %1362 }
 0x119   : > { %12635 = vmatprep.subr.bf16.mxu0 %v13891_v48  ;;  %v14938_v43 = vpack.c.bf16 %v1015_v0, %v1014_v63  ;;  %v14940_v16 = vpack.c.bf16 %v1017_v54, %v1016_v55  ;;  %v1275_v63 = vrot.slane %v14656_v5, %v14571_v56  ;;  %v1299_v0 = vrot.slane %v14668_v26, %v14571_v56  ;;  %v14970_v55 = vpop.permute.xlu1 %2393  ;;  %v1031_v15 = vld [vmem:[#allocation2 + $0xff] sm:$0xff] }
 0x11a   : > { %12592 = vmatpush3.bf16.msra.mxu1 %v13892_v57  ;;  %v18665_v57 = vmax.f32 %v14701_v19, 0.0  ;;  %v1021_v19 = vld [vmem:[#allocation2 + $0xaf] sm:$0xff]  ;;  %v18667_v26 = vmax.f32 %v14725_v28, 0.0 }
 0x11b   : > { %12673 = vmatprep.subr.bf16.mxu1 %v14929_v49  ;;  %v1535_v38 = vmul.bf16 %v14934_v1, %v14938_v43  ;;  %v1536_v42 = vmul.bf16 %v14936_v52, %v14940_v16  ;;  %v14981_v5 = vpack.c.bf16 %v1021_v19, %v1020_v53  ;;  %v1347_v53 = vrot.slane %v14915_v24, %v14571_v56 }
 0x11c   : > { %v1602_v21 = vpack.c.bf16 %v18665_v57, %v18664_v39  ;;  %12636 = vmatpush3.bf16.msra.mxu0 %v13891_v48  ;;  %v1311_v48 = vrot.slane %v14666_v22, %v14571_v56  ;;  %v14972_v54 = vpop.permute.xlu0 %2381  ;;  %v14983_v22 = vcombine.low %v1275_v63, %v1287_v35  ;;  %v1025_v35 = vld [vmem:[#allocation2 + $0xcf] sm:$0xff]  ;;  %v1359_v63 = vrot.slane %v14913_v51, %v14571_v56 }
 0x11d   : > { %12514 = vmatmul.mubr.bf16.gmra.mxu1 %v1601_v47  ;;  %12637 = vmatprep.subr.bf16.mxu0 %v13893_v50  ;;  %v15014_v27 = vpack.c.bf16 %v1025_v35, %v1024_v11  ;;  %v18677_v51 = vmax.f32 %v14798_v61, 0.0  ;;  %v1371_v61 = vrot.slane %v14944_v30, %v14571_v56 }
 0x11e   : > { %12517 = vmatprep.mubr.bf16.mxu1 %v1602_v21  ;;  %18666 = vst [vmem:[#allocation28_spill] sm:$0xff] %v14983_v22  ;;  %v14989_v47 = vcombine.low %v1299_v0, %v1311_v48  ;;  %v1537_v57 = vmul.bf16 %v14983_v22, %v14974_v8  ;;  %v1023_v21 = vld [vmem:[#allocation2 + $0xbf] sm:$0xff]  ;;  %v18674_v0 = vmax.f32 %v14816_v59, 0.0  ;;  %v1026_v59 = vld [vmem:[#allocation2 + $0xd7] sm:$0xff] }
 0x11f   : > { %12558 = vmatmul.mubr.bf16.gmra.mxu0 %v1535_v38  ;;  %v18670_v38 = vmax.f32 %v14717_v7, 0.0  ;;  %v1323_v7 = vrot.slane %v14672_v29, %v14571_v56  ;;  %v18673_v29 = vmax.f32 %v14781_v17, 0.0 }
 0x120   : > { %12561 = vmatprep.mubr.bf16.mxu0 %v1536_v42  ;;  %12638 = vmatpush3.bf16.msra.mxu0 %v13893_v50  ;;  %v18668_v50 = vmax.f32 %v14750_v62, 0.0  ;;  %18669 = vst [vmem:[#allocation29_spill] sm:$0xff] %v14989_v47  ;;  %v18671_v42 = vmax.f32 %v14735_v13, 0.0  ;;  %v1538_v28 = vmul.bf16 %v14989_v47, %v14981_v5  ;;  %v1022_v62 = vld [vmem:[#allocation2 + $0xb7] sm:$0xff]  ;;  %v15004_v13 = vpop.permute.xlu1 %2417 }
 0x121   : > { %12639 = vmatprep.subr.bf16.mxu0 %v13894_v6  ;;  %v15012_v19 = vpack.c.bf16 %v1023_v21, %v1022_v62  ;;  %v15016_v48 = vcombine.low %v1323_v7, %v1335_v45  ;;  %v1027_v62 = vld [vmem:[#allocation2 + $0xdf] sm:$0xff]  ;;  %v1028_v21 = vld [vmem:[#allocation2 + $0xe7] sm:$0xff]  ;;  %v1029_v45 = vld [vmem:[#allocation2 + $0xef] sm:$0xff] }
 0x122   : > { %v1603_v58 = vpack.c.bf16 %v18668_v50, %v18667_v26  ;;  %v1604_v39 = vpack.c.bf16 %v18671_v42, %v18670_v38  ;;  %v1605_v26 = vpack.c.bf16 %v18674_v0, %v18673_v29  ;;  %v15022_v50 = vcombine.low %v1347_v53, %v1359_v63 }
 0x123   : > { %18672 = vst [vmem:[#allocation30_spill] sm:$0xff] %v15016_v48  ;;  %v15038_v63 = vpack.c.bf16 %v1027_v62, %v1026_v59  ;;  %v15040_v53 = vpack.c.bf16 %v1029_v45, %v1028_v21  ;;  %v15061_v59 = vpack.c.bf16 %v1031_v15, %v1030_v40  ;;  %v2049_v45 = vld [vmem:[#allocation2 + $0x39] sm:$0xff]  ;;  %v18682_v40 = vld [vmem:[#allocation19_spill] sm:$0xff] }
 0x124   : > { %12640 = vmatpush3.bf16.msra.mxu0 %v13894_v6  ;;  %v15006_v6 = vpop.permute.xlu0 %2405  ;;  %18675 = vst [vmem:[#allocation31_spill] sm:$0xff] %v15022_v50  ;;  %v1399_v24 = vpop.permute.xlu1 %1398  ;;  %v1540_v17 = vmul.bf16 %v15022_v50, %v15014_v27 }
 0x125   : > { %12518 = vmatmul.mubr.bf16.gmra.mxu1 %v1603_v58  ;;  %12721 = vmatprep.subr.bf16.mxu0 %v14979_v4  ;;  %v18676_v58 = vmax.f32 %v14763_v3, 0.0  ;;  %v1383_v3 = vrot.slane %v14942_v18, %v14571_v56  ;;  %v1407_v7 = vrot.slane %v1399_v24, %v14571_v56  ;;  %v1607_v18 = vpack.c.bf16 %v965_v36, %v964_v34 }
 0x126   : > { %12521 = vmatprep.mubr.bf16.mxu1 %v1604_v39  ;;  %v1539_v39 = vmul.bf16 %v15016_v48, %v15012_v19 }
 0x127   : > { %12562 = vmatmul.mubr.bf16.gmra.mxu0 %v1537_v57  ;;  %v1606_v38 = vpack.c.bf16 %v18677_v51, %v18676_v58  ;;  %v2043_v57 = vld [vmem:[#allocation2 + $0x9] sm:$0xff]  ;;  %v15042_v29 = vcombine.low %v1371_v61, %v1383_v3  ;;  %v2045_v51 = vld [vmem:[#allocation2 + $0x19] sm:$0xff] }
 0x128   : > { %12565 = vmatprep.mubr.bf16.mxu0 %v1538_v28  ;;  %v1387_v42 = vpop.permute.xlu0 %1386  ;;  %v2044_v28 = vld [vmem:[#allocation2 + $0x11] sm:$0xff]  ;;  %v1423_v0 = vpop.permute.xlu1 %1422 }
 0x129   : > { %v1395_v11 = vrot.slane %v1387_v42, %v14571_v56  ;;  %v2075_v35 = vpack.c.bf16 %v2044_v28, %v2043_v57  ;;  %18678 = vst [vmem:[#allocation32_spill] sm:$0xff] %v15042_v29  ;;  %v1541_v24 = vmul.bf16 %v15042_v29, %v15038_v63  ;;  %v2048_v42 = vld [vmem:[#allocation2 + $0x31] sm:$0xff]  ;;  %v1431_v34 = vrot.slane %v1423_v0, %v14571_v56  ;;  %v2047_v28 = vld [vmem:[#allocation2 + $0x29] sm:$0xff] }
 0x12a   : > { %v13896_v61 = vld [vmem:[%s18508_s7 + $0x130] sm:$0xff]  }
 0x12b   : > { %v15048_v30 = vcombine.low %v1395_v11, %v1407_v7  ;;  %v2571_v58 = vmul.bf16 %v14590_v9, %v2075_v35  ;;  %v2050_v7 = vld [vmem:[#allocation2 + $0x41] sm:$0xff]  ;;  %v2052_v35 = vld [vmem:[#allocation2 + $0x51] sm:$0xff] }
 0x12c   : > { %v15077_v0 = vpack.c.bf16 %v2050_v7, %v2049_v45  ;;  %v13899_v45 = vld [vmem:[%s18508_s7 + $0x118] sm:$0xff]  }
 0x12d   : > { %12522 = vmatmul.mubr.bf16.gmra.mxu1 %v1605_v26  ;;  %18679 = vst [vmem:[#allocation33_spill] sm:$0xff] %v15048_v30  ;;  %v1411_v26 = vpop.permute.xlu0 %1410 }
 0x12e   : > { %12525 = vmatprep.mubr.bf16.mxu1 %v1606_v38  ;;  %v2046_v38 = vld [vmem:[#allocation2 + $0x21] sm:$0xff]  ;;  %v1419_v36 = vrot.slane %v1411_v26, %v14571_v56  ;;  %v2051_v26 = vld [vmem:[#allocation2 + $0x49] sm:$0xff] }
 0x12f   : > { %12566 = vmatmul.mubr.bf16.gmra.mxu0 %v1539_v39  ;;  %v1542_v39 = vmul.bf16 %v15048_v30, %v15040_v53  ;;  %v15057_v57 = vpack.c.bf16 %v2046_v38, %v2045_v51  ;;  %v15082_v51 = vpack.c.bf16 %v2052_v35, %v2051_v26  ;;  %v2574_v38 = vmul.bf16 %v14615_v32, %v15077_v0  ;;  %v18685_v26 = vld [vmem:[#allocation12_spill] sm:$0xff] }
 0x130   : > { %12569 = vmatprep.mubr.bf16.mxu0 %v1540_v17  ;;  %v15059_v17 = vpack.c.bf16 %v2048_v42, %v2047_v28  ;;  %v15063_v62 = vcombine.low %v1419_v36, %v1431_v34  ;;  %v2054_v42 = vld [vmem:[#allocation2 + $0x61] sm:$0xff]  ;;  %v2056_v34 = vld [vmem:[#allocation2 + $0x71] sm:$0xff] }
 0x131   : > { %v2572_v3 = vmul.bf16 %v14594_v14, %v15057_v57  ;;  %v13901_v36 = vld [vmem:[%s18508_s7 + $0x170] sm:$0xff]   ;;  %v18683_v28 = vld [vmem:[#allocation20_spill] sm:$0xff] }
 0x132   : > { %18680 = vst [vmem:[#allocation34_spill] sm:$0xff] %v15063_v62  ;;  %v2573_v21 = vmul.bf16 %v14606_v23, %v15059_v17  ;;  %v1543_v11 = vmul.bf16 %v15063_v62, %v15061_v59 }
 0x135   : > { %12526 = vmatmul.mubr.bf16.gmra.mxu1 %v1607_v18  ;;  %v2893_v18 = vmul.bf16 %v14585_v2, %v14783_v37  ;;  %v13898_v37 = vld [vmem:[%s18508_s7 + $0x120] sm:$0xff]  }
 0x136   : > { %12593 = vmatprep.mubr.bf16.mxu1 %v2571_v58  ;;  %v13897_v58 = vld [vmem:[%s18508_s7 + $0x128] sm:$0xff]  }
 0x137   : > { %12570 = vmatmul.mubr.bf16.gmra.mxu0 %v1541_v24  ;;  %v2053_v24 = vld [vmem:[#allocation2 + $0x59] sm:$0xff] }
 0x138   : > { %12573 = vmatprep.mubr.bf16.mxu0 %v1542_v39  ;;  %v18681_v39 = vld [vmem:[#allocation21_spill] sm:$0xff] }
 0x139   : > { %v2894_v15 = vmul.bf16 %v18682_v40, %v18681_v39  ;;  %v2897_v39 = vmul.bf16 %v14831_v25, %v14897_v31  ;;  %v18686_v31 = vld [vmem:[#allocation13_spill] sm:$0xff] }
 0x13d   : > { %12594 = vmatmul.mubr.bf16.vlgmr.msra.gmra.mxu1 %v2572_v3  ;;  %v2895_v3 = vmul.bf16 %v18683_v28, %v14849_v46  ;;  %v13903_v46 = vld [vmem:[%s18508_s7 + $0x168] sm:$0xff]  }
 0x13e   : > { %12674 = vmatpush3.bf16.msra.mxu1 %v14929_v49  ;;  %12597 = vmatprep.mubr.bf16.mxu1 %v2573_v21  ;;  %v2575_v49 = vmul.bf16 %v14628_v41, %v15082_v51  ;;  %v2055_v21 = vld [vmem:[#allocation2 + $0x69] sm:$0xff] }
 0x13f   : > { %12574 = vmatmul.mubr.bf16.gmra.mxu0 %v1543_v11  ;;  %12675 = vmatprep.subr.bf16.mxu1 %v13896_v61  ;;  %v15103_v7 = vpack.c.bf16 %v2056_v34, %v2055_v21  ;;  %v18684_v11 = vld [vmem:[#allocation11_spill] sm:$0xff]  ;;  %v13908_v21 = vld [vmem:[%s18508_s7 + $0x100] sm:$0xff]  }
 0x140   : > { %12641 = vmatprep.mubr.bf16.mxu0 %v2893_v18  ;;  %v13902_v18 = vld [vmem:[%s18508_s7 + $0x110] sm:$0xff]  }
 0x142   : > { %12676 = vmatpush3.bf16.msra.mxu1 %v13896_v61  ;;  %v15098_v61 = vpack.c.bf16 %v2054_v42, %v2053_v24  ;;  %v2059_v24 = vld [vmem:[#allocation2 + $0x89] sm:$0xff]  ;;  %v13904_v42 = vld [vmem:[%s18508_s7 + $0x160] sm:$0xff]  }
 0x143   : > { %12677 = vmatprep.subr.bf16.mxu1 %v13897_v58 }
 0x144   : > { %v2576_v35 = vmul.bf16 %v18684_v11, %v15098_v61 }
 0x145   : > { %12598 = vmatmul.mubr.bf16.gmra.mxu1 %v2574_v38  ;;  %v2057_v38 = vld [vmem:[#allocation2 + $0x79] sm:$0xff] }
 0x146   : > { %12601 = vmatprep.mubr.bf16.mxu1 %v2575_v49  ;;  %12678 = vmatpush3.bf16.msra.mxu1 %v13897_v58  ;;  %v2577_v58 = vmul.bf16 %v18685_v26, %v15103_v7  ;;  %v2058_v49 = vld [vmem:[#allocation2 + $0x81] sm:$0xff] }
 0x147   : > { %12642 = vmatmul.mubr.bf16.vlgmr.msra.gmra.mxu0 %v2894_v15  ;;  %12679 = vmatprep.subr.bf16.mxu1 %v13898_v37  ;;  %v15123_v15 = vpack.c.bf16 %v2058_v49, %v2057_v38  ;;  %v2062_v38 = vld [vmem:[#allocation2 + $0xa1] sm:$0xff]  ;;  %v2063_v49 = vld [vmem:[#allocation2 + $0xa9] sm:$0xff] }
 0x148   : > { %12645 = vmatprep.mubr.bf16.mxu0 %v2895_v3  ;;  %12722 = vmatpush3.bf16.msra.mxu0 %v14979_v4  ;;  %v2896_v4 = vmul.bf16 %v14818_v10, %v14851_v60  ;;  %v13905_v60 = vld [vmem:[%s18508_s7 + $0x108] sm:$0xff]  }
 0x149   : > { %12723 = vmatprep.subr.bf16.mxu0 %v13901_v36  ;;  %v2578_v3 = vmul.bf16 %v18686_v31, %v15123_v15 }
 0x14a   : > { %12680 = vmatpush3.bf16.msra.mxu1 %v13898_v37  ;;  %v2060_v37 = vld [vmem:[#allocation2 + $0x91] sm:$0xff] }
 0x14b   : > { %12681 = vmatprep.subr.bf16.mxu1 %v13899_v45  ;;  %v15128_v34 = vpack.c.bf16 %v2060_v37, %v2059_v24  ;;  %v18688_v24 = vld [vmem:[#allocation16_spill] sm:$0xff] }
 0x14c   : > { %12724 = vmatpush3.bf16.msra.mxu0 %v13901_v36  ;;  %v13906_v36 = vld [vmem:[%s18508_s7 + $0x158] sm:$0xff]   ;;  %v2354_v37 = vrot.slane %v18688_v24, %v14571_v56 }
 0x14d   : > { %12602 = vmatmul.mubr.bf16.gmra.mxu1 %v2576_v35  ;;  %12725 = vmatprep.subr.bf16.mxu0 %v13903_v46  ;;  %v2068_v24 = vld [vmem:[#allocation2 + $0xd1] sm:$0xff] }
 0x14e   : > { %12605 = vmatprep.mubr.bf16.mxu1 %v2577_v58  ;;  %12682 = vmatpush3.bf16.msra.mxu1 %v13899_v45  ;;  %v18687_v45 = vld [vmem:[#allocation14_spill] sm:$0xff]  ;;  %v2061_v58 = vld [vmem:[#allocation2 + $0x99] sm:$0xff] }
 0x14f   : > { %12646 = vmatmul.mubr.bf16.gmra.mxu0 %v2896_v4  ;;  %12683 = vmatprep.subr.bf16.mxu1 %v13902_v18  ;;  %v2579_v35 = vmul.bf16 %v18687_v45, %v15128_v34  ;;  %v13907_v4 = vld [vmem:[%s18508_s7 + $0x150] sm:$0xff]  }
 0x150   : > { %12649 = vmatprep.mubr.bf16.mxu0 %v2897_v39  ;;  %12726 = vmatpush3.bf16.msra.mxu0 %v13903_v46  ;;  %v2898_v46 = vmul.bf16 %v14887_v44, %v14899_v33  ;;  %v18689_v39 = vld [vmem:[#allocation17_spill] sm:$0xff]  ;;  %v15151_v33 = vpack.c.bf16 %v2062_v38, %v2061_v58 }
 0x151   : > { %12727 = vmatprep.subr.bf16.mxu0 %v13904_v42  ;;  %v2342_v25 = vrot.slane %v18689_v39, %v14571_v56 }
 0x152   : > { %12684 = vmatpush3.bf16.msra.mxu1 %v13902_v18  ;;  %v2064_v18 = vld [vmem:[#allocation2 + $0xb1] sm:$0xff] }
 0x153   : > { %12685 = vmatprep.subr.bf16.mxu1 %v13905_v60  ;;  %v15158_v44 = vpack.c.bf16 %v2064_v18, %v2063_v49  ;;  %v2066_v49 = vld [vmem:[#allocation2 + $0xc1] sm:$0xff]  ;;  %v2067_v18 = vld [vmem:[#allocation2 + $0xc9] sm:$0xff] }
 0x154   : > { %12728 = vmatpush3.bf16.msra.mxu0 %v13904_v42  ;;  %v2899_v42 = vmul.bf16 %v14892_v12, %v14938_v43  ;;  %v13909_v43 = vld [vmem:[%s18508_s7 + $0x148] sm:$0xff]   ;;  %v15183_v39 = vpack.c.bf16 %v2068_v24, %v2067_v18  ;;  %v2414_v18 = vrot.slane %v15006_v6, %v14571_v56  ;;  %v2902_v24 = vmul.bf16 %v14983_v22, %v14981_v5 }
 0x155   : > { %12606 = vmatmul.mubr.bf16.gmra.mxu1 %v2578_v3  ;;  %12729 = vmatprep.subr.bf16.mxu0 %v13906_v36  ;;  %v15156_v3 = vld [vmem:[%s18508_s7 + $0x1b8] sm:$0xff]  }
 0x156   : > { %12609 = vmatprep.mubr.bf16.mxu1 %v2579_v35  ;;  %12686 = vmatpush3.bf16.msra.mxu1 %v13905_v60  ;;  %v15163_v35 = vcombine.low %v2342_v25, %v2354_v37  ;;  %v18691_v60 = vld [vmem:[#allocation15_spill] sm:$0xff]  ;;  %v13910_v25 = vld [vmem:[%s18508_s7 + $0x140] sm:$0xff]   ;;  %v2390_v37 = vrot.slane %v14972_v54, %v14571_v56  ;;  %v2442_v54 = vpop.permute.xlu1 %2441 }
 0x157   : > { %12650 = vmatmul.mubr.bf16.gmra.mxu0 %v2898_v46  ;;  %12687 = vmatprep.subr.bf16.mxu1 %v13908_v21  ;;  %v2580_v58 = vmul.bf16 %v18691_v60, %v15151_v33  ;;  %v2065_v46 = vld [vmem:[#allocation2 + $0xb9] sm:$0xff] }
 0x158   : > { %12653 = vmatprep.mubr.bf16.mxu0 %v2899_v42  ;;  %12730 = vmatpush3.bf16.msra.mxu0 %v13906_v36  ;;  %18690 = vst [vmem:[#allocation21_spill] sm:$0xff] %v15163_v35  ;;  %v2581_v38 = vmul.bf16 %v15163_v35, %v15158_v44  ;;  %v2900_v36 = vmul.bf16 %v14934_v1, %v14940_v16  ;;  %v15188_v42 = vld [vmem:[%s18508_s7 + $0x1f8] sm:$0xff]  }
 0x159   : > { %12731 = vmatprep.subr.bf16.mxu0 %v13907_v4  ;;  %v15181_v16 = vpack.c.bf16 %v2066_v49, %v2065_v46  ;;  %v2069_v49 = vld [vmem:[#allocation2 + $0xd9] sm:$0xff] }
 0x15a   : > { %12688 = vmatpush3.bf16.msra.mxu1 %v13908_v21  ;;  %v2402_v21 = vrot.slane %v14970_v55, %v14571_v56  ;;  %v2466_v22 = vpop.permute.xlu1 %2465 }
 0x15b   : > { %12769 = vmatprep.subr.bf16.mxu1 %v15156_v3 }
 0x15c   : > { %12732 = vmatpush3.bf16.msra.mxu0 %v13907_v4  ;;  %v2901_v4 = vmul.bf16 %v14936_v52, %v14974_v8  ;;  %v15190_v55 = vcombine.low %v2390_v37, %v2402_v21  ;;  %v18693_v8 = vld [vmem:[#allocation18_spill] sm:$0xff]  ;;  %v2072_v37 = vld [vmem:[#allocation2 + $0xf1] sm:$0xff] }
 0x15d   : > { %12610 = vmatmul.mubr.bf16.gmra.mxu1 %v2580_v58  ;;  %12733 = vmatprep.subr.bf16.mxu0 %v13909_v43  ;;  %v2430_v58 = vpop.permute.xlu0 %2429  ;;  %v2071_v21 = vld [vmem:[#allocation2 + $0xe9] sm:$0xff] }
 0x15e   : > { %12613 = vmatprep.mubr.bf16.mxu1 %v2581_v38  ;;  %18692 = vst [vmem:[#allocation16_spill] sm:$0xff] %v15190_v55  ;;  %v2582_v38 = vmul.bf16 %v18693_v8, %v15181_v16  ;;  %v2583_v46 = vmul.bf16 %v15190_v55, %v15183_v39  ;;  %v2438_v52 = vrot.slane %v2430_v58, %v14571_v56 }
 0x15f   : > { %12654 = vmatmul.mubr.bf16.gmra.mxu0 %v2900_v36  ;;  %v2070_v36 = vld [vmem:[#allocation2 + $0xe1] sm:$0xff]  ;;  %v15209_v6 = vpack.c.bf16 %v2072_v37, %v2071_v21  ;;  %v3167_v37 = vld [vmem:[#allocation2 + $0x18] sm:$0xff] }
 0x160   : > { %12657 = vmatprep.mubr.bf16.mxu0 %v2901_v4  ;;  %12734 = vmatpush3.bf16.msra.mxu0 %v13909_v43  ;;  %v2426_v43 = vrot.slane %v15004_v13, %v14571_v56  ;;  %v2450_v4 = vrot.slane %v2442_v54, %v14571_v56  ;;  %v15207_v13 = vpack.c.bf16 %v2070_v36, %v2069_v49  ;;  %v3168_v21 = vld [vmem:[#allocation2 + $0x20] sm:$0xff] }
 0x161   : > { %12735 = vmatprep.subr.bf16.mxu0 %v13910_v25  ;;  %v2454_v1 = vpop.permute.xlu0 %2453  ;;  %v2474_v49 = vrot.slane %v2466_v22, %v14571_v56 }
 0x162   : > { %v15211_v5 = vcombine.low %v2414_v18, %v2426_v43  ;;  %v2462_v36 = vrot.slane %v2454_v1, %v14571_v56  ;;  %v2904_v43 = vmul.bf16 %v15016_v48, %v15014_v27  ;;  %v3199_v56 = vpack.c.bf16 %v3168_v21, %v3167_v37  ;;  %v3174_v21 = vld [vmem:[#allocation2 + $0x50] sm:$0xff]  ;;  %v3173_v37 = vld [vmem:[#allocation2 + $0x48] sm:$0xff] }
 0x163   : > { %v2906_v1 = vmul.bf16 %v15042_v29, %v15040_v53  ;;  %v2907_v27 = vmul.bf16 %v15048_v30, %v15061_v59  ;;  %v13912_v53 = vld [vmem:[%s18508_s7 + $0x1b0] sm:$0xff]  }
 0x164   : > { %12736 = vmatpush3.bf16.msra.mxu0 %v13910_v25  ;;  %v2903_v25 = vmul.bf16 %v14989_v47, %v15012_v19  ;;  %18694 = vst [vmem:[#allocation17_spill] sm:$0xff] %v15211_v5  ;;  %v2584_v54 = vmul.bf16 %v15211_v5, %v15207_v13  ;;  %v2073_v19 = vld [vmem:[#allocation2 + $0xf9] sm:$0xff] }
 0x165   : > { %12614 = vmatmul.mubr.bf16.gmra.mxu1 %v2582_v38  ;;  %12817 = vmatprep.subr.bf16.mxu0 %v15188_v42  ;;  %v15213_v38 = vcombine.low %v2438_v52, %v2450_v4  ;;  %v2905_v52 = vmul.bf16 %v15022_v50, %v15038_v63  ;;  %v2875_v63 = vld [vmem:[#allocation2 + $0x107] sm:$0xff]  ;;  %v2876_v4 = vld [vmem:[#allocation2 + $0x10f] sm:$0xff] }
 0x166   : > { %12617 = vmatprep.mubr.bf16.mxu1 %v2583_v46  ;;  %v2074_v46 = vld [vmem:[#allocation2 + $0x101] sm:$0xff] }
 0x167   : > { %12658 = vmatmul.mubr.bf16.gmra.mxu0 %v2902_v24  ;;  %18695 = vst [vmem:[#allocation35_spill] sm:$0xff] %v15213_v38  ;;  %v2585_v58 = vmul.bf16 %v15213_v38, %v15209_v6  ;;  %v15225_v18 = vpack.c.bf16 %v2074_v46, %v2073_v19  ;;  %v15227_v24 = vcombine.low %v2462_v36, %v2474_v49  ;;  %v3169_v19 = vld [vmem:[#allocation2 + $0x28] sm:$0xff]  ;;  %v3171_v49 = vld [vmem:[#allocation2 + $0x38] sm:$0xff] }
 0x168   : > { %12661 = vmatprep.mubr.bf16.mxu0 %v2903_v25  ;;  %v3170_v25 = vld [vmem:[#allocation2 + $0x30] sm:$0xff] }
 0x169   : > { %18696 = vst [vmem:[#allocation36_spill] sm:$0xff] %v15227_v24  ;;  %v2586_v22 = vmul.bf16 %v15227_v24, %v15225_v18  ;;  %v15237_v46 = vpack.c.bf16 %v3170_v25, %v3169_v19  ;;  %v13915_v25 = vld [vmem:[%s18508_s7 + $0x198] sm:$0xff]   ;;  %v3177_v19 = vld [vmem:[#allocation2 + $0x68] sm:$0xff] }
 0x16d   : > { %12618 = vmatmul.mubr.bf16.gmra.mxu1 %v2584_v54  ;;  %v15235_v54 = vpack.c.bf16 %v2876_v4, %v2875_v63  ;;  %v13917_v63 = vld [vmem:[%s18508_s7 + $0x1f0] sm:$0xff]   ;;  %v3523_v4 = vmul.bf16 %v14606_v23, %v15077_v0  ;;  %v13919_v0 = vld [vmem:[%s18508_s7 + $0x1e8] sm:$0xff]  }
 0x16e   : > { %12621 = vmatprep.mubr.bf16.mxu1 %v2585_v58  ;;  %v3172_v58 = vld [vmem:[#allocation2 + $0x40] sm:$0xff] }
 0x16f   : > { %12662 = vmatmul.mubr.bf16.gmra.mxu0 %v2904_v43  ;;  %v15242_v36 = vpack.c.bf16 %v3172_v58, %v3171_v49  ;;  %v2908_v59 = vmul.bf16 %v15063_v62, %v15235_v54  ;;  %v3521_v43 = vmul.bf16 %v14590_v9, %v15057_v57  ;;  %v13914_v57 = vld [vmem:[%s18508_s7 + $0x1a0] sm:$0xff]   ;;  %v15274_v58 = vld [vmem:[#allocation2 + $0x78] sm:$0xff] }
 0x170   : > { %12665 = vmatprep.mubr.bf16.mxu0 %v2905_v52  ;;  %v13913_v52 = vld [vmem:[%s18508_s7 + $0x1a8] sm:$0xff]  }
 0x175   : > { %12622 = vmatmul.mubr.bf16.gmra.mxu1 %v2586_v22  ;;  %v3176_v22 = vld [vmem:[#allocation2 + $0x60] sm:$0xff] }
 0x176   : > { %12689 = vmatprep.mubr.bf16.mxu1 %v3199_v56  ;;  %v15254_v56 = vpack.c.bf16 %v3174_v21, %v3173_v37  ;;  %v3183_v21 = vld [vmem:[#allocation2 + $0x98] sm:$0xff] }
 0x177   : > { %12666 = vmatmul.mubr.bf16.gmra.mxu0 %v2906_v1  ;;  %v3175_v1 = vld [vmem:[#allocation2 + $0x58] sm:$0xff] }
 0x178   : > { %12669 = vmatprep.mubr.bf16.mxu0 %v2907_v27  ;;  %v3522_v27 = vmul.bf16 %v14594_v14, %v15059_v17  ;;  %v3178_v17 = vld [vmem:[#allocation2 + $0x70] sm:$0xff]  ;;  %v13922_v37 = vld [vmem:[%s18508_s7 + $0x1d8] sm:$0xff]  }
 0x179   : > { %v15279_v49 = vpack.c.bf16 %v3178_v17, %v3177_v19  ;;  %v15319_v17 = vld [vmem:[%s18508_s7 + $0x238] sm:$0xff]  }
 0x17a   : > { %v3187_v19 = vld [vmem:[#allocation2 + $0xb8] sm:$0xff] }
 0x17d   : > { %12690 = vmatmul.mubr.bf16.vlgmr.msra.gmra.mxu1 %v15237_v46 }
 0x17e   : > { %12770 = vmatpush3.bf16.msra.mxu1 %v15156_v3  ;;  %12693 = vmatprep.mubr.bf16.mxu1 %v15242_v36  ;;  %v15259_v3 = vpack.c.bf16 %v3176_v22, %v3175_v1  ;;  %v3184_v22 = vld [vmem:[#allocation2 + $0xa0] sm:$0xff]  ;;  %v3181_v1 = vld [vmem:[#allocation2 + $0x88] sm:$0xff] }
 0x17f   : > { %12670 = vmatmul.mubr.bf16.gmra.mxu0 %v2908_v59  ;;  %12771 = vmatprep.subr.bf16.mxu1 %v13912_v53  ;;  %v3205_v59 = vpack.c.bf16 %v14881_v20, %v15274_v58  ;;  %v13921_v20 = vld [vmem:[%s18508_s7 + $0x188] sm:$0xff]  }
 0x180   : > { %12737 = vmatprep.mubr.bf16.mxu0 %v3521_v43  ;;  %v13920_v43 = vld [vmem:[%s18508_s7 + $0x1e0] sm:$0xff]  }
 0x182   : > { %12772 = vmatpush3.bf16.msra.mxu1 %v13912_v53  ;;  %v13918_v53 = vld [vmem:[%s18508_s7 + $0x190] sm:$0xff]  }
 0x183   : > { %12773 = vmatprep.subr.bf16.mxu1 %v13913_v52 }
 0x185   : > { %12694 = vmatmul.mubr.bf16.gmra.mxu1 %v15254_v56 }
 0x186   : > { %12697 = vmatprep.mubr.bf16.mxu1 %v15259_v3  ;;  %12774 = vmatpush3.bf16.msra.mxu1 %v13913_v52  ;;  %v3525_v52 = vmul.bf16 %v14628_v41, %v15098_v61 }
 0x187   : > { %12738 = vmatmul.mubr.bf16.vlgmr.msra.gmra.mxu0 %v3522_v27  ;;  %12775 = vmatprep.subr.bf16.mxu1 %v13914_v57  ;;  %v15305_v27 = vpack.c.bf16 %v3184_v22, %v3183_v21  ;;  %v3190_v21 = vld [vmem:[#allocation2 + $0xd0] sm:$0xff]  ;;  %v3191_v22 = vld [vmem:[#allocation2 + $0xd8] sm:$0xff] }
 0x188   : > { %12741 = vmatprep.mubr.bf16.mxu0 %v3523_v4  ;;  %12818 = vmatpush3.bf16.msra.mxu0 %v15188_v42  ;;  %v3524_v42 = vmul.bf16 %v14615_v32, %v15082_v51  ;;  %v3182_v51 = vld [vmem:[#allocation2 + $0x90] sm:$0xff] }
 0x189   : > { %12819 = vmatprep.subr.bf16.mxu0 %v13917_v63  ;;  %v15300_v61 = vpack.c.bf16 %v3182_v51, %v3181_v1  ;;  %v13923_v4 = vld [vmem:[%s18508_s7 + $0x1d0] sm:$0xff]   ;;  %v3189_v51 = vld [vmem:[#allocation2 + $0xc8] sm:$0xff] }
 0x18a   : > { %12776 = vmatpush3.bf16.msra.mxu1 %v13914_v57  ;;  %v13924_v57 = vld [vmem:[%s18508_s7 + $0x180] sm:$0xff]  }
 0x18b   : > { %12777 = vmatprep.subr.bf16.mxu1 %v13915_v25 }
 0x18c   : > { %12820 = vmatpush3.bf16.msra.mxu0 %v13917_v63  ;;  %v3526_v63 = vmul.bf16 %v18684_v11, %v15103_v7  ;;  %v3185_v7 = vld [vmem:[#allocation2 + $0xa8] sm:$0xff] }
 0x18d   : > { %12698 = vmatmul.mubr.bf16.gmra.mxu1 %v15279_v49  ;;  %12821 = vmatprep.subr.bf16.mxu0 %v13919_v0 }
 0x18e   : > { %12701 = vmatprep.mubr.bf16.mxu1 %v3205_v59  ;;  %12778 = vmatpush3.bf16.msra.mxu1 %v13915_v25  ;;  %v3527_v25 = vmul.bf16 %v18685_v26, %v15123_v15  ;;  %v13925_v15 = vld [vmem:[%s18508_s7 + $0x1c8] sm:$0xff]  }
 0x18f   : > { %12742 = vmatmul.mubr.bf16.gmra.mxu0 %v3524_v42  ;;  %12779 = vmatprep.subr.bf16.mxu1 %v13918_v53 }
 0x190   : > { %12745 = vmatprep.mubr.bf16.mxu0 %v3525_v52  ;;  %12822 = vmatpush3.bf16.msra.mxu0 %v13919_v0  ;;  %v3186_v0 = vld [vmem:[#allocation2 + $0xb0] sm:$0xff]  ;;  %v13926_v52 = vld [vmem:[%s18508_s7 + $0x1c0] sm:$0xff]  }
 0x191   : > { %12823 = vmatprep.subr.bf16.mxu0 %v13920_v43  ;;  %v15324_v59 = vpack.c.bf16 %v3186_v0, %v3185_v7  ;;  %v3196_v7 = vld [vmem:[#allocation2 + $0x100] sm:$0xff] }
 0x192   : > { %12780 = vmatpush3.bf16.msra.mxu1 %v13918_v53  ;;  %v3188_v53 = vld [vmem:[#allocation2 + $0xc0] sm:$0xff] }
 0x193   : > { %12781 = vmatprep.subr.bf16.mxu1 %v13921_v20  ;;  %v15327_v42 = vpack.c.bf16 %v3188_v53, %v3187_v19  ;;  %v3795_v53 = vld [vmem:[#allocation2 + $0x27] sm:$0xff] }
 0x194   : > { %12824 = vmatpush3.bf16.msra.mxu0 %v13920_v43  ;;  %v3528_v43 = vmul.bf16 %v18686_v31, %v15128_v34  ;;  %v15338_v34 = vpack.c.bf16 %v3190_v21, %v3189_v51 }
 0x195   : > { %12702 = vmatmul.mubr.bf16.gmra.mxu1 %v15300_v61  ;;  %12825 = vmatprep.subr.bf16.mxu0 %v13922_v37 }
 0x196   : > { %12705 = vmatprep.mubr.bf16.mxu1 %v15305_v27  ;;  %12782 = vmatpush3.bf16.msra.mxu1 %v13921_v20  ;;  %v3529_v20 = vmul.bf16 %v18687_v45, %v15151_v33  ;;  %v3531_v33 = vmul.bf16 %v15163_v35, %v15181_v16  ;;  %v3533_v16 = vmul.bf16 %v15190_v55, %v15207_v13 }
 0x197   : > { %12746 = vmatmul.mubr.bf16.gmra.mxu0 %v3526_v63  ;;  %12783 = vmatprep.subr.bf16.mxu1 %v13924_v57  ;;  %v3193_v63 = vld [vmem:[#allocation2 + $0xe8] sm:$0xff]  ;;  %v3535_v13 = vmul.bf16 %v15213_v38, %v15225_v18  ;;  %v3802_v18 = vld [vmem:[#allocation2 + $0x5f] sm:$0xff] }
 0x198   : > { %12749 = vmatprep.mubr.bf16.mxu0 %v3527_v25  ;;  %12826 = vmatpush3.bf16.msra.mxu0 %v13922_v37  ;;  %v3192_v37 = vld [vmem:[#allocation2 + $0xe0] sm:$0xff]  ;;  %v3195_v25 = vld [vmem:[#allocation2 + $0xf8] sm:$0xff] }
 0x199   : > { %12827 = vmatprep.subr.bf16.mxu0 %v13923_v4  ;;  %v15340_v1 = vpack.c.bf16 %v3192_v37, %v3191_v22  ;;  %v15350_v19 = vpack.c.bf16 %v3196_v7, %v3195_v25  ;;  %v3798_v22 = vld [vmem:[#allocation2 + $0x3f] sm:$0xff]  ;;  %v3799_v37 = vld [vmem:[#allocation2 + $0x47] sm:$0xff]  ;;  %v3800_v25 = vld [vmem:[#allocation2 + $0x4f] sm:$0xff] }
 0x19a   : > { %12784 = vmatpush3.bf16.msra.mxu1 %v13924_v57  ;;  %v3530_v57 = vmul.bf16 %v18691_v60, %v15158_v44  ;;  %v3532_v44 = vmul.bf16 %v18693_v8, %v15183_v39  ;;  %v3534_v39 = vmul.bf16 %v15211_v5, %v15209_v6  ;;  %v3829_v7 = vpack.c.bf16 %v3800_v25, %v3799_v37  ;;  %v13928_v6 = vld [vmem:[%s18508_s7 + $0x230] sm:$0xff]   ;;  %v13929_v37 = vld [vmem:[%s18508_s7 + $0x228] sm:$0xff]  }
 0x19b   : > { %12865 = vmatprep.subr.bf16.mxu1 %v15319_v17 }
 0x19c   : > { %12828 = vmatpush3.bf16.msra.mxu0 %v13923_v4  ;;  %v3194_v4 = vld [vmem:[#allocation2 + $0xf0] sm:$0xff] }
 0x19d   : > { %12706 = vmatmul.mubr.bf16.gmra.mxu1 %v15324_v59  ;;  %12829 = vmatprep.subr.bf16.mxu0 %v13925_v15  ;;  %v15348_v0 = vpack.c.bf16 %v3194_v4, %v3193_v63  ;;  %v3797_v63 = vld [vmem:[#allocation2 + $0x37] sm:$0xff] }
 0x19e   : > { %12709 = vmatprep.mubr.bf16.mxu1 %v15327_v42  ;;  %v3828_v4 = vpack.c.bf16 %v3798_v22, %v3797_v63 }
 0x19f   : > { %12750 = vmatmul.mubr.bf16.gmra.mxu0 %v3528_v43  ;;  %v3197_v43 = vld [vmem:[#allocation2 + $0x108] sm:$0xff] }
 0x1a0   : > { %12753 = vmatprep.mubr.bf16.mxu0 %v3529_v20  ;;  %12830 = vmatpush3.bf16.msra.mxu0 %v13925_v15  ;;  %v3796_v15 = vld [vmem:[#allocation2 + $0x2f] sm:$0xff] }
 0x1a1   : > { %12831 = vmatprep.subr.bf16.mxu0 %v13926_v52  ;;  %v3827_v20 = vpack.c.bf16 %v3796_v15, %v3795_v53  ;;  %v3844_v53 = vmul.bf16 %v18682_v40, %v3828_v4  ;;  %v18697_v4 = vld [vmem:[#allocation23_spill] sm:$0xff] }
 0x1a3   : > { %v3843_v21 = vmul.bf16 %v14585_v2, %v3827_v20  ;;  %v3801_v20 = vld [vmem:[#allocation2 + $0x57] sm:$0xff]  ;;  %v3816_v2 = vld [vmem:[#allocation2 + $0xcf] sm:$0xff] }
 0x1a4   : > { %12832 = vmatpush3.bf16.msra.mxu0 %v13926_v52  ;;  %v3198_v52 = vld [vmem:[#allocation2 + $0x110] sm:$0xff]  ;;  %v3830_v22 = vpack.c.bf16 %v3802_v18, %v3801_v20  ;;  %v13931_v20 = vld [vmem:[%s18508_s7 + $0x218] sm:$0xff]  }
 0x1a5   : > { %12710 = vmatmul.mubr.bf16.gmra.mxu1 %v15338_v34  ;;  %v15358_v51 = vpack.c.bf16 %v3198_v52, %v3197_v43  ;;  %v3803_v52 = vld [vmem:[#allocation2 + $0x67] sm:$0xff]  ;;  %v3805_v18 = vld [vmem:[#allocation2 + $0x77] sm:$0xff] }
 0x1a6   : > { %12713 = vmatprep.mubr.bf16.mxu1 %v15340_v1  ;;  %v3846_v63 = vmul.bf16 %v14818_v10, %v3830_v22 }
 0x1a7   : > { %12754 = vmatmul.mubr.bf16.gmra.mxu0 %v3530_v57  ;;  %v3503_v57 = vld [vmem:[#allocation2 + $0x109] sm:$0xff] }
 0x1a8   : > { %12757 = vmatprep.mubr.bf16.mxu0 %v3531_v33  ;;  %v3504_v33 = vld [vmem:[#allocation2 + $0x111] sm:$0xff] }
 0x1ad   : > { %12714 = vmatmul.mubr.bf16.gmra.mxu1 %v15348_v0 }
 0x1ae   : > { %12717 = vmatprep.mubr.bf16.mxu1 %v15350_v19 }
 0x1af   : > { %12758 = vmatmul.mubr.bf16.gmra.mxu0 %v3532_v44  ;;  %v15366_v44 = vpack.c.bf16 %v3504_v33, %v3503_v57 }
 0x1b0   : > { %12761 = vmatprep.mubr.bf16.mxu0 %v3533_v16  ;;  %v3845_v16 = vmul.bf16 %v18683_v28, %v3829_v7  ;;  %v3806_v7 = vld [vmem:[#allocation2 + $0x7f] sm:$0xff] }
 0x1b1   : > { %v3536_v15 = vmul.bf16 %v15227_v24, %v15366_v44 }
 0x1b5   : > { %12718 = vmatmul.mubr.bf16.gmra.mxu1 %v15358_v51 }
 0x1b6   : > { %12785 = vmatprep.mubr.bf16.mxu1 %v3843_v21 }
 0x1b7   : > { %12762 = vmatmul.mubr.bf16.gmra.mxu0 %v3534_v39  ;;  %v3804_v39 = vld [vmem:[#allocation2 + $0x6f] sm:$0xff] }
 0x1b8   : > { %12765 = vmatprep.mubr.bf16.mxu0 %v3535_v13  ;;  %v3831_v13 = vpack.c.bf16 %v3804_v39, %v3803_v52  ;;  %v3808_v52 = vld [vmem:[#allocation2 + $0x8f] sm:$0xff] }
 0x1ba   : > { %v3847_v25 = vmul.bf16 %v18697_v4, %v3831_v13  ;;  %v18698_v4 = vld [vmem:[#allocation24_spill] sm:$0xff] }
 0x1bc   : > { %v12499_v43 = vpop.f32.mrf.mxu1 }
 0x1bd   : > { %12786 = vmatmul.mubr.bf16.vlgmr.msra.gmra.mxu1 %v3844_v53 }
 0x1be   : > { %12866 = vmatpush3.bf16.msra.mxu1 %v15319_v17  ;;  %12789 = vmatprep.mubr.bf16.mxu1 %v3845_v16  ;;  %v1707_v21 = vpop.f32.mrf.mxu1  ;;  %v13930_v17 = vld [vmem:[%s18508_s7 + $0x220] sm:$0xff]  }
 0x1bf   : > { %12766 = vmatmul.mubr.bf16.gmra.mxu0 %v3536_v15  ;;  %12867 = vmatprep.subr.bf16.mxu1 %v13928_v6  ;;  %v3807_v16 = vld [vmem:[#allocation2 + $0x87] sm:$0xff]  ;;  %v3832_v15 = vpack.c.bf16 %v3806_v7, %v3805_v18  ;;  %v13932_v18 = vld [vmem:[%s18508_s7 + $0x210] sm:$0xff]  }
 0x1c0   : > { %12833 = vmatprep.mubr.bf16.mxu0 %v15237_v46  ;;  %v12500_v57 = vpop.f32.mrf.mxu1  ;;  %v3833_v39 = vpack.c.bf16 %v3808_v52, %v3807_v16  ;;  %v3810_v16 = vld [vmem:[#allocation2 + $0x9f] sm:$0xff] }
 0x1c1   : > { %v3848_v7 = vmul.bf16 %v18698_v4, %v3832_v15 }
 0x1c2   : > { %12868 = vmatpush3.bf16.msra.mxu1 %v13928_v6  ;;  %v1710_v33 = vpop.f32.mrf.mxu1 }
 0x1c3   : > { %12869 = vmatprep.subr.bf16.mxu1 %v13929_v37 }
 0x1c4   : > { %v12503_v53 = vpop.f32.mrf.mxu1 }
 0x1c5   : > { %12790 = vmatmul.mubr.bf16.gmra.mxu1 %v3846_v63 }
 0x1c6   : > { %12793 = vmatprep.mubr.bf16.mxu1 %v3847_v25  ;;  %12870 = vmatpush3.bf16.msra.mxu1 %v13929_v37  ;;  %v12547_v46 = vpop.f32.mrf.mxu0  ;;  %v1723_v6 = vpop.f32.mrf.mxu1 }
 0x1c7   : > { %12834 = vmatmul.mubr.bf16.vlgmr.msra.gmra.mxu0 %v15242_v36  ;;  %12871 = vmatprep.subr.bf16.mxu1 %v13930_v17  ;;  %v15389_v22 = vadd.f32 %v12547_v46, %v12499_v43  ;;  %v3849_v43 = vmul.bf16 %v14892_v12, %v3833_v39  ;;  %v18699_v12 = vld [vmem:[#allocation26_spill] sm:$0xff] }
 0x1c8   : > { %12837 = vmatprep.mubr.bf16.mxu0 %v15254_v56  ;;  %v1916_v13 = vpop.f32.mrf.mxu0  ;;  %v12504_v63 = vpop.f32.mrf.mxu1  ;;  %v3809_v56 = vld [vmem:[#allocation2 + $0x97] sm:$0xff] }
 0x1c9   : > { %v15392_v25 = vadd.f32 %v1916_v13, %v1707_v21  ;;  %v3811_v21 = vld [vmem:[#allocation2 + $0xa7] sm:$0xff]  ;;  %v3834_v28 = vpack.c.bf16 %v3810_v16, %v3809_v56 }
 0x1ca   : > { %12872 = vmatpush3.bf16.msra.mxu1 %v13930_v17  ;;  %v12548_v37 = vpop.f32.mrf.mxu0  ;;  %v1726_v36 = vpop.f32.mrf.mxu1  ;;  %v3812_v17 = vld [vmem:[#allocation2 + $0xaf] sm:$0xff]  ;;  %v13934_v16 = vld [vmem:[%s18508_s7 + $0x200] sm:$0xff]  }
 0x1cb   : > { %12873 = vmatprep.subr.bf16.mxu1 %v13931_v20  ;;  %v15398_v10 = vadd.f32 %v12548_v37, %v12500_v57  ;;  %v13933_v57 = vld [vmem:[%s18508_s7 + $0x208] sm:$0xff]   ;;  %v3835_v37 = vpack.c.bf16 %v3812_v17, %v3811_v21  ;;  %v3850_v56 = vmul.bf16 %v18699_v12, %v3834_v28  ;;  %v3813_v21 = vld [vmem:[#allocation2 + $0xb7] sm:$0xff]  ;;  %v3814_v17 = vld [vmem:[#allocation2 + $0xbf] sm:$0xff] }
 0x1cc   : > { %v1919_v46 = vpop.f32.mrf.mxu0 }
 0x1cd   : > { %v12507_v52 = vpop.f32.mrf.mxu1  ;;  %12794 = vmatmul.mubr.bf16.gmra.mxu1 %v3848_v7  ;;  %v15401_v13 = vadd.f32 %v1919_v46, %v1710_v33 }
 0x1ce   : > { %12797 = vmatprep.mubr.bf16.mxu1 %v3849_v43  ;;  %12874 = vmatpush3.bf16.msra.mxu1 %v13931_v20  ;;  %v4128_v20 = vld [vmem:[#allocation2 + $0x80] sm:$0xff] }
 0x1cf   : > { %v12551_v15 = vpop.f32.mrf.mxu0  ;;  %12838 = vmatmul.mubr.bf16.gmra.mxu0 %v15259_v3  ;;  %v1739_v4 = vpop.f32.mrf.mxu1  ;;  %12875 = vmatprep.subr.bf16.mxu1 %v13932_v18 }
 0x1d0   : > { %v15407_v39 = vadd.f32 %v12551_v15, %v12503_v53  ;;  %12841 = vmatprep.mubr.bf16.mxu0 %v15279_v49  ;;  %v18700_v15 = vld [vmem:[#allocation27_spill] sm:$0xff] }
 0x1d1   : > { %v1932_v7 = vpop.f32.mrf.mxu0  ;;  %v12508_v33 = vpop.f32.mrf.mxu1  ;;  %v3851_v49 = vmul.bf16 %v18700_v15, %v3835_v37 }
 0x1d2   : > { %v15410_v46 = vadd.f32 %v1932_v7, %v1723_v6  ;;  %12876 = vmatpush3.bf16.msra.mxu1 %v13932_v18  ;;  %v4154_v6 = vpack.c.bf16 %v4128_v20, %v15274_v58  ;;  %v3815_v18 = vld [vmem:[#allocation2 + $0xc7] sm:$0xff] }
 0x1d3   : > { %v12552_v43 = vpop.f32.mrf.mxu0  ;;  %v1742_v3 = vpop.f32.mrf.mxu1  ;;  %12877 = vmatprep.subr.bf16.mxu1 %v13933_v57  ;;  %v3837_v37 = vpack.c.bf16 %v3816_v2, %v3815_v18  ;;  %v3820_v2 = vld [vmem:[#allocation2 + $0xef] sm:$0xff] }
 0x1d4   : > { %v15416_v53 = vadd.f32 %v12552_v43, %v12504_v63  ;;  %v3836_v63 = vpack.c.bf16 %v3814_v17, %v3813_v21  ;;  %v3817_v21 = vld [vmem:[#allocation2 + $0xd7] sm:$0xff]  ;;  %v3818_v17 = vld [vmem:[#allocation2 + $0xdf] sm:$0xff] }
 0x1d5   : > { %v1935_v40 = vpop.f32.mrf.mxu0  ;;  %v12511_v7 = vpop.f32.mrf.mxu1  ;;  %12798 = vmatmul.mubr.bf16.gmra.mxu1 %v3850_v56 }
 0x1d6   : > { %v15420_v24 = vadd.f32 %v1935_v40, %v1726_v36  ;;  %12801 = vmatprep.mubr.bf16.mxu1 %v3851_v49  ;;  %12878 = vmatpush3.bf16.msra.mxu1 %v13933_v57  ;;  %v18701_v36 = vld [vmem:[#allocation28_spill] sm:$0xff] }
 0x1d7   : > { %v12555_v28 = vpop.f32.mrf.mxu0  ;;  %12842 = vmatmul.mubr.bf16.gmra.mxu0 %v4154_v6  ;;  %v1755_v12 = vpop.f32.mrf.mxu1  ;;  %12879 = vmatprep.subr.bf16.mxu1 %v13934_v16  ;;  %v3852_v49 = vmul.bf16 %v18701_v36, %v3836_v63  ;;  %v3853_v6 = vmul.bf16 %v14989_v47, %v3837_v37 }
 0x1d8   : > { %v15422_v43 = vadd.f32 %v12555_v28, %v12507_v52  ;;  %12845 = vmatprep.mubr.bf16.mxu0 %v15300_v61  ;;  %v3819_v61 = vld [vmem:[#allocation2 + $0xe7] sm:$0xff] }
 0x1d9   : > { %v1948_v15 = vpop.f32.mrf.mxu0  ;;  %v12512_v58 = vpop.f32.mrf.mxu1 }
 0x1da   : > { %v15425_v20 = vadd.f32 %v1948_v15, %v1739_v4  ;;  %12880 = vmatpush3.bf16.msra.mxu1 %v13934_v16  ;;  %v3838_v15 = vpack.c.bf16 %v3818_v17, %v3817_v21  ;;  %v3822_v21 = vld [vmem:[#allocation2 + $0xff] sm:$0xff] }
 0x1db   : > { %v12556_v56 = vpop.f32.mrf.mxu0  ;;  %v1758_v40 = vpop.f32.mrf.mxu1 }
 0x1dc   : > { %v15428_v57 = vadd.f32 %v12556_v56, %v12508_v33  ;;  %v3839_v33 = vpack.c.bf16 %v3820_v2, %v3819_v61 }
 0x1dd   : > { %v1951_v52 = vpop.f32.mrf.mxu0  ;;  %v12515_v28 = vpop.f32.mrf.mxu1  ;;  %12802 = vmatmul.mubr.bf16.gmra.mxu1 %v3852_v49 }
 0x1de   : > { %v15431_v18 = vadd.f32 %v1951_v52, %v1742_v3  ;;  %12805 = vmatprep.mubr.bf16.mxu1 %v3853_v6  ;;  %v3854_v3 = vmul.bf16 %v15016_v48, %v3838_v15  ;;  %v3821_v52 = vld [vmem:[#allocation2 + $0xf7] sm:$0xff] }
 0x1df   : > { %v12559_v4 = vpop.f32.mrf.mxu0  ;;  %12846 = vmatmul.mubr.bf16.gmra.mxu0 %v15305_v27  ;;  %v1771_v16 = vpop.f32.mrf.mxu1  ;;  %v3855_v27 = vmul.bf16 %v15022_v50, %v3839_v33  ;;  %v3840_v2 = vpack.c.bf16 %v3822_v21, %v3821_v52  ;;  %v3826_v52 = vld [vmem:[#allocation2 + $0x11f] sm:$0xff] }
 0x1e0   : > { %v15434_v63 = vadd.f32 %v12559_v4, %v12511_v7  ;;  %12849 = vmatprep.mubr.bf16.mxu0 %v15324_v59 }
 0x1e1   : > { %v1964_v37 = vpop.f32.mrf.mxu0  ;;  %v12516_v56 = vpop.f32.mrf.mxu1 }
 0x1e2   : > { %v15437_v47 = vadd.f32 %v1964_v37, %v1755_v12 }
 0x1e3   : > { %v12560_v49 = vpop.f32.mrf.mxu0  ;;  %v15439_v36 = vpop.f32.mrf.mxu1 }
 0x1e4   : > { %v15442_v6 = vadd.f32 %v12560_v49, %v12512_v58 }
 0x1e5   : > { %v1967_v7 = vpop.f32.mrf.mxu0  ;;  %v12519_v17 = vpop.f32.mrf.mxu1  ;;  %12806 = vmatmul.mubr.bf16.gmra.mxu1 %v3854_v3 }
 0x1e6   : > { %v15445_v59 = vadd.f32 %v1967_v7, %v1758_v40  ;;  %12809 = vmatprep.mubr.bf16.mxu1 %v3855_v27  ;;  %v3856_v40 = vmul.bf16 %v15042_v29, %v3840_v2  ;;  %v3825_v27 = vld [vmem:[#allocation2 + $0x117] sm:$0xff] }
 0x1e7   : > { %v12563_v61 = vpop.f32.mrf.mxu0  ;;  %12850 = vmatmul.mubr.bf16.gmra.mxu0 %v15327_v42  ;;  %v1787_v12 = vpop.f32.mrf.mxu1  ;;  %v3857_v42 = vmul.bf16 %v15048_v30, %v15235_v54 }
 0x1e8   : > { %v15448_v4 = vadd.f32 %v12563_v61, %v12515_v28  ;;  %12853 = vmatprep.mubr.bf16.mxu0 %v15338_v34  ;;  %v4424_v34 = vld [vmem:[#allocation2 + $0x31] sm:$0xff]  ;;  %v3842_v61 = vpack.c.bf16 %v3826_v52, %v3825_v27  ;;  %v4425_v27 = vld [vmem:[#allocation2 + $0x39] sm:$0xff]  ;;  %v4426_v52 = vld [vmem:[#allocation2 + $0x41] sm:$0xff] }
 0x1e9   : > { %v1980_v58 = vpop.f32.mrf.mxu0  ;;  %v12520_v15 = vpop.f32.mrf.mxu1 }
 0x1ea   : > { %v15451_v33 = vadd.f32 %v1980_v58, %v1771_v16  ;;  %v4423_v58 = vld [vmem:[#allocation2 + $0x29] sm:$0xff] }
 0x1eb   : > { %v12564_v37 = vpop.f32.mrf.mxu0  ;;  %v15453_v49 = vpop.f32.mrf.mxu1 }
 0x1ec   : > { %v15456_v3 = vadd.f32 %v12564_v37, %v12516_v56  ;;  %v4455_v56 = vpack.c.bf16 %v4424_v34, %v4423_v58  ;;  %v4456_v58 = vpack.c.bf16 %v4426_v52, %v4425_v27  ;;  %v4429_v27 = vld [vmem:[#allocation2 + $0x59] sm:$0xff]  ;;  %v4430_v52 = vld [vmem:[#allocation2 + $0x61] sm:$0xff] }
 0x1ed   : > { %v15460_v28 = vpop.f32.mrf.mxu0  ;;  %v12523_v21 = vpop.f32.mrf.mxu1  ;;  %12810 = vmatmul.mubr.bf16.gmra.mxu1 %v3856_v40  ;;  %v3858_v40 = vmul.bf16 %v15063_v62, %v3842_v61 }
 0x1ee   : > { %12813 = vmatprep.mubr.bf16.mxu1 %v3857_v42 }
 0x1ef   : > { %v12567_v16 = vpop.f32.mrf.mxu0  ;;  %12854 = vmatmul.mubr.bf16.gmra.mxu0 %v15340_v1  ;;  %v1803_v7 = vpop.f32.mrf.mxu1  ;;  %v4471_v1 = vmul.bf16 %v14590_v9, %v4455_v56  ;;  %v14102_v9 = vld [vmem:[#allocation2] sm:$0xff] }
 0x1f0   : > { %v15463_v2 = vadd.f32 %v12567_v16, %v12519_v17  ;;  %12857 = vmatprep.mubr.bf16.mxu0 %v15348_v0  ;;  %v4428_v0 = vld [vmem:[#allocation2 + $0x51] sm:$0xff] }
 0x1f1   : > { %v1996_v54 = vpop.f32.mrf.mxu0  ;;  %v12524_v37 = vpop.f32.mrf.mxu1 }
 0x1f2   : > { %v15466_v30 = vadd.f32 %v1996_v54, %v1787_v12  ;;  %v4427_v54 = vld [vmem:[#allocation2 + $0x49] sm:$0xff] }
 0x1f3   : > { %v12568_v29 = vpop.f32.mrf.mxu0  ;;  %v15468_v50 = vpop.f32.mrf.mxu1 }
 0x1f4   : > { %18702 = vst [vmem:[#allocation37_spill] sm:$0xff] %v15468_v50  ;;  %v15471_v42 = vadd.f32 %v12568_v29, %v12520_v15  ;;  %v4457_v29 = vpack.c.bf16 %v4428_v0, %v4427_v54 }
 0x1f5   : > { %v15474_v17 = vpop.f32.mrf.mxu0  ;;  %v12527_v16 = vpop.f32.mrf.mxu1  ;;  %12814 = vmatmul.mubr.bf16.gmra.mxu1 %v3858_v40  ;;  %v15482_v40 = vpack.c.bf16 %v14102_v9, %v14102_v9 }
 0x1f6   : > { %12881 = vmatprep.mubr.bf16.mxu1 %v4471_v1 }
 0x1f7   : > { %v12571_v34 = vpop.f32.mrf.mxu0  ;;  %12858 = vmatmul.mubr.bf16.gmra.mxu0 %v15350_v19  ;;  %v1819_v12 = vpop.f32.mrf.mxu1  ;;  %v4472_v19 = vmul.bf16 %v14594_v14, %v4456_v58  ;;  %v4431_v58 = vld [vmem:[#allocation2 + $0x69] sm:$0xff] }
 0x1f8   : > { %v15477_v48 = vadd.f32 %v12571_v34, %v12523_v21  ;;  %12861 = vmatprep.mubr.bf16.mxu0 %v15358_v51  ;;  %v4473_v21 = vmul.bf16 %v14606_v23, %v4457_v29 }
 0x1f9   : > { %v2012_v15 = vpop.f32.mrf.mxu0  ;;  %v12528_v61 = vpop.f32.mrf.mxu1 }
 0x1fa   : > { %v15480_v56 = vadd.f32 %v2012_v15, %v1803_v7  ;;  %v4432_v7 = vld [vmem:[#allocation2 + $0x71] sm:$0xff]  ;;  %v4458_v15 = vpack.c.bf16 %v4430_v52, %v4429_v27  ;;  %v4433_v52 = vld [vmem:[#allocation2 + $0x79] sm:$0xff] }
 0x1fb   : > { %v12572_v62 = vpop.f32.mrf.mxu0  ;;  %v15484_v1 = vpop.f32.mrf.mxu1  ;;  %v4459_v29 = vpack.c.bf16 %v4432_v7, %v4431_v58 }
 0x1fc   : > { %18703 = vst [vmem:[#allocation38_spill] sm:$0xff] %v15484_v1  ;;  %v15487_v50 = vadd.f32 %v12572_v62, %v12524_v37 }
 0x1fd   : > { %v15490_v51 = vpop.f32.mrf.mxu0  ;;  %v12595_v0 = vpop.f32.mrf.mxu1  ;;  %12882 = vmatmul.mubr.bf16.vlgmr.msra.gmra.mxu1 %v4472_v19 }
 0x1fe   : > { %18704 = vst [vmem:[#allocation39_spill] sm:$0xff] %v15490_v51  ;;  %v2815_v34 = vadd.f32 %v12595_v0, %v15389_v22  ;;  %12885 = vmatprep.mubr.bf16.mxu1 %v4473_v21  ;;  %v4474_v21 = vmul.bf16 %v14615_v32, %v4458_v15 }
 0x1ff   : > { %v12575_v9 = vpop.f32.mrf.mxu0  ;;  %12862 = vmatmul.mubr.bf16.gmra.mxu0 %v15482_v40  ;;  %v2686_v54 = vpop.f32.mrf.mxu1 }
 0x200   : > { %v15494_v62 = vadd.f32 %v12575_v9, %v12527_v16  ;;  %v2813_v37 = vadd.f32 %v2686_v54, %v15392_v25  ;;  %v4475_v16 = vmul.bf16 %v14628_v41, %v4459_v29  ;;  %v4434_v25 = vld [vmem:[#allocation2 + $0x81] sm:$0xff]  ;;  %12929 = vmatprep.mubr.bf16.mxu0 %v15482_v40 }
 0x201   : > { %v2028_v23 = vpop.f32.mrf.mxu0  ;;  %v12596_v14 = vpop.f32.mrf.mxu1 }
 0x202   : > { %v15497_v1 = vadd.f32 %v2028_v23, %v1819_v12  ;;  %v2816_v19 = vadd.f32 %v12596_v14, %v15398_v10  ;;  %v4435_v23 = vld [vmem:[#allocation2 + $0x89] sm:$0xff]  ;;  %v4436_v12 = vld [vmem:[#allocation2 + $0x91] sm:$0xff] }
 0x203   : > { %v12576_v51 = vpop.f32.mrf.mxu0  ;;  %v2689_v22 = vpop.f32.mrf.mxu1  ;;  %v4461_v15 = vpack.c.bf16 %v4436_v12, %v4435_v23  ;;  %v4440_v23 = vld [vmem:[#allocation2 + $0xb1] sm:$0xff] }
 0x204   : > { %v15501_v0 = vadd.f32 %v12576_v51, %v12528_v61  ;;  %v15504_v27 = vadd.f32 %v2689_v22, %v15401_v13  ;;  %v4460_v61 = vpack.c.bf16 %v4434_v25, %v4433_v52  ;;  %v4437_v52 = vld [vmem:[#allocation2 + $0x99] sm:$0xff] }
 0x205   : > { %v15507_v7 = vpop.f32.mrf.mxu0  ;;  %v12599_v9 = vpop.f32.mrf.mxu1  ;;  %12886 = vmatmul.mubr.bf16.gmra.mxu1 %v4474_v21 }
 0x206   : > { %18705 = vst [vmem:[#allocation40_spill] sm:$0xff] %v15507_v7  ;;  %v2819_v14 = vadd.f32 %v12599_v9, %v15407_v39  ;;  %12889 = vmatprep.mubr.bf16.mxu1 %v4475_v16  ;;  %v4476_v7 = vmul.bf16 %v18684_v11, %v4460_v61 }
 0x207   : > { %v12643_v10 = vpop.f32.mrf.mxu0  ;;  %v2702_v54 = vpop.f32.mrf.mxu1 }
 0x208   : > { %v15510_v51 = vadd.f32 %v12643_v10, %v2815_v34  ;;  %v2817_v13 = vadd.f32 %v2702_v54, %v15410_v46  ;;  %v4477_v34 = vmul.bf16 %v18685_v26, %v4461_v15  ;;  %v4438_v46 = vld [vmem:[#allocation2 + $0xa1] sm:$0xff] }
 0x209   : > { %v3008_v58 = vpop.f32.mrf.mxu0  ;;  %v12600_v29 = vpop.f32.mrf.mxu1 }
 0x20a   : > { %v15513_v22 = vadd.f32 %v3008_v58, %v2813_v37  ;;  %v2820_v41 = vadd.f32 %v12600_v29, %v15416_v53  ;;  %v4439_v37 = vld [vmem:[#allocation2 + $0xa9] sm:$0xff] }
 0x20b   : > { %v12644_v21 = vpop.f32.mrf.mxu0  ;;  %v2705_v32 = vpop.f32.mrf.mxu1 }
 0x20c   : > { %v15517_v39 = vadd.f32 %v12644_v21, %v2816_v19  ;;  %v15520_v16 = vadd.f32 %v2705_v32, %v15420_v24  ;;  %v4462_v19 = vpack.c.bf16 %v4438_v46, %v4437_v52  ;;  %v4463_v24 = vpack.c.bf16 %v4440_v23, %v4439_v37  ;;  %v4441_v52 = vld [vmem:[#allocation2 + $0xb9] sm:$0xff]  ;;  %v4444_v37 = vld [vmem:[#allocation2 + $0xd1] sm:$0xff] }
 0x20d   : > { %v15523_v25 = vpop.f32.mrf.mxu0  ;;  %v12603_v9 = vpop.f32.mrf.mxu1  ;;  %12890 = vmatmul.mubr.bf16.gmra.mxu1 %v4476_v7 }
 0x20e   : > { %v2823_v53 = vadd.f32 %v12603_v9, %v15422_v43  ;;  %12893 = vmatprep.mubr.bf16.mxu1 %v4477_v34  ;;  %v4478_v26 = vmul.bf16 %v18686_v31, %v4462_v19 }
 0x20f   : > { %v12647_v12 = vpop.f32.mrf.mxu0  ;;  %v2718_v10 = vpop.f32.mrf.mxu1 }
 0x210   : > { %v15526_v54 = vadd.f32 %v12647_v12, %v2819_v14  ;;  %v2821_v32 = vadd.f32 %v2718_v10, %v15425_v20  ;;  %v4479_v14 = vmul.bf16 %v18687_v45, %v4463_v24  ;;  %v4442_v20 = vld [vmem:[#allocation2 + $0xc1] sm:$0xff] }
 0x211   : > { %v3024_v61 = vpop.f32.mrf.mxu0  ;;  %v12604_v15 = vpop.f32.mrf.mxu1 }
 0x212   : > { %v15529_v58 = vadd.f32 %v3024_v61, %v2817_v13  ;;  %v2824_v29 = vadd.f32 %v12604_v15, %v15428_v57  ;;  %v4443_v13 = vld [vmem:[#allocation2 + $0xc9] sm:$0xff] }
 0x213   : > { %v12648_v7 = vpop.f32.mrf.mxu0  ;;  %v2721_v21 = vpop.f32.mrf.mxu1  ;;  %v4465_v19 = vpack.c.bf16 %v4444_v37, %v4443_v13  ;;  %v4448_v13 = vld [vmem:[#allocation2 + $0xf1] sm:$0xff] }
 0x214   : > { %v15533_v43 = vadd.f32 %v12648_v7, %v2820_v41  ;;  %v15536_v34 = vadd.f32 %v2721_v21, %v15431_v18  ;;  %v4464_v41 = vpack.c.bf16 %v4442_v20, %v4441_v52  ;;  %v4445_v52 = vld [vmem:[#allocation2 + $0xd9] sm:$0xff] }
 0x215   : > { %v15539_v46 = vpop.f32.mrf.mxu0  ;;  %v12607_v9 = vpop.f32.mrf.mxu1  ;;  %12894 = vmatmul.mubr.bf16.gmra.mxu1 %v4478_v26 }
 0x216   : > { %v2827_v57 = vadd.f32 %v12607_v9, %v15434_v63  ;;  %12897 = vmatprep.mubr.bf16.mxu1 %v4479_v14  ;;  %v4480_v45 = vmul.bf16 %v18691_v60, %v4464_v41  ;;  %v4447_v9 = vld [vmem:[#allocation2 + $0xe9] sm:$0xff] }
 0x217   : > { %v12651_v23 = vpop.f32.mrf.mxu0  ;;  %v2734_v12 = vpop.f32.mrf.mxu1 }
 0x218   : > { %v15542_v10 = vadd.f32 %v12651_v23, %v2823_v53  ;;  %v2825_v18 = vadd.f32 %v2734_v12, %v15437_v47  ;;  %v4481_v53 = vmul.bf16 %v15163_v35, %v4465_v19  ;;  %v4446_v47 = vld [vmem:[#allocation2 + $0xe1] sm:$0xff]  ;;  %v4467_v19 = vpack.c.bf16 %v4448_v13, %v4447_v9 }
 0x219   : > { %v3040_v24 = vpop.f32.mrf.mxu0  ;;  %v12608_v61 = vpop.f32.mrf.mxu1  ;;  %v4466_v23 = vpack.c.bf16 %v4446_v47, %v4445_v52  ;;  %v4450_v47 = vld [vmem:[#allocation2 + $0x101] sm:$0xff] }
 0x21a   : > { %v15545_v15 = vadd.f32 %v3040_v24, %v2821_v32  ;;  %v2828_v7 = vadd.f32 %v12608_v61, %v15442_v6  ;;  %v13935_v32 = vld [vmem:[%s18510_s9 + $0x78] sm:$0xff]   ;;  %v4483_v52 = vmul.bf16 %v15190_v55, %v4467_v19 }
 0x21b   : > { %v12652_v26 = vpop.f32.mrf.mxu0  ;;  %v2737_v21 = vpop.f32.mrf.mxu1  ;;  %12913 = vmatprep.subr.bf16.mxu0 %v13935_v32 }
 0x21c   : > { %v15549_v63 = vadd.f32 %v12652_v26, %v2824_v29  ;;  %v15552_v14 = vadd.f32 %v2737_v21, %v15445_v59  ;;  %12914 = vmatpush3.bf16.msra.mxu0 %v13935_v32 }
 0x21d   : > { %v15558_v20 = vpop.f32.mrf.mxu0  ;;  %v12611_v6 = vpop.f32.mrf.mxu1  ;;  %12898 = vmatmul.mubr.bf16.gmra.mxu1 %v4480_v45 }
 0x21e   : > { %v2831_v29 = vadd.f32 %v12611_v6, %v15448_v4  ;;  %12901 = vmatprep.mubr.bf16.mxu1 %v4481_v53  ;;  %v4482_v4 = vmul.bf16 %v18693_v8, %v4466_v23  ;;  %v13947_v8 = vld [vmem:[%s18510_s9 + $0x10] sm:$0xff]  }
 0x21f   : > { %v12655_v59 = vpop.f32.mrf.mxu0  ;;  %v2750_v37 = vpop.f32.mrf.mxu1 }
 0x220   : > { %v15561_v12 = vadd.f32 %v12655_v59, %v2827_v57  ;;  %v2829_v41 = vadd.f32 %v2750_v37, %v15451_v33  ;;  %v4449_v57 = vld [vmem:[#allocation2 + $0xf9] sm:$0xff]  ;;  %v13936_v33 = vld [vmem:[%s18510_s9 + $0x70] sm:$0xff]  }
 0x221   : > { %v3056_v24 = vpop.f32.mrf.mxu0  ;;  %v12612_v61 = vpop.f32.mrf.mxu1  ;;  %12915 = vmatprep.subr.bf16.mxu0 %v13936_v33 }
 0x222   : > { %v15564_v26 = vadd.f32 %v3056_v24, %v2825_v18  ;;  %v2832_v45 = vadd.f32 %v12612_v61, %v15456_v3  ;;  %12916 = vmatpush3.bf16.msra.mxu0 %v13936_v33  ;;  %v4849_v33 = vld [vmem:[#allocation2 + $0xf] sm:$0xff] }
 0x223   : > { %v12656_v21 = vpop.f32.mrf.mxu0  ;;  %v15567_v35 = vpop.f32.mrf.mxu1 }
 0x224   : > { %v15570_v53 = vadd.f32 %v12656_v21, %v2828_v7  ;;  %v4468_v7 = vpack.c.bf16 %v4450_v47, %v4449_v57  ;;  %v4454_v57 = vld [vmem:[#allocation2 + $0x121] sm:$0xff] }
 0x225   : > { %v15576_v32 = vpop.f32.mrf.mxu0  ;;  %v12615_v18 = vpop.f32.mrf.mxu1  ;;  %12902 = vmatmul.mubr.bf16.gmra.mxu1 %v4482_v4 }
 0x226   : > { %v2835_v3 = vadd.f32 %v12615_v18, %v15463_v2  ;;  %12905 = vmatprep.mubr.bf16.mxu1 %v4483_v52  ;;  %v4484_v2 = vmul.bf16 %v15211_v5, %v4468_v7  ;;  %v4485_v52 = vmul.bf16 %v15213_v38, %v15366_v44 }
 0x227   : > { %v12659_v6 = vpop.f32.mrf.mxu0  ;;  %v2766_v9 = vpop.f32.mrf.mxu1 }
 0x228   : > { %v15579_v13 = vadd.f32 %v12659_v6, %v2831_v29  ;;  %v2833_v59 = vadd.f32 %v2766_v9, %v15466_v30  ;;  %v4453_v29 = vld [vmem:[#allocation2 + $0x119] sm:$0xff]  ;;  %v13937_v30 = vld [vmem:[%s18510_s9 + $0x68] sm:$0xff]  }
 0x229   : > { %v3072_v37 = vpop.f32.mrf.mxu0  ;;  %v12616_v23 = vpop.f32.mrf.mxu1  ;;  %12917 = vmatprep.subr.bf16.mxu0 %v13937_v30  ;;  %v4470_v9 = vpack.c.bf16 %v4454_v57, %v4453_v29  ;;  %v18707_v29 = vld [vmem:[#allocation5_spill] sm:$0xff] }
 0x22a   : > { %v15582_v19 = vadd.f32 %v3072_v37, %v2829_v41  ;;  %v2836_v24 = vadd.f32 %v12616_v23, %v15471_v42  ;;  %v4848_v42 = vld [vmem:[#allocation2 + $0x7] sm:$0xff]  ;;  %12918 = vmatpush3.bf16.msra.mxu0 %v13937_v30 }
 0x22b   : > { %v12660_v61 = vpop.f32.mrf.mxu0  ;;  %v15585_v21 = vpop.f32.mrf.mxu1  ;;  %v4880_v37 = vpack.c.bf16 %v4849_v33, %v4848_v42 }
 0x22c   : > { %v15588_v4 = vadd.f32 %v12660_v61, %v2832_v45 }
 0x22d   : > { %v15595_v41 = vpop.f32.mrf.mxu0  ;;  %v12619_v47 = vpop.f32.mrf.mxu1  ;;  %12906 = vmatmul.mubr.bf16.gmra.mxu1 %v4484_v2  ;;  %v4896_v57 = vmul.bf16 %v18707_v29, %v4880_v37 }
 0x22e   : > { %v2839_v18 = vadd.f32 %v12619_v47, %v15477_v48  ;;  %12909 = vmatprep.mubr.bf16.mxu1 %v4485_v52  ;;  %v18706_v48 = vld [vmem:[#allocation36_spill] sm:$0xff] }
 0x22f   : > { %v12663_v45 = vpop.f32.mrf.mxu0  ;;  %v2782_v6 = vpop.f32.mrf.mxu1  ;;  %v4486_v52 = vmul.bf16 %v18706_v48, %v4470_v9 }
 0x230   : > { %v15598_v44 = vadd.f32 %v12663_v45, %v2835_v3  ;;  %v2837_v7 = vadd.f32 %v2782_v6, %v15480_v56  ;;  %v13938_v56 = vld [vmem:[%s18510_s9 + $0x60] sm:$0xff]  }
 0x231   : > { %v3088_v23 = vpop.f32.mrf.mxu0  ;;  %v12620_v61 = vpop.f32.mrf.mxu1  ;;  %12919 = vmatprep.subr.bf16.mxu0 %v13938_v56 }
 0x232   : > { %v15601_v38 = vadd.f32 %v3088_v23, %v2833_v59  ;;  %v2840_v2 = vadd.f32 %v12620_v61, %v15487_v50  ;;  %12920 = vmatpush3.bf16.msra.mxu0 %v13938_v56 }
 0x233   : > { %v12664_v5 = vpop.f32.mrf.mxu0  ;;  %v15604_v55 = vpop.f32.mrf.mxu1 }
 0x234   : > { %v15607_v47 = vadd.f32 %v12664_v5, %v2836_v24 }
 0x235   : > { %v15613_v3 = vpop.f32.mrf.mxu0  ;;  %v12623_v30 = vpop.f32.mrf.mxu1  ;;  %12910 = vmatmul.mubr.bf16.gmra.mxu1 %v4486_v52 }
 0x236   : > { %v2843_v59 = vadd.f32 %v12623_v30, %v15494_v62  ;;  %12977 = vmatprep.mubr.bf16.mxu1 %v4896_v57  ;;  %v13939_v62 = vld [vmem:[%s18510_s9 + $0x58] sm:$0xff]  }
 0x237   : > { %v12667_v50 = vpop.f32.mrf.mxu0  ;;  %v2798_v42 = vpop.f32.mrf.mxu1  ;;  %12921 = vmatprep.subr.bf16.mxu0 %v13939_v62 }
 0x238   : > { %v15616_v33 = vadd.f32 %v12667_v50, %v2839_v18  ;;  %v2841_v5 = vadd.f32 %v2798_v42, %v15497_v1  ;;  %12922 = vmatpush3.bf16.msra.mxu0 %v13939_v62 }
 0x239   : > { %v3104_v24 = vpop.f32.mrf.mxu0  ;;  %v12624_v45 = vpop.f32.mrf.mxu1 }
 0x23a   : > { %v15619_v6 = vadd.f32 %v3104_v24, %v2837_v7  ;;  %v2844_v9 = vadd.f32 %v12624_v45, %v15501_v0  ;;  %v13940_v0 = vld [vmem:[%s18510_s9 + $0x38] sm:$0xff]   ;;  %v13941_v24 = vld [vmem:[%s18510_s9 + $0x30] sm:$0xff]  }
 0x23b   : > { %v12668_v37 = vpop.f32.mrf.mxu0  ;;  %v15622_v23 = vpop.f32.mrf.mxu1  ;;  %12961 = vmatprep.subr.bf16.mxu1 %v13940_v0 }
 0x23c   : > { %v15624_v61 = vadd.f32 %v12668_v37, %v2840_v2  ;;  %12962 = vmatpush3.bf16.msra.mxu1 %v13940_v0 }
 0x23d   : > { %v15629_v52 = vpop.f32.mrf.mxu0  ;;  %v12691_v18 = vpop.f32.mrf.mxu1  ;;  %12963 = vmatprep.subr.bf16.mxu1 %v13941_v24 }
 0x23e   : > { %v15632_v1 = vadd.f32 %v12691_v18, %v15510_v51  ;;  %v13943_v18 = vld [vmem:[%s18510_s9 + $0x28] sm:$0xff]  }
 0x23f   : > { %v12671_v7 = vpop.f32.mrf.mxu0  ;;  %v3314_v57 = vpop.f32.mrf.mxu1 }
 0x240   : > { %v15637_v2 = vadd.f32 %v12671_v7, %v2843_v59  ;;  %v15640_v56 = vadd.f32 %v3314_v57, %v15513_v22  ;;  %v13942_v22 = vld [vmem:[%s18510_s9 + $0x50] sm:$0xff]   ;;  %12964 = vmatpush3.bf16.msra.mxu1 %v13941_v24  ;;  %v13944_v57 = vld [vmem:[%s18510_s9 + $0x20] sm:$0xff]   ;;  %v13945_v24 = vld [vmem:[%s18510_s9 + $0x48] sm:$0xff]  }
 0x241   : > { %v3120_v30 = vpop.f32.mrf.mxu0  ;;  %v12692_v50 = vpop.f32.mrf.mxu1  ;;  %12923 = vmatprep.subr.bf16.mxu0 %v13942_v22  ;;  %12965 = vmatprep.subr.bf16.mxu1 %v13943_v18 }
 0x242   : > { %v15642_v42 = vadd.f32 %v3120_v30, %v2841_v5  ;;  %v15645_v51 = vadd.f32 %v12692_v50, %v15517_v39  ;;  %12924 = vmatpush3.bf16.msra.mxu0 %v13942_v22  ;;  %v13946_v22 = vld [vmem:[%s18510_s9 + $0x18] sm:$0xff]  }
 0x243   : > { %v12672_v45 = vpop.f32.mrf.mxu0  ;;  %v15650_v37 = vpop.f32.mrf.mxu1  ;;  %12925 = vmatprep.subr.bf16.mxu0 %v13945_v24 }
 0x244   : > { %v15652_v59 = vadd.f32 %v12672_v45, %v2844_v9  ;;  %12966 = vmatpush3.bf16.msra.mxu1 %v13943_v18 }
 0x245   : > { %v15657_v62 = vpop.f32.mrf.mxu0  ;;  %v12695_v5 = vpop.f32.mrf.mxu1  ;;  %12967 = vmatprep.subr.bf16.mxu1 %v13944_v57 }
 0x246   : > { %v15660_v39 = vadd.f32 %v12695_v5, %v15526_v54  ;;  %12926 = vmatpush3.bf16.msra.mxu0 %v13945_v24 }
 0x247   : > { %v15665_v0 = vpop.f32.mrf.mxu0  ;;  %v3330_v9 = vpop.f32.mrf.mxu1 }
 0x248   : > { %v15668_v7 = vadd.f32 %v3330_v9, %v15529_v58  ;;  %12968 = vmatpush3.bf16.msra.mxu1 %v13944_v57 }
 0x249   : > { %v15673_v30 = vpop.f32.mrf.mxu0  ;;  %v12696_v54 = vpop.f32.mrf.mxu1  ;;  %12969 = vmatprep.subr.bf16.mxu1 %v13946_v22 }
 0x24a   : > { %v15676_v50 = vadd.f32 %v12696_v54, %v15533_v43 }
 0x24b   : > { %v15681_v45 = vpop.f32.mrf.mxu0  ;;  %v15683_v58 = vpop.f32.mrf.mxu1 }
 0x24c   : > { %12970 = vmatpush3.bf16.msra.mxu1 %v13946_v22 }
 0x24d   : > { %v15688_v5 = vpop.f32.mrf.mxu0  ;;  %v12699_v18 = vpop.f32.mrf.mxu1  ;;  %12971 = vmatprep.subr.bf16.mxu1 %v13947_v8 }
 0x24e   : > { %v15691_v43 = vadd.f32 %v12699_v18, %v15542_v10  ;;  %v13948_v10 = vld [vmem:[%s18510_s9 + $0x40] sm:$0xff]   ;;  %v13949_v18 = vld [vmem:[%s18510_s9 + $0x8] sm:$0xff]  }
 0x24f   : > { %v15693_v9 = vpop.f32.mrf.mxu0  ;;  %v3346_v54 = vpop.f32.mrf.mxu1  ;;  %12927 = vmatprep.subr.bf16.mxu0 %v13948_v10 }
 0x250   : > { %v15696_v48 = vadd.f32 %v3346_v54, %v15545_v15  ;;  %12972 = vmatpush3.bf16.msra.mxu1 %v13947_v8  ;;  %12928 = vmatpush3.bf16.msra.mxu0 %v13948_v10 }
 0x251   : > { %v15701_v60 = vpop.f32.mrf.mxu0  ;;  %v12700_v31 = vpop.f32.mrf.mxu1  ;;  %12973 = vmatprep.subr.bf16.mxu1 %v13949_v18 }
 0x252   : > { %18708 = vst [vmem:[#allocation41_spill] sm:$0xff] %v15696_v48  ;;  %v15704_v57 = vadd.f32 %v12700_v31, %v15549_v63 }
 0x253   : > { %v15709_v24 = vpop.f32.mrf.mxu0  ;;  %v15711_v15 = vpop.f32.mrf.mxu1 }
 0x254   : > { %18709 = vst [vmem:[#allocation42_spill] sm:$0xff] %v15704_v57  ;;  %18710 = vst [vmem:[#allocation43_spill] sm:$0xff] %v15711_v15  ;;  %v13950_v57 = vld [vmem:[%s18510_s9] sm:$0xff]   ;;  %12974 = vmatpush3.bf16.msra.mxu1 %v13949_v18 }
 0x255   : > { %v15716_v54 = vpop.f32.mrf.mxu0  ;;  %v12703_v22 = vpop.f32.mrf.mxu1  ;;  %12975 = vmatprep.subr.bf16.mxu1 %v13950_v57 }
 0x256   : > { %v15719_v31 = vadd.f32 %v12703_v22, %v15561_v12  ;;  %v15737_v12 = vld [vmem:[%s18510_s9 + $0xb8] sm:$0xff]  }
 0x257   : > { %v15721_v63 = vpop.f32.mrf.mxu0  ;;  %v3362_v11 = vpop.f32.mrf.mxu1  ;;  %18715 = vst [vmem:[#allocation48_spill] sm:$0xff] %v15737_v12  ;;  %13009 = vmatprep.subr.bf16.mxu0 %v15737_v12 }
 0x258   : > { %18711 = vst [vmem:[#allocation44_spill] sm:$0xff] %v15719_v31  ;;  %v15724_v29 = vadd.f32 %v3362_v11, %v15564_v26  ;;  %12976 = vmatpush3.bf16.msra.mxu1 %v13950_v57 }
 0x259   : > { %v15729_v15 = vpop.f32.mrf.mxu0  ;;  %v12704_v48 = vpop.f32.mrf.mxu1 }
 0x25a   : > { %18712 = vst [vmem:[#allocation45_spill] sm:$0xff] %v15724_v29  ;;  %18713 = vst [vmem:[#allocation46_spill] sm:$0xff] %v15729_v15  ;;  %v15732_v8 = vadd.f32 %v12704_v48, %v15570_v53 }
 0x25b   : > { %v15739_v10 = vpop.f32.mrf.mxu0  ;;  %v15741_v11 = vpop.f32.mrf.mxu1 }
 0x25c   : > { %18714 = vst [vmem:[#allocation47_spill] sm:$0xff] %v15732_v8  ;;  %18716 = vst [vmem:[#allocation49_spill] sm:$0xff] %v15739_v10 }
 0x25d   : > { %18717 = vst [vmem:[#allocation50_spill] sm:$0xff] %v15741_v11  ;;  %v15745_v26 = vpop.f32.mrf.mxu0  ;;  %v12707_v18 = vpop.f32.mrf.mxu1 }
 0x25e   : > { %18718 = vst [vmem:[#allocation51_spill] sm:$0xff] %v15745_v26  ;;  %v15748_v53 = vadd.f32 %v12707_v18, %v15579_v13 }
 0x25f   : > { %v15750_v48 = vpop.f32.mrf.mxu0  ;;  %v3378_v22 = vpop.f32.mrf.mxu1 }
 0x260   : > { %18719 = vst [vmem:[#allocation52_spill] sm:$0xff] %v15748_v53  ;;  %18720 = vst [vmem:[#allocation53_spill] sm:$0xff] %v15750_v48  ;;  %v15753_v8 = vadd.f32 %v3378_v22, %v15582_v19 }
 0x261   : > { %v15755_v29 = vpop.f32.mrf.mxu0  ;;  %v12708_v31 = vpop.f32.mrf.mxu1 }
 0x262   : > { %18721 = vst [vmem:[#allocation54_spill] sm:$0xff] %v15753_v8  ;;  %18722 = vst [vmem:[#allocation55_spill] sm:$0xff] %v15755_v29  ;;  %v15758_v40 = vadd.f32 %v12708_v31, %v15588_v4 }
 0x263   : > { %v15760_v12 = vpop.f32.mrf.mxu0  ;;  %v15762_v26 = vpop.f32.mrf.mxu1 }
 0x264   : > { %18723 = vst [vmem:[#allocation56_spill] sm:$0xff] %v15758_v40  ;;  %18724 = vst [vmem:[#allocation57_spill] sm:$0xff] %v15760_v12 }
 0x265   : > { %18725 = vst [vmem:[#allocation58_spill] sm:$0xff] %v15762_v26  ;;  %v15764_v57 = vpop.f32.mrf.mxu0  ;;  %v12711_v13 = vpop.f32.mrf.mxu1 }
 0x266   : > { %18726 = vst [vmem:[#allocation59_spill] sm:$0xff] %v15764_v57  ;;  %v15767_v18 = vadd.f32 %v12711_v13, %v15598_v44 }
 0x267   : > { %v15769_v53 = vpop.f32.mrf.mxu0  ;;  %v3394_v19 = vpop.f32.mrf.mxu1 }
 0x268   : > { %18727 = vst [vmem:[#allocation60_spill] sm:$0xff] %v15767_v18  ;;  %18728 = vst [vmem:[#allocation61_spill] sm:$0xff] %v15769_v53  ;;  %v15772_v22 = vadd.f32 %v3394_v19, %v15601_v38 }
 0x269   : > { %v15774_v8 = vpop.f32.mrf.mxu0  ;;  %v12712_v4 = vpop.f32.mrf.mxu1 }
 0x26a   : > { %18729 = vst [vmem:[#allocation62_spill] sm:$0xff] %v15772_v22  ;;  %18730 = vst [vmem:[#allocation63_spill] sm:$0xff] %v15774_v8  ;;  %v15777_v31 = vadd.f32 %v12712_v4, %v15607_v47 }
 0x26b   : > { %v15779_v40 = vpop.f32.mrf.mxu0  ;;  %v15781_v26 = vpop.f32.mrf.mxu1 }
 0x26c   : > { %18731 = vst [vmem:[#allocation64_spill] sm:$0xff] %v15777_v31  ;;  %18732 = vst [vmem:[#allocation65_spill] sm:$0xff] %v15779_v40 }
 0x26d   : > { %18733 = vst [vmem:[#allocation66_spill] sm:$0xff] %v15781_v26  ;;  %v15783_v57 = vpop.f32.mrf.mxu0  ;;  %v12715_v44 = vpop.f32.mrf.mxu1 }
 0x26e   : > { %18734 = vst [vmem:[#allocation67_spill] sm:$0xff] %v15783_v57  ;;  %v15786_v13 = vadd.f32 %v12715_v44, %v15616_v33 }
 0x26f   : > { %v15788_v18 = vpop.f32.mrf.mxu0  ;;  %v3410_v38 = vpop.f32.mrf.mxu1 }
 0x270   : > { %18735 = vst [vmem:[#allocation68_spill] sm:$0xff] %v15786_v13  ;;  %18736 = vst [vmem:[#allocation69_spill] sm:$0xff] %v15788_v18  ;;  %v15791_v19 = vadd.f32 %v3410_v38, %v15619_v6 }
 0x271   : > { %v15793_v22 = vpop.f32.mrf.mxu0  ;;  %v12716_v47 = vpop.f32.mrf.mxu1 }
 0x272   : > { %18737 = vst [vmem:[#allocation70_spill] sm:$0xff] %v15791_v19  ;;  %18738 = vst [vmem:[#allocation71_spill] sm:$0xff] %v15793_v22  ;;  %v15796_v4 = vadd.f32 %v12716_v47, %v15624_v61 }
 0x273   : > { %v15798_v31 = vpop.f32.mrf.mxu0  ;;  %v15800_v26 = vpop.f32.mrf.mxu1 }
 0x274   : > { %18739 = vst [vmem:[#allocation72_spill] sm:$0xff] %v15796_v4  ;;  %18740 = vst [vmem:[#allocation73_spill] sm:$0xff] %v15798_v31 }
 0x275   : > { %18741 = vst [vmem:[#allocation74_spill] sm:$0xff] %v15800_v26  ;;  %v15802_v57 = vpop.f32.mrf.mxu0  ;;  %v12719_v33 = vpop.f32.mrf.mxu1 }
 0x276   : > { %18742 = vst [vmem:[#allocation75_spill] sm:$0xff] %v15802_v57  ;;  %v15805_v44 = vadd.f32 %v12719_v33, %v15637_v2  ;;  %v15824_v2 = vld [vmem:[%s18510_s9 + $0xf8] sm:$0xff]  }
 0x277   : > { %v15807_v13 = vpop.f32.mrf.mxu0  ;;  %v3426_v6 = vpop.f32.mrf.mxu1  ;;  %18750 = vst [vmem:[#allocation83_spill] sm:$0xff] %v15824_v2  ;;  %13057 = vmatprep.subr.bf16.mxu1 %v15824_v2 }
 0x278   : > { %18743 = vst [vmem:[#allocation76_spill] sm:$0xff] %v15805_v44  ;;  %18744 = vst [vmem:[#allocation77_spill] sm:$0xff] %v15807_v13  ;;  %v15810_v38 = vadd.f32 %v3426_v6, %v15642_v42 }
 0x279   : > { %v15812_v19 = vpop.f32.mrf.mxu0  ;;  %v12720_v61 = vpop.f32.mrf.mxu1 }
 0x27a   : > { %18745 = vst [vmem:[#allocation78_spill] sm:$0xff] %v15810_v38  ;;  %18746 = vst [vmem:[#allocation79_spill] sm:$0xff] %v15812_v19  ;;  %v15815_v47 = vadd.f32 %v12720_v61, %v15652_v59 }
 0x27b   : > { %v15817_v4 = vpop.f32.mrf.mxu0  ;;  %v15819_v26 = vpop.f32.mrf.mxu1 }
 0x27c   : > { %18747 = vst [vmem:[#allocation80_spill] sm:$0xff] %v15815_v47  ;;  %18748 = vst [vmem:[#allocation81_spill] sm:$0xff] %v15817_v4 }
 0x27d   : > { %18749 = vst [vmem:[#allocation82_spill] sm:$0xff] %v15819_v26  ;;  %v15826_v33 = vpop.f32.mrf.mxu0  ;;  %v12787_v44 = vpop.f32.mrf.mxu1 }
 0x27e   : > { %18751 = vst [vmem:[#allocation84_spill] sm:$0xff] %v15826_v33 }
 0x27f   : > { %v15829_v42 = vpop.f32.mrf.mxu0  ;;  %v3958_v6 = vpop.f32.mrf.mxu1 }
 0x280   : > { %18752 = vst [vmem:[#allocation85_spill] sm:$0xff] %v15829_v42 }
 0x281   : > { %v15831_v38 = vpop.f32.mrf.mxu0  ;;  %v15833_v59 = vpop.f32.mrf.mxu1 }
 0x282   : > { %18753 = vst [vmem:[#allocation86_spill] sm:$0xff] %v15831_v38 }
 0x283   : > { %v15835_v61 = vpop.f32.mrf.mxu0  ;;  %v15837_v47 = vpop.f32.mrf.mxu1 }
 0x284   : > { %18754 = vst [vmem:[#allocation87_spill] sm:$0xff] %v15835_v61 }
 0x285   : > { %v15839_v26 = vpop.f32.mrf.mxu0  ;;  %v15841_v4 = vpop.f32.mrf.mxu1 }
 0x286   : > { %18755 = vst [vmem:[#allocation88_spill] sm:$0xff] %v15839_v26 }
 0x287   : > { %v12835_v19 = vpop.f32.mrf.mxu0  ;;  %v15843_v33 = vpop.f32.mrf.mxu1 }
 0x289   : > { %v4264_v13 = vpop.f32.mrf.mxu0  ;;  %v15845_v57 = vpop.f32.mrf.mxu1 }
 0x28b   : > { %v15847_v42 = vpop.f32.mrf.mxu0  ;;  %v15849_v31 = vpop.f32.mrf.mxu1 }
 0x28d   : > { %v15851_v38 = vpop.f32.mrf.mxu0  ;;  %v15853_v22 = vpop.f32.mrf.mxu1 }
 0x28e   : > { %18756 = vst [vmem:[#allocation89_spill] sm:$0xff] %v15853_v22 }
 0x28f   : > { %v15855_v61 = vpop.f32.mrf.mxu0  ;;  %v15857_v18 = vpop.f32.mrf.mxu1 }
 0x290   : > { %18757 = vst [vmem:[#allocation90_spill] sm:$0xff] %v15857_v18 }
 0x291   : > { %v15859_v26 = vpop.f32.mrf.mxu0  ;;  %v15861_v2 = vpop.f32.mrf.mxu1 }
 0x292   : > { %18758 = vst [vmem:[#allocation91_spill] sm:$0xff] %v15861_v2 }
 0x293   : > { %v15863_v40 = vpop.f32.mrf.mxu0  ;;  %v15865_v8 = vpop.f32.mrf.mxu1 }
 0x294   : > { %18759 = vst [vmem:[#allocation92_spill] sm:$0xff] %v15865_v8 }
 0x295   : > { %v15867_v53 = vpop.f32.mrf.mxu1  ;;  %v15869_v12 = vpop.f32.mrf.mxu0 }
 0x296   : > { %18760 = vst [vmem:[#allocation93_spill] sm:$0xff] %v15867_v53  ;;  %18761 = vst [vmem:[#allocation94_spill] sm:$0xff] %v15869_v12 }
 0x297   : > { %v15871_v29 = vpop.f32.mrf.mxu1  ;;  %v15875_v11 = vpop.f32.mrf.mxu0 }
 0x298   : > { %18762 = vst [vmem:[#allocation95_spill] sm:$0xff] %v15871_v29  ;;  %18764 = vst [vmem:[#allocation97_spill] sm:$0xff] %v15875_v11 }
 0x299   : > { %v15873_v48 = vpop.f32.mrf.mxu1  ;;  %v15881_v22 = vpop.f32.mrf.mxu0 }
 0x29a   : > { %18763 = vst [vmem:[#allocation96_spill] sm:$0xff] %v15873_v48  ;;  %18767 = vst [vmem:[#allocation100_spill] sm:$0xff] %v15881_v22 }
 0x29b   : > { %v15877_v10 = vpop.f32.mrf.mxu1  ;;  %v15887_v8 = vpop.f32.mrf.mxu0 }
 0x29c   : > { %18765 = vst [vmem:[#allocation98_spill] sm:$0xff] %v15877_v10  ;;  %18770 = vst [vmem:[#allocation103_spill] sm:$0xff] %v15887_v8 }
 0x29d   : > { %v15879_v18 = vpop.f32.mrf.mxu1  ;;  %v15893_v29 = vpop.f32.mrf.mxu0 }
 0x29e   : > { %18766 = vst [vmem:[#allocation99_spill] sm:$0xff] %v15879_v18  ;;  %18773 = vst [vmem:[#allocation106_spill] sm:$0xff] %v15893_v29 }
 0x29f   : > { %v15883_v2 = vpop.f32.mrf.mxu1  ;;  %v15899_v10 = vpop.f32.mrf.mxu0 }
 0x2a0   : > { %18768 = vst [vmem:[#allocation101_spill] sm:$0xff] %v15883_v2 }
 0x2a1   : > { %v15885_v15 = vpop.f32.mrf.mxu1  ;;  %v15905_v2 = vpop.f32.mrf.mxu0 }
 0x2a2   : > { %18769 = vst [vmem:[#allocation102_spill] sm:$0xff] %v15885_v15  ;;  %18778 = vst [vmem:[#allocation111_spill] sm:$0xff] %v15905_v2 }
 0x2a3   : > { %v15889_v53 = vpop.f32.mrf.mxu1 }
 0x2a4   : > { %18771 = vst [vmem:[#allocation104_spill] sm:$0xff] %v15889_v53  ;;  %v15911_v53 = vpop.f32.mrf.mxu0 }
 0x2a5   : > { %v15891_v12 = vpop.f32.mrf.mxu1  ;;  %18781 = vst [vmem:[#allocation114_spill] sm:$0xff] %v15911_v53 }
 0x2a6   : > { %18772 = vst [vmem:[#allocation105_spill] sm:$0xff] %v15891_v12 }
 0x2a7   : > { %v15895_v48 = vpop.f32.mrf.mxu1 }
 0x2a8   : > { %18774 = vst [vmem:[#allocation107_spill] sm:$0xff] %v15895_v48  ;;  %v15917_v48 = vpop.f32.mrf.mxu0 }
 0x2a9   : > { %v15897_v11 = vpop.f32.mrf.mxu1 }
 0x2aa   : > { %18775 = vst [vmem:[#allocation108_spill] sm:$0xff] %v15897_v11  ;;  %v15929_v2 = vpop.f32.mrf.mxu0 }
 0x2ab   : > { %v15901_v18 = vpop.f32.mrf.mxu1  ;;  %18786 = vst [vmem:[#allocation119_spill] sm:$0xff] %v15929_v2 }
 0x2ac   : > { %18776 = vst [vmem:[#allocation109_spill] sm:$0xff] %v15901_v18  ;;  %v3765_v18 = vadd.f32 %v15665_v0, %v15632_v1  ;;  %v3766_v1 = vadd.f32 %v15681_v45, %v15645_v51 }
 0x2ad   : > { %v15903_v22 = vpop.f32.mrf.mxu1 }
 0x2ae   : > { %18777 = vst [vmem:[#allocation110_spill] sm:$0xff] %v15903_v22  ;;  %v4087_v53 = vadd.f32 %v12787_v44, %v3765_v18  ;;  %v18789_v18 = vld [vmem:[#allocation38_spill] sm:$0xff]  ;;  %v18790_v44 = vld [vmem:[#allocation40_spill] sm:$0xff]  ;;  %v4088_v45 = vadd.f32 %v15833_v59, %v3766_v1 }
 0x2af   : > { %v15907_v15 = vpop.f32.mrf.mxu1  ;;  %v2032_v2 = vadd.f32 %v18790_v44, %v18789_v18 }
 0x2b0   : > { %18779 = vst [vmem:[#allocation112_spill] sm:$0xff] %v15907_v15  ;;  %v3136_v15 = vadd.f32 %v15523_v25, %v15504_v27  ;;  %v2000_v27 = vadd.f32 %v15474_v17, %v15453_v49  ;;  %v18787_v25 = vld [vmem:[#allocation37_spill] sm:$0xff]  ;;  %v15953_v17 = vpop.f32.mrf.mxu0 }
 0x2b1   : > { %v15909_v8 = vpop.f32.mrf.mxu1 }
 0x2b2   : > { %18780 = vst [vmem:[#allocation113_spill] sm:$0xff] %v15909_v8  ;;  %v3763_v8 = vadd.f32 %v15673_v30, %v15640_v56  ;;  %v18788_v56 = vld [vmem:[#allocation39_spill] sm:$0xff] }
 0x2b3   : > { %v15913_v12 = vpop.f32.mrf.mxu1  ;;  %v2016_v30 = vadd.f32 %v18788_v56, %v18787_v25 }
 0x2b4   : > { %18782 = vst [vmem:[#allocation115_spill] sm:$0xff] %v15913_v12  ;;  %v4085_v0 = vadd.f32 %v3958_v6, %v3763_v8  ;;  %v3144_v8 = vadd.f32 %v15558_v20, %v15536_v34  ;;  %v2834_v34 = vadd.f32 %v15585_v21, %v2000_v27  ;;  %v3770_v21 = vadd.f32 %v15709_v24, %v15676_v50 }
 0x2b5   : > { %v15915_v29 = vpop.f32.mrf.mxu1 }
 0x2b6   : > { %18783 = vst [vmem:[#allocation116_spill] sm:$0xff] %v15915_v29  ;;  %v1984_v29 = vadd.f32 %v15460_v28, %v15439_v36  ;;  %v3140_v36 = vadd.f32 %v15539_v46, %v15520_v16  ;;  %v4391_v49 = vadd.f32 %v4264_v13, %v4085_v0  ;;  %v15959_v16 = vadd.f32 %v15576_v32, %v15552_v14 }
 0x2b7   : > { %v15919_v11 = vpop.f32.mrf.mxu1  ;;  %v3767_v14 = vadd.f32 %v15701_v60, %v15668_v7  ;;  %v15986_v0 = vadd.f32 %v15613_v3, %v2834_v34  ;;  %v4092_v27 = vadd.f32 %v15845_v57, %v3770_v21  ;;  %v3773_v3 = vadd.f32 %v15721_v63, %v15691_v43  ;;  %v18794_v43 = vld [vmem:[#allocation94_spill] sm:$0xff] }
 0x2b8   : > { %18784 = vst [vmem:[#allocation117_spill] sm:$0xff] %v15919_v11  ;;  %v3442_v11 = vadd.f32 %v15650_v37, %v3136_v15  ;;  %v15949_v37 = vld [vmem:[%s18509_s8] ss:$0 sm:$0xff]  ;;  %v2830_v46 = vadd.f32 %v15567_v35, %v1984_v29  ;;  %v15975_v29 = vpop.f32.mrf.mxu0 }
 0x2b9   : > { %v15923_v22 = vpop.f32.mrf.mxu1  ;;  %v4089_v60 = vadd.f32 %v15843_v33, %v3767_v14  ;;  %v18798_v14 = vld [vmem:[#allocation50_spill] sm:$0xff] }
 0x2ba   : > { %18785 = vst [vmem:[#allocation118_spill] sm:$0xff] %v15923_v22  ;;  %v4393_v22 = vadd.f32 %v12835_v19, %v4087_v53  ;;  %v3764_v51 = vadd.f32 %v15688_v5, %v3442_v11  ;;  %v3769_v53 = vadd.f32 %v15693_v9, %v15660_v39  ;;  %v4394_v11 = vadd.f32 %v15847_v42, %v4088_v45  ;;  %v15992_v33 = vpop.f32.mrf.mxu0  ;;  %v18793_v45 = vld [vmem:[#allocation89_spill] sm:$0xff] }
 0x2bb   : > { %v15933_v12 = vpop.f32.mrf.mxu1  ;;  %v15968_v6 = vadd.f32 %v15595_v41, %v2830_v46  ;;  %v2838_v42 = vadd.f32 %v15604_v55, %v2016_v30  ;;  %v3446_v41 = vadd.f32 %v15683_v58, %v3140_v36  ;;  %v2842_v55 = vadd.f32 %v15622_v23, %v2032_v2 }
 0x2bc   : > { %v4086_v5 = vadd.f32 %v15837_v47, %v3764_v51  ;;  %v4091_v35 = vadd.f32 %v15841_v4, %v3769_v53  ;;  %v4395_v24 = vadd.f32 %v15859_v26, %v4089_v60  ;;  %v18801_v60 = vld [vmem:[#allocation51_spill] sm:$0xff] }
 0x2bd   : > { %v12883_v28 = vpop.f32.mrf.mxu1  ;;  %v3768_v58 = vadd.f32 %v15716_v54, %v3446_v41  ;;  %v15996_v30 = vadd.f32 %v15629_v52, %v2838_v42  ;;  %v4398_v54 = vadd.f32 %v15863_v40, %v4092_v27  ;;  %v16004_v36 = vadd.f32 %v15657_v62, %v2842_v55  ;;  %v18792_v52 = vld [vmem:[#allocation46_spill] sm:$0xff]  ;;  %v13952_v62 = vld [vmem:[%s18510_s9 + $0xb0] sm:$0xff]  }
 0x2be   : > { %v4715_v15 = vadd.f32 %v12883_v28, %v4393_v22  ;;  %v4392_v32 = vadd.f32 %v15851_v38, %v4086_v5  ;;  %v4397_v4 = vadd.f32 %v15855_v61, %v4091_v35  ;;  %v18791_v28 = vld [vmem:[#allocation41_spill] sm:$0xff]  ;;  %v18795_v5 = vld [vmem:[#allocation43_spill] sm:$0xff]  ;;  %v3454_v35 = vadd.f32 %v18798_v14, %v15959_v16  ;;  %v18805_v16 = vld [vmem:[#allocation48_spill] sm:$0xff] }
 0x2bf   : > { %v4586_v19 = vpop.f32.mrf.mxu1  ;;  %v4090_v23 = vadd.f32 %v15849_v31, %v3768_v58  ;;  %v3771_v51 = vadd.f32 %v18792_v52, %v18791_v28  ;;  %v18806_v58 = vld [vmem:[#allocation100_spill] sm:$0xff]  ;;  %v18812_v28 = vld [vmem:[#allocation103_spill] sm:$0xff] }
 0x2c0   : > { %v4754_v13 = vadd.f32 %v15949_v37, %v4715_v15  ;;  %v4713_v22 = vadd.f32 %v4586_v19, %v4391_v49  ;;  %v4095_v49 = vadd.f32 %v18793_v45, %v3773_v3  ;;  %v16010_v15 = vpop.f32.mrf.mxu0  ;;  %v18807_v3 = vld [vmem:[#allocation45_spill] sm:$0xff] }
 0x2c1   : > { %v12884_v20 = vpop.f32.mrf.mxu1  ;;  %v4396_v63 = vadd.f32 %v18794_v43, %v4090_v23  ;;  %v18808_v23 = vld [vmem:[#allocation55_spill] sm:$0xff] }
 0x2c2   : > { %v4786_v39 = vmax.f32 %v4754_v13, 0.0  ;;  %v4752_v9 = vadd.f32 %v15949_v37, %v4713_v22  ;;  %v4716_v47 = vadd.f32 %v12884_v20, %v4394_v11  ;;  %v3450_v11 = vadd.f32 %v18795_v5, %v3144_v8  ;;  %v18796_v13 = vld [vmem:[#allocation42_spill] sm:$0xff]  ;;  %v18797_v22 = vld [vmem:[#allocation49_spill] sm:$0xff]  ;;  %v18802_v8 = vld [vmem:[#allocation44_spill] sm:$0xff] }
 0x2c3   : > { %v4589_v7 = vpop.f32.mrf.mxu1  ;;  %v3774_v34 = vadd.f32 %v18797_v22, %v18796_v13  ;;  %v18799_v20 = vld [vmem:[#allocation90_spill] sm:$0xff]  ;;  %v18815_v5 = vld [vmem:[#allocation93_spill] sm:$0xff] }
 0x2c4   : > { %4818 = vst [vmem:[#allocation2 + $0x28] sm:$0xff] %v4786_v39  ;;  %v4784_v38 = vmax.f32 %v4752_v9, 0.0  ;;  %v4755_v59 = vadd.f32 %v15949_v37, %v4716_v47  ;;  %v4714_v1 = vadd.f32 %v4589_v7, %v4392_v32  ;;  %v4093_v32 = vadd.f32 %v18799_v20, %v3771_v51  ;;  %v18800_v9 = vld [vmem:[#allocation97_spill] sm:$0xff]  ;;  %v18816_v13 = vld [vmem:[#allocation106_spill] sm:$0xff] }
 0x2c5   : > { %v12887_v50 = vpop.f32.mrf.mxu1  ;;  %v4401_v47 = vadd.f32 %v18800_v9, %v4095_v49  ;;  %v3772_v7 = vadd.f32 %v18801_v60, %v3450_v11 }
 0x2c6   : > { %4816 = vst [vmem:[#allocation2 + $0x18] sm:$0xff] %v4784_v38  ;;  %v4787_v61 = vmax.f32 %v4755_v59, 0.0  ;;  %v4753_v25 = vadd.f32 %v15949_v37, %v4714_v1  ;;  %v4719_v56 = vadd.f32 %v12887_v50, %v4397_v4  ;;  %v18803_v4 = vld [vmem:[#allocation53_spill] sm:$0xff]  ;;  %v18804_v59 = vld [vmem:[#allocation91_spill] sm:$0xff]  ;;  %v4399_v27 = vadd.f32 %v18806_v58, %v4093_v32  ;;  %v16030_v50 = vpop.f32.mrf.mxu0  ;;  %v18819_v58 = vld [vmem:[#allocation52_spill] sm:$0xff] }
 0x2c7   : > { %v4602_v57 = vpop.f32.mrf.mxu1  ;;  %v4096_v1 = vadd.f32 %v18804_v59, %v3774_v34 }
 0x2c8   : > { %4819 = vst [vmem:[#allocation2 + $0x30] sm:$0xff] %v4787_v61  ;;  %v4785_v26 = vmax.f32 %v4753_v25, 0.0  ;;  %v4758_v2 = vadd.f32 %v15949_v37, %v4719_v56  ;;  %v4717_v18 = vadd.f32 %v4602_v57, %v4395_v24  ;;  %v4962_v44 = vpack.c.bf16 %v4787_v61, %v4786_v39  ;;  %v13953_v56 = vld [vmem:[%s18510_s9 + $0xa8] sm:$0xff]   ;;  %v18809_v57 = vld [vmem:[#allocation47_spill] sm:$0xff] }
 0x2c9   : > { %v12888_v31 = vpop.f32.mrf.mxu1  ;;  %v4402_v52 = vadd.f32 %v18812_v28, %v4096_v1  ;;  %v18818_v1 = vld [vmem:[#allocation19_spill] sm:$0xff] }
 0x2ca   : > { %4817 = vst [vmem:[#allocation2 + $0x20] sm:$0xff] %v4785_v26  ;;  %v4790_v40 = vmax.f32 %v4758_v2, 0.0  ;;  %v4756_v46 = vadd.f32 %v15949_v37, %v4717_v18  ;;  %v4720_v53 = vadd.f32 %v12888_v31, %v4398_v54  ;;  %v4961_v19 = vpack.c.bf16 %v4785_v26, %v4784_v38  ;;  %v18810_v26 = vld [vmem:[#allocation57_spill] sm:$0xff]  ;;  %v18811_v18 = vld [vmem:[#allocation92_spill] sm:$0xff]  ;;  %v18813_v31 = vld [vmem:[#allocation59_spill] sm:$0xff] }
 0x2cb   : > { %v4605_v39 = vpop.f32.mrf.mxu1  ;;  %v3777_v38 = vadd.f32 %v18803_v4, %v18802_v8  ;;  %v3775_v54 = vadd.f32 %v18808_v23, %v18807_v3  ;;  %v3778_v2 = vadd.f32 %v18810_v26, %v18809_v57  ;;  %v13957_v26 = vld [vmem:[%s18510_s9 + $0xf0] sm:$0xff]  }
 0x2cc   : > { %4822 = vst [vmem:[#allocation2 + $0x48] sm:$0xff] %v4790_v40  ;;  %v4788_v42 = vmax.f32 %v4756_v46, 0.0  ;;  %v4759_v41 = vadd.f32 %v15949_v37, %v4720_v53  ;;  %v4718_v21 = vadd.f32 %v4605_v39, %v4396_v63  ;;  %12930 = vmatmul.mubr.bf16.vlgmr.msra.gmra.mxu0 %v4961_v19  ;;  %v3776_v46 = vadd.f32 %v18813_v31, %v3454_v35  ;;  %v18814_v53 = vld [vmem:[#allocation58_spill] sm:$0xff]  ;;  %v16048_v39 = vpop.f32.mrf.mxu0 }
 0x2cd   : > { %v12891_v55 = vpop.f32.mrf.mxu1  ;;  %13010 = vmatpush3.bf16.msra.mxu0 %v18805_v16  ;;  %12933 = vmatprep.mubr.bf16.mxu0 %v4962_v44  ;;  %v4094_v44 = vadd.f32 %v18811_v18, %v3772_v7  ;;  %v3458_v19 = vadd.f32 %v18814_v53, %v15968_v6  ;;  %v4099_v11 = vadd.f32 %v18815_v5, %v3777_v38  ;;  %v4850_v14 = vld [vmem:[#allocation2 + $0x17] sm:$0xff]  ;;  %v13954_v16 = vld [vmem:[%s18510_s9 + $0xa0] sm:$0xff]   ;;  %v18828_v31 = vld [vmem:[#allocation98_spill] sm:$0xff] }
 0x2ce   : > { %4820 = vst [vmem:[#allocation2 + $0x38] sm:$0xff] %v4788_v42  ;;  %v4791_v24 = vmax.f32 %v4759_v41, 0.0  ;;  %v4757_v61 = vadd.f32 %v15949_v37, %v4718_v21  ;;  %v4723_v25 = vadd.f32 %v12891_v55, %v4401_v47  ;;  %13011 = vmatprep.subr.bf16.mxu0 %v13952_v62  ;;  %v18817_v41 = vld [vmem:[#allocation95_spill] sm:$0xff]  ;;  %v16077_v28 = vpop.f32.mrf.mxu0  ;;  %v4098_v53 = vadd.f32 %v18828_v31, %v3776_v46  ;;  %v18829_v5 = vld [vmem:[#allocation114_spill] sm:$0xff] }
 0x2cf   : > { %v4618_v51 = vpop.f32.mrf.mxu1  ;;  %v4400_v22 = vadd.f32 %v18816_v13, %v4094_v44  ;;  %v4853_v6 = vld [vmem:[#allocation2 + $0x2f] sm:$0xff]  ;;  %v4097_v21 = vadd.f32 %v18817_v41, %v3775_v54  ;;  %v4405_v60 = vadd.f32 %v15899_v10, %v4099_v11  ;;  %v18824_v54 = vld [vmem:[#allocation20_spill] sm:$0xff] }
 0x2d0   : > { %4823 = vst [vmem:[#allocation2 + $0x50] sm:$0xff] %v4791_v24  ;;  %v4789_v45 = vmax.f32 %v4757_v61, 0.0  ;;  %v4762_v49 = vadd.f32 %v15949_v37, %v4723_v25  ;;  %v4721_v43 = vadd.f32 %v4618_v51, %v4399_v27  ;;  %v4964_v63 = vpack.c.bf16 %v4791_v24, %v4790_v40  ;;  %v18820_v27 = vld [vmem:[#allocation61_spill] sm:$0xff]  ;;  %v18821_v24 = vld [vmem:[#allocation54_spill] sm:$0xff]  ;;  %v18822_v61 = vld [vmem:[#allocation63_spill] sm:$0xff] }
 0x2d1   : > { %v12892_v34 = vpop.f32.mrf.mxu1  ;;  %v4851_v20 = vld [vmem:[#allocation2 + $0x1f] sm:$0xff]  ;;  %v4852_v32 = vld [vmem:[#allocation2 + $0x27] sm:$0xff]  ;;  %13012 = vmatpush3.bf16.msra.mxu0 %v13952_v62  ;;  %v3781_v10 = vadd.f32 %v18820_v27, %v18819_v58  ;;  %v3779_v25 = vadd.f32 %v18822_v61, %v18821_v24  ;;  %v18825_v18 = vld [vmem:[#allocation111_spill] sm:$0xff] }
 0x2d2   : > { %4821 = vst [vmem:[#allocation2 + $0x40] sm:$0xff] %v4789_v45  ;;  %v4794_v9 = vmax.f32 %v4762_v49, 0.0  ;;  %v16051_v40 = vadd.f32 %v15949_v37, %v4721_v43  ;;  %v4724_v35 = vadd.f32 %v12892_v34, %v4402_v52  ;;  %v16053_v47 = vpack.c.bf16 %v4851_v20, %v4850_v14  ;;  %13013 = vmatprep.subr.bf16.mxu0 %v13953_v56  ;;  %v18827_v49 = vld [vmem:[#allocation65_spill] sm:$0xff]  ;;  %v13959_v46 = vld [vmem:[%s18510_s9 + $0xe8] sm:$0xff]   ;;  %v18833_v41 = vld [vmem:[#allocation99_spill] sm:$0xff] }
 0x2d3   : > { %v4621_v7 = vpop.f32.mrf.mxu1  ;;  %v16057_v8 = vpack.c.bf16 %v4853_v6, %v4852_v32  ;;  %v4963_v62 = vpack.c.bf16 %v4789_v45, %v4788_v42  ;;  %v18823_v42 = vld [vmem:[#allocation96_spill] sm:$0xff]  ;;  %v4403_v44 = vadd.f32 %v18825_v18, %v4097_v21  ;;  %v18830_v32 = vld [vmem:[#allocation83_spill] sm:$0xff]  ;;  %v4103_v21 = vadd.f32 %v18833_v41, %v3781_v10  ;;  %v18834_v10 = vld [vmem:[#allocation101_spill] sm:$0xff] }
 0x2d4   : > { %4826 = vst [vmem:[#allocation2 + $0x68] sm:$0xff] %v4794_v9  ;;  %v4792_v4 = vmax.f32 %v16051_v40, 0.0  ;;  %v4763_v38 = vadd.f32 %v15949_v37, %v4724_v35  ;;  %v4722_v59 = vadd.f32 %v4621_v7, %v4400_v22  ;;  %v4897_v55 = vmul.bf16 %v18818_v1, %v16053_v47  ;;  %v18831_v40 = vld [vmem:[#allocation67_spill] sm:$0xff]  ;;  %v18832_v35 = vld [vmem:[#allocation66_spill] sm:$0xff] }
 0x2d5   : > { %v4100_v3 = vadd.f32 %v18823_v42, %v3778_v2  ;;  %v12895_v23 = vpop.f32.mrf.mxu1  ;;  %v4898_v57 = vmul.bf16 %v18824_v54, %v16057_v8  ;;  %12934 = vmatmul.mubr.bf16.gmra.mxu0 %v4963_v62  ;;  %v18826_v2 = vld [vmem:[#allocation56_spill] sm:$0xff]  ;;  %v16097_v6 = vadd.f32 %v18832_v35, %v15986_v0  ;;  %v4101_v24 = vadd.f32 %v18834_v10, %v3779_v25  ;;  %v13958_v25 = vld [vmem:[%s18510_s9 + $0x90] sm:$0xff]  }
 0x2d6   : > { %4824 = vst [vmem:[#allocation2 + $0x58] sm:$0xff] %v4792_v4  ;;  %v4795_v52 = vmax.f32 %v4763_v38, 0.0  ;;  %v4761_v51 = vadd.f32 %v15949_v37, %v4722_v59  ;;  %v4727_v45 = vadd.f32 %v12895_v23, %v4405_v60  ;;  %12978 = vmatmul.mubr.bf16.vlgmr.msra.gmra.mxu1 %v4897_v55  ;;  %12937 = vmatprep.mubr.bf16.mxu0 %v4964_v63  ;;  %v13955_v63 = vld [vmem:[%s18510_s9 + $0x98] sm:$0xff]   ;;  %v16101_v59 = vpop.f32.mrf.mxu0 }
 0x2d7   : > { %v3782_v43 = vadd.f32 %v18827_v49, %v18826_v2  ;;  %v4406_v11 = vadd.f32 %v18829_v5, %v4100_v3  ;;  %v4634_v13 = vpop.f32.mrf.mxu1  ;;  %12981 = vmatprep.mubr.bf16.mxu1 %v4898_v57  ;;  %13014 = vmatpush3.bf16.msra.mxu0 %v13953_v56  ;;  %v3780_v56 = vadd.f32 %v18831_v40, %v3458_v19  ;;  %v4854_v7 = vld [vmem:[#allocation2 + $0x37] sm:$0xff]  ;;  %v4857_v27 = vld [vmem:[#allocation2 + $0x4f] sm:$0xff]  ;;  %v18838_v2 = vld [vmem:[#allocation69_spill] sm:$0xff] }
 0x2d8   : > { %4827 = vst [vmem:[#allocation2 + $0x70] sm:$0xff] %v4795_v52  ;;  %v4793_v22 = vmax.f32 %v4761_v51, 0.0  ;;  %v16085_v34 = vadd.f32 %v15949_v37, %v4727_v45  ;;  %v4725_v14 = vadd.f32 %v4634_v13, %v4403_v44  ;;  %v4966_v20 = vpack.c.bf16 %v4795_v52, %v4794_v9  ;;  %13015 = vmatprep.subr.bf16.mxu0 %v13954_v16  ;;  %v18836_v52 = vld [vmem:[#allocation22_spill] sm:$0xff]  ;;  %v18837_v45 = vld [vmem:[#allocation60_spill] sm:$0xff] }
 0x2d9   : > { %13058 = vmatpush3.bf16.msra.mxu1 %v18830_v32  ;;  %v4404_v9 = vadd.f32 %v15917_v48, %v4098_v53  ;;  %v12896_v60 = vpop.f32.mrf.mxu1  ;;  %v4855_v62 = vld [vmem:[#allocation2 + $0x3f] sm:$0xff]  ;;  %v4856_v38 = vld [vmem:[#allocation2 + $0x47] sm:$0xff]  ;;  %v18835_v48 = vld [vmem:[#allocation119_spill] sm:$0xff]  ;;  %v3785_v49 = vadd.f32 %v18838_v2, %v18837_v45  ;;  %v4407_v13 = vadd.f32 %v15953_v17, %v4101_v24 }
 0x2da   : > { %13059 = vmatprep.subr.bf16.mxu1 %v13957_v26  ;;  %4825 = vst [vmem:[#allocation2 + $0x60] sm:$0xff] %v4793_v22  ;;  %v4798_v55 = vmax.f32 %v16085_v34, 0.0  ;;  %v16105_v19 = vadd.f32 %v15949_v37, %v4725_v14  ;;  %v4728_v58 = vadd.f32 %v12896_v60, %v4406_v11  ;;  %v16107_v0 = vpack.c.bf16 %v4855_v62, %v4854_v7  ;;  %v18840_v53 = vld [vmem:[#allocation23_spill] sm:$0xff]  ;;  %v13960_v11 = vld [vmem:[%s18510_s9 + $0xe0] sm:$0xff]   ;;  %v18843_v35 = vld [vmem:[#allocation104_spill] sm:$0xff] }
 0x2db   : > { %v4409_v61 = vadd.f32 %v18835_v48, %v4103_v21  ;;  %v4637_v42 = vpop.f32.mrf.mxu1  ;;  %v16111_v3 = vpack.c.bf16 %v4857_v27, %v4856_v38  ;;  %v4965_v23 = vpack.c.bf16 %v4793_v22, %v4792_v4  ;;  %13016 = vmatpush3.bf16.msra.mxu0 %v13954_v16  ;;  %v18839_v4 = vld [vmem:[#allocation102_spill] sm:$0xff]  ;;  %v16129_v22 = vpop.f32.mrf.mxu0  ;;  %v18842_v32 = vld [vmem:[#allocation71_spill] sm:$0xff]  ;;  %v4102_v41 = vadd.f32 %v18843_v35, %v3780_v56  ;;  %v18844_v56 = vld [vmem:[#allocation64_spill] sm:$0xff] }
 0x2dc   : > { %4830 = vst [vmem:[#allocation2 + $0x88] sm:$0xff] %v4798_v55  ;;  %v4796_v57 = vmax.f32 %v16105_v19, 0.0  ;;  %v4767_v18 = vadd.f32 %v15949_v37, %v4728_v58  ;;  %v4726_v44 = vadd.f32 %v4637_v42, %v4404_v9  ;;  %v4899_v51 = vmul.bf16 %v18836_v52, %v16107_v0  ;;  %13017 = vmatprep.subr.bf16.mxu0 %v13955_v63  ;;  %v18845_v38 = vld [vmem:[#allocation73_spill] sm:$0xff]  ;;  %v18846_v19 = vld [vmem:[#allocation74_spill] sm:$0xff]  ;;  %v18848_v45 = vld [vmem:[#allocation107_spill] sm:$0xff] }
 0x2dd   : > { %13060 = vmatpush3.bf16.msra.mxu1 %v13957_v26  ;;  %v4104_v16 = vadd.f32 %v18839_v4, %v3782_v43  ;;  %v12899_v31 = vpop.f32.mrf.mxu1  ;;  %v4900_v5 = vmul.bf16 %v18840_v53, %v16111_v3  ;;  %12938 = vmatmul.mubr.bf16.gmra.mxu0 %v4965_v23  ;;  %v18841_v43 = vld [vmem:[#allocation62_spill] sm:$0xff]  ;;  %v16149_v58 = vadd.f32 %v18846_v19, %v15996_v30  ;;  %v18847_v27 = vld [vmem:[#allocation105_spill] sm:$0xff]  ;;  %v4858_v24 = vld [vmem:[#allocation2 + $0x57] sm:$0xff]  ;;  %v16153_v42 = vpop.f32.mrf.mxu0 }
 0x2de   : > { %13061 = vmatprep.subr.bf16.mxu1 %v13959_v46  ;;  %4828 = vst [vmem:[#allocation2 + $0x78] sm:$0xff] %v4796_v57  ;;  %v4799_v26 = vmax.f32 %v4767_v18, 0.0  ;;  %v4765_v34 = vadd.f32 %v15949_v37, %v4726_v44  ;;  %v4731_v14 = vadd.f32 %v12899_v31, %v4409_v61  ;;  %12982 = vmatmul.mubr.bf16.gmra.mxu1 %v4899_v51 }
 0x2df   : > { %12941 = vmatprep.mubr.bf16.mxu0 %v4966_v20  ;;  %v3783_v40 = vadd.f32 %v18842_v32, %v18841_v43  ;;  %v4410_v21 = vadd.f32 %v15975_v29, %v4104_v16  ;;  %v4650_v9 = vpop.f32.mrf.mxu1  ;;  %12985 = vmatprep.mubr.bf16.mxu1 %v4900_v5  ;;  %v13961_v20 = vld [vmem:[%s18510_s9 + $0x88] sm:$0xff]   ;;  %v13962_v29 = vld [vmem:[%s18510_s9 + $0xd8] sm:$0xff]   ;;  %v4107_v10 = vadd.f32 %v18847_v27, %v3785_v49 }
 0x2e0   : > { %13018 = vmatpush3.bf16.msra.mxu0 %v13955_v63  ;;  %4831 = vst [vmem:[#allocation2 + $0x90] sm:$0xff] %v4799_v26  ;;  %v4797_v17 = vmax.f32 %v4765_v34, 0.0  ;;  %v16137_v60 = vadd.f32 %v15949_v37, %v4731_v14  ;;  %v4729_v7 = vadd.f32 %v4650_v9, %v4407_v13  ;;  %v4968_v62 = vpack.c.bf16 %v4799_v26, %v4798_v55  ;;  %v4861_v51 = vld [vmem:[#allocation2 + $0x6f] sm:$0xff]  ;;  %v18849_v26 = vld [vmem:[#allocation24_spill] sm:$0xff] }
 0x2e1   : > { %13019 = vmatprep.subr.bf16.mxu0 %v13958_v25  ;;  %13062 = vmatpush3.bf16.msra.mxu1 %v13959_v46  ;;  %v3786_v63 = vadd.f32 %v18845_v38, %v18844_v56  ;;  %v4408_v55 = vadd.f32 %v15992_v33, %v4102_v41  ;;  %v12900_v46 = vpop.f32.mrf.mxu1  ;;  %v4859_v48 = vld [vmem:[#allocation2 + $0x5f] sm:$0xff]  ;;  %v4860_v61 = vld [vmem:[#allocation2 + $0x67] sm:$0xff]  ;;  %v4105_v2 = vadd.f32 %v18848_v45, %v3783_v40  ;;  %v18850_v14 = vld [vmem:[#allocation75_spill] sm:$0xff] }
 0x2e2   : > { %13063 = vmatprep.subr.bf16.mxu1 %v13960_v11  ;;  %4829 = vst [vmem:[#allocation2 + $0x80] sm:$0xff] %v4797_v17  ;;  %v4802_v23 = vmax.f32 %v16137_v60, 0.0  ;;  %v16157_v18 = vadd.f32 %v15949_v37, %v4729_v7  ;;  %v4732_v44 = vadd.f32 %v12900_v46, %v4410_v21  ;;  %v16159_v30 = vpack.c.bf16 %v4859_v48, %v4858_v24  ;;  %v18852_v40 = vld [vmem:[#allocation25_spill] sm:$0xff]  ;;  %v13963_v41 = vld [vmem:[%s18510_s9 + $0xd0] sm:$0xff]   ;;  %v16181_v21 = vpop.f32.mrf.mxu0  ;;  %v18853_v60 = vld [vmem:[#allocation68_spill] sm:$0xff] }
 0x2e3   : > { %v4413_v33 = vadd.f32 %v16010_v15, %v4107_v10  ;;  %v4653_v49 = vpop.f32.mrf.mxu1  ;;  %v16163_v4 = vpack.c.bf16 %v4861_v51, %v4860_v61  ;;  %v4967_v16 = vpack.c.bf16 %v4797_v17, %v4796_v57  ;;  %v13964_v15 = vld [vmem:[%s18510_s9 + $0x80] sm:$0xff]   ;;  %v3784_v43 = vadd.f32 %v18850_v14, %v16097_v6  ;;  %v18851_v57 = vld [vmem:[#allocation108_spill] sm:$0xff]  ;;  %v18857_v48 = vld [vmem:[#allocation79_spill] sm:$0xff] }
 0x2e4   : > { %13020 = vmatpush3.bf16.msra.mxu0 %v13958_v25  ;;  %4834 = vst [vmem:[#allocation2 + $0xa8] sm:$0xff] %v4802_v23  ;;  %v4800_v31 = vmax.f32 %v16157_v18, 0.0  ;;  %v4771_v5 = vadd.f32 %v15949_v37, %v4732_v44  ;;  %v4730_v13 = vadd.f32 %v4653_v49, %v4408_v55  ;;  %v4901_v34 = vmul.bf16 %v18849_v26, %v16159_v30  ;;  %v18854_v7 = vld [vmem:[#allocation77_spill] sm:$0xff]  ;;  %v16195_v24 = vld [vmem:[%s18510_s9 + $0x138] sm:$0xff]   ;;  %v18860_v51 = vld [vmem:[#allocation110_spill] sm:$0xff] }
 0x2e5   : > { %13021 = vmatprep.subr.bf16.mxu0 %v13961_v20  ;;  %13064 = vmatpush3.bf16.msra.mxu1 %v13960_v11  ;;  %v4108_v25 = vadd.f32 %v18851_v57, %v3786_v63  ;;  %v12903_v32 = vpop.f32.mrf.mxu1  ;;  %v4902_v35 = vmul.bf16 %v18852_v40, %v16163_v4  ;;  %v4411_v11 = vadd.f32 %v16030_v50, %v4105_v2  ;;  %v18855_v38 = vld [vmem:[#allocation109_spill] sm:$0xff]  ;;  %v18858_v61 = vld [vmem:[#allocation72_spill] sm:$0xff] }
 0x2e6   : > { %12942 = vmatmul.mubr.bf16.gmra.mxu0 %v4967_v16  ;;  %13065 = vmatprep.subr.bf16.mxu1 %v13962_v29  ;;  %4832 = vst [vmem:[#allocation2 + $0x98] sm:$0xff] %v4800_v31  ;;  %v4803_v9 = vmax.f32 %v4771_v5, 0.0  ;;  %v4769_v6 = vadd.f32 %v15949_v37, %v4730_v13  ;;  %v4735_v17 = vadd.f32 %v12903_v32, %v4413_v33  ;;  %v18859_v18 = vld [vmem:[#allocation81_spill] sm:$0xff]  ;;  %v4862_v2 = vld [vmem:[#allocation2 + $0x77] sm:$0xff]  ;;  %v16203_v16 = vpop.f32.mrf.mxu0 }
 0x2e7   : > { %12986 = vmatmul.mubr.bf16.gmra.mxu1 %v4901_v34  ;;  %12945 = vmatprep.mubr.bf16.mxu0 %v4968_v62  ;;  %v3789_v56 = vadd.f32 %v18854_v7, %v18853_v60  ;;  %v4106_v63 = vadd.f32 %v18855_v38, %v3784_v43  ;;  %v4414_v19 = vadd.f32 %v16048_v39, %v4108_v25  ;;  %v4666_v27 = vpop.f32.mrf.mxu1  ;;  %v13965_v62 = vld [vmem:[%s18510_s9 + $0xc8] sm:$0xff]   ;;  %v18861_v57 = vld [vmem:[#allocation112_spill] sm:$0xff]  ;;  %v18864_v38 = vld [vmem:[#allocation113_spill] sm:$0xff] }
 0x2e8   : > { %12989 = vmatprep.mubr.bf16.mxu1 %v4902_v35  ;;  %13022 = vmatpush3.bf16.msra.mxu0 %v13961_v20  ;;  %4835 = vst [vmem:[#allocation2 + $0xb0] sm:$0xff] %v4803_v9  ;;  %v4801_v50 = vmax.f32 %v4769_v6, 0.0  ;;  %v4774_v10 = vadd.f32 %v15949_v37, %v4735_v17  ;;  %v4733_v55 = vadd.f32 %v4666_v27, %v4411_v11  ;;  %v18856_v39 = vld [vmem:[#allocation70_spill] sm:$0xff]  ;;  %v13966_v27 = vld [vmem:[%s18510_s9 + $0xc0] sm:$0xff]  }
 0x2e9   : > { %v4970_v46 = vpack.c.bf16 %v4803_v9, %v4802_v23  ;;  %13066 = vmatpush3.bf16.msra.mxu1 %v13962_v29  ;;  %13023 = vmatprep.subr.bf16.mxu0 %v13964_v15  ;;  %v3787_v20 = vadd.f32 %v18857_v48, %v18856_v39  ;;  %v3790_v44 = vadd.f32 %v18859_v18, %v18858_v61  ;;  %v12904_v23 = vpop.f32.mrf.mxu1  ;;  %v4863_v33 = vld [vmem:[#allocation2 + $0x7f] sm:$0xff]  ;;  %v4864_v49 = vld [vmem:[#allocation2 + $0x87] sm:$0xff]  ;;  %v4865_v43 = vld [vmem:[#allocation2 + $0x8f] sm:$0xff] }
 0x2ea   : > { %v4111_v45 = vadd.f32 %v18860_v51, %v3789_v56  ;;  %v4412_v29 = vadd.f32 %v16077_v28, %v4106_v63  ;;  %13067 = vmatprep.subr.bf16.mxu1 %v13963_v41  ;;  %4833 = vst [vmem:[#allocation2 + $0xa0] sm:$0xff] %v4801_v50  ;;  %v4806_v5 = vmax.f32 %v4774_v10, 0.0  ;;  %v16206_v13 = vadd.f32 %v15949_v37, %v4733_v55  ;;  %v18862_v60 = vld [vmem:[#allocation26_spill] sm:$0xff]  ;;  %v18863_v56 = vld [vmem:[#allocation84_spill] sm:$0xff]  ;;  %v18867_v48 = vld [vmem:[#allocation85_spill] sm:$0xff] }
 0x2eb   : > { %v4736_v34 = vadd.f32 %v12904_v23, %v4414_v19  ;;  %v16208_v14 = vpack.c.bf16 %v4863_v33, %v4862_v2  ;;  %v4109_v25 = vadd.f32 %v18861_v57, %v3787_v20  ;;  %v4669_v32 = vpop.f32.mrf.mxu1  ;;  %v16212_v35 = vpack.c.bf16 %v4865_v43, %v4864_v49  ;;  %v18866_v39 = vld [vmem:[#allocation76_spill] sm:$0xff]  ;;  %v18868_v61 = vld [vmem:[#allocation82_spill] sm:$0xff]  ;;  %v18873_v43 = vld [vmem:[#allocation87_spill] sm:$0xff] }
 0x2ec   : > { %v4417_v28 = vadd.f32 %v16101_v59, %v4111_v45  ;;  %v4969_v11 = vpack.c.bf16 %v4801_v50, %v4800_v31  ;;  %13024 = vmatpush3.bf16.msra.mxu0 %v13964_v15  ;;  %4838 = vst [vmem:[#allocation2 + $0xc8] sm:$0xff] %v4806_v5  ;;  %v4804_v9 = vmax.f32 %v16206_v13, 0.0  ;;  %v4734_v17 = vadd.f32 %v4669_v32, %v4412_v29  ;;  %v18865_v31 = vld [vmem:[#allocation27_spill] sm:$0xff]  ;;  %v18871_v49 = vld [vmem:[#allocation86_spill] sm:$0xff] }
 0x2ed   : > { %v4775_v6 = vadd.f32 %v15949_v37, %v4736_v34  ;;  %v4903_v7 = vmul.bf16 %v18862_v60, %v16208_v14  ;;  %13068 = vmatpush3.bf16.msra.mxu1 %v13963_v41  ;;  %13105 = vmatprep.subr.bf16.mxu0 %v16195_v24  ;;  %v3788_v59 = vadd.f32 %v18863_v56, %v16149_v58  ;;  %v12907_v19 = vpop.f32.mrf.mxu1  ;;  %v4376_v41 = vpop.f32.mrf.mxu0  ;;  %v18872_v34 = vld [vmem:[#allocation80_spill] sm:$0xff] }
 0x2ee   : > { %v4112_v63 = vadd.f32 %v18864_v38, %v3790_v44  ;;  %v4904_v15 = vmul.bf16 %v18865_v31, %v16212_v35  ;;  %12946 = vmatmul.mubr.bf16.gmra.mxu0 %v4969_v11  ;;  %13069 = vmatprep.subr.bf16.mxu1 %v13965_v62  ;;  %v4415_v50 = vadd.f32 %v16129_v22, %v4109_v25  ;;  %v18869_v44 = vld [vmem:[#allocation115_spill] sm:$0xff]  ;;  %v18875_v38 = vld [vmem:[#allocation117_spill] sm:$0xff] }
 0x2ef   : > { %4836 = vst [vmem:[#allocation2 + $0xb8] sm:$0xff] %v4804_v9  ;;  %v4807_v10 = vmax.f32 %v4775_v6, 0.0  ;;  %v4773_v55 = vadd.f32 %v15949_v37, %v4734_v17  ;;  %v4739_v58 = vadd.f32 %v12907_v19, %v4417_v28  ;;  %12990 = vmatmul.mubr.bf16.gmra.mxu1 %v4903_v7  ;;  %12949 = vmatprep.mubr.bf16.mxu0 %v4970_v46  ;;  %v4682_v29 = vpop.f32.mrf.mxu1  ;;  %v18870_v46 = vld [vmem:[#allocation78_spill] sm:$0xff]  ;;  %v4866_v32 = vld [vmem:[#allocation2 + $0x97] sm:$0xff]  ;;  %v12864_v17 = vpop.f32.mrf.mxu0 }
 0x2f0   : > { %v3793_v20 = vadd.f32 %v18867_v48, %v18866_v39  ;;  %v3470_v18 = vadd.f32 %v18868_v61, %v16004_v36  ;;  %v4110_v51 = vadd.f32 %v18869_v44, %v3788_v59  ;;  %v4418_v45 = vadd.f32 %v16153_v42, %v4112_v63  ;;  %12993 = vmatprep.mubr.bf16.mxu1 %v4904_v15  ;;  %v18874_v36 = vld [vmem:[#allocation116_spill] sm:$0xff]  ;;  %v4869_v59 = vld [vmem:[#allocation2 + $0xaf] sm:$0xff] }
 0x2f1   : > { %4839 = vst [vmem:[#allocation2 + $0xd0] sm:$0xff] %v4807_v10  ;;  %v4805_v22 = vmax.f32 %v4773_v55, 0.0  ;;  %v4778_v23 = vadd.f32 %v15949_v37, %v4739_v58  ;;  %v4737_v2 = vadd.f32 %v4682_v29, %v4415_v50  ;;  %v4972_v33 = vpack.c.bf16 %v4807_v10, %v4806_v5  ;;  %13070 = vmatpush3.bf16.msra.mxu1 %v13965_v62  ;;  %v12908_v42 = vpop.f32.mrf.mxu1  ;;  %v4867_v11 = vld [vmem:[#allocation2 + $0x9f] sm:$0xff]  ;;  %v4868_v6 = vld [vmem:[#allocation2 + $0xa7] sm:$0xff] }
 0x2f2   : > { %v3791_v13 = vadd.f32 %v18871_v49, %v18870_v46  ;;  %v3794_v57 = vadd.f32 %v18873_v43, %v18872_v34  ;;  %v4115_v25 = vadd.f32 %v18874_v36, %v3793_v20  ;;  %v4416_v28 = vadd.f32 %v16181_v21, %v4110_v51  ;;  %13071 = vmatprep.subr.bf16.mxu1 %v13966_v27  ;;  %v16252_v10 = vld [vmem:[%s18510_s9 + $0x178] sm:$0xff]   ;;  %v18878_v44 = vld [vmem:[#allocation118_spill] sm:$0xff] }
 0x2f3   : > { %4837 = vst [vmem:[#allocation2 + $0xc0] sm:$0xff] %v4805_v22  ;;  %v4810_v7 = vmax.f32 %v4778_v23, 0.0  ;;  %v4776_v62 = vadd.f32 %v15949_v37, %v4737_v2  ;;  %v4740_v5 = vadd.f32 %v12908_v42, %v4418_v45  ;;  %v16243_v56 = vpack.c.bf16 %v4867_v11, %v4866_v32  ;;  %v4685_v15 = vpop.f32.mrf.mxu1  ;;  %v18876_v48 = vld [vmem:[#allocation28_spill] sm:$0xff]  ;;  %v4379_v23 = vpop.f32.mrf.mxu0 }
 0x2f4   : > { %v4113_v63 = vadd.f32 %v18875_v38, %v3791_v13  ;;  %v4421_v19 = vadd.f32 %v16203_v16, %v4115_v25  ;;  %v16247_v21 = vpack.c.bf16 %v4869_v59, %v4868_v6  ;;  %v4971_v50 = vpack.c.bf16 %v4805_v22, %v4804_v9  ;;  %v18877_v61 = vld [vmem:[#allocation88_spill] sm:$0xff]  ;;  %v18879_v9 = vld [vmem:[#allocation29_spill] sm:$0xff] }
 0x2f5   : > { %4842 = vst [vmem:[#allocation2 + $0xe8] sm:$0xff] %v4810_v7  ;;  %v4808_v55 = vmax.f32 %v4776_v62, 0.0  ;;  %v4779_v58 = vadd.f32 %v15949_v37, %v4740_v5  ;;  %v4738_v39 = vadd.f32 %v4685_v15, %v4416_v28  ;;  %v4905_v20 = vmul.bf16 %v18876_v48, %v16243_v56  ;;  %13072 = vmatpush3.bf16.msra.mxu1 %v13966_v27  ;;  %v12911_v45 = vpop.f32.mrf.mxu1 }
 0x2f6   : > { %v3792_v16 = vadd.f32 %v18877_v61, %v3470_v18  ;;  %v4116_v51 = vadd.f32 %v18878_v44, %v3794_v57  ;;  %v4906_v29 = vmul.bf16 %v18879_v9, %v16247_v21  ;;  %12950 = vmatmul.mubr.bf16.gmra.mxu0 %v4971_v50  ;;  %v4419_v22 = vadd.f32 %v4376_v41, %v4113_v63  ;;  %v4870_v28 = vld [vmem:[#allocation2 + $0xb7] sm:$0xff] }
 0x2f7   : > { %4840 = vst [vmem:[#allocation2 + $0xd8] sm:$0xff] %v4808_v55  ;;  %v4811_v2 = vmax.f32 %v4779_v58, 0.0  ;;  %v4777_v46 = vadd.f32 %v15949_v37, %v4738_v39  ;;  %v4743_v49 = vadd.f32 %v12911_v45, %v4421_v19  ;;  %12994 = vmatmul.mubr.bf16.gmra.mxu1 %v4905_v20  ;;  %12953 = vmatprep.mubr.bf16.mxu0 %v4972_v33  ;;  %v4698_v18 = vpop.f32.mrf.mxu1  ;;  %v18880_v19 = vld [vmem:[#allocation30_spill] sm:$0xff]  ;;  %v18881_v50 = vld [vmem:[#allocation31_spill] sm:$0xff] }
 0x2f8   : > { %v4114_v27 = vadd.f32 %v15933_v12, %v3792_v16  ;;  %v4422_v13 = vadd.f32 %v12864_v17, %v4116_v51  ;;  %12997 = vmatprep.mubr.bf16.mxu1 %v4906_v29  ;;  %13153 = vmatprep.subr.bf16.mxu1 %v16252_v10  ;;  %v4741_v41 = vadd.f32 %v4698_v18, %v4419_v22  ;;  %v4873_v17 = vld [vmem:[#allocation2 + $0xcf] sm:$0xff] }
 0x2f9   : > { %4843 = vst [vmem:[#allocation2 + $0xf0] sm:$0xff] %v4811_v2  ;;  %v4809_v34 = vmax.f32 %v4777_v46, 0.0  ;;  %v4782_v43 = vadd.f32 %v15949_v37, %v4743_v49  ;;  %v4974_v57 = vpack.c.bf16 %v4811_v2, %v4810_v7  ;;  %v12912_v25 = vpop.f32.mrf.mxu1  ;;  %v5411_v39 = vld [vmem:[#allocation2 + $0x9] sm:$0xff]  ;;  %v5412_v20 = vld [vmem:[#allocation2 + $0x11] sm:$0xff] }
 0x2fa   : > { %v4420_v36 = vadd.f32 %v4379_v23, %v4114_v27  ;;  %v4871_v42 = vld [vmem:[#allocation2 + $0xbf] sm:$0xff]  ;;  %v4872_v32 = vld [vmem:[#allocation2 + $0xc7] sm:$0xff]  ;;  %v4780_v12 = vadd.f32 %v15949_v37, %v4741_v41  ;;  %v4744_v11 = vadd.f32 %v12912_v25, %v4422_v13  ;;  %v5443_v51 = vpack.c.bf16 %v5412_v20, %v5411_v39  ;;  %v5420_v20 = vld [vmem:[#allocation2 + $0x51] sm:$0xff] }
 0x2fb   : > { %4841 = vst [vmem:[#allocation2 + $0xe0] sm:$0xff] %v4809_v34  ;;  %v4814_v33 = vmax.f32 %v4782_v43, 0.0  ;;  %v16266_v6 = vpack.c.bf16 %v4871_v42, %v4870_v28  ;;  %v4701_v62 = vpop.f32.mrf.mxu1  ;;  %v16268_v5 = vpack.c.bf16 %v4873_v17, %v4872_v32  ;;  %v4973_v59 = vpack.c.bf16 %v4809_v34, %v4808_v55  ;;  %v18883_v27 = vld [vmem:[#allocation33_spill] sm:$0xff]  ;;  %v18884_v18 = vld [vmem:[#allocation6_spill] sm:$0xff] }
 0x2fc   : > { %v4812_v38 = vmax.f32 %v4780_v12, 0.0  ;;  %v4783_v7 = vadd.f32 %v15949_v37, %v4744_v11  ;;  %v4742_v63 = vadd.f32 %v4701_v62, %v4420_v36  ;;  %v5459_v34 = vmul.bf16 %v18884_v18, %v5443_v51  ;;  %v5413_v43 = vld [vmem:[#allocation2 + $0x19] sm:$0xff]  ;;  %v5414_v41 = vld [vmem:[#allocation2 + $0x21] sm:$0xff]  ;;  %v5415_v25 = vld [vmem:[#allocation2 + $0x29] sm:$0xff] }
 0x2fd   : > { %4846 = vst [vmem:[#allocation2 + $0x108] sm:$0xff] %v4814_v33  ;;  %v4907_v15 = vmul.bf16 %v18880_v19, %v16266_v6  ;;  %v4908_v58 = vmul.bf16 %v18881_v50, %v16268_v5  ;;  %v16289_v36 = vpack.c.bf16 %v5414_v41, %v5413_v43  ;;  %v18885_v12 = vld [vmem:[#allocation7_spill] sm:$0xff]  ;;  %v18886_v17 = vld [vmem:[#allocation34_spill] sm:$0xff] }
 0x2fe   : > { %12954 = vmatmul.mubr.bf16.gmra.mxu0 %v4973_v59  ;;  %4844 = vst [vmem:[#allocation2 + $0xf8] sm:$0xff] %v4812_v38  ;;  %v4815_v61 = vmax.f32 %v4783_v7, 0.0  ;;  %v4781_v16 = vadd.f32 %v15949_v37, %v4742_v63  ;;  %v4874_v44 = vld [vmem:[#allocation2 + $0xd7] sm:$0xff]  ;;  %v5418_v7 = vld [vmem:[#allocation2 + $0x41] sm:$0xff] }
 0x2ff   : > { %12998 = vmatmul.mubr.bf16.gmra.mxu1 %v4907_v15  ;;  %12957 = vmatprep.mubr.bf16.mxu0 %v4974_v57  ;;  %v18882_v37 = vld [vmem:[#allocation32_spill] sm:$0xff]  ;;  %v5460_v11 = vmul.bf16 %v18885_v12, %v16289_v36  ;;  %v13968_v59 = vld [vmem:[%s18510_s9 + $0x130] sm:$0xff]   ;;  %v18887_v63 = vld [vmem:[#allocation5_spill] sm:$0xff] }
 0x300   : > { %13001 = vmatprep.mubr.bf16.mxu1 %v4908_v58  ;;  %4847 = vst [vmem:[#allocation2 + $0x110] sm:$0xff] %v4815_v61  ;;  %v16276_v55 = vmax.f32 %v4781_v16, 0.0  ;;  %v4877_v22 = vld [vmem:[#allocation2 + $0xef] sm:$0xff]  ;;  %v5781_v15 = vmul.bf16 %v18887_v63, %v16053_v47  ;;  %v18888_v58 = vld [vmem:[#allocation8_spill] sm:$0xff]  ;;  %v18889_v47 = vld [vmem:[#allocation9_spill] sm:$0xff] }
 0x301   : > { %v5416_v57 = vld [vmem:[#allocation2 + $0x31] sm:$0xff]  ;;  %v5419_v16 = vld [vmem:[#allocation2 + $0x49] sm:$0xff] }
 0x302   : > { %v4875_v45 = vld [vmem:[#allocation2 + $0xdf] sm:$0xff]  ;;  %v4876_v29 = vld [vmem:[#allocation2 + $0xe7] sm:$0xff]  ;;  %4845 = vst [vmem:[#allocation2 + $0x100] sm:$0xff] %v16276_v55  ;;  %v4975_v46 = vpack.c.bf16 %v16276_v55, %v4812_v38  ;;  %v16291_v32 = vpack.c.bf16 %v5416_v57, %v5415_v25  ;;  %v16312_v51 = vpack.c.bf16 %v5420_v20, %v5419_v16  ;;  %v5424_v43 = vld [vmem:[#allocation2 + $0x71] sm:$0xff] }
 0x303   : > { %v16279_v23 = vpack.c.bf16 %v4875_v45, %v4874_v44  ;;  %v16281_v2 = vpack.c.bf16 %v4877_v22, %v4876_v29  ;;  %v5417_v38 = vld [vmem:[#allocation2 + $0x39] sm:$0xff]  ;;  %v13969_v44 = vld [vmem:[%s18510_s9 + $0x128] sm:$0xff]   ;;  %v13973_v41 = vld [vmem:[%s18510_s9 + $0x170] sm:$0xff]  }
 0x304   : > { %v5461_v39 = vmul.bf16 %v18888_v58, %v16291_v32  ;;  %v16307_v61 = vpack.c.bf16 %v5418_v7, %v5417_v38  ;;  %v18890_v29 = vld [vmem:[#allocation10_spill] sm:$0xff]  ;;  %v5425_v7 = vld [vmem:[#allocation2 + $0x79] sm:$0xff]  ;;  %v5428_v20 = vld [vmem:[#allocation2 + $0x91] sm:$0xff] }
 0x305   : > { %v4909_v49 = vmul.bf16 %v18882_v37, %v16279_v23  ;;  %v4910_v13 = vmul.bf16 %v18883_v27, %v16281_v2  ;;  %v4878_v28 = vld [vmem:[#allocation2 + $0xf7] sm:$0xff]  ;;  %v5463_v22 = vmul.bf16 %v18890_v29, %v16312_v51  ;;  %v5423_v57 = vld [vmem:[#allocation2 + $0x69] sm:$0xff] }
 0x306   : > { %12958 = vmatmul.mubr.bf16.gmra.mxu0 %v4975_v46  ;;  %v5462_v45 = vmul.bf16 %v18889_v47, %v16307_v61  ;;  %v5421_v46 = vld [vmem:[#allocation2 + $0x59] sm:$0xff]  ;;  %v16330_v25 = vpack.c.bf16 %v5424_v43, %v5423_v57 }
 0x307   : > { %13002 = vmatmul.mubr.bf16.gmra.mxu1 %v4909_v49  ;;  %13025 = vmatprep.mubr.bf16.mxu0 %v5459_v34  ;;  %v5422_v49 = vld [vmem:[#allocation2 + $0x61] sm:$0xff]  ;;  %v5783_v34 = vmul.bf16 %v18824_v54, %v16107_v0  ;;  %v13971_v0 = vld [vmem:[%s18510_s9 + $0x118] sm:$0xff]  }
 0x308   : > { %13005 = vmatprep.mubr.bf16.mxu1 %v4910_v13  ;;  %v13970_v13 = vld [vmem:[%s18510_s9 + $0x120] sm:$0xff]  }
 0x309   : > { %v4879_v42 = vld [vmem:[#allocation2 + $0xff] sm:$0xff] }
 0x30a   : > { %v16293_v33 = vpack.c.bf16 %v4879_v42, %v4878_v28  ;;  %v13975_v28 = vld [vmem:[%s18510_s9 + $0x168] sm:$0xff]   ;;  %v18891_v42 = vld [vmem:[#allocation11_spill] sm:$0xff]  ;;  %v5429_v43 = vld [vmem:[#allocation2 + $0x99] sm:$0xff] }
 0x30b   : > { %v13980_v57 = vld [vmem:[%s18510_s9 + $0x100] sm:$0xff]  }
 0x30c   : > { %v4911_v62 = vmul.bf16 %v18886_v17, %v16293_v33 }
 0x30e   : > { %13026 = vmatmul.mubr.bf16.vlgmr.msra.gmra.mxu0 %v5460_v11 }
 0x30f   : > { %13006 = vmatmul.mubr.bf16.gmra.mxu1 %v4911_v62  ;;  %13106 = vmatpush3.bf16.msra.mxu0 %v16195_v24  ;;  %v5782_v24 = vmul.bf16 %v18818_v1, %v16057_v8  ;;  %v16328_v8 = vpack.c.bf16 %v5422_v49, %v5421_v46  ;;  %v5784_v62 = vmul.bf16 %v18836_v52, %v16111_v3  ;;  %v13976_v3 = vld [vmem:[%s18510_s9 + $0x160] sm:$0xff]  }
 0x310   : > { %13073 = vmatprep.mubr.bf16.mxu1 %v5781_v15  ;;  %13029 = vmatprep.mubr.bf16.mxu0 %v5461_v39  ;;  %v5426_v15 = vld [vmem:[#allocation2 + $0x81] sm:$0xff]  ;;  %v5785_v39 = vmul.bf16 %v18840_v53, %v16159_v30  ;;  %v5786_v49 = vmul.bf16 %v18849_v26, %v16163_v4  ;;  %v13979_v4 = vld [vmem:[%s18510_s9 + $0x150] sm:$0xff]  }
 0x311   : > { %13107 = vmatprep.subr.bf16.mxu0 %v13968_v59  ;;  %v5464_v11 = vmul.bf16 %v18891_v42, %v16328_v8  ;;  %v16353_v16 = vpack.c.bf16 %v5426_v15, %v5425_v7  ;;  %v13977_v30 = vld [vmem:[%s18510_s9 + $0x108] sm:$0xff]   ;;  %v18895_v15 = vld [vmem:[#allocation15_spill] sm:$0xff] }
 0x312   : > { %v13981_v7 = vld [vmem:[%s18510_s9 + $0x148] sm:$0xff]  }
 0x313   : > { %13108 = vmatpush3.bf16.msra.mxu0 %v13968_v59  ;;  %v18892_v59 = vld [vmem:[#allocation12_spill] sm:$0xff] }
 0x314   : > { %13109 = vmatprep.subr.bf16.mxu0 %v13969_v44  ;;  %v5465_v38 = vmul.bf16 %v18892_v59, %v16330_v25 }
 0x316   : > { %13030 = vmatmul.mubr.bf16.gmra.mxu0 %v5462_v45 }
 0x317   : > { %13074 = vmatmul.mubr.bf16.vlgmr.msra.gmra.mxu1 %v5782_v24  ;;  %13033 = vmatprep.mubr.bf16.mxu0 %v5463_v22  ;;  %v13978_v24 = vld [vmem:[%s18510_s9 + $0x158] sm:$0xff]   ;;  %v18893_v22 = vld [vmem:[#allocation13_spill] sm:$0xff] }
 0x318   : > { %13077 = vmatprep.mubr.bf16.mxu1 %v5783_v34  ;;  %13110 = vmatpush3.bf16.msra.mxu0 %v13969_v44  ;;  %v5427_v44 = vld [vmem:[#allocation2 + $0x89] sm:$0xff]  ;;  %v5466_v46 = vmul.bf16 %v18893_v22, %v16353_v16 }
 0x319   : > { %13111 = vmatprep.subr.bf16.mxu0 %v13970_v13  ;;  %13154 = vmatpush3.bf16.msra.mxu1 %v16252_v10  ;;  %v13974_v10 = vld [vmem:[%s18510_s9 + $0x110] sm:$0xff]   ;;  %v16355_v45 = vpack.c.bf16 %v5428_v20, %v5427_v44  ;;  %v18896_v20 = vld [vmem:[#allocation21_spill] sm:$0xff] }
 0x31a   : > { %13155 = vmatprep.subr.bf16.mxu1 %v13973_v41  ;;  %v5433_v44 = vld [vmem:[#allocation2 + $0xb9] sm:$0xff] }
 0x31c   : > { %13112 = vmatpush3.bf16.msra.mxu0 %v13970_v13  ;;  %v18894_v13 = vld [vmem:[#allocation14_spill] sm:$0xff] }
 0x31d   : > { %13113 = vmatprep.subr.bf16.mxu0 %v13971_v0  ;;  %13156 = vmatpush3.bf16.msra.mxu1 %v13973_v41  ;;  %v5467_v34 = vmul.bf16 %v18894_v13, %v16355_v45  ;;  %v5430_v41 = vld [vmem:[#allocation2 + $0xa1] sm:$0xff] }
 0x31e   : > { %13034 = vmatmul.mubr.bf16.gmra.mxu0 %v5464_v11  ;;  %13157 = vmatprep.subr.bf16.mxu1 %v13975_v28  ;;  %v16377_v11 = vpack.c.bf16 %v5430_v41, %v5429_v43  ;;  %v18897_v41 = vld [vmem:[#allocation18_spill] sm:$0xff] }
 0x31f   : > { %13078 = vmatmul.mubr.bf16.gmra.mxu1 %v5784_v62  ;;  %13037 = vmatprep.mubr.bf16.mxu0 %v5465_v38  ;;  %v5431_v62 = vld [vmem:[#allocation2 + $0xa9] sm:$0xff] }
 0x320   : > { %13081 = vmatprep.mubr.bf16.mxu1 %v5785_v39  ;;  %13114 = vmatpush3.bf16.msra.mxu0 %v13971_v0  ;;  %v5787_v0 = vmul.bf16 %v18852_v40, %v16208_v14  ;;  %v16384_v14 = vld [vmem:[%s18510_s9 + $0x1b8] sm:$0xff]   ;;  %v5788_v39 = vmul.bf16 %v18862_v60, %v16212_v35 }
 0x321   : > { %13115 = vmatprep.subr.bf16.mxu0 %v13974_v10  ;;  %13158 = vmatpush3.bf16.msra.mxu1 %v13975_v28  ;;  %v5432_v28 = vld [vmem:[#allocation2 + $0xb1] sm:$0xff] }
 0x322   : > { %13159 = vmatprep.subr.bf16.mxu1 %v13976_v3  ;;  %v16379_v38 = vpack.c.bf16 %v5432_v28, %v5431_v62  ;;  %v18898_v28 = vld [vmem:[#allocation16_spill] sm:$0xff] }
 0x323   : > { %v5437_v62 = vld [vmem:[#allocation2 + $0xd9] sm:$0xff] }
 0x324   : > { %13116 = vmatpush3.bf16.msra.mxu0 %v13974_v10  ;;  %v5468_v10 = vmul.bf16 %v18895_v15, %v16377_v11 }
 0x325   : > { %13117 = vmatprep.subr.bf16.mxu0 %v13977_v30  ;;  %13160 = vmatpush3.bf16.msra.mxu1 %v13976_v3  ;;  %v5469_v3 = vmul.bf16 %v18896_v20, %v16379_v38 }
 0x326   : > { %13038 = vmatmul.mubr.bf16.gmra.mxu0 %v5466_v46  ;;  %13161 = vmatprep.subr.bf16.mxu1 %v13978_v24  ;;  %v5436_v46 = vld [vmem:[#allocation2 + $0xd1] sm:$0xff] }
 0x327   : > { %13082 = vmatmul.mubr.bf16.gmra.mxu1 %v5786_v49  ;;  %13041 = vmatprep.mubr.bf16.mxu0 %v5467_v34  ;;  %v13982_v49 = vld [vmem:[%s18510_s9 + $0x140] sm:$0xff]   ;;  %v5435_v34 = vld [vmem:[#allocation2 + $0xc9] sm:$0xff] }
 0x328   : > { %13085 = vmatprep.mubr.bf16.mxu1 %v5787_v0  ;;  %13118 = vmatpush3.bf16.msra.mxu0 %v13977_v30  ;;  %v5434_v30 = vld [vmem:[#allocation2 + $0xc1] sm:$0xff]  ;;  %v16403_v43 = vpack.c.bf16 %v5436_v46, %v5435_v34  ;;  %v5790_v0 = vmul.bf16 %v18876_v48, %v16247_v21  ;;  %v5792_v46 = vmul.bf16 %v18880_v19, %v16268_v5  ;;  %v5441_v34 = vld [vmem:[#allocation2 + $0xf9] sm:$0xff] }
 0x329   : > { %13162 = vmatpush3.bf16.msra.mxu1 %v13978_v24  ;;  %13119 = vmatprep.subr.bf16.mxu0 %v13980_v57  ;;  %v5789_v24 = vmul.bf16 %v18865_v31, %v16243_v56  ;;  %v16401_v35 = vpack.c.bf16 %v5434_v30, %v5433_v44  ;;  %v16408_v56 = vld [vmem:[%s18510_s9 + $0x1f8] sm:$0xff]   ;;  %v5439_v44 = vld [vmem:[#allocation2 + $0xe9] sm:$0xff]  ;;  %v18899_v30 = vld [vmem:[#allocation17_spill] sm:$0xff]  ;;  %v5794_v5 = vmul.bf16 %v18882_v37, %v16281_v2 }
 0x32a   : > { %13163 = vmatprep.subr.bf16.mxu1 %v13979_v4  ;;  %v5795_v19 = vmul.bf16 %v18883_v27, %v16293_v33  ;;  %v13984_v33 = vld [vmem:[%s18510_s9 + $0x1b0] sm:$0xff]  }
 0x32c   : > { %13120 = vmatpush3.bf16.msra.mxu0 %v13980_v57  ;;  %v5470_v57 = vmul.bf16 %v18897_v41, %v16401_v35 }
 0x32d   : > { %13164 = vmatpush3.bf16.msra.mxu1 %v13979_v4  ;;  %13201 = vmatprep.subr.bf16.mxu0 %v16384_v14  ;;  %v5471_v4 = vmul.bf16 %v18898_v28, %v16403_v43 }
 0x32e   : > { %13042 = vmatmul.mubr.bf16.gmra.mxu0 %v5468_v10  ;;  %13165 = vmatprep.subr.bf16.mxu1 %v13981_v7  ;;  %v5438_v10 = vld [vmem:[#allocation2 + $0xe1] sm:$0xff] }
 0x32f   : > { %13086 = vmatmul.mubr.bf16.gmra.mxu1 %v5788_v39  ;;  %13045 = vmatprep.mubr.bf16.mxu0 %v5469_v3  ;;  %v5440_v39 = vld [vmem:[#allocation2 + $0xf1] sm:$0xff]  ;;  %v16419_v3 = vpack.c.bf16 %v5438_v10, %v5437_v62  ;;  %v6056_v62 = vld [vmem:[#allocation2 + $0x20] sm:$0xff] }
 0x330   : > { %13089 = vmatprep.mubr.bf16.mxu1 %v5789_v24  ;;  %v16421_v21 = vpack.c.bf16 %v5440_v39, %v5439_v44  ;;  %v18901_v10 = vld [vmem:[#allocation36_spill] sm:$0xff] }
 0x331   : > { %13166 = vmatpush3.bf16.msra.mxu1 %v13981_v7  ;;  %v5791_v7 = vmul.bf16 %v18879_v9, %v16266_v6  ;;  %v5472_v24 = vmul.bf16 %v18899_v30, %v16419_v3  ;;  %v18900_v6 = vld [vmem:[#allocation35_spill] sm:$0xff]  ;;  %v6055_v39 = vld [vmem:[#allocation2 + $0x18] sm:$0xff] }
 0x332   : > { %13167 = vmatprep.subr.bf16.mxu1 %v13982_v49  ;;  %v6087_v44 = vpack.c.bf16 %v6056_v62, %v6055_v39  ;;  %v6059_v62 = vld [vmem:[#allocation2 + $0x38] sm:$0xff]  ;;  %v13985_v39 = vld [vmem:[%s18510_s9 + $0x1a8] sm:$0xff]  }
 0x335   : > { %13168 = vmatpush3.bf16.msra.mxu1 %v13982_v49  ;;  %v5473_v49 = vmul.bf16 %v18900_v6, %v16421_v21 }
 0x336   : > { %13046 = vmatmul.mubr.bf16.gmra.mxu0 %v5470_v57  ;;  %13249 = vmatprep.subr.bf16.mxu1 %v16408_v56  ;;  %v5442_v57 = vld [vmem:[#allocation2 + $0x101] sm:$0xff] }
 0x337   : > { %13090 = vmatmul.mubr.bf16.gmra.mxu1 %v5790_v0  ;;  %13049 = vmatprep.mubr.bf16.mxu0 %v5471_v4  ;;  %v5793_v0 = vmul.bf16 %v18881_v50, %v16279_v23  ;;  %v16431_v4 = vpack.c.bf16 %v5442_v57, %v5441_v34  ;;  %v5763_v23 = vld [vmem:[#allocation2 + $0x107] sm:$0xff] }
 0x338   : > { %13093 = vmatprep.mubr.bf16.mxu1 %v5791_v7  ;;  %v6057_v34 = vld [vmem:[#allocation2 + $0x28] sm:$0xff]  ;;  %v6060_v57 = vld [vmem:[#allocation2 + $0x40] sm:$0xff] }
 0x339   : > { %v5474_v7 = vmul.bf16 %v18901_v10, %v16431_v4 }
 0x33e   : > { %13050 = vmatmul.mubr.bf16.gmra.mxu0 %v5472_v24  ;;  %v5764_v24 = vld [vmem:[#allocation2 + $0x10f] sm:$0xff] }
 0x33f   : > { %13094 = vmatmul.mubr.bf16.gmra.mxu1 %v5792_v46  ;;  %13053 = vmatprep.mubr.bf16.mxu0 %v5473_v49  ;;  %v16439_v46 = vpack.c.bf16 %v5764_v24, %v5763_v23  ;;  %v6058_v49 = vld [vmem:[#allocation2 + $0x30] sm:$0xff]  ;;  %v6061_v23 = vld [vmem:[#allocation2 + $0x48] sm:$0xff]  ;;  %v6063_v24 = vld [vmem:[#allocation2 + $0x58] sm:$0xff] }
 0x340   : > { %13097 = vmatprep.mubr.bf16.mxu1 %v5793_v0  ;;  %v16441_v0 = vpack.c.bf16 %v6058_v49, %v6057_v34  ;;  %v6410_v49 = vmul.bf16 %v18885_v12, %v16291_v32  ;;  %v13986_v34 = vld [vmem:[%s18510_s9 + $0x1a0] sm:$0xff]   ;;  %v6066_v32 = vld [vmem:[#allocation2 + $0x70] sm:$0xff] }
 0x341   : > { %v5796_v2 = vmul.bf16 %v18886_v17, %v16439_v46 }
 0x346   : > { %13054 = vmatmul.mubr.bf16.gmra.mxu0 %v5474_v7  ;;  %v6409_v7 = vmul.bf16 %v18884_v18, %v16289_v36 }
 0x347   : > { %13098 = vmatmul.mubr.bf16.gmra.mxu1 %v5794_v5  ;;  %13121 = vmatprep.mubr.bf16.mxu0 %v6087_v44  ;;  %v6062_v5 = vld [vmem:[#allocation2 + $0x50] sm:$0xff]  ;;  %v6064_v44 = vld [vmem:[#allocation2 + $0x60] sm:$0xff] }
 0x348   : > { %13101 = vmatprep.mubr.bf16.mxu1 %v5795_v19  ;;  %v16451_v19 = vpack.c.bf16 %v6060_v57, %v6059_v62  ;;  %v16458_v36 = vpack.c.bf16 %v6062_v5, %v6061_v23  ;;  %v6411_v57 = vmul.bf16 %v18888_v58, %v16307_v61  ;;  %v13987_v62 = vld [vmem:[%s18510_s9 + $0x198] sm:$0xff]   ;;  %v6068_v61 = vld [vmem:[#allocation2 + $0x80] sm:$0xff] }
 0x34e   : > { %13122 = vmatmul.mubr.bf16.vlgmr.msra.gmra.mxu0 %v16441_v0 }
 0x34f   : > { %13102 = vmatmul.mubr.bf16.gmra.mxu1 %v5796_v2  ;;  %13202 = vmatpush3.bf16.msra.mxu0 %v16384_v14  ;;  %v16462_v14 = vpack.c.bf16 %v6064_v44, %v6063_v24  ;;  %v13989_v2 = vld [vmem:[%s18510_s9 + $0x1f0] sm:$0xff]   ;;  %v6067_v44 = vld [vmem:[#allocation2 + $0x78] sm:$0xff]  ;;  %v6413_v24 = vmul.bf16 %v18890_v29, %v16328_v8  ;;  %v6072_v8 = vld [vmem:[#allocation2 + $0xa0] sm:$0xff] }
 0x350   : > { %13169 = vmatprep.mubr.bf16.mxu1 %v6409_v7  ;;  %13125 = vmatprep.mubr.bf16.mxu0 %v16451_v19  ;;  %v6065_v7 = vld [vmem:[#allocation2 + $0x68] sm:$0xff]  ;;  %v16485_v23 = vpack.c.bf16 %v6068_v61, %v6067_v44  ;;  %v6071_v61 = vld [vmem:[#allocation2 + $0x98] sm:$0xff]  ;;  %v6415_v44 = vmul.bf16 %v18892_v59, %v16353_v16  ;;  %v6076_v16 = vld [vmem:[#allocation2 + $0xc0] sm:$0xff] }
 0x351   : > { %13203 = vmatprep.subr.bf16.mxu0 %v13984_v33  ;;  %v16481_v5 = vpack.c.bf16 %v6066_v32, %v6065_v7  ;;  %v16507_v7 = vpack.c.bf16 %v6072_v8, %v6071_v61  ;;  %v6075_v8 = vld [vmem:[#allocation2 + $0xb8] sm:$0xff]  ;;  %v13998_v61 = vld [vmem:[%s18510_s9 + $0x1c0] sm:$0xff]  }
 0x353   : > { %13204 = vmatpush3.bf16.msra.mxu0 %v13984_v33  ;;  %v13991_v33 = vld [vmem:[%s18510_s9 + $0x1e8] sm:$0xff]  }
 0x354   : > { %13205 = vmatprep.subr.bf16.mxu0 %v13985_v39 }
 0x356   : > { %13126 = vmatmul.mubr.bf16.gmra.mxu0 %v16458_v36 }
 0x357   : > { %13170 = vmatmul.mubr.bf16.vlgmr.msra.gmra.mxu1 %v6410_v49  ;;  %13129 = vmatprep.mubr.bf16.mxu0 %v16462_v14  ;;  %v13992_v49 = vld [vmem:[%s18510_s9 + $0x1e0] sm:$0xff]  }
 0x358   : > { %13173 = vmatprep.mubr.bf16.mxu1 %v6411_v57  ;;  %13206 = vmatpush3.bf16.msra.mxu0 %v13985_v39  ;;  %v6412_v39 = vmul.bf16 %v18889_v47, %v16312_v51  ;;  %v6070_v51 = vld [vmem:[#allocation2 + $0x90] sm:$0xff]  ;;  %v13994_v57 = vld [vmem:[%s18510_s9 + $0x1d8] sm:$0xff]  }
 0x359   : > { %13207 = vmatprep.subr.bf16.mxu0 %v13986_v34  ;;  %13250 = vmatpush3.bf16.msra.mxu1 %v16408_v56  ;;  %v13990_v56 = vld [vmem:[%s18510_s9 + $0x190] sm:$0xff]  }
 0x35a   : > { %13251 = vmatprep.subr.bf16.mxu1 %v13989_v2 }
 0x35c   : > { %13208 = vmatpush3.bf16.msra.mxu0 %v13986_v34  ;;  %v13993_v34 = vld [vmem:[%s18510_s9 + $0x188] sm:$0xff]  }
 0x35d   : > { %13209 = vmatprep.subr.bf16.mxu0 %v13987_v62  ;;  %13252 = vmatpush3.bf16.msra.mxu1 %v13989_v2  ;;  %v6069_v2 = vld [vmem:[#allocation2 + $0x88] sm:$0xff] }
 0x35e   : > { %13130 = vmatmul.mubr.bf16.gmra.mxu0 %v16481_v5  ;;  %13253 = vmatprep.subr.bf16.mxu1 %v13991_v33  ;;  %v16503_v32 = vpack.c.bf16 %v6070_v51, %v6069_v2  ;;  %v6417_v2 = vmul.bf16 %v18894_v13, %v16377_v11  ;;  %v6418_v11 = vmul.bf16 %v18895_v15, %v16379_v38 }
 0x35f   : > { %13174 = vmatmul.mubr.bf16.gmra.mxu1 %v6412_v39  ;;  %13133 = vmatprep.mubr.bf16.mxu0 %v16485_v23  ;;  %v13995_v39 = vld [vmem:[%s18510_s9 + $0x1d0] sm:$0xff]   ;;  %v6420_v38 = vmul.bf16 %v18897_v41, %v16403_v43  ;;  %v6422_v43 = vmul.bf16 %v18899_v30, %v16421_v21 }
 0x360   : > { %13177 = vmatprep.mubr.bf16.mxu1 %v6413_v24  ;;  %13210 = vmatpush3.bf16.msra.mxu0 %v13987_v62  ;;  %v6414_v62 = vmul.bf16 %v18891_v42, %v16330_v25  ;;  %v6074_v25 = vld [vmem:[#allocation2 + $0xb0] sm:$0xff]  ;;  %v13997_v24 = vld [vmem:[%s18510_s9 + $0x1c8] sm:$0xff]  }
 0x361   : > { %13211 = vmatprep.subr.bf16.mxu0 %v13990_v56  ;;  %13254 = vmatpush3.bf16.msra.mxu1 %v13991_v33  ;;  %v13996_v33 = vld [vmem:[%s18510_s9 + $0x180] sm:$0xff]  }
 0x362   : > { %13255 = vmatprep.subr.bf16.mxu1 %v13992_v49 }
 0x364   : > { %13212 = vmatpush3.bf16.msra.mxu0 %v13990_v56  ;;  %v16522_v56 = vld [vmem:[%s18510_s9 + $0x238] sm:$0xff]  }
 0x365   : > { %13213 = vmatprep.subr.bf16.mxu0 %v13993_v34  ;;  %13256 = vmatpush3.bf16.msra.mxu1 %v13992_v49  ;;  %v6073_v49 = vld [vmem:[#allocation2 + $0xa8] sm:$0xff] }
 0x366   : > { %13134 = vmatmul.mubr.bf16.gmra.mxu0 %v16503_v32  ;;  %13257 = vmatprep.subr.bf16.mxu1 %v13994_v57  ;;  %v16527_v51 = vpack.c.bf16 %v6074_v25, %v6073_v49  ;;  %v16551_v49 = vld [vmem:[#allocation2 + $0xf8] sm:$0xff] }
 0x367   : > { %13178 = vmatmul.mubr.bf16.gmra.mxu1 %v6414_v62  ;;  %13137 = vmatprep.mubr.bf16.mxu0 %v16507_v7  ;;  %v6080_v62 = vld [vmem:[#allocation2 + $0xe0] sm:$0xff] }
 0x368   : > { %13181 = vmatprep.mubr.bf16.mxu1 %v6415_v44  ;;  %13214 = vmatpush3.bf16.msra.mxu0 %v13993_v34  ;;  %v6416_v34 = vmul.bf16 %v18893_v22, %v16355_v45  ;;  %v6078_v45 = vld [vmem:[#allocation2 + $0xd0] sm:$0xff] }
 0x369   : > { %13258 = vmatpush3.bf16.msra.mxu1 %v13994_v57  ;;  %13215 = vmatprep.subr.bf16.mxu0 %v13996_v33  ;;  %v16531_v57 = vpack.c.bf16 %v6076_v16, %v6075_v8  ;;  %v6419_v16 = vmul.bf16 %v18896_v20, %v16401_v35  ;;  %v6081_v8 = vld [vmem:[#allocation2 + $0xe8] sm:$0xff]  ;;  %v6421_v35 = vmul.bf16 %v18898_v28, %v16419_v3 }
 0x36a   : > { %13259 = vmatprep.subr.bf16.mxu1 %v13995_v39  ;;  %v6423_v3 = vmul.bf16 %v18900_v6, %v16431_v4 }
 0x36c   : > { %13216 = vmatpush3.bf16.msra.mxu0 %v13996_v33  ;;  %v6077_v33 = vld [vmem:[#allocation2 + $0xc8] sm:$0xff] }
 0x36d   : > { %13260 = vmatpush3.bf16.msra.mxu1 %v13995_v39  ;;  %13297 = vmatprep.subr.bf16.mxu0 %v16522_v56  ;;  %v16541_v44 = vpack.c.bf16 %v6078_v45, %v6077_v33  ;;  %v6079_v39 = vld [vmem:[#allocation2 + $0xd8] sm:$0xff]  ;;  %v6684_v45 = vld [vmem:[#allocation2 + $0x2f] sm:$0xff] }
 0x36e   : > { %13138 = vmatmul.mubr.bf16.gmra.mxu0 %v16527_v51  ;;  %13261 = vmatprep.subr.bf16.mxu1 %v13997_v24  ;;  %v16545_v25 = vpack.c.bf16 %v6080_v62, %v6079_v39  ;;  %v6086_v62 = vld [vmem:[#allocation2 + $0x110] sm:$0xff]  ;;  %v6085_v39 = vld [vmem:[#allocation2 + $0x108] sm:$0xff] }
 0x36f   : > { %13182 = vmatmul.mubr.bf16.gmra.mxu1 %v6416_v34  ;;  %13141 = vmatprep.mubr.bf16.mxu0 %v16531_v57 }
 0x370   : > { %13185 = vmatprep.mubr.bf16.mxu1 %v6417_v2  ;;  %v6101_v2 = vpack.c.bf16 %v16276_v55, %v16551_v49 }
 0x371   : > { %13262 = vmatpush3.bf16.msra.mxu1 %v13997_v24  ;;  %v6082_v24 = vld [vmem:[#allocation2 + $0xf0] sm:$0xff] }
 0x372   : > { %13263 = vmatprep.subr.bf16.mxu1 %v13998_v61  ;;  %v16553_v34 = vpack.c.bf16 %v6082_v24, %v6081_v8  ;;  %v6391_v24 = vld [vmem:[#allocation2 + $0x109] sm:$0xff]  ;;  %v6392_v8 = vld [vmem:[#allocation2 + $0x111] sm:$0xff] }
 0x375   : > { %13264 = vmatpush3.bf16.msra.mxu1 %v13998_v61  ;;  %v6683_v61 = vld [vmem:[#allocation2 + $0x27] sm:$0xff] }
 0x376   : > { %13142 = vmatmul.mubr.bf16.gmra.mxu0 %v16541_v44  ;;  %v6715_v33 = vpack.c.bf16 %v6684_v45, %v6683_v61  ;;  %v16570_v61 = vpack.c.bf16 %v6392_v8, %v6391_v24  ;;  %v6688_v45 = vld [vmem:[#allocation2 + $0x4f] sm:$0xff]  ;;  %v6689_v24 = vld [vmem:[#allocation2 + $0x57] sm:$0xff] }
 0x377   : > { %13186 = vmatmul.mubr.bf16.gmra.mxu1 %v6418_v11  ;;  %13145 = vmatprep.mubr.bf16.mxu0 %v16545_v25  ;;  %v16562_v11 = vpack.c.bf16 %v6086_v62, %v6085_v39  ;;  %v14000_v39 = vld [vmem:[%s18510_s9 + $0x230] sm:$0xff]  }
 0x378   : > { %13189 = vmatprep.mubr.bf16.mxu1 %v6419_v16  ;;  %v6731_v55 = vmul.bf16 %v18887_v63, %v6715_v33  ;;  %v6686_v16 = vld [vmem:[#allocation2 + $0x3f] sm:$0xff]  ;;  %v6424_v33 = vmul.bf16 %v18901_v10, %v16570_v61 }
 0x37e   : > { %13146 = vmatmul.mubr.bf16.gmra.mxu0 %v16553_v34 }
 0x37f   : > { %13190 = vmatmul.mubr.bf16.gmra.mxu1 %v6420_v38  ;;  %13149 = vmatprep.mubr.bf16.mxu0 %v6101_v2  ;;  %v6685_v38 = vld [vmem:[#allocation2 + $0x37] sm:$0xff]  ;;  %v6687_v2 = vld [vmem:[#allocation2 + $0x47] sm:$0xff] }
 0x380   : > { %13193 = vmatprep.mubr.bf16.mxu1 %v6421_v35  ;;  %v6716_v35 = vpack.c.bf16 %v6686_v16, %v6685_v38  ;;  %v6717_v21 = vpack.c.bf16 %v6688_v45, %v6687_v2  ;;  %v6692_v38 = vld [vmem:[#allocation2 + $0x6f] sm:$0xff] }
 0x381   : > { %v14001_v2 = vld [vmem:[%s18510_s9 + $0x228] sm:$0xff]  }
 0x382   : > { %v6732_v62 = vmul.bf16 %v18818_v1, %v6716_v35 }
 0x386   : > { %13150 = vmatmul.mubr.bf16.gmra.mxu0 %v16562_v11 }
 0x387   : > { %13194 = vmatmul.mubr.bf16.gmra.mxu1 %v6422_v43  ;;  %13217 = vmatprep.mubr.bf16.mxu0 %v6731_v55  ;;  %v6690_v43 = vld [vmem:[#allocation2 + $0x5f] sm:$0xff]  ;;  %v6733_v55 = vmul.bf16 %v18824_v54, %v6717_v21 }
 0x388   : > { %13197 = vmatprep.mubr.bf16.mxu1 %v6423_v3  ;;  %v6691_v3 = vld [vmem:[#allocation2 + $0x67] sm:$0xff]  ;;  %v6718_v8 = vpack.c.bf16 %v6690_v43, %v6689_v24 }
 0x389   : > { %v6719_v45 = vpack.c.bf16 %v6692_v38, %v6691_v3  ;;  %v6693_v3 = vld [vmem:[#allocation2 + $0x77] sm:$0xff] }
 0x38a   : > { %v6734_v21 = vmul.bf16 %v18836_v52, %v6718_v8 }
 0x38c   : > { %v12931_v4 = vpop.f32.mrf.mxu0 }
 0x38e   : > { %13218 = vmatmul.mubr.bf16.vlgmr.msra.gmra.mxu0 %v6732_v62  ;;  %v5075_v16 = vpop.f32.mrf.mxu0 }
 0x38f   : > { %13198 = vmatmul.mubr.bf16.gmra.mxu1 %v6424_v33  ;;  %13298 = vmatpush3.bf16.msra.mxu0 %v16522_v56  ;;  %v6735_v56 = vmul.bf16 %v18840_v53, %v6719_v45  ;;  %v6694_v33 = vld [vmem:[#allocation2 + $0x7f] sm:$0xff]  ;;  %v6696_v45 = vld [vmem:[#allocation2 + $0x8f] sm:$0xff] }
 0x390   : > { %13265 = vmatprep.mubr.bf16.mxu1 %v16441_v0  ;;  %13221 = vmatprep.mubr.bf16.mxu0 %v6733_v55  ;;  %v12932_v35 = vpop.f32.mrf.mxu0  ;;  %v14002_v0 = vld [vmem:[%s18510_s9 + $0x220] sm:$0xff]   ;;  %v6720_v8 = vpack.c.bf16 %v6694_v33, %v6693_v3 }
 0x391   : > { %13299 = vmatprep.subr.bf16.mxu0 %v14000_v39  ;;  %v6695_v55 = vld [vmem:[#allocation2 + $0x87] sm:$0xff] }
 0x392   : > { %v5078_v62 = vpop.f32.mrf.mxu0  ;;  %v6721_v52 = vpack.c.bf16 %v6696_v45, %v6695_v55  ;;  %v14004_v55 = vld [vmem:[%s18510_s9 + $0x210] sm:$0xff]  }
 0x393   : > { %13300 = vmatpush3.bf16.msra.mxu0 %v14000_v39 }
 0x394   : > { %13301 = vmatprep.subr.bf16.mxu0 %v14001_v2 }
 0x395   : > { %v12935_v43 = vpop.f32.mrf.mxu0 }
 0x396   : > { %13222 = vmatmul.mubr.bf16.gmra.mxu0 %v6734_v21  ;;  %v12979_v24 = vpop.f32.mrf.mxu1  ;;  %v14003_v21 = vld [vmem:[%s18510_s9 + $0x218] sm:$0xff]  }
 0x397   : > { %13266 = vmatmul.mubr.bf16.vlgmr.msra.gmra.mxu1 %v16451_v19  ;;  %13225 = vmatprep.mubr.bf16.mxu0 %v6735_v56  ;;  %v16590_v38 = vadd.f32 %v12979_v24, %v12931_v4  ;;  %v5091_v39 = vpop.f32.mrf.mxu0  ;;  %v6698_v24 = vld [vmem:[#allocation2 + $0x9f] sm:$0xff] }
 0x398   : > { %13269 = vmatprep.mubr.bf16.mxu1 %v16458_v36  ;;  %13302 = vmatpush3.bf16.msra.mxu0 %v14001_v2  ;;  %v5284_v53 = vpop.f32.mrf.mxu1  ;;  %v6736_v36 = vmul.bf16 %v18849_v26, %v6720_v8  ;;  %v6737_v2 = vmul.bf16 %v18852_v40, %v6721_v52  ;;  %v6697_v8 = vld [vmem:[#allocation2 + $0x97] sm:$0xff] }
 0x399   : > { %13303 = vmatprep.subr.bf16.mxu0 %v14002_v0  ;;  %v16596_v54 = vadd.f32 %v5284_v53, %v5075_v16  ;;  %v12936_v19 = vpop.f32.mrf.mxu0  ;;  %v6699_v16 = vld [vmem:[#allocation2 + $0xa7] sm:$0xff]  ;;  %v6722_v45 = vpack.c.bf16 %v6698_v24, %v6697_v8 }
 0x39a   : > { %v12980_v56 = vpop.f32.mrf.mxu1 }
 0x39b   : > { %v16598_v1 = vadd.f32 %v12980_v56, %v12932_v35  ;;  %v5094_v4 = vpop.f32.mrf.mxu0  ;;  %v6700_v56 = vld [vmem:[#allocation2 + $0xaf] sm:$0xff] }
 0x39c   : > { %13304 = vmatpush3.bf16.msra.mxu0 %v14002_v0  ;;  %v5287_v33 = vpop.f32.mrf.mxu1  ;;  %v6723_v26 = vpack.c.bf16 %v6700_v56, %v6699_v16  ;;  %v14006_v16 = vld [vmem:[%s18510_s9 + $0x200] sm:$0xff]  }
 0x39d   : > { %13305 = vmatprep.subr.bf16.mxu0 %v14003_v21  ;;  %v16605_v3 = vadd.f32 %v5287_v33, %v5078_v62  ;;  %v12939_v53 = vpop.f32.mrf.mxu0  ;;  %v14005_v62 = vld [vmem:[%s18510_s9 + $0x208] sm:$0xff]  }
 0x39e   : > { %13226 = vmatmul.mubr.bf16.gmra.mxu0 %v6736_v36  ;;  %v12983_v35 = vpop.f32.mrf.mxu1 }
 0x39f   : > { %13270 = vmatmul.mubr.bf16.gmra.mxu1 %v16462_v14  ;;  %13229 = vmatprep.mubr.bf16.mxu0 %v6737_v2  ;;  %v16608_v0 = vadd.f32 %v12983_v35, %v12935_v43  ;;  %v5107_v52 = vpop.f32.mrf.mxu0  ;;  %v6702_v35 = vld [vmem:[#allocation2 + $0xbf] sm:$0xff] }
 0x3a0   : > { %13273 = vmatprep.mubr.bf16.mxu1 %v16481_v5  ;;  %13306 = vmatpush3.bf16.msra.mxu0 %v14003_v21  ;;  %v5300_v40 = vpop.f32.mrf.mxu1  ;;  %v6738_v5 = vmul.bf16 %v18862_v60, %v6722_v45  ;;  %v6739_v21 = vmul.bf16 %v18865_v31, %v6723_v26  ;;  %v6701_v45 = vld [vmem:[#allocation2 + $0xb7] sm:$0xff] }
 0x3a1   : > { %13307 = vmatprep.subr.bf16.mxu0 %v14004_v55  ;;  %v16614_v36 = vadd.f32 %v5300_v40, %v5091_v39  ;;  %v12940_v14 = vpop.f32.mrf.mxu0  ;;  %v6703_v39 = vld [vmem:[#allocation2 + $0xc7] sm:$0xff]  ;;  %v6724_v56 = vpack.c.bf16 %v6702_v35, %v6701_v45 }
 0x3a2   : > { %v12984_v33 = vpop.f32.mrf.mxu1 }
 0x3a3   : > { %v16616_v2 = vadd.f32 %v12984_v33, %v12936_v19  ;;  %v5110_v43 = vpop.f32.mrf.mxu0  ;;  %v6704_v33 = vld [vmem:[#allocation2 + $0xcf] sm:$0xff] }
 0x3a4   : > { %13308 = vmatpush3.bf16.msra.mxu0 %v14004_v55  ;;  %v5303_v24 = vpop.f32.mrf.mxu1  ;;  %v6725_v60 = vpack.c.bf16 %v6704_v33, %v6703_v39  ;;  %v6707_v39 = vld [vmem:[#allocation2 + $0xe7] sm:$0xff] }
 0x3a5   : > { %13309 = vmatprep.subr.bf16.mxu0 %v14005_v62  ;;  %v16623_v8 = vadd.f32 %v5303_v24, %v5094_v4 }
 0x3a6   : > { %v12943_v40 = vpop.f32.mrf.mxu0  ;;  %13230 = vmatmul.mubr.bf16.gmra.mxu0 %v6738_v5 }
 0x3a7   : > { %v12987_v19 = vpop.f32.mrf.mxu1  ;;  %13274 = vmatmul.mubr.bf16.gmra.mxu1 %v16485_v23  ;;  %13233 = vmatprep.mubr.bf16.mxu0 %v6739_v21  ;;  %v6740_v21 = vmul.bf16 %v18876_v48, %v6724_v56  ;;  %v6708_v56 = vld [vmem:[#allocation2 + $0xef] sm:$0xff] }
 0x3a8   : > { %v16626_v55 = vadd.f32 %v12987_v19, %v12939_v53  ;;  %13277 = vmatprep.mubr.bf16.mxu1 %v16503_v32  ;;  %v5123_v26 = vpop.f32.mrf.mxu0  ;;  %13310 = vmatpush3.bf16.msra.mxu0 %v14005_v62  ;;  %v6741_v32 = vmul.bf16 %v18879_v9, %v6725_v60  ;;  %v6706_v19 = vld [vmem:[#allocation2 + $0xdf] sm:$0xff]  ;;  %v6727_v60 = vpack.c.bf16 %v6708_v56, %v6707_v39 }
 0x3a9   : > { %v5316_v31 = vpop.f32.mrf.mxu1  ;;  %13311 = vmatprep.subr.bf16.mxu0 %v14006_v16 }
 0x3aa   : > { %v16629_v4 = vadd.f32 %v5316_v31, %v5107_v52  ;;  %v12944_v5 = vpop.f32.mrf.mxu0  ;;  %v6705_v31 = vld [vmem:[#allocation2 + $0xd7] sm:$0xff] }
 0x3ab   : > { %v12988_v24 = vpop.f32.mrf.mxu1 }
 0x3ac   : > { %v16631_v63 = vadd.f32 %v12988_v24, %v12940_v14  ;;  %v5126_v23 = vpop.f32.mrf.mxu0  ;;  %13312 = vmatpush3.bf16.msra.mxu0 %v14006_v16  ;;  %v6726_v16 = vpack.c.bf16 %v6706_v19, %v6705_v31 }
 0x3ad   : > { %v5319_v53 = vpop.f32.mrf.mxu1 }
 0x3ae   : > { %v16635_v35 = vadd.f32 %v5319_v53, %v5110_v43  ;;  %v12947_v62 = vpop.f32.mrf.mxu0  ;;  %13234 = vmatmul.mubr.bf16.gmra.mxu0 %v6740_v21 }
 0x3af   : > { %v12991_v45 = vpop.f32.mrf.mxu1  ;;  %13278 = vmatmul.mubr.bf16.gmra.mxu1 %v16507_v7  ;;  %13237 = vmatprep.mubr.bf16.mxu0 %v6741_v32  ;;  %v18902_v7 = vld [vmem:[#allocation30_spill] sm:$0xff] }
 0x3b0   : > { %v16638_v52 = vadd.f32 %v12991_v45, %v12943_v40  ;;  %13281 = vmatprep.mubr.bf16.mxu1 %v16527_v51  ;;  %v5139_v14 = vpop.f32.mrf.mxu0  ;;  %v6742_v32 = vmul.bf16 %v18902_v7, %v6726_v16  ;;  %v6743_v40 = vmul.bf16 %v18881_v50, %v6727_v60  ;;  %v6710_v45 = vld [vmem:[#allocation2 + $0xff] sm:$0xff] }
 0x3b1   : > { %v5332_v33 = vpop.f32.mrf.mxu1 }
 0x3b2   : > { %v16641_v24 = vadd.f32 %v5332_v33, %v5123_v26  ;;  %v12948_v43 = vpop.f32.mrf.mxu0  ;;  %v6709_v26 = vld [vmem:[#allocation2 + $0xf7] sm:$0xff] }
 0x3b3   : > { %v12992_v53 = vpop.f32.mrf.mxu1  ;;  %v6728_v56 = vpack.c.bf16 %v6710_v45, %v6709_v26  ;;  %v7312_v45 = vld [vmem:[#allocation2 + $0x31] sm:$0xff] }
 0x3b4   : > { %v16643_v21 = vadd.f32 %v12992_v53, %v12944_v5  ;;  %v16645_v9 = vpop.f32.mrf.mxu0 }
 0x3b5   : > { %v5335_v48 = vpop.f32.mrf.mxu1 }
 0x3b6   : > { %v16649_v51 = vadd.f32 %v5335_v48, %v5126_v23  ;;  %v12951_v19 = vpop.f32.mrf.mxu0  ;;  %13238 = vmatmul.mubr.bf16.gmra.mxu0 %v6742_v32  ;;  %v6744_v32 = vmul.bf16 %v18882_v37, %v6728_v56 }
 0x3b7   : > { %v12995_v31 = vpop.f32.mrf.mxu1  ;;  %13282 = vmatmul.mubr.bf16.gmra.mxu1 %v16531_v57  ;;  %13241 = vmatprep.mubr.bf16.mxu0 %v6743_v40  ;;  %v6713_v40 = vld [vmem:[#allocation2 + $0x117] sm:$0xff] }
 0x3b8   : > { %v16652_v39 = vadd.f32 %v12995_v31, %v12947_v62  ;;  %13285 = vmatprep.mubr.bf16.mxu1 %v16541_v44  ;;  %v5155_v5 = vpop.f32.mrf.mxu0  ;;  %v6745_v62 = vmul.bf16 %v18883_v27, %v16439_v46  ;;  %v6714_v44 = vld [vmem:[#allocation2 + $0x11f] sm:$0xff] }
 0x3b9   : > { %v5348_v16 = vpop.f32.mrf.mxu1  ;;  %v6730_v56 = vpack.c.bf16 %v6714_v44, %v6713_v40  ;;  %v7032_v46 = vld [vmem:[#allocation2 + $0x100] sm:$0xff] }
 0x3ba   : > { %v16655_v33 = vadd.f32 %v5348_v16, %v5139_v14  ;;  %v12952_v60 = vpop.f32.mrf.mxu0  ;;  %v7311_v16 = vld [vmem:[#allocation2 + $0x29] sm:$0xff]  ;;  %v7313_v40 = vld [vmem:[#allocation2 + $0x39] sm:$0xff]  ;;  %v7314_v44 = vld [vmem:[#allocation2 + $0x41] sm:$0xff] }
 0x3bb   : > { %v12996_v53 = vpop.f32.mrf.mxu1  ;;  %v7343_v37 = vpack.c.bf16 %v7312_v45, %v7311_v16  ;;  %v7315_v16 = vld [vmem:[#allocation2 + $0x49] sm:$0xff] }
 0x3bc   : > { %v16657_v48 = vadd.f32 %v12996_v53, %v12948_v43  ;;  %v16659_v23 = vpop.f32.mrf.mxu0 }
 0x3bd   : > { %18903 = vst [vmem:[#allocation37_spill] sm:$0xff] %v16659_v23  ;;  %v16662_v57 = vpop.f32.mrf.mxu1 }
 0x3be   : > { %18904 = vst [vmem:[#allocation39_spill] sm:$0xff] %v16662_v57  ;;  %v12955_v31 = vpop.f32.mrf.mxu0  ;;  %13242 = vmatmul.mubr.bf16.gmra.mxu0 %v6744_v32 }
 0x3bf   : > { %v12999_v14 = vpop.f32.mrf.mxu1  ;;  %13286 = vmatmul.mubr.bf16.gmra.mxu1 %v16545_v25  ;;  %13245 = vmatprep.mubr.bf16.mxu0 %v6745_v62  ;;  %v6746_v25 = vmul.bf16 %v18886_v17, %v6730_v56  ;;  %v7359_v62 = vmul.bf16 %v18884_v18, %v7343_v37  ;;  %v7344_v56 = vpack.c.bf16 %v7314_v44, %v7313_v40  ;;  %v14103_v18 = vld [vmem:[#allocation2] sm:$0xff] }
 0x3c0   : > { %v16667_v43 = vadd.f32 %v12999_v14, %v12951_v19  ;;  %13289 = vmatprep.mubr.bf16.mxu1 %v16553_v34  ;;  %v5171_v26 = vpop.f32.mrf.mxu0  ;;  %v7050_v34 = vpack.c.bf16 %v7032_v46, %v16551_v49  ;;  %v7317_v40 = vld [vmem:[#allocation2 + $0x59] sm:$0xff]  ;;  %v7318_v44 = vld [vmem:[#allocation2 + $0x61] sm:$0xff] }
 0x3c1   : > { %v5364_v53 = vpop.f32.mrf.mxu1 }
 0x3c2   : > { %v16670_v50 = vadd.f32 %v5364_v53, %v5155_v5  ;;  %v12956_v27 = vpop.f32.mrf.mxu0  ;;  %v7316_v5 = vld [vmem:[#allocation2 + $0x51] sm:$0xff] }
 0x3c3   : > { %v13000_v7 = vpop.f32.mrf.mxu1  ;;  %v7345_v17 = vpack.c.bf16 %v7316_v5, %v7315_v16 }
 0x3c4   : > { %v16672_v32 = vadd.f32 %v13000_v7, %v12952_v60  ;;  %v16674_v23 = vpop.f32.mrf.mxu0 }
 0x3c5   : > { %18905 = vst [vmem:[#allocation38_spill] sm:$0xff] %v16674_v23  ;;  %v16677_v19 = vpop.f32.mrf.mxu1  ;;  %v16686_v23 = vpack.c.bf16 %v14103_v18, %v14103_v18 }
 0x3c6   : > { %18906 = vst [vmem:[#allocation40_spill] sm:$0xff] %v16677_v19  ;;  %v12959_v45 = vpop.f32.mrf.mxu0  ;;  %13246 = vmatmul.mubr.bf16.gmra.mxu0 %v6746_v25 }
 0x3c7   : > { %v13003_v14 = vpop.f32.mrf.mxu1  ;;  %13290 = vmatmul.mubr.bf16.gmra.mxu1 %v7050_v34  ;;  %13313 = vmatprep.mubr.bf16.mxu0 %v7359_v62 }
 0x3c8   : > { %v16681_v7 = vadd.f32 %v13003_v14, %v12955_v31  ;;  %13293 = vmatprep.mubr.bf16.mxu1 %v16562_v11  ;;  %v5187_v60 = vpop.f32.mrf.mxu0  ;;  %v7360_v31 = vmul.bf16 %v18885_v12, %v7344_v56  ;;  %v7361_v11 = vmul.bf16 %v18888_v58, %v7345_v17  ;;  %v7319_v56 = vld [vmem:[#allocation2 + $0x69] sm:$0xff] }
 0x3c9   : > { %v5380_v53 = vpop.f32.mrf.mxu1 }
 0x3ca   : > { %v16684_v49 = vadd.f32 %v5380_v53, %v5171_v26  ;;  %v12960_v37 = vpop.f32.mrf.mxu0  ;;  %v7320_v26 = vld [vmem:[#allocation2 + $0x71] sm:$0xff]  ;;  %v7346_v53 = vpack.c.bf16 %v7318_v44, %v7317_v40  ;;  %v7322_v44 = vld [vmem:[#allocation2 + $0x81] sm:$0xff] }
 0x3cb   : > { %v13004_v46 = vpop.f32.mrf.mxu1  ;;  %v7347_v17 = vpack.c.bf16 %v7320_v26, %v7319_v56 }
 0x3cc   : > { %v16688_v25 = vadd.f32 %v13004_v46, %v12956_v27  ;;  %v16690_v34 = vpop.f32.mrf.mxu0 }
 0x3cd   : > { %18907 = vst [vmem:[#allocation41_spill] sm:$0xff] %v16690_v34  ;;  %v16693_v62 = vpop.f32.mrf.mxu1  ;;  %v7363_v40 = vmul.bf16 %v18890_v29, %v7347_v17 }
 0x3ce   : > { %18908 = vst [vmem:[#allocation46_spill] sm:$0xff] %v16693_v62  ;;  %v13027_v5 = vpop.f32.mrf.mxu0  ;;  %13314 = vmatmul.mubr.bf16.vlgmr.msra.gmra.mxu0 %v7360_v31 }
 0x3cf   : > { %v13007_v14 = vpop.f32.mrf.mxu1  ;;  %13294 = vmatmul.mubr.bf16.gmra.mxu1 %v16686_v23  ;;  %v5703_v18 = vadd.f32 %v13027_v5, %v16590_v38  ;;  %13317 = vmatprep.mubr.bf16.mxu0 %v7361_v11  ;;  %v7362_v38 = vmul.bf16 %v18889_v47, %v7346_v53  ;;  %v7324_v5 = vld [vmem:[#allocation2 + $0x91] sm:$0xff] }
 0x3d0   : > { %v16698_v27 = vadd.f32 %v13007_v14, %v12959_v45  ;;  %v5574_v16 = vpop.f32.mrf.mxu0  ;;  %13361 = vmatprep.mubr.bf16.mxu1 %v16686_v23 }
 0x3d1   : > { %v5396_v46 = vpop.f32.mrf.mxu1  ;;  %v5701_v12 = vadd.f32 %v5574_v16, %v16596_v54  ;;  %v7321_v54 = vld [vmem:[#allocation2 + $0x79] sm:$0xff]  ;;  %v7323_v16 = vld [vmem:[#allocation2 + $0x89] sm:$0xff] }
 0x3d2   : > { %v16701_v58 = vadd.f32 %v5396_v46, %v5187_v60  ;;  %v13028_v34 = vpop.f32.mrf.mxu0  ;;  %v7348_v14 = vpack.c.bf16 %v7322_v44, %v7321_v54  ;;  %v7326_v44 = vld [vmem:[#allocation2 + $0xa1] sm:$0xff] }
 0x3d3   : > { %v13008_v31 = vpop.f32.mrf.mxu1  ;;  %v5704_v62 = vadd.f32 %v13028_v34, %v16598_v1 }
 0x3d4   : > { %v16704_v19 = vadd.f32 %v13008_v31, %v12960_v37  ;;  %v5577_v57 = vpop.f32.mrf.mxu0 }
 0x3d5   : > { %v16707_v45 = vpop.f32.mrf.mxu1  ;;  %v16710_v11 = vadd.f32 %v5577_v57, %v16605_v3  ;;  %v7349_v57 = vpack.c.bf16 %v7324_v5, %v7323_v16 }
 0x3d6   : > { %v13031_v60 = vpop.f32.mrf.mxu0  ;;  %13318 = vmatmul.mubr.bf16.gmra.mxu0 %v7362_v38 }
 0x3d7   : > { %v13075_v26 = vpop.f32.mrf.mxu1  ;;  %v5707_v1 = vadd.f32 %v13031_v60, %v16608_v0  ;;  %13321 = vmatprep.mubr.bf16.mxu0 %v7363_v40  ;;  %v7364_v0 = vmul.bf16 %v18891_v42, %v7348_v14  ;;  %v7365_v54 = vmul.bf16 %v18892_v59, %v7349_v57  ;;  %v7328_v60 = vld [vmem:[#allocation2 + $0xb1] sm:$0xff]  ;;  %v7327_v14 = vld [vmem:[#allocation2 + $0xa9] sm:$0xff] }
 0x3d8   : > { %v16714_v37 = vadd.f32 %v13075_v26, %v5703_v18  ;;  %v5590_v34 = vpop.f32.mrf.mxu0 }
 0x3d9   : > { %v5896_v53 = vpop.f32.mrf.mxu1  ;;  %v5705_v3 = vadd.f32 %v5590_v34, %v16614_v36  ;;  %v7325_v36 = vld [vmem:[#allocation2 + $0x99] sm:$0xff] }
 0x3da   : > { %v16717_v56 = vadd.f32 %v5896_v53, %v5701_v12  ;;  %v13032_v46 = vpop.f32.mrf.mxu0  ;;  %v7350_v34 = vpack.c.bf16 %v7326_v44, %v7325_v36  ;;  %v7330_v44 = vld [vmem:[#allocation2 + $0xc1] sm:$0xff] }
 0x3db   : > { %v13076_v17 = vpop.f32.mrf.mxu1  ;;  %v5708_v31 = vadd.f32 %v13032_v46, %v16616_v2 }
 0x3dc   : > { %v16720_v38 = vadd.f32 %v13076_v17, %v5704_v62  ;;  %v5593_v29 = vpop.f32.mrf.mxu0 }
 0x3dd   : > { %v16723_v18 = vpop.f32.mrf.mxu1  ;;  %v16726_v40 = vadd.f32 %v5593_v29, %v16623_v8  ;;  %v7351_v8 = vpack.c.bf16 %v7328_v60, %v7327_v14 }
 0x3de   : > { %v13035_v12 = vpop.f32.mrf.mxu0  ;;  %13322 = vmatmul.mubr.bf16.gmra.mxu0 %v7364_v0 }
 0x3df   : > { %v13079_v5 = vpop.f32.mrf.mxu1  ;;  %v5711_v2 = vadd.f32 %v13035_v12, %v16626_v55  ;;  %13325 = vmatprep.mubr.bf16.mxu0 %v7365_v54  ;;  %v7366_v55 = vmul.bf16 %v18893_v22, %v7350_v34  ;;  %v7367_v36 = vmul.bf16 %v18894_v13, %v7351_v8  ;;  %v7332_v12 = vld [vmem:[#allocation2 + $0xd1] sm:$0xff]  ;;  %v7331_v34 = vld [vmem:[#allocation2 + $0xc9] sm:$0xff] }
 0x3e0   : > { %v16730_v62 = vadd.f32 %v13079_v5, %v5707_v1  ;;  %v5606_v26 = vpop.f32.mrf.mxu0 }
 0x3e1   : > { %v5912_v16 = vpop.f32.mrf.mxu1  ;;  %v5709_v29 = vadd.f32 %v5606_v26, %v16629_v4  ;;  %v7329_v4 = vld [vmem:[#allocation2 + $0xb9] sm:$0xff] }
 0x3e2   : > { %v16733_v53 = vadd.f32 %v5912_v16, %v5705_v3  ;;  %v13036_v57 = vpop.f32.mrf.mxu0  ;;  %v7352_v26 = vpack.c.bf16 %v7330_v44, %v7329_v4  ;;  %v7333_v4 = vld [vmem:[#allocation2 + $0xd9] sm:$0xff]  ;;  %v7334_v44 = vld [vmem:[#allocation2 + $0xe1] sm:$0xff] }
 0x3e3   : > { %v13080_v46 = vpop.f32.mrf.mxu1  ;;  %v5712_v17 = vadd.f32 %v13036_v57, %v16631_v63 }
 0x3e4   : > { %v16736_v0 = vadd.f32 %v13080_v46, %v5708_v31  ;;  %v5609_v59 = vpop.f32.mrf.mxu0 }
 0x3e5   : > { %v16739_v1 = vpop.f32.mrf.mxu1  ;;  %v16742_v54 = vadd.f32 %v5609_v59, %v16635_v35  ;;  %v7353_v35 = vpack.c.bf16 %v7332_v12, %v7331_v34  ;;  %v7335_v34 = vld [vmem:[#allocation2 + $0xe9] sm:$0xff] }
 0x3e6   : > { %v13039_v3 = vpop.f32.mrf.mxu0  ;;  %13326 = vmatmul.mubr.bf16.gmra.mxu0 %v7366_v55 }
 0x3e7   : > { %v13083_v60 = vpop.f32.mrf.mxu1  ;;  %v5715_v63 = vadd.f32 %v13039_v3, %v16638_v52  ;;  %13329 = vmatprep.mubr.bf16.mxu0 %v7367_v36  ;;  %v7368_v52 = vmul.bf16 %v18895_v15, %v7352_v26  ;;  %v7354_v26 = vpack.c.bf16 %v7334_v44, %v7333_v4  ;;  %v14009_v4 = vld [vmem:[%s18512_s11 + $0x70] sm:$0xff]   ;;  %v7337_v44 = vld [vmem:[#allocation2 + $0xf9] sm:$0xff] }
 0x3e8   : > { %v16746_v31 = vadd.f32 %v13083_v60, %v5711_v2  ;;  %v5622_v5 = vpop.f32.mrf.mxu0  ;;  %v14007_v2 = vld [vmem:[%s18512_s11 + $0x78] sm:$0xff]  }
 0x3e9   : > { %v5928_v14 = vpop.f32.mrf.mxu1  ;;  %v5713_v59 = vadd.f32 %v5622_v5, %v16641_v24  ;;  %13345 = vmatprep.subr.bf16.mxu1 %v14007_v2 }
 0x3ea   : > { %v16749_v16 = vadd.f32 %v5928_v14, %v5709_v29  ;;  %v13040_v8 = vpop.f32.mrf.mxu0  ;;  %v7369_v29 = vmul.bf16 %v18896_v20, %v7353_v35  ;;  %13346 = vmatpush3.bf16.msra.mxu1 %v14007_v2 }
 0x3eb   : > { %v13084_v57 = vpop.f32.mrf.mxu1  ;;  %v5716_v46 = vadd.f32 %v13040_v8, %v16643_v21  ;;  %v7336_v21 = vld [vmem:[#allocation2 + $0xf1] sm:$0xff]  ;;  %13347 = vmatprep.subr.bf16.mxu1 %v14009_v4 }
 0x3ec   : > { %v16752_v55 = vadd.f32 %v13084_v57, %v5712_v17  ;;  %v5625_v13 = vpop.f32.mrf.mxu0  ;;  %v7355_v35 = vpack.c.bf16 %v7336_v21, %v7335_v34  ;;  %v14010_v34 = vld [vmem:[%s18512_s11 + $0x30] sm:$0xff]  }
 0x3ed   : > { %v16758_v36 = vpop.f32.mrf.mxu1  ;;  %v16761_v24 = vadd.f32 %v5625_v13, %v16649_v51  ;;  %v14008_v13 = vld [vmem:[%s18512_s11 + $0x38] sm:$0xff]  }
 0x3ee   : > { %v13043_v3 = vpop.f32.mrf.mxu0  ;;  %13330 = vmatmul.mubr.bf16.gmra.mxu0 %v7368_v52  ;;  %13393 = vmatprep.subr.bf16.mxu0 %v14008_v13 }
 0x3ef   : > { %v13087_v17 = vpop.f32.mrf.mxu1  ;;  %v5719_v12 = vadd.f32 %v13043_v3, %v16652_v39  ;;  %13333 = vmatprep.mubr.bf16.mxu0 %v7369_v29  ;;  %13394 = vmatpush3.bf16.msra.mxu0 %v14008_v13  ;;  %v7370_v29 = vmul.bf16 %v18897_v41, %v7354_v26  ;;  %v7338_v3 = vld [vmem:[#allocation2 + $0x101] sm:$0xff] }
 0x3f0   : > { %v16765_v60 = vadd.f32 %v13087_v17, %v5715_v63  ;;  %v5638_v5 = vpop.f32.mrf.mxu0  ;;  %13348 = vmatpush3.bf16.msra.mxu1 %v14009_v4  ;;  %v7356_v26 = vpack.c.bf16 %v7338_v3, %v7337_v44  ;;  %13395 = vmatprep.subr.bf16.mxu0 %v14010_v34  ;;  %v7342_v3 = vld [vmem:[#allocation2 + $0x121] sm:$0xff] }
 0x3f1   : > { %v5944_v51 = vpop.f32.mrf.mxu1  ;;  %v5717_v14 = vadd.f32 %v5638_v5, %v16655_v33 }
 0x3f2   : > { %v16771_v8 = vadd.f32 %v5944_v51, %v5713_v59  ;;  %v13044_v57 = vpop.f32.mrf.mxu0  ;;  %v7371_v59 = vmul.bf16 %v18898_v28, %v7355_v35  ;;  %v7372_v4 = vmul.bf16 %v18899_v30, %v7356_v26 }
 0x3f3   : > { %v13088_v39 = vpop.f32.mrf.mxu1  ;;  %v5720_v52 = vadd.f32 %v13044_v57, %v16657_v48  ;;  %13396 = vmatpush3.bf16.msra.mxu0 %v14010_v34 }
 0x3f4   : > { %v16774_v63 = vadd.f32 %v13088_v39, %v5716_v46  ;;  %v16776_v2 = vpop.f32.mrf.mxu0 }
 0x3f5   : > { %v16782_v33 = vpop.f32.mrf.mxu1 }
 0x3f6   : > { %v13047_v21 = vpop.f32.mrf.mxu0  ;;  %13334 = vmatmul.mubr.bf16.gmra.mxu0 %v7370_v29 }
 0x3f7   : > { %v13091_v48 = vpop.f32.mrf.mxu1  ;;  %v5723_v46 = vadd.f32 %v13047_v21, %v16667_v43  ;;  %13337 = vmatprep.mubr.bf16.mxu0 %v7371_v59  ;;  %v14011_v59 = vld [vmem:[%s18512_s11 + $0x68] sm:$0xff]  }
 0x3f8   : > { %v16786_v17 = vadd.f32 %v13091_v48, %v5719_v12  ;;  %v5654_v5 = vpop.f32.mrf.mxu0  ;;  %13349 = vmatprep.subr.bf16.mxu1 %v14011_v59 }
 0x3f9   : > { %v5960_v13 = vpop.f32.mrf.mxu1  ;;  %v5721_v51 = vadd.f32 %v5654_v5, %v16670_v50  ;;  %v7373_v50 = vmul.bf16 %v18900_v6, %v16570_v61  ;;  %13350 = vmatpush3.bf16.msra.mxu1 %v14011_v59  ;;  %v14012_v61 = vld [vmem:[%s18512_s11 + $0x28] sm:$0xff]  }
 0x3fa   : > { %v16792_v35 = vadd.f32 %v5960_v13, %v5717_v14  ;;  %v13048_v57 = vpop.f32.mrf.mxu0  ;;  %v7341_v14 = vld [vmem:[#allocation2 + $0x119] sm:$0xff]  ;;  %13397 = vmatprep.subr.bf16.mxu0 %v14012_v61 }
 0x3fb   : > { %v13092_v39 = vpop.f32.mrf.mxu1  ;;  %v5724_v43 = vadd.f32 %v13048_v57, %v16672_v32  ;;  %v7736_v32 = vld [vmem:[#allocation2 + $0x7] sm:$0xff]  ;;  %v7358_v13 = vpack.c.bf16 %v7342_v3, %v7341_v14  ;;  %13398 = vmatpush3.bf16.msra.mxu0 %v14012_v61 }
 0x3fc   : > { %v16795_v29 = vadd.f32 %v13092_v39, %v5720_v52  ;;  %v16797_v12 = vpop.f32.mrf.mxu0  ;;  %v7737_v52 = vld [vmem:[#allocation2 + $0xf] sm:$0xff]  ;;  %v14013_v14 = vld [vmem:[%s18512_s11 + $0x60] sm:$0xff]  }
 0x3fd   : > { %v16803_v44 = vpop.f32.mrf.mxu1  ;;  %13351 = vmatprep.subr.bf16.mxu1 %v14013_v14 }
 0x3fe   : > { %v13051_v21 = vpop.f32.mrf.mxu0  ;;  %13338 = vmatmul.mubr.bf16.gmra.mxu0 %v7372_v4  ;;  %v7768_v4 = vpack.c.bf16 %v7737_v52, %v7736_v32  ;;  %13352 = vmatpush3.bf16.msra.mxu1 %v14013_v14 }
 0x3ff   : > { %v13095_v48 = vpop.f32.mrf.mxu1  ;;  %v5727_v5 = vadd.f32 %v13051_v21, %v16681_v7  ;;  %13341 = vmatprep.mubr.bf16.mxu0 %v7373_v50  ;;  %v7374_v50 = vmul.bf16 %v18901_v10, %v7358_v13 }
 0x400   : > { %v16808_v26 = vadd.f32 %v13095_v48, %v5723_v46  ;;  %v5670_v34 = vpop.f32.mrf.mxu0 }
 0x401   : > { %v5976_v57 = vpop.f32.mrf.mxu1  ;;  %v5725_v39 = vadd.f32 %v5670_v34, %v16684_v49 }
 0x402   : > { %v16814_v6 = vadd.f32 %v5976_v57, %v5721_v51  ;;  %v13052_v30 = vpop.f32.mrf.mxu0  ;;  %v18909_v51 = vld [vmem:[#allocation5_spill] sm:$0xff] }
 0x403   : > { %v13096_v28 = vpop.f32.mrf.mxu1  ;;  %v5728_v7 = vadd.f32 %v13052_v30, %v16688_v25  ;;  %v7784_v3 = vmul.bf16 %v18909_v51, %v7768_v4  ;;  %v14015_v4 = vld [vmem:[%s18512_s11 + $0x58] sm:$0xff]  }
 0x404   : > { %v16817_v46 = vadd.f32 %v13096_v28, %v5724_v43  ;;  %v16819_v59 = vpop.f32.mrf.mxu0  ;;  %v14014_v43 = vld [vmem:[%s18512_s11 + $0x20] sm:$0xff]   ;;  %13353 = vmatprep.subr.bf16.mxu1 %v14015_v4 }
 0x405   : > { %v16825_v49 = vpop.f32.mrf.mxu1  ;;  %13399 = vmatprep.subr.bf16.mxu0 %v14014_v43  ;;  %13354 = vmatpush3.bf16.msra.mxu1 %v14015_v4 }
 0x406   : > { %v13055_v21 = vpop.f32.mrf.mxu0  ;;  %13342 = vmatmul.mubr.bf16.gmra.mxu0 %v7374_v50 }
 0x407   : > { %v13099_v32 = vpop.f32.mrf.mxu1  ;;  %v5731_v30 = vadd.f32 %v13055_v21, %v16698_v27  ;;  %13409 = vmatprep.mubr.bf16.mxu0 %v7784_v3  ;;  %13400 = vmatpush3.bf16.msra.mxu0 %v14014_v43 }
 0x408   : > { %v16829_v28 = vadd.f32 %v13099_v32, %v5727_v5  ;;  %v5686_v25 = vpop.f32.mrf.mxu0 }
 0x409   : > { %v5992_v52 = vpop.f32.mrf.mxu1  ;;  %v5729_v48 = vadd.f32 %v5686_v25, %v16701_v58 }
 0x40a   : > { %v16835_v34 = vadd.f32 %v5992_v52, %v5725_v39  ;;  %v13056_v13 = vpop.f32.mrf.mxu0 }
 0x40b   : > { %v13100_v61 = vpop.f32.mrf.mxu1  ;;  %v5732_v57 = vadd.f32 %v13056_v13, %v16704_v19 }
 0x40c   : > { %v16838_v27 = vadd.f32 %v13100_v61, %v5728_v7  ;;  %v16840_v5 = vpop.f32.mrf.mxu0  ;;  %v14016_v7 = vld [vmem:[%s18512_s11 + $0x18] sm:$0xff]   ;;  %v14017_v61 = vld [vmem:[%s18512_s11 + $0x50] sm:$0xff]  }
 0x40d   : > { %v16845_v50 = vpop.f32.mrf.mxu1  ;;  %13401 = vmatprep.subr.bf16.mxu0 %v14016_v7  ;;  %13355 = vmatprep.subr.bf16.mxu1 %v14017_v61 }
 0x40e   : > { %v13123_v14 = vpop.f32.mrf.mxu0  ;;  %13402 = vmatpush3.bf16.msra.mxu0 %v14016_v7  ;;  %13356 = vmatpush3.bf16.msra.mxu1 %v14017_v61 }
 0x40f   : > { %v13103_v58 = vpop.f32.mrf.mxu1  ;;  %v16848_v39 = vadd.f32 %v13123_v14, %v16714_v37 }
 0x410   : > { %v16850_v3 = vadd.f32 %v13103_v58, %v5731_v30  ;;  %v6202_v19 = vpop.f32.mrf.mxu0 }
 0x411   : > { %v6008_v21 = vpop.f32.mrf.mxu1  ;;  %v16856_v32 = vadd.f32 %v6202_v19, %v16717_v56 }
 0x412   : > { %v16858_v25 = vadd.f32 %v6008_v21, %v5729_v48  ;;  %v13124_v43 = vpop.f32.mrf.mxu0 }
 0x413   : > { %v13104_v52 = vpop.f32.mrf.mxu1  ;;  %v16861_v37 = vadd.f32 %v13124_v43, %v16720_v38  ;;  %v14018_v38 = vld [vmem:[%s18512_s11 + $0x10] sm:$0xff]  }
 0x414   : > { %v16863_v30 = vadd.f32 %v13104_v52, %v5732_v57  ;;  %v16865_v13 = vpop.f32.mrf.mxu0  ;;  %13403 = vmatprep.subr.bf16.mxu0 %v14018_v38 }
 0x415   : > { %v16870_v4 = vpop.f32.mrf.mxu1  ;;  %13404 = vmatpush3.bf16.msra.mxu0 %v14018_v38 }
 0x416   : > { %v13127_v56 = vpop.f32.mrf.mxu0 }
 0x417   : > { %v16872_v48 = vpop.f32.mrf.mxu1  ;;  %v16875_v14 = vadd.f32 %v13127_v56, %v16730_v62  ;;  %v14019_v62 = vld [vmem:[%s18512_s11 + $0x48] sm:$0xff]  }
 0x418   : > { %v6218_v57 = vpop.f32.mrf.mxu0  ;;  %13357 = vmatprep.subr.bf16.mxu1 %v14019_v62 }
 0x419   : > { %v16880_v58 = vpop.f32.mrf.mxu1  ;;  %v16883_v19 = vadd.f32 %v6218_v57, %v16733_v53  ;;  %13358 = vmatpush3.bf16.msra.mxu1 %v14019_v62 }
 0x41a   : > { %v13128_v7 = vpop.f32.mrf.mxu0 }
 0x41b   : > { %v16885_v21 = vpop.f32.mrf.mxu1  ;;  %v16888_v43 = vadd.f32 %v13128_v7, %v16736_v0  ;;  %v14020_v0 = vld [vmem:[%s18512_s11 + $0x8] sm:$0xff]  }
 0x41c   : > { %v16893_v52 = vpop.f32.mrf.mxu0  ;;  %13405 = vmatprep.subr.bf16.mxu0 %v14020_v0 }
 0x41d   : > { %v16895_v61 = vpop.f32.mrf.mxu1  ;;  %13406 = vmatpush3.bf16.msra.mxu0 %v14020_v0 }
 0x41e   : > { %v13131_v56 = vpop.f32.mrf.mxu0 }
 0x41f   : > { %v16897_v53 = vpop.f32.mrf.mxu1  ;;  %v16900_v38 = vadd.f32 %v13131_v56, %v16746_v31  ;;  %v14021_v31 = vld [vmem:[%s18512_s11 + $0x40] sm:$0xff]  }
 0x420   : > { %v6234_v57 = vpop.f32.mrf.mxu0  ;;  %13359 = vmatprep.subr.bf16.mxu1 %v14021_v31 }
 0x421   : > { %v16905_v7 = vpop.f32.mrf.mxu1  ;;  %v16908_v10 = vadd.f32 %v6234_v57, %v16749_v16  ;;  %13360 = vmatpush3.bf16.msra.mxu1 %v14021_v31 }
 0x422   : > { %v13132_v41 = vpop.f32.mrf.mxu0 }
 0x423   : > { %v16910_v20 = vpop.f32.mrf.mxu1  ;;  %v16913_v62 = vadd.f32 %v13132_v41, %v16752_v55  ;;  %v14022_v41 = vld [vmem:[%s18512_s11] sm:$0xff]  }
 0x424   : > { %v16918_v56 = vpop.f32.mrf.mxu0  ;;  %13407 = vmatprep.subr.bf16.mxu0 %v14022_v41 }
 0x425   : > { %18910 = vst [vmem:[#allocation89_spill] sm:$0xff] %v16913_v62  ;;  %18911 = vst [vmem:[#allocation94_spill] sm:$0xff] %v16918_v56  ;;  %v16920_v15 = vpop.f32.mrf.mxu1  ;;  %13408 = vmatpush3.bf16.msra.mxu0 %v14022_v41 }
 0x426   : > { %v13135_v22 = vpop.f32.mrf.mxu0 }
 0x427   : > { %v16922_v16 = vpop.f32.mrf.mxu1  ;;  %v16925_v0 = vadd.f32 %v13135_v22, %v16765_v60  ;;  %v16943_v22 = vld [vmem:[%s18512_s11 + $0xb8] sm:$0xff]  }
 0x428   : > { %v6250_v55 = vpop.f32.mrf.mxu0  ;;  %18917 = vst [vmem:[#allocation97_spill] sm:$0xff] %v16943_v22  ;;  %13441 = vmatprep.subr.bf16.mxu1 %v16943_v22 }
 0x429   : > { %18912 = vst [vmem:[#allocation43_spill] sm:$0xff] %v16925_v0  ;;  %v16930_v57 = vpop.f32.mrf.mxu1  ;;  %v16933_v42 = vadd.f32 %v6250_v55, %v16771_v8 }
 0x42a   : > { %18913 = vst [vmem:[#allocation42_spill] sm:$0xff] %v16930_v57  ;;  %v13136_v47 = vpop.f32.mrf.mxu0 }
 0x42b   : > { %18914 = vst [vmem:[#allocation49_spill] sm:$0xff] %v16933_v42  ;;  %v16935_v51 = vpop.f32.mrf.mxu1  ;;  %v16938_v31 = vadd.f32 %v13136_v47, %v16774_v63  ;;  %v16959_v47 = vld [vmem:[%s18512_s11 + $0xf8] sm:$0xff]  }
 0x42c   : > { %18915 = vst [vmem:[#allocation50_spill] sm:$0xff] %v16935_v51  ;;  %v16945_v60 = vpop.f32.mrf.mxu0  ;;  %18922 = vst [vmem:[#allocation48_spill] sm:$0xff] %v16959_v47  ;;  %13489 = vmatprep.subr.bf16.mxu0 %v16959_v47 }
 0x42d   : > { %18916 = vst [vmem:[#allocation90_spill] sm:$0xff] %v16938_v31  ;;  %18918 = vst [vmem:[#allocation51_spill] sm:$0xff] %v16945_v60  ;;  %v16947_v0 = vpop.f32.mrf.mxu1 }
 0x42e   : > { %18919 = vst [vmem:[#allocation44_spill] sm:$0xff] %v16947_v0  ;;  %v13139_v8 = vpop.f32.mrf.mxu0 }
 0x42f   : > { %v16951_v41 = vpop.f32.mrf.mxu1  ;;  %v16954_v55 = vadd.f32 %v13139_v8, %v16786_v17 }
 0x430   : > { %18920 = vst [vmem:[#allocation53_spill] sm:$0xff] %v16951_v41  ;;  %v6266_v63 = vpop.f32.mrf.mxu0 }
 0x431   : > { %18921 = vst [vmem:[#allocation91_spill] sm:$0xff] %v16954_v55  ;;  %v16961_v31 = vpop.f32.mrf.mxu1  ;;  %v16964_v42 = vadd.f32 %v6266_v63, %v16792_v35 }
 0x432   : > { %18923 = vst [vmem:[#allocation100_spill] sm:$0xff] %v16961_v31  ;;  %v13140_v23 = vpop.f32.mrf.mxu0 }
 0x433   : > { %18924 = vst [vmem:[#allocation45_spill] sm:$0xff] %v16964_v42  ;;  %v16967_v22 = vpop.f32.mrf.mxu1  ;;  %v16970_v41 = vadd.f32 %v13140_v23, %v16795_v29 }
 0x434   : > { %18925 = vst [vmem:[#allocation55_spill] sm:$0xff] %v16967_v22  ;;  %v16972_v17 = vpop.f32.mrf.mxu0 }
 0x435   : > { %18926 = vst [vmem:[#allocation47_spill] sm:$0xff] %v16970_v41  ;;  %18927 = vst [vmem:[#allocation57_spill] sm:$0xff] %v16972_v17  ;;  %v16974_v8 = vpop.f32.mrf.mxu1 }
 0x436   : > { %18928 = vst [vmem:[#allocation92_spill] sm:$0xff] %v16974_v8  ;;  %v13143_v55 = vpop.f32.mrf.mxu0 }
 0x437   : > { %v16976_v60 = vpop.f32.mrf.mxu1  ;;  %v16979_v31 = vadd.f32 %v13143_v55, %v16808_v26 }
 0x438   : > { %18929 = vst [vmem:[#allocation103_spill] sm:$0xff] %v16976_v60  ;;  %v6282_v35 = vpop.f32.mrf.mxu0 }
 0x439   : > { %18930 = vst [vmem:[#allocation59_spill] sm:$0xff] %v16979_v31  ;;  %v16981_v63 = vpop.f32.mrf.mxu1  ;;  %v16984_v47 = vadd.f32 %v6282_v35, %v16814_v6 }
 0x43a   : > { %18931 = vst [vmem:[#allocation58_spill] sm:$0xff] %v16981_v63  ;;  %v13144_v42 = vpop.f32.mrf.mxu0 }
 0x43b   : > { %18932 = vst [vmem:[#allocation93_spill] sm:$0xff] %v16984_v47  ;;  %v16986_v22 = vpop.f32.mrf.mxu1  ;;  %v16989_v29 = vadd.f32 %v13144_v42, %v16817_v46 }
 0x43c   : > { %18933 = vst [vmem:[#allocation106_spill] sm:$0xff] %v16986_v22  ;;  %v16991_v23 = vpop.f32.mrf.mxu0 }
 0x43d   : > { %18934 = vst [vmem:[#allocation95_spill] sm:$0xff] %v16989_v29  ;;  %18935 = vst [vmem:[#allocation52_spill] sm:$0xff] %v16991_v23  ;;  %v16993_v41 = vpop.f32.mrf.mxu1 }
 0x43e   : > { %18936 = vst [vmem:[#allocation61_spill] sm:$0xff] %v16993_v41  ;;  %v13147_v60 = vpop.f32.mrf.mxu0 }
 0x43f   : > { %v16995_v8 = vpop.f32.mrf.mxu1  ;;  %v16998_v26 = vadd.f32 %v13147_v60, %v16829_v28 }
 0x440   : > { %18937 = vst [vmem:[#allocation54_spill] sm:$0xff] %v16995_v8  ;;  %v6298_v55 = vpop.f32.mrf.mxu0 }
 0x441   : > { %18938 = vst [vmem:[#allocation63_spill] sm:$0xff] %v16998_v26  ;;  %v17000_v31 = vpop.f32.mrf.mxu1  ;;  %v17003_v6 = vadd.f32 %v6298_v55, %v16835_v34 }
 0x442   : > { %18939 = vst [vmem:[#allocation96_spill] sm:$0xff] %v17000_v31  ;;  %v13148_v35 = vpop.f32.mrf.mxu0 }
 0x443   : > { %18940 = vst [vmem:[#allocation111_spill] sm:$0xff] %v17003_v6  ;;  %v17005_v47 = vpop.f32.mrf.mxu1  ;;  %v17008_v42 = vadd.f32 %v13148_v35, %v16838_v27 }
 0x444   : > { %18941 = vst [vmem:[#allocation56_spill] sm:$0xff] %v17005_v47  ;;  %v17010_v46 = vpop.f32.mrf.mxu0 }
 0x445   : > { %18942 = vst [vmem:[#allocation65_spill] sm:$0xff] %v17008_v42  ;;  %18943 = vst [vmem:[#allocation98_spill] sm:$0xff] %v17010_v46  ;;  %v17012_v29 = vpop.f32.mrf.mxu1 }
 0x446   : > { %18944 = vst [vmem:[#allocation114_spill] sm:$0xff] %v17012_v29  ;;  %v13151_v8 = vpop.f32.mrf.mxu0 }
 0x447   : > { %v17014_v41 = vpop.f32.mrf.mxu1  ;;  %v17017_v28 = vadd.f32 %v13151_v8, %v16850_v3 }
 0x448   : > { %18945 = vst [vmem:[#allocation83_spill] sm:$0xff] %v17014_v41  ;;  %v6314_v60 = vpop.f32.mrf.mxu0 }
 0x449   : > { %18946 = vst [vmem:[#allocation67_spill] sm:$0xff] %v17017_v28  ;;  %v17019_v26 = vpop.f32.mrf.mxu1  ;;  %v17022_v34 = vadd.f32 %v6314_v60, %v16858_v25 }
 0x44a   : > { %18947 = vst [vmem:[#allocation66_spill] sm:$0xff] %v17019_v26  ;;  %v13152_v55 = vpop.f32.mrf.mxu0 }
 0x44b   : > { %18948 = vst [vmem:[#allocation99_spill] sm:$0xff] %v17022_v34  ;;  %v17024_v6 = vpop.f32.mrf.mxu1  ;;  %v17027_v27 = vadd.f32 %v13152_v55, %v16863_v30 }
 0x44c   : > { %18949 = vst [vmem:[#allocation101_spill] sm:$0xff] %v17024_v6  ;;  %v17029_v35 = vpop.f32.mrf.mxu0 }
 0x44d   : > { %18950 = vst [vmem:[#allocation119_spill] sm:$0xff] %v17027_v27  ;;  %18951 = vst [vmem:[#allocation60_spill] sm:$0xff] %v17029_v35  ;;  %v17031_v42 = vpop.f32.mrf.mxu1 }
 0x44e   : > { %18952 = vst [vmem:[#allocation69_spill] sm:$0xff] %v17031_v42  ;;  %v13219_v41 = vpop.f32.mrf.mxu0 }
 0x44f   : > { %v17033_v46 = vpop.f32.mrf.mxu1 }
 0x450   : > { %18953 = vst [vmem:[#allocation102_spill] sm:$0xff] %v17033_v46  ;;  %v6846_v3 = vpop.f32.mrf.mxu0 }
 0x451   : > { %v17035_v8 = vpop.f32.mrf.mxu1 }
 0x452   : > { %18954 = vst [vmem:[#allocation62_spill] sm:$0xff] %v17035_v8  ;;  %v17037_v28 = vpop.f32.mrf.mxu0 }
 0x453   : > { %v17039_v25 = vpop.f32.mrf.mxu1 }
 0x454   : > { %18955 = vst [vmem:[#allocation71_spill] sm:$0xff] %v17039_v25  ;;  %v17041_v60 = vpop.f32.mrf.mxu0 }
 0x455   : > { %v17043_v34 = vpop.f32.mrf.mxu1 }
 0x456   : > { %18956 = vst [vmem:[#allocation104_spill] sm:$0xff] %v17043_v34  ;;  %v17045_v30 = vpop.f32.mrf.mxu0 }
 0x457   : > { %v13267_v55 = vpop.f32.mrf.mxu1 }
 0x458   : > { %v17047_v27 = vpop.f32.mrf.mxu0 }
 0x459   : > { %v7152_v42 = vpop.f32.mrf.mxu1 }
 0x45a   : > { %v17049_v35 = vpop.f32.mrf.mxu0 }
 0x45b   : > { %v17051_v46 = vpop.f32.mrf.mxu1 }
 0x45c   : > { %v17053_v6 = vpop.f32.mrf.mxu0 }
 0x45d   : > { %v17055_v8 = vpop.f32.mrf.mxu1 }
 0x45e   : > { %v17057_v26 = vpop.f32.mrf.mxu0 }
 0x45f   : > { %18957 = vst [vmem:[#allocation64_spill] sm:$0xff] %v17057_v26  ;;  %v17059_v25 = vpop.f32.mrf.mxu1 }
 0x460   : > { %v17061_v29 = vpop.f32.mrf.mxu0 }
 0x461   : > { %18958 = vst [vmem:[#allocation73_spill] sm:$0xff] %v17061_v29  ;;  %v17063_v34 = vpop.f32.mrf.mxu1 }
 0x462   : > { %v17065_v47 = vpop.f32.mrf.mxu0 }
 0x463   : > { %18959 = vst [vmem:[#allocation74_spill] sm:$0xff] %v17065_v47  ;;  %v17067_v31 = vpop.f32.mrf.mxu1 }
 0x464   : > { %v17069_v23 = vpop.f32.mrf.mxu0 }
 0x465   : > { %18960 = vst [vmem:[#allocation105_spill] sm:$0xff] %v17069_v23  ;;  %v17073_v63 = vpop.f32.mrf.mxu1 }
 0x466   : > { %v17071_v22 = vpop.f32.mrf.mxu0  ;;  %18962 = vst [vmem:[#allocation75_spill] sm:$0xff] %v17073_v63 }
 0x467   : > { %18961 = vst [vmem:[#allocation107_spill] sm:$0xff] %v17071_v22  ;;  %v17079_v51 = vpop.f32.mrf.mxu1 }
 0x468   : > { %v17075_v17 = vpop.f32.mrf.mxu0  ;;  %18965 = vst [vmem:[#allocation77_spill] sm:$0xff] %v17079_v51 }
 0x469   : > { %18963 = vst [vmem:[#allocation108_spill] sm:$0xff] %v17075_v17  ;;  %v17085_v26 = vpop.f32.mrf.mxu1 }
 0x46a   : > { %v17077_v0 = vpop.f32.mrf.mxu0  ;;  %18968 = vst [vmem:[#allocation79_spill] sm:$0xff] %v17085_v26 }
 0x46b   : > { %18964 = vst [vmem:[#allocation68_spill] sm:$0xff] %v17077_v0  ;;  %v17091_v23 = vpop.f32.mrf.mxu1 }
 0x46c   : > { %v17081_v62 = vpop.f32.mrf.mxu0  ;;  %18971 = vst [vmem:[#allocation110_spill] sm:$0xff] %v17091_v23 }
 0x46d   : > { %18966 = vst [vmem:[#allocation109_spill] sm:$0xff] %v17081_v62  ;;  %v17097_v17 = vpop.f32.mrf.mxu1 }
 0x46e   : > { %v17083_v29 = vpop.f32.mrf.mxu0  ;;  %18974 = vst [vmem:[#allocation113_spill] sm:$0xff] %v17097_v17 }
 0x46f   : > { %18967 = vst [vmem:[#allocation70_spill] sm:$0xff] %v17083_v29  ;;  %v17103_v62 = vpop.f32.mrf.mxu1 }
 0x470   : > { %v17087_v47 = vpop.f32.mrf.mxu0  ;;  %18977 = vst [vmem:[#allocation82_spill] sm:$0xff] %v17103_v62  ;;  %v18991_v62 = vld [vmem:[#allocation40_spill] sm:$0xff] }
 0x471   : > { %18969 = vst [vmem:[#allocation72_spill] sm:$0xff] %v17087_v47  ;;  %v17109_v47 = vpop.f32.mrf.mxu1 }
 0x472   : > { %v17089_v56 = vpop.f32.mrf.mxu0  ;;  %18980 = vst [vmem:[#allocation86_spill] sm:$0xff] %v17109_v47 }
 0x473   : > { %18970 = vst [vmem:[#allocation81_spill] sm:$0xff] %v17089_v56 }
 0x474   : > { %v17093_v22 = vpop.f32.mrf.mxu0 }
 0x475   : > { %18972 = vst [vmem:[#allocation112_spill] sm:$0xff] %v17093_v22  ;;  %v17115_v22 = vpop.f32.mrf.mxu1 }
 0x476   : > { %v17095_v63 = vpop.f32.mrf.mxu0  ;;  %18983 = vst [vmem:[#allocation116_spill] sm:$0xff] %v17115_v22 }
 0x477   : > { %18973 = vst [vmem:[#allocation84_spill] sm:$0xff] %v17095_v63 }
 0x478   : > { %v17099_v0 = vpop.f32.mrf.mxu0 }
 0x479   : > { %18975 = vst [vmem:[#allocation76_spill] sm:$0xff] %v17099_v0  ;;  %v17121_v0 = vpop.f32.mrf.mxu1 }
 0x47a   : > { %v17101_v51 = vpop.f32.mrf.mxu0  ;;  %18986 = vst [vmem:[#allocation118_spill] sm:$0xff] %v17121_v0  ;;  %v18990_v0 = vld [vmem:[#allocation37_spill] sm:$0xff] }
 0x47b   : > { %18976 = vst [vmem:[#allocation85_spill] sm:$0xff] %v17101_v51  ;;  %v17133_v47 = vpop.f32.mrf.mxu1 }
 0x47c   : > { %v17105_v29 = vpop.f32.mrf.mxu0 }
 0x47d   : > { %18978 = vst [vmem:[#allocation115_spill] sm:$0xff] %v17105_v29  ;;  %v6653_v29 = vadd.f32 %v16872_v48, %v16848_v39  ;;  %v6654_v48 = vadd.f32 %v16885_v21, %v16861_v37 }
 0x47e   : > { %v17107_v26 = vpop.f32.mrf.mxu0 }
 0x47f   : > { %18979 = vst [vmem:[#allocation78_spill] sm:$0xff] %v17107_v26  ;;  %v6975_v22 = vadd.f32 %v13219_v41, %v6653_v29  ;;  %v18994_v41 = vld [vmem:[#allocation41_spill] sm:$0xff]  ;;  %v6976_v21 = vadd.f32 %v17037_v28, %v6654_v48 }
 0x480   : > { %v17111_v56 = vpop.f32.mrf.mxu0  ;;  %v5400_v29 = vadd.f32 %v16707_v45, %v18994_v41 }
 0x481   : > { %18981 = vst [vmem:[#allocation80_spill] sm:$0xff] %v17111_v56  ;;  %v6024_v56 = vadd.f32 %v16723_v18, %v16710_v11  ;;  %v7281_v18 = vadd.f32 %v13267_v55, %v6975_v22  ;;  %v17159_v22 = vpop.f32.mrf.mxu1 }
 0x482   : > { %v17113_v23 = vpop.f32.mrf.mxu0 }
 0x483   : > { %18982 = vst [vmem:[#allocation87_spill] sm:$0xff] %v17113_v23  ;;  %v6651_v23 = vadd.f32 %v16880_v58, %v16856_v32  ;;  %v6330_v39 = vadd.f32 %v16865_v13, %v6024_v56  ;;  %v18993_v32 = vld [vmem:[#allocation46_spill] sm:$0xff]  ;;  %v17155_v13 = vld [vmem:[%s18511_s10] ss:$0 sm:$0xff] }
 0x484   : > { %v17117_v63 = vpop.f32.mrf.mxu0 }
 0x485   : > { %18984 = vst [vmem:[#allocation117_spill] sm:$0xff] %v17117_v63  ;;  %v6973_v11 = vadd.f32 %v6846_v3, %v6651_v23  ;;  %v6652_v37 = vadd.f32 %v16895_v61, %v6330_v39  ;;  %v7282_v23 = vadd.f32 %v17051_v46, %v6976_v21  ;;  %v18997_v21 = vld [vmem:[#allocation64_spill] sm:$0xff] }
 0x486   : > { %v17119_v17 = vpop.f32.mrf.mxu0 }
 0x487   : > { %18985 = vst [vmem:[#allocation88_spill] sm:$0xff] %v17119_v17  ;;  %v18989_v17 = vld [vmem:[#allocation39_spill] sm:$0xff]  ;;  %v7279_v56 = vadd.f32 %v7152_v42, %v6973_v11  ;;  %v6974_v61 = vadd.f32 %v17041_v60, %v6652_v37  ;;  %v18996_v37 = vld [vmem:[#allocation94_spill] sm:$0xff] }
 0x488   : > { %v17123_v51 = vpop.f32.mrf.mxu0  ;;  %v5352_v63 = vadd.f32 %v18989_v17, %v16645_v9  ;;  %v6028_v9 = vadd.f32 %v16739_v1, %v16726_v40  ;;  %v17163_v40 = vadd.f32 %v16782_v33, %v16761_v24 }
 0x489   : > { %18987 = vst [vmem:[#allocation120_spill] sm:$0xff] %v17123_v51  ;;  %v5368_v51 = vadd.f32 %v18991_v62, %v18990_v0  ;;  %v6032_v62 = vadd.f32 %v16758_v36, %v16742_v54  ;;  %v6657_v36 = vadd.f32 %v16897_v53, %v16875_v14  ;;  %v17180_v14 = vpop.f32.mrf.mxu1 }
 0x48a   : > { %v17127_v26 = vpop.f32.mrf.mxu0  ;;  %v5718_v1 = vadd.f32 %v16776_v2, %v5352_v63  ;;  %v6655_v2 = vadd.f32 %v16905_v7, %v16883_v19 }
 0x48b   : > { %18988 = vst [vmem:[#allocation121_spill] sm:$0xff] %v17127_v26  ;;  %v18992_v26 = vld [vmem:[#allocation38_spill] sm:$0xff]  ;;  %v5722_v54 = vadd.f32 %v16797_v12, %v5368_v51  ;;  %v6979_v33 = vadd.f32 %v17045_v30, %v6657_v36  ;;  %v7280_v51 = vadd.f32 %v17055_v8, %v6974_v61 }
 0x48c   : > { %v17139_v57 = vpop.f32.mrf.mxu0  ;;  %v5384_v58 = vadd.f32 %v18993_v32, %v18992_v26  ;;  %v17173_v28 = vadd.f32 %v16803_v44, %v5718_v1  ;;  %v6334_v44 = vadd.f32 %v16893_v52, %v6028_v9  ;;  %v6977_v19 = vadd.f32 %v17047_v27, %v6655_v2  ;;  %v17199_v27 = vpop.f32.mrf.mxu1  ;;  %v18995_v9 = vld [vmem:[#allocation42_spill] sm:$0xff]  ;;  %v19003_v2 = vld [vmem:[#allocation73_spill] sm:$0xff] }
 0x48d   : > { %v17184_v3 = vadd.f32 %v16825_v49, %v5722_v54  ;;  %v7285_v60 = vadd.f32 %v17059_v25, %v6979_v33  ;;  %v5730_v49 = vadd.f32 %v16840_v5, %v5400_v29  ;;  %v6661_v5 = vadd.f32 %v16922_v16, %v16900_v38  ;;  %v19000_v61 = vld [vmem:[#allocation50_spill] sm:$0xff] }
 0x48e   : > { %v13315_v0 = vpop.f32.mrf.mxu0  ;;  %v5726_v24 = vadd.f32 %v16819_v59, %v5384_v58  ;;  %v6658_v59 = vadd.f32 %v16910_v20, %v16888_v43  ;;  %v6656_v52 = vadd.f32 %v16920_v15, %v6334_v44  ;;  %v7283_v43 = vadd.f32 %v17063_v34, %v6977_v19  ;;  %v19006_v19 = vld [vmem:[#allocation53_spill] sm:$0xff] }
 0x48f   : > { %v7603_v45 = vadd.f32 %v13315_v0, %v7281_v18  ;;  %v17203_v32 = vadd.f32 %v16870_v4, %v5730_v49  ;;  %v6659_v0 = vadd.f32 %v18995_v9, %v16908_v10  ;;  %v6338_v4 = vadd.f32 %v18996_v37, %v6032_v62  ;;  %v18999_v10 = vld [vmem:[#allocation89_spill] sm:$0xff]  ;;  %v19016_v9 = vld [vmem:[#allocation110_spill] sm:$0xff] }
 0x490   : > { %v7474_v17 = vpop.f32.mrf.mxu0  ;;  %v17193_v39 = vadd.f32 %v16845_v50, %v5726_v24  ;;  %v6980_v48 = vadd.f32 %v17049_v35, %v6658_v59  ;;  %v6978_v15 = vadd.f32 %v17053_v6, %v6656_v52  ;;  %v17215_v6 = vpop.f32.mrf.mxu1  ;;  %v6662_v62 = vadd.f32 %v19000_v61, %v18999_v10  ;;  %v19005_v59 = vld [vmem:[#allocation43_spill] sm:$0xff]  ;;  %v19010_v52 = vld [vmem:[#allocation97_spill] sm:$0xff] }
 0x491   : > { %v7642_v26 = vadd.f32 %v17155_v13, %v7603_v45  ;;  %v7601_v42 = vadd.f32 %v7474_v17, %v7279_v56  ;;  %v6983_v56 = vadd.f32 %v18997_v21, %v6661_v5  ;;  %v18998_v45 = vld [vmem:[#allocation75_spill] sm:$0xff]  ;;  %v6981_v33 = vadd.f32 %v19003_v2, %v6659_v0  ;;  %v17242_v5 = vld [vmem:[%s18512_s11 + $0xa8] sm:$0xff]  }
 0x492   : > { %v13316_v12 = vpop.f32.mrf.mxu0  ;;  %v7286_v50 = vadd.f32 %v17067_v31, %v6980_v48  ;;  %v7284_v38 = vadd.f32 %v18998_v45, %v6978_v15  ;;  %v14025_v17 = vld [vmem:[%s18512_s11 + $0xb0] sm:$0xff]   ;;  %v19012_v15 = vld [vmem:[#allocation90_spill] sm:$0xff] }
 0x493   : > { %v7674_v53 = vmax.f32 %v7642_v26, 0.0  ;;  %v7640_v63 = vadd.f32 %v17155_v13, %v7601_v42  ;;  %v7604_v46 = vadd.f32 %v13316_v12, %v7282_v23  ;;  %v19001_v23 = vld [vmem:[#allocation44_spill] sm:$0xff]  ;;  %v19002_v42 = vld [vmem:[#allocation51_spill] sm:$0xff] }
 0x494   : > { %v7477_v7 = vpop.f32.mrf.mxu0  ;;  %v6660_v26 = vadd.f32 %v19001_v23, %v6338_v4  ;;  %v6342_v24 = vadd.f32 %v19002_v42, %v17163_v40  ;;  %v19011_v48 = vld [vmem:[#allocation79_spill] sm:$0xff] }
 0x495   : > { %7706 = vst [vmem:[#allocation2 + $0x28] sm:$0xff] %v7674_v53  ;;  %v7672_v8 = vmax.f32 %v7640_v63, 0.0  ;;  %v7643_v30 = vadd.f32 %v17155_v13, %v7604_v46  ;;  %v7602_v55 = vadd.f32 %v7477_v7, %v7280_v51  ;;  %v19004_v51 = vld [vmem:[#allocation77_spill] sm:$0xff]  ;;  %v6665_v7 = vadd.f32 %v19006_v19, %v19005_v59  ;;  %v19020_v10 = vld [vmem:[#allocation107_spill] sm:$0xff]  ;;  %v19023_v59 = vld [vmem:[#allocation82_spill] sm:$0xff] }
 0x496   : > { %v13319_v20 = vpop.f32.mrf.mxu0 }
 0x497   : > { %7704 = vst [vmem:[#allocation2 + $0x18] sm:$0xff] %v7672_v8  ;;  %v7675_v25 = vmax.f32 %v7643_v30, 0.0  ;;  %v7641_v11 = vadd.f32 %v17155_v13, %v7602_v55  ;;  %v7607_v18 = vadd.f32 %v13319_v20, %v7285_v60  ;;  %v19007_v60 = vld [vmem:[#allocation49_spill] sm:$0xff]  ;;  %v19009_v55 = vld [vmem:[#allocation74_spill] sm:$0xff]  ;;  %v7287_v20 = vadd.f32 %v19011_v48, %v6981_v33  ;;  %v14026_v48 = vld [vmem:[%s18512_s11 + $0xf0] sm:$0xff]  }
 0x498   : > { %v7490_v35 = vpop.f32.mrf.mxu0  ;;  %v6984_v49 = vadd.f32 %v19009_v55, %v6662_v62  ;;  %v6987_v61 = vadd.f32 %v19020_v10, %v6665_v7 }
 0x499   : > { %7707 = vst [vmem:[#allocation2 + $0x30] sm:$0xff] %v7675_v25  ;;  %v7673_v34 = vmax.f32 %v7641_v11, 0.0  ;;  %v7646_v58 = vadd.f32 %v17155_v13, %v7607_v18  ;;  %v7605_v41 = vadd.f32 %v7490_v35, %v7283_v43  ;;  %v7850_v29 = vpack.c.bf16 %v7675_v25, %v7674_v53  ;;  %v17236_v43 = vpop.f32.mrf.mxu1 }
 0x49a   : > { %v13320_v16 = vpop.f32.mrf.mxu0  ;;  %v7289_v53 = vadd.f32 %v19004_v51, %v6983_v56  ;;  %v7290_v0 = vadd.f32 %v19016_v9, %v6984_v49  ;;  %v7293_v19 = vadd.f32 %v19023_v59, %v6987_v61  ;;  %v14029_v9 = vld [vmem:[%s18512_s11 + $0xa0] sm:$0xff]   ;;  %v19034_v61 = vld [vmem:[#allocation116_spill] sm:$0xff]  ;;  %v19039_v59 = vld [vmem:[#allocation70_spill] sm:$0xff] }
 0x49b   : > { %7705 = vst [vmem:[#allocation2 + $0x20] sm:$0xff] %v7673_v34  ;;  %v7678_v31 = vmax.f32 %v7646_v58, 0.0  ;;  %v7644_v1 = vadd.f32 %v17155_v13, %v7605_v41  ;;  %v7608_v54 = vadd.f32 %v13320_v16, %v7286_v50  ;;  %v7849_v36 = vpack.c.bf16 %v7673_v34, %v7672_v8  ;;  %v19008_v8 = vld [vmem:[#allocation100_spill] sm:$0xff]  ;;  %v19013_v50 = vld [vmem:[#allocation55_spill] sm:$0xff]  ;;  %v19014_v34 = vld [vmem:[#allocation57_spill] sm:$0xff]  ;;  %v17258_v33 = vpop.f32.mrf.mxu1 }
 0x49c   : > { %v7493_v12 = vpop.f32.mrf.mxu0  ;;  %v6663_v30 = vadd.f32 %v19008_v8, %v19007_v60  ;;  %v6666_v35 = vadd.f32 %v19013_v50, %v19012_v15  ;;  %v17248_v58 = vadd.f32 %v19014_v34, %v17173_v28  ;;  %v19015_v41 = vld [vmem:[#allocation105_spill] sm:$0xff] }
 0x49d   : > { %7710 = vst [vmem:[#allocation2 + $0x48] sm:$0xff] %v7678_v31  ;;  %v7676_v63 = vmax.f32 %v7644_v1, 0.0  ;;  %v7647_v46 = vadd.f32 %v17155_v13, %v7608_v54  ;;  %v7606_v44 = vadd.f32 %v7493_v12, %v7284_v38  ;;  %13362 = vmatmul.mubr.bf16.vlgmr.msra.gmra.mxu1 %v7849_v36  ;;  %v19017_v38 = vld [vmem:[#allocation92_spill] sm:$0xff]  ;;  %v19018_v1 = vld [vmem:[#allocation91_spill] sm:$0xff]  ;;  %v19021_v28 = vld [vmem:[#allocation113_spill] sm:$0xff] }
 0x49e   : > { %v13323_v40 = vpop.f32.mrf.mxu0  ;;  %13442 = vmatpush3.bf16.msra.mxu1 %v19010_v52  ;;  %13365 = vmatprep.mubr.bf16.mxu1 %v7850_v29  ;;  %v6982_v29 = vadd.f32 %v19015_v41, %v6660_v26  ;;  %v6664_v16 = vadd.f32 %v19017_v38, %v6342_v24  ;;  %v19019_v54 = vld [vmem:[#allocation103_spill] sm:$0xff]  ;;  %v19030_v41 = vld [vmem:[#allocation20_spill] sm:$0xff] }
 0x49f   : > { %7708 = vst [vmem:[#allocation2 + $0x38] sm:$0xff] %v7676_v63  ;;  %v7679_v25 = vmax.f32 %v7647_v46, 0.0  ;;  %v7645_v11 = vadd.f32 %v17155_v13, %v7606_v44  ;;  %v7611_v18 = vadd.f32 %v13323_v40, %v7289_v53  ;;  %13443 = vmatprep.subr.bf16.mxu1 %v14025_v17  ;;  %v6669_v36 = vadd.f32 %v19019_v54, %v19018_v1  ;;  %v7738_v26 = vld [vmem:[#allocation2 + $0x17] sm:$0xff]  ;;  %v19033_v54 = vld [vmem:[#allocation109_spill] sm:$0xff] }
 0x4a0   : > { %v7506_v37 = vpop.f32.mrf.mxu0  ;;  %v7288_v62 = vadd.f32 %v19021_v28, %v6982_v29  ;;  %v7741_v53 = vld [vmem:[#allocation2 + $0x2f] sm:$0xff]  ;;  %v19022_v46 = vld [vmem:[#allocation108_spill] sm:$0xff]  ;;  %v6986_v10 = vadd.f32 %v19033_v54, %v6664_v16 }
 0x4a1   : > { %7711 = vst [vmem:[#allocation2 + $0x50] sm:$0xff] %v7679_v25  ;;  %v7677_v4 = vmax.f32 %v7645_v11, 0.0  ;;  %v7650_v21 = vadd.f32 %v17155_v13, %v7611_v18  ;;  %v7609_v56 = vadd.f32 %v7506_v37, %v7287_v20  ;;  %v7852_v45 = vpack.c.bf16 %v7679_v25, %v7678_v31  ;;  %v19024_v40 = vld [vmem:[#allocation19_spill] sm:$0xff]  ;;  %v19026_v20 = vld [vmem:[#allocation58_spill] sm:$0xff]  ;;  %v14031_v16 = vld [vmem:[%s18512_s11 + $0x98] sm:$0xff]  }
 0x4a2   : > { %v13324_v23 = vpop.f32.mrf.mxu0  ;;  %v7739_v42 = vld [vmem:[#allocation2 + $0x1f] sm:$0xff]  ;;  %v7740_v2 = vld [vmem:[#allocation2 + $0x27] sm:$0xff]  ;;  %13444 = vmatpush3.bf16.msra.mxu1 %v14025_v17  ;;  %v6985_v44 = vadd.f32 %v19022_v46, %v6663_v30  ;;  %v19027_v11 = vld [vmem:[#allocation47_spill] sm:$0xff] }
 0x4a3   : > { %7709 = vst [vmem:[#allocation2 + $0x40] sm:$0xff] %v7677_v4  ;;  %v7682_v12 = vmax.f32 %v7650_v21, 0.0  ;;  %v17261_v31 = vadd.f32 %v17155_v13, %v7609_v56  ;;  %v7612_v24 = vadd.f32 %v13324_v23, %v7290_v0  ;;  %v17263_v51 = vpack.c.bf16 %v7739_v42, %v7738_v26  ;;  %13445 = vmatprep.subr.bf16.mxu1 %v17242_v5  ;;  %v19025_v30 = vld [vmem:[#allocation45_spill] sm:$0xff]  ;;  %v19028_v18 = vld [vmem:[#allocation106_spill] sm:$0xff]  ;;  %v19035_v23 = vld [vmem:[#allocation48_spill] sm:$0xff] }
 0x4a4   : > { %v7509_v7 = vpop.f32.mrf.mxu0  ;;  %v17268_v60 = vpack.c.bf16 %v7741_v53, %v7740_v2  ;;  %v7851_v17 = vpack.c.bf16 %v7677_v4, %v7676_v63  ;;  %v6667_v25 = vadd.f32 %v19026_v20, %v19025_v30  ;;  %v6670_v15 = vadd.f32 %v19028_v18, %v19027_v11  ;;  %v19029_v63 = vld [vmem:[#allocation68_spill] sm:$0xff]  ;;  %v19031_v0 = vld [vmem:[#allocation86_spill] sm:$0xff]  ;;  %v17288_v4 = vpop.f32.mrf.mxu1  ;;  %v19037_v53 = vld [vmem:[#allocation59_spill] sm:$0xff] }
 0x4a5   : > { %7714 = vst [vmem:[#allocation2 + $0x68] sm:$0xff] %v7682_v12  ;;  %v7680_v8 = vmax.f32 %v17261_v31, 0.0  ;;  %v7651_v55 = vadd.f32 %v17155_v13, %v7612_v24  ;;  %v7610_v49 = vadd.f32 %v7509_v7, %v7288_v62  ;;  %v7785_v52 = vmul.bf16 %v19024_v40, %v17263_v51  ;;  %v19036_v31 = vld [vmem:[#allocation61_spill] sm:$0xff]  ;;  %v19038_v46 = vld [vmem:[#allocation54_spill] sm:$0xff]  ;;  %v19044_v54 = vld [vmem:[#allocation96_spill] sm:$0xff] }
 0x4a6   : > { %v6988_v50 = vadd.f32 %v19029_v63, %v6666_v35  ;;  %v13327_v34 = vpop.f32.mrf.mxu0  ;;  %v7786_v29 = vmul.bf16 %v19030_v41, %v17268_v60  ;;  %13366 = vmatmul.mubr.bf16.gmra.mxu1 %v7851_v17  ;;  %v7291_v37 = vadd.f32 %v19031_v0, %v6985_v44  ;;  %v19032_v35 = vld [vmem:[#allocation52_spill] sm:$0xff]  ;;  %v6668_v24 = vadd.f32 %v19036_v31, %v17248_v58  ;;  %v19040_v7 = vld [vmem:[#allocation118_spill] sm:$0xff] }
 0x4a7   : > { %7712 = vst [vmem:[#allocation2 + $0x58] sm:$0xff] %v7680_v8  ;;  %v7683_v21 = vmax.f32 %v7651_v55, 0.0  ;;  %v7649_v56 = vadd.f32 %v17155_v13, %v7610_v49  ;;  %v7615_v38 = vadd.f32 %v13327_v34, %v7293_v19  ;;  %13410 = vmatmul.mubr.bf16.vlgmr.msra.gmra.mxu0 %v7785_v52  ;;  %13369 = vmatprep.mubr.bf16.mxu1 %v7852_v45  ;;  %v17314_v52 = vpop.f32.mrf.mxu1 }
 0x4a8   : > { %v17293_v1 = vadd.f32 %v19032_v35, %v17184_v3  ;;  %v7294_v28 = vadd.f32 %v19034_v61, %v6988_v50  ;;  %v7522_v62 = vpop.f32.mrf.mxu0  ;;  %13413 = vmatprep.mubr.bf16.mxu0 %v7786_v29  ;;  %13490 = vmatpush3.bf16.msra.mxu0 %v19035_v23  ;;  %v14028_v3 = vld [vmem:[%s18512_s11 + $0xe8] sm:$0xff]   ;;  %v6673_v44 = vadd.f32 %v19038_v46, %v19037_v53  ;;  %v14033_v23 = vld [vmem:[%s18512_s11 + $0x90] sm:$0xff]   ;;  %v19048_v53 = vld [vmem:[#allocation56_spill] sm:$0xff] }
 0x4a9   : > { %7715 = vst [vmem:[#allocation2 + $0x70] sm:$0xff] %v7683_v21  ;;  %v7681_v26 = vmax.f32 %v7649_v56, 0.0  ;;  %v17299_v42 = vadd.f32 %v17155_v13, %v7615_v38  ;;  %v7613_v2 = vadd.f32 %v7522_v62, %v7291_v37  ;;  %13491 = vmatprep.subr.bf16.mxu0 %v14026_v48  ;;  %13446 = vmatpush3.bf16.msra.mxu1 %v17242_v5  ;;  %v7745_v18 = vld [vmem:[#allocation2 + $0x4f] sm:$0xff] }
 0x4aa   : > { %v7854_v45 = vpack.c.bf16 %v7683_v21, %v7682_v12  ;;  %v6991_v19 = vadd.f32 %v19039_v59, %v6669_v36  ;;  %v7292_v17 = vadd.f32 %v19040_v7, %v6986_v10  ;;  %v13328_v5 = vpop.f32.mrf.mxu0  ;;  %v7742_v12 = vld [vmem:[#allocation2 + $0x37] sm:$0xff]  ;;  %v7743_v55 = vld [vmem:[#allocation2 + $0x3f] sm:$0xff]  ;;  %v7744_v49 = vld [vmem:[#allocation2 + $0x47] sm:$0xff]  ;;  %13447 = vmatprep.subr.bf16.mxu1 %v14029_v9 }
 0x4ab   : > { %7713 = vst [vmem:[#allocation2 + $0x60] sm:$0xff] %v7681_v26  ;;  %v7686_v30 = vmax.f32 %v17299_v42, 0.0  ;;  %v17318_v20 = vadd.f32 %v17155_v13, %v7613_v2  ;;  %v7616_v58 = vadd.f32 %v13328_v5, %v7294_v28  ;;  %v17320_v11 = vpack.c.bf16 %v7743_v55, %v7742_v12  ;;  %v19041_v36 = vld [vmem:[#allocation72_spill] sm:$0xff]  ;;  %v19042_v38 = vld [vmem:[#allocation22_spill] sm:$0xff]  ;;  %v19046_v28 = vld [vmem:[#allocation23_spill] sm:$0xff] }
 0x4ac   : > { %v6989_v63 = vadd.f32 %v19041_v36, %v6667_v25  ;;  %v7297_v50 = vadd.f32 %v17133_v47, %v6991_v19  ;;  %v7525_v34 = vpop.f32.mrf.mxu0  ;;  %v17324_v29 = vpack.c.bf16 %v7745_v18, %v7744_v49  ;;  %13492 = vmatpush3.bf16.msra.mxu0 %v14026_v48  ;;  %v7853_v0 = vpack.c.bf16 %v7681_v26, %v7680_v8  ;;  %v14030_v47 = vld [vmem:[%s18512_s11 + $0xe0] sm:$0xff]   ;;  %v17342_v26 = vpop.f32.mrf.mxu1  ;;  %v19049_v59 = vld [vmem:[#allocation112_spill] sm:$0xff]  ;;  %v19051_v49 = vld [vmem:[#allocation98_spill] sm:$0xff] }
 0x4ad   : > { %7718 = vst [vmem:[#allocation2 + $0x88] sm:$0xff] %v7686_v30  ;;  %v7684_v37 = vmax.f32 %v17318_v20, 0.0  ;;  %v7655_v21 = vadd.f32 %v17155_v13, %v7616_v58  ;;  %v7614_v56 = vadd.f32 %v7525_v34, %v7292_v17  ;;  %v7787_v35 = vmul.bf16 %v19042_v38, %v17320_v11  ;;  %13493 = vmatprep.subr.bf16.mxu0 %v14028_v3  ;;  %v19043_v25 = vld [vmem:[#allocation93_spill] sm:$0xff]  ;;  %v19052_v58 = vld [vmem:[#allocation84_spill] sm:$0xff] }
 0x4ae   : > { %13448 = vmatpush3.bf16.msra.mxu1 %v14029_v9  ;;  %v6671_v10 = vadd.f32 %v19044_v54, %v19043_v25  ;;  %v19045_v48 = vld [vmem:[#allocation81_spill] sm:$0xff]  ;;  %v13331_v61 = vpop.f32.mrf.mxu0  ;;  %v7788_v62 = vmul.bf16 %v19046_v28, %v17324_v29  ;;  %v7295_v9 = vadd.f32 %v17159_v22, %v6989_v63  ;;  %v6990_v19 = vadd.f32 %v19049_v59, %v6668_v24  ;;  %v19050_v24 = vld [vmem:[#allocation114_spill] sm:$0xff]  ;;  %v7746_v36 = vld [vmem:[#allocation2 + $0x57] sm:$0xff]  ;;  %v17366_v34 = vpop.f32.mrf.mxu1 }
 0x4af   : > { %v6992_v8 = vadd.f32 %v19045_v48, %v6670_v15  ;;  %13370 = vmatmul.mubr.bf16.gmra.mxu1 %v7853_v0  ;;  %13449 = vmatprep.subr.bf16.mxu1 %v14031_v16  ;;  %7716 = vst [vmem:[#allocation2 + $0x78] sm:$0xff] %v7684_v37  ;;  %v7687_v42 = vmax.f32 %v7655_v21, 0.0  ;;  %v7653_v2 = vadd.f32 %v17155_v13, %v7614_v56  ;;  %v19047_v15 = vld [vmem:[#allocation95_spill] sm:$0xff] }
 0x4b0   : > { %v7619_v31 = vadd.f32 %v13331_v61, %v7297_v50  ;;  %13414 = vmatmul.mubr.bf16.gmra.mxu0 %v7787_v35  ;;  %13373 = vmatprep.mubr.bf16.mxu1 %v7854_v45  ;;  %v6674_v46 = vadd.f32 %v19048_v53, %v19047_v15  ;;  %v7538_v17 = vpop.f32.mrf.mxu0  ;;  %v14032_v45 = vld [vmem:[%s18512_s11 + $0xd8] sm:$0xff]   ;;  %v17362_v20 = vadd.f32 %v19051_v49, %v17193_v39  ;;  %v7749_v56 = vld [vmem:[#allocation2 + $0x6f] sm:$0xff]  ;;  %v19058_v53 = vld [vmem:[#allocation25_spill] sm:$0xff] }
 0x4b1   : > { %v7298_v7 = vadd.f32 %v17180_v14, %v6992_v8  ;;  %13417 = vmatprep.mubr.bf16.mxu0 %v7788_v62  ;;  %13494 = vmatpush3.bf16.msra.mxu0 %v14028_v3  ;;  %7719 = vst [vmem:[#allocation2 + $0x90] sm:$0xff] %v7687_v42  ;;  %v7685_v22 = vmax.f32 %v7653_v2, 0.0  ;;  %v7617_v12 = vadd.f32 %v7538_v17, %v7295_v9  ;;  %v14035_v14 = vld [vmem:[%s18512_s11 + $0x88] sm:$0xff]   ;;  %v19054_v9 = vld [vmem:[#allocation24_spill] sm:$0xff]  ;;  %v19056_v2 = vld [vmem:[#allocation83_spill] sm:$0xff] }
 0x4b2   : > { %v17350_v5 = vadd.f32 %v17155_v13, %v7619_v31  ;;  %v7856_v55 = vpack.c.bf16 %v7687_v42, %v7686_v30  ;;  %13495 = vmatprep.subr.bf16.mxu0 %v14030_v47  ;;  %13450 = vmatpush3.bf16.msra.mxu1 %v14031_v16  ;;  %v6672_v3 = vadd.f32 %v19050_v24, %v17293_v1  ;;  %v13332_v16 = vpop.f32.mrf.mxu0  ;;  %v7747_v63 = vld [vmem:[#allocation2 + $0x5f] sm:$0xff]  ;;  %v7748_v50 = vld [vmem:[#allocation2 + $0x67] sm:$0xff]  ;;  %v19061_v49 = vld [vmem:[#allocation115_spill] sm:$0xff] }
 0x4b3   : > { %v6995_v18 = vadd.f32 %v19052_v58, %v6673_v44  ;;  %v7296_v30 = vadd.f32 %v17199_v27, %v6990_v19  ;;  %13451 = vmatprep.subr.bf16.mxu1 %v14033_v23  ;;  %7717 = vst [vmem:[#allocation2 + $0x80] sm:$0xff] %v7685_v22  ;;  %v17370_v1 = vadd.f32 %v17155_v13, %v7617_v12  ;;  %v19053_v44 = vld [vmem:[#allocation76_spill] sm:$0xff]  ;;  %v14037_v19 = vld [vmem:[%s18512_s11 + $0x80] sm:$0xff]   ;;  %v19060_v12 = vld [vmem:[#allocation66_spill] sm:$0xff] }
 0x4b4   : > { %v7690_v0 = vmax.f32 %v17350_v5, 0.0  ;;  %v7620_v21 = vadd.f32 %v13332_v16, %v7298_v7  ;;  %v17372_v39 = vpack.c.bf16 %v7747_v63, %v7746_v36  ;;  %v6993_v35 = vadd.f32 %v19053_v44, %v6671_v10  ;;  %v7541_v25 = vpop.f32.mrf.mxu0  ;;  %v19055_v10 = vld [vmem:[#allocation63_spill] sm:$0xff]  ;;  %v17394_v7 = vpop.f32.mrf.mxu1 }
 0x4b5   : > { %v7301_v27 = vadd.f32 %v17215_v6, %v6995_v18  ;;  %v17376_v54 = vpack.c.bf16 %v7749_v56, %v7748_v50  ;;  %v7855_v48 = vpack.c.bf16 %v7685_v22, %v7684_v37  ;;  %13496 = vmatpush3.bf16.msra.mxu0 %v14030_v47  ;;  %v7688_v8 = vmax.f32 %v17370_v1, 0.0  ;;  %v14034_v6 = vld [vmem:[%s18512_s11 + $0xd0] sm:$0xff]   ;;  %v19057_v37 = vld [vmem:[#allocation85_spill] sm:$0xff]  ;;  %v19064_v1 = vld [vmem:[#allocation60_spill] sm:$0xff] }
 0x4b6   : > { %7722 = vst [vmem:[#allocation2 + $0xa8] sm:$0xff] %v7690_v0  ;;  %v7659_v61 = vadd.f32 %v17155_v13, %v7620_v21  ;;  %v7618_v62 = vadd.f32 %v7541_v25, %v7296_v30  ;;  %v7789_v42 = vmul.bf16 %v19054_v9, %v17372_v39  ;;  %13497 = vmatprep.subr.bf16.mxu0 %v14032_v45  ;;  %v13335_v15 = vpop.f32.mrf.mxu0  ;;  %v19063_v50 = vld [vmem:[#allocation101_spill] sm:$0xff]  ;;  %v19065_v56 = vld [vmem:[#allocation78_spill] sm:$0xff] }
 0x4b7   : > { %13452 = vmatpush3.bf16.msra.mxu1 %v14033_v23  ;;  %v6677_v31 = vadd.f32 %v19056_v2, %v19055_v10  ;;  %v6996_v47 = vadd.f32 %v19057_v37, %v6674_v46  ;;  %v7790_v59 = vmul.bf16 %v19058_v53, %v17376_v54  ;;  %v7299_v23 = vadd.f32 %v17236_v43, %v6993_v35  ;;  %v19059_v46 = vld [vmem:[#allocation111_spill] sm:$0xff]  ;;  %v19066_v2 = vld [vmem:[#allocation80_spill] sm:$0xff] }
 0x4b8   : > { %13374 = vmatmul.mubr.bf16.gmra.mxu1 %v7855_v48  ;;  %13453 = vmatprep.subr.bf16.mxu1 %v14035_v14  ;;  %7720 = vst [vmem:[#allocation2 + $0x98] sm:$0xff] %v7688_v8  ;;  %v7691_v17 = vmax.f32 %v7659_v61, 0.0  ;;  %v7657_v22 = vadd.f32 %v17155_v13, %v7618_v62  ;;  %v7623_v5 = vadd.f32 %v13335_v15, %v7301_v27  ;;  %v7554_v30 = vpop.f32.mrf.mxu0  ;;  %v7750_v35 = vld [vmem:[#allocation2 + $0x77] sm:$0xff]  ;;  %v17418_v48 = vpop.f32.mrf.mxu1 }
 0x4b9   : > { %13418 = vmatmul.mubr.bf16.gmra.mxu0 %v7789_v42  ;;  %13377 = vmatprep.mubr.bf16.mxu1 %v7856_v55  ;;  %v6675_v24 = vadd.f32 %v19060_v12, %v19059_v46  ;;  %v6994_v58 = vadd.f32 %v19061_v49, %v6672_v3  ;;  %v7302_v18 = vadd.f32 %v17258_v33, %v6996_v47  ;;  %v14036_v55 = vld [vmem:[%s18512_s11 + $0xc8] sm:$0xff]   ;;  %v17408_v3 = vld [vmem:[%s18512_s11 + $0x138] sm:$0xff]   ;;  %v19062_v33 = vld [vmem:[#allocation65_spill] sm:$0xff] }
 0x4ba   : > { %13421 = vmatprep.mubr.bf16.mxu0 %v7790_v59  ;;  %13498 = vmatpush3.bf16.msra.mxu0 %v14032_v45  ;;  %7723 = vst [vmem:[#allocation2 + $0xb0] sm:$0xff] %v7691_v17  ;;  %v7689_v43 = vmax.f32 %v7657_v22, 0.0  ;;  %v7662_v16 = vadd.f32 %v17155_v13, %v7623_v5  ;;  %v7621_v36 = vadd.f32 %v7554_v30, %v7299_v23  ;;  %v13336_v44 = vpop.f32.mrf.mxu0  ;;  %v7751_v27 = vld [vmem:[#allocation2 + $0x7f] sm:$0xff]  ;;  %v7752_v25 = vld [vmem:[#allocation2 + $0x87] sm:$0xff]  ;;  %v19070_v49 = vld [vmem:[#allocation27_spill] sm:$0xff]  ;;  %v7264_v30 = vpop.f32.mrf.mxu1 }
 0x4bb   : > { %v7858_v63 = vpack.c.bf16 %v7691_v17, %v7690_v0  ;;  %13499 = vmatprep.subr.bf16.mxu0 %v14034_v6  ;;  %13454 = vmatpush3.bf16.msra.mxu1 %v14035_v14  ;;  %v6678_v45 = vadd.f32 %v19063_v50, %v19062_v33  ;;  %v17414_v21 = vadd.f32 %v19064_v1, %v17203_v32  ;;  %v7753_v32 = vld [vmem:[#allocation2 + $0x8f] sm:$0xff]  ;;  %v19068_v46 = vld [vmem:[#allocation69_spill] sm:$0xff] }
 0x4bc   : > { %v6999_v0 = vadd.f32 %v19065_v56, %v6677_v31  ;;  %v7300_v14 = vadd.f32 %v17288_v4, %v6994_v58  ;;  %13455 = vmatprep.subr.bf16.mxu1 %v14037_v19  ;;  %7721 = vst [vmem:[#allocation2 + $0xa0] sm:$0xff] %v7689_v43  ;;  %v7694_v61 = vmax.f32 %v7662_v16, 0.0  ;;  %v17421_v62 = vadd.f32 %v17155_v13, %v7621_v36  ;;  %v7557_v37 = vpop.f32.mrf.mxu0  ;;  %v19067_v22 = vld [vmem:[#allocation26_spill] sm:$0xff]  ;;  %v19073_v50 = vld [vmem:[#allocation117_spill] sm:$0xff] }
 0x4bd   : > { %v7624_v42 = vadd.f32 %v13336_v44, %v7302_v18  ;;  %v17423_v10 = vpack.c.bf16 %v7751_v27, %v7750_v35  ;;  %v6997_v31 = vadd.f32 %v19066_v2, %v6675_v24  ;;  %v17427_v47 = vpack.c.bf16 %v7753_v32, %v7752_v25  ;;  %v19072_v36 = vld [vmem:[#allocation102_spill] sm:$0xff]  ;;  %v19074_v35 = vld [vmem:[#allocation99_spill] sm:$0xff]  ;;  %v19078_v32 = vld [vmem:[#allocation88_spill] sm:$0xff] }
 0x4be   : > { %v7305_v4 = vadd.f32 %v17314_v52, %v6999_v0  ;;  %v7857_v15 = vpack.c.bf16 %v7689_v43, %v7688_v8  ;;  %13500 = vmatpush3.bf16.msra.mxu0 %v14034_v6  ;;  %7726 = vst [vmem:[#allocation2 + $0xc8] sm:$0xff] %v7694_v61  ;;  %v7692_v59 = vmax.f32 %v17421_v62, 0.0  ;;  %v7622_v17 = vadd.f32 %v7557_v37, %v7300_v14  ;;  %v14038_v52 = vld [vmem:[%s18512_s11 + $0xc0] sm:$0xff]   ;;  %v19069_v8 = vld [vmem:[#allocation87_spill] sm:$0xff]  ;;  %v13339_v24 = vpop.f32.mrf.mxu0  ;;  %v19075_v27 = vld [vmem:[#allocation62_spill] sm:$0xff] }
 0x4bf   : > { %v7663_v23 = vadd.f32 %v17155_v13, %v7624_v42  ;;  %v7791_v5 = vmul.bf16 %v19067_v22, %v17423_v10  ;;  %13501 = vmatprep.subr.bf16.mxu0 %v14036_v55  ;;  %13456 = vmatpush3.bf16.msra.mxu1 %v14037_v19  ;;  %v6676_v12 = vadd.f32 %v19068_v46, %v17362_v20  ;;  %v19071_v20 = vld [vmem:[#allocation67_spill] sm:$0xff] }
 0x4c0   : > { %v7000_v6 = vadd.f32 %v19069_v8, %v6678_v45  ;;  %v7792_v58 = vmul.bf16 %v19070_v49, %v17427_v47  ;;  %13378 = vmatmul.mubr.bf16.gmra.mxu1 %v7857_v15  ;;  %13537 = vmatprep.subr.bf16.mxu1 %v17408_v3  ;;  %v7303_v18 = vadd.f32 %v17342_v26, %v6997_v31  ;;  %v7570_v56 = vpop.f32.mrf.mxu0  ;;  %v19076_v62 = vld [vmem:[#allocation119_spill] sm:$0xff]  ;;  %v13296_v15 = vpop.f32.mrf.mxu1  ;;  %v19079_v8 = vld [vmem:[#allocation120_spill] sm:$0xff] }
 0x4c1   : > { %7724 = vst [vmem:[#allocation2 + $0xb8] sm:$0xff] %v7692_v59  ;;  %v7695_v19 = vmax.f32 %v7663_v23, 0.0  ;;  %v7661_v43 = vadd.f32 %v17155_v13, %v7622_v17  ;;  %v7627_v16 = vadd.f32 %v13339_v24, %v7305_v4  ;;  %13422 = vmatmul.mubr.bf16.gmra.mxu0 %v7791_v5  ;;  %13381 = vmatprep.mubr.bf16.mxu1 %v7858_v63  ;;  %v17452_v63 = vld [vmem:[%s18512_s11 + $0x178] sm:$0xff]  }
 0x4c2   : > { %v6681_v33 = vadd.f32 %v19072_v36, %v19071_v20  ;;  %v6998_v45 = vadd.f32 %v19073_v50, %v6676_v12  ;;  %v7306_v1 = vadd.f32 %v17366_v34, %v7000_v6  ;;  %13425 = vmatprep.mubr.bf16.mxu0 %v7792_v58  ;;  %13502 = vmatpush3.bf16.msra.mxu0 %v14036_v55  ;;  %v19077_v34 = vld [vmem:[#allocation71_spill] sm:$0xff]  ;;  %v13340_v31 = vpop.f32.mrf.mxu0  ;;  %v19080_v20 = vld [vmem:[#allocation28_spill] sm:$0xff] }
 0x4c3   : > { %7727 = vst [vmem:[#allocation2 + $0xd0] sm:$0xff] %v7695_v19  ;;  %v7693_v26 = vmax.f32 %v7661_v43, 0.0  ;;  %v7666_v0 = vadd.f32 %v17155_v13, %v7627_v16  ;;  %v7625_v14 = vadd.f32 %v7570_v56, %v7303_v18  ;;  %v7860_v44 = vpack.c.bf16 %v7695_v19, %v7694_v61  ;;  %13503 = vmatprep.subr.bf16.mxu0 %v14038_v52  ;;  %v7754_v4 = vld [vmem:[#allocation2 + $0x97] sm:$0xff]  ;;  %v7755_v37 = vld [vmem:[#allocation2 + $0x9f] sm:$0xff]  ;;  %v7756_v61 = vld [vmem:[#allocation2 + $0xa7] sm:$0xff] }
 0x4c4   : > { %v6679_v25 = vadd.f32 %v19075_v27, %v19074_v35  ;;  %v6682_v42 = vadd.f32 %v19077_v34, %v19076_v62  ;;  %v7003_v55 = vadd.f32 %v19078_v32, %v6681_v33  ;;  %v7304_v2 = vadd.f32 %v17394_v7, %v6998_v45  ;;  %v7757_v12 = vld [vmem:[#allocation2 + $0xaf] sm:$0xff]  ;;  %v7573_v58 = vpop.f32.mrf.mxu0  ;;  %v19081_v33 = vld [vmem:[#allocation104_spill] sm:$0xff]  ;;  %v19082_v45 = vld [vmem:[#allocation121_spill] sm:$0xff] }
 0x4c5   : > { %7725 = vst [vmem:[#allocation2 + $0xc0] sm:$0xff] %v7693_v26  ;;  %v7698_v23 = vmax.f32 %v7666_v0, 0.0  ;;  %v7664_v17 = vadd.f32 %v17155_v13, %v7625_v14  ;;  %v7628_v5 = vadd.f32 %v13340_v31, %v7306_v1  ;;  %v17461_v46 = vpack.c.bf16 %v7755_v37, %v7754_v4  ;;  %v19083_v56 = vld [vmem:[#allocation29_spill] sm:$0xff] }
 0x4c6   : > { %v7001_v6 = vadd.f32 %v19079_v8, %v6679_v25  ;;  %v7309_v24 = vadd.f32 %v17418_v48, %v7003_v55  ;;  %v17465_v18 = vpack.c.bf16 %v7757_v12, %v7756_v61  ;;  %v7859_v7 = vpack.c.bf16 %v7693_v26, %v7692_v59  ;;  %13504 = vmatpush3.bf16.msra.mxu0 %v14038_v52  ;;  %v13343_v1 = vpop.f32.mrf.mxu0  ;;  %v7267_v26 = vpop.f32.mrf.mxu1 }
 0x4c7   : > { %7730 = vst [vmem:[#allocation2 + $0xe8] sm:$0xff] %v7698_v23  ;;  %v7696_v19 = vmax.f32 %v7664_v17, 0.0  ;;  %v7667_v43 = vadd.f32 %v17155_v13, %v7628_v5  ;;  %v7626_v16 = vadd.f32 %v7573_v58, %v7304_v2  ;;  %v7793_v36 = vmul.bf16 %v19080_v20, %v17461_v46  ;;  %13585 = vmatprep.subr.bf16.mxu0 %v17452_v63 }
 0x4c8   : > { %v6680_v50 = vadd.f32 %v19081_v33, %v17414_v21  ;;  %v7004_v48 = vadd.f32 %v19082_v45, %v6682_v42  ;;  %v7794_v59 = vmul.bf16 %v19083_v56, %v17465_v18  ;;  %13382 = vmatmul.mubr.bf16.gmra.mxu1 %v7859_v7  ;;  %v7307_v52 = vadd.f32 %v7264_v30, %v7001_v6  ;;  %v7586_v21 = vpop.f32.mrf.mxu0  ;;  %v7758_v2 = vld [vmem:[#allocation2 + $0xb7] sm:$0xff] }
 0x4c9   : > { %7728 = vst [vmem:[#allocation2 + $0xd8] sm:$0xff] %v7696_v19  ;;  %v7699_v0 = vmax.f32 %v7667_v43, 0.0  ;;  %v7665_v14 = vadd.f32 %v17155_v13, %v7626_v16  ;;  %v7631_v35 = vadd.f32 %v13343_v1, %v7309_v24  ;;  %13426 = vmatmul.mubr.bf16.gmra.mxu0 %v7793_v36  ;;  %13385 = vmatprep.mubr.bf16.mxu1 %v7860_v44  ;;  %v19084_v24 = vld [vmem:[#allocation30_spill] sm:$0xff]  ;;  %v19085_v7 = vld [vmem:[#allocation31_spill] sm:$0xff] }
 0x4ca   : > { %v7002_v27 = vadd.f32 %v17139_v57, %v6680_v50  ;;  %v7310_v25 = vadd.f32 %v13296_v15, %v7004_v48  ;;  %13429 = vmatprep.mubr.bf16.mxu0 %v7794_v59  ;;  %v7629_v42 = vadd.f32 %v7586_v21, %v7307_v52  ;;  %v13344_v55 = vpop.f32.mrf.mxu0  ;;  %v7761_v15 = vld [vmem:[#allocation2 + $0xcf] sm:$0xff] }
 0x4cb   : > { %7731 = vst [vmem:[#allocation2 + $0xf0] sm:$0xff] %v7699_v0  ;;  %v7697_v62 = vmax.f32 %v7665_v14, 0.0  ;;  %v7670_v34 = vadd.f32 %v17155_v13, %v7631_v35  ;;  %v7862_v32 = vpack.c.bf16 %v7699_v0, %v7698_v23  ;;  %v8299_v16 = vld [vmem:[#allocation2 + $0x9] sm:$0xff]  ;;  %v8300_v36 = vld [vmem:[#allocation2 + $0x11] sm:$0xff] }
 0x4cc   : > { %v7308_v30 = vadd.f32 %v7267_v26, %v7002_v27  ;;  %v7759_v31 = vld [vmem:[#allocation2 + $0xbf] sm:$0xff]  ;;  %v7760_v4 = vld [vmem:[#allocation2 + $0xc7] sm:$0xff]  ;;  %v7668_v44 = vadd.f32 %v17155_v13, %v7629_v42  ;;  %v7632_v61 = vadd.f32 %v13344_v55, %v7310_v25  ;;  %v7589_v17 = vpop.f32.mrf.mxu0  ;;  %v8331_v48 = vpack.c.bf16 %v8300_v36, %v8299_v16  ;;  %v8308_v36 = vld [vmem:[#allocation2 + $0x51] sm:$0xff] }
 0x4cd   : > { %7729 = vst [vmem:[#allocation2 + $0xe0] sm:$0xff] %v7697_v62  ;;  %v7702_v37 = vmax.f32 %v7670_v34, 0.0  ;;  %v17480_v57 = vpack.c.bf16 %v7759_v31, %v7758_v2  ;;  %v17482_v5 = vpack.c.bf16 %v7761_v15, %v7760_v4  ;;  %v7861_v12 = vpack.c.bf16 %v7697_v62, %v7696_v19  ;;  %v19087_v27 = vld [vmem:[#allocation33_spill] sm:$0xff]  ;;  %v19088_v21 = vld [vmem:[#allocation6_spill] sm:$0xff] }
 0x4ce   : > { %v7700_v8 = vmax.f32 %v7668_v44, 0.0  ;;  %v7671_v23 = vadd.f32 %v17155_v13, %v7632_v61  ;;  %v7630_v6 = vadd.f32 %v7589_v17, %v7308_v30  ;;  %v8347_v62 = vmul.bf16 %v19088_v21, %v8331_v48  ;;  %v8301_v34 = vld [vmem:[#allocation2 + $0x19] sm:$0xff]  ;;  %v8302_v42 = vld [vmem:[#allocation2 + $0x21] sm:$0xff]  ;;  %v8303_v55 = vld [vmem:[#allocation2 + $0x29] sm:$0xff] }
 0x4cf   : > { %7734 = vst [vmem:[#allocation2 + $0x108] sm:$0xff] %v7702_v37  ;;  %v7795_v58 = vmul.bf16 %v19084_v24, %v17480_v57  ;;  %v7796_v43 = vmul.bf16 %v19085_v7, %v17482_v5  ;;  %v17503_v30 = vpack.c.bf16 %v8302_v42, %v8301_v34  ;;  %v19089_v44 = vld [vmem:[#allocation7_spill] sm:$0xff]  ;;  %v19090_v15 = vld [vmem:[#allocation34_spill] sm:$0xff]  ;;  %v14045_v42 = vld [vmem:[%s18512_s11 + $0x120] sm:$0xff]  }
 0x4d0   : > { %13386 = vmatmul.mubr.bf16.gmra.mxu1 %v7861_v12  ;;  %7732 = vst [vmem:[#allocation2 + $0xf8] sm:$0xff] %v7700_v8  ;;  %v7703_v33 = vmax.f32 %v7671_v23, 0.0  ;;  %v7669_v50 = vadd.f32 %v17155_v13, %v7630_v6  ;;  %v7762_v45 = vld [vmem:[#allocation2 + $0xd7] sm:$0xff]  ;;  %v8306_v23 = vld [vmem:[#allocation2 + $0x41] sm:$0xff] }
 0x4d1   : > { %13430 = vmatmul.mubr.bf16.gmra.mxu0 %v7795_v58  ;;  %13389 = vmatprep.mubr.bf16.mxu1 %v7862_v32  ;;  %v19086_v13 = vld [vmem:[#allocation32_spill] sm:$0xff]  ;;  %v8348_v61 = vmul.bf16 %v19089_v44, %v17503_v30  ;;  %v14041_v12 = vld [vmem:[%s18512_s11 + $0x130] sm:$0xff]   ;;  %v19091_v6 = vld [vmem:[#allocation5_spill] sm:$0xff] }
 0x4d2   : > { %13433 = vmatprep.mubr.bf16.mxu0 %v7796_v43  ;;  %7735 = vst [vmem:[#allocation2 + $0x110] sm:$0xff] %v7703_v33  ;;  %v17490_v19 = vmax.f32 %v7669_v50, 0.0  ;;  %v7765_v52 = vld [vmem:[#allocation2 + $0xef] sm:$0xff]  ;;  %v8669_v58 = vmul.bf16 %v19091_v6, %v17263_v51  ;;  %v19092_v43 = vld [vmem:[#allocation8_spill] sm:$0xff]  ;;  %v19093_v51 = vld [vmem:[#allocation9_spill] sm:$0xff] }
 0x4d3   : > { %v8304_v32 = vld [vmem:[#allocation2 + $0x31] sm:$0xff]  ;;  %v8307_v50 = vld [vmem:[#allocation2 + $0x49] sm:$0xff] }
 0x4d4   : > { %v7763_v1 = vld [vmem:[#allocation2 + $0xdf] sm:$0xff]  ;;  %v7764_v59 = vld [vmem:[#allocation2 + $0xe7] sm:$0xff]  ;;  %7733 = vst [vmem:[#allocation2 + $0x100] sm:$0xff] %v17490_v19  ;;  %v7863_v14 = vpack.c.bf16 %v17490_v19, %v7700_v8  ;;  %v17505_v4 = vpack.c.bf16 %v8304_v32, %v8303_v55  ;;  %v17526_v48 = vpack.c.bf16 %v8308_v36, %v8307_v50  ;;  %v8312_v34 = vld [vmem:[#allocation2 + $0x71] sm:$0xff] }
 0x4d5   : > { %v17493_v26 = vpack.c.bf16 %v7763_v1, %v7762_v45  ;;  %v17495_v0 = vpack.c.bf16 %v7765_v52, %v7764_v59  ;;  %v8305_v8 = vld [vmem:[#allocation2 + $0x39] sm:$0xff]  ;;  %v14043_v45 = vld [vmem:[%s18512_s11 + $0x128] sm:$0xff]   ;;  %v8316_v36 = vld [vmem:[#allocation2 + $0x91] sm:$0xff] }
 0x4d6   : > { %v8349_v16 = vmul.bf16 %v19092_v43, %v17505_v4  ;;  %v17521_v33 = vpack.c.bf16 %v8306_v23, %v8305_v8  ;;  %v19094_v59 = vld [vmem:[#allocation10_spill] sm:$0xff]  ;;  %v8313_v8 = vld [vmem:[#allocation2 + $0x79] sm:$0xff] }
 0x4d7   : > { %v7797_v35 = vmul.bf16 %v19086_v13, %v17493_v26  ;;  %v7798_v25 = vmul.bf16 %v19087_v27, %v17495_v0  ;;  %v7766_v2 = vld [vmem:[#allocation2 + $0xf7] sm:$0xff]  ;;  %v8351_v52 = vmul.bf16 %v19094_v59, %v17526_v48  ;;  %v8311_v32 = vld [vmem:[#allocation2 + $0x69] sm:$0xff]  ;;  %v8314_v23 = vld [vmem:[#allocation2 + $0x81] sm:$0xff] }
 0x4d8   : > { %13390 = vmatmul.mubr.bf16.gmra.mxu1 %v7863_v14  ;;  %v8350_v1 = vmul.bf16 %v19093_v51, %v17521_v33  ;;  %v14042_v14 = vld [vmem:[%s18512_s11 + $0x170] sm:$0xff]   ;;  %v17545_v55 = vpack.c.bf16 %v8312_v34, %v8311_v32  ;;  %v17567_v50 = vpack.c.bf16 %v8314_v23, %v8313_v8  ;;  %v8317_v34 = vld [vmem:[#allocation2 + $0x99] sm:$0xff] }
 0x4d9   : > { %13434 = vmatmul.mubr.bf16.gmra.mxu0 %v7797_v35  ;;  %13457 = vmatprep.mubr.bf16.mxu1 %v8347_v62  ;;  %v8309_v35 = vld [vmem:[#allocation2 + $0x59] sm:$0xff]  ;;  %v8671_v62 = vmul.bf16 %v19030_v41, %v17320_v11  ;;  %v14044_v11 = vld [vmem:[%s18512_s11 + $0x168] sm:$0xff]   ;;  %v14050_v32 = vld [vmem:[%s18512_s11 + $0x150] sm:$0xff]  }
 0x4da   : > { %13437 = vmatprep.mubr.bf16.mxu0 %v7798_v25  ;;  %v8310_v25 = vld [vmem:[#allocation2 + $0x61] sm:$0xff]  ;;  %v17601_v8 = vld [vmem:[%s18512_s11 + $0x1b8] sm:$0xff]   ;;  %v19099_v23 = vld [vmem:[#allocation15_spill] sm:$0xff] }
 0x4db   : > { %v7767_v31 = vld [vmem:[#allocation2 + $0xff] sm:$0xff] }
 0x4dc   : > { %v17507_v37 = vpack.c.bf16 %v7767_v31, %v7766_v2  ;;  %v14047_v2 = vld [vmem:[%s18512_s11 + $0x118] sm:$0xff]   ;;  %v19095_v31 = vld [vmem:[#allocation11_spill] sm:$0xff] }
 0x4de   : > { %v7799_v17 = vmul.bf16 %v19090_v15, %v17507_v37 }
 0x4e0   : > { %13458 = vmatmul.mubr.bf16.vlgmr.msra.gmra.mxu1 %v8348_v61  ;;  %v8672_v61 = vmul.bf16 %v19042_v38, %v17324_v29  ;;  %v14049_v29 = vld [vmem:[%s18512_s11 + $0x110] sm:$0xff]  }
 0x4e1   : > { %13438 = vmatmul.mubr.bf16.gmra.mxu0 %v7799_v17  ;;  %13538 = vmatpush3.bf16.msra.mxu1 %v17408_v3  ;;  %v8670_v3 = vmul.bf16 %v19024_v40, %v17268_v60  ;;  %v17543_v60 = vpack.c.bf16 %v8310_v25, %v8309_v35  ;;  %v19096_v17 = vld [vmem:[#allocation12_spill] sm:$0xff]  ;;  %v8674_v35 = vmul.bf16 %v19054_v9, %v17376_v54  ;;  %v19098_v25 = vld [vmem:[#allocation14_spill] sm:$0xff]  ;;  %v14053_v54 = vld [vmem:[%s18512_s11 + $0x100] sm:$0xff]  }
 0x4e2   : > { %13505 = vmatprep.mubr.bf16.mxu0 %v8669_v58  ;;  %13461 = vmatprep.mubr.bf16.mxu1 %v8349_v16  ;;  %v14046_v58 = vld [vmem:[%s18512_s11 + $0x160] sm:$0xff]   ;;  %v8673_v16 = vmul.bf16 %v19046_v28, %v17372_v39  ;;  %v14048_v39 = vld [vmem:[%s18512_s11 + $0x158] sm:$0xff]  }
 0x4e3   : > { %13539 = vmatprep.subr.bf16.mxu1 %v14041_v12 }
 0x4e5   : > { %13540 = vmatpush3.bf16.msra.mxu1 %v14041_v12  ;;  %v8353_v12 = vmul.bf16 %v19096_v17, %v17545_v55 }
 0x4e6   : > { %13541 = vmatprep.subr.bf16.mxu1 %v14043_v45 }
 0x4e8   : > { %13462 = vmatmul.mubr.bf16.gmra.mxu1 %v8350_v1 }
 0x4e9   : > { %13506 = vmatmul.mubr.bf16.vlgmr.msra.gmra.mxu0 %v8670_v3  ;;  %13465 = vmatprep.mubr.bf16.mxu1 %v8351_v52  ;;  %v14051_v3 = vld [vmem:[%s18512_s11 + $0x108] sm:$0xff]   ;;  %v19097_v52 = vld [vmem:[#allocation13_spill] sm:$0xff] }
 0x4ea   : > { %13509 = vmatprep.mubr.bf16.mxu0 %v8671_v62  ;;  %13586 = vmatpush3.bf16.msra.mxu0 %v17452_v63  ;;  %v8352_v63 = vmul.bf16 %v19095_v31, %v17543_v60 }
 0x4eb   : > { %13587 = vmatprep.subr.bf16.mxu0 %v14042_v14  ;;  %13542 = vmatpush3.bf16.msra.mxu1 %v14043_v45  ;;  %v8315_v45 = vld [vmem:[#allocation2 + $0x89] sm:$0xff] }
 0x4ec   : > { %13543 = vmatprep.subr.bf16.mxu1 %v14045_v42  ;;  %v17569_v1 = vpack.c.bf16 %v8316_v36, %v8315_v45  ;;  %v19100_v36 = vld [vmem:[#allocation21_spill] sm:$0xff] }
 0x4ed   : > { %v8321_v45 = vld [vmem:[#allocation2 + $0xb9] sm:$0xff] }
 0x4ee   : > { %13588 = vmatpush3.bf16.msra.mxu0 %v14042_v14  ;;  %v8354_v14 = vmul.bf16 %v19097_v52, %v17567_v50  ;;  %v8355_v62 = vmul.bf16 %v19098_v25, %v17569_v1 }
 0x4ef   : > { %13589 = vmatprep.subr.bf16.mxu0 %v14044_v11  ;;  %13544 = vmatpush3.bf16.msra.mxu1 %v14045_v42  ;;  %v8318_v42 = vld [vmem:[#allocation2 + $0xa1] sm:$0xff] }
 0x4f0   : > { %13466 = vmatmul.mubr.bf16.gmra.mxu1 %v8352_v63  ;;  %13545 = vmatprep.subr.bf16.mxu1 %v14047_v2  ;;  %v17591_v63 = vpack.c.bf16 %v8318_v42, %v8317_v34  ;;  %v17622_v42 = vld [vmem:[%s18512_s11 + $0x1f8] sm:$0xff]  }
 0x4f1   : > { %13510 = vmatmul.mubr.bf16.gmra.mxu0 %v8672_v61  ;;  %13469 = vmatprep.mubr.bf16.mxu1 %v8353_v12  ;;  %v8319_v61 = vld [vmem:[#allocation2 + $0xa9] sm:$0xff] }
 0x4f2   : > { %13513 = vmatprep.mubr.bf16.mxu0 %v8673_v16  ;;  %13590 = vmatpush3.bf16.msra.mxu0 %v14044_v11  ;;  %v8675_v11 = vmul.bf16 %v19058_v53, %v17423_v10  ;;  %v14052_v10 = vld [vmem:[%s18512_s11 + $0x148] sm:$0xff]   ;;  %v8676_v16 = vmul.bf16 %v19067_v22, %v17427_v47 }
 0x4f3   : > { %13591 = vmatprep.subr.bf16.mxu0 %v14046_v58  ;;  %13546 = vmatpush3.bf16.msra.mxu1 %v14047_v2  ;;  %v8320_v2 = vld [vmem:[#allocation2 + $0xb1] sm:$0xff] }
 0x4f4   : > { %13547 = vmatprep.subr.bf16.mxu1 %v14049_v29  ;;  %v17593_v12 = vpack.c.bf16 %v8320_v2, %v8319_v61  ;;  %v19102_v2 = vld [vmem:[#allocation16_spill] sm:$0xff] }
 0x4f5   : > { %v8325_v61 = vld [vmem:[#allocation2 + $0xd9] sm:$0xff] }
 0x4f6   : > { %13592 = vmatpush3.bf16.msra.mxu0 %v14046_v58  ;;  %v8356_v58 = vmul.bf16 %v19099_v23, %v17591_v63 }
 0x4f7   : > { %13593 = vmatprep.subr.bf16.mxu0 %v14048_v39  ;;  %13548 = vmatpush3.bf16.msra.mxu1 %v14049_v29  ;;  %v8357_v29 = vmul.bf16 %v19100_v36, %v17593_v12 }
 0x4f8   : > { %13470 = vmatmul.mubr.bf16.gmra.mxu1 %v8354_v14  ;;  %13549 = vmatprep.subr.bf16.mxu1 %v14051_v3  ;;  %v8677_v14 = vmul.bf16 %v19070_v49, %v17461_v46  ;;  %v19101_v46 = vld [vmem:[#allocation18_spill] sm:$0xff] }
 0x4f9   : > { %13514 = vmatmul.mubr.bf16.gmra.mxu0 %v8674_v35  ;;  %13473 = vmatprep.mubr.bf16.mxu1 %v8355_v62  ;;  %v8324_v35 = vld [vmem:[#allocation2 + $0xd1] sm:$0xff]  ;;  %v8323_v62 = vld [vmem:[#allocation2 + $0xc9] sm:$0xff] }
 0x4fa   : > { %13517 = vmatprep.mubr.bf16.mxu0 %v8675_v11  ;;  %13594 = vmatpush3.bf16.msra.mxu0 %v14048_v39  ;;  %v8322_v39 = vld [vmem:[#allocation2 + $0xc1] sm:$0xff]  ;;  %v17617_v34 = vpack.c.bf16 %v8324_v35, %v8323_v62  ;;  %v8678_v11 = vmul.bf16 %v19080_v20, %v17465_v18  ;;  %v19104_v35 = vld [vmem:[#allocation35_spill] sm:$0xff] }
 0x4fb   : > { %13595 = vmatprep.subr.bf16.mxu0 %v14050_v32  ;;  %13550 = vmatpush3.bf16.msra.mxu1 %v14051_v3  ;;  %v14054_v3 = vld [vmem:[%s18512_s11 + $0x140] sm:$0xff]   ;;  %v17615_v47 = vpack.c.bf16 %v8322_v39, %v8321_v45  ;;  %v8327_v45 = vld [vmem:[#allocation2 + $0xe9] sm:$0xff] }
 0x4fc   : > { %13551 = vmatprep.subr.bf16.mxu1 %v14053_v54  ;;  %v19103_v18 = vld [vmem:[#allocation17_spill] sm:$0xff] }
 0x4fe   : > { %13596 = vmatpush3.bf16.msra.mxu0 %v14050_v32  ;;  %v8358_v32 = vmul.bf16 %v19101_v46, %v17615_v47 }
 0x4ff   : > { %13597 = vmatprep.subr.bf16.mxu0 %v14052_v10  ;;  %13552 = vmatpush3.bf16.msra.mxu1 %v14053_v54  ;;  %v8359_v54 = vmul.bf16 %v19102_v2, %v17617_v34 }
 0x500   : > { %13474 = vmatmul.mubr.bf16.gmra.mxu1 %v8356_v58  ;;  %13633 = vmatprep.subr.bf16.mxu1 %v17601_v8  ;;  %v8679_v58 = vmul.bf16 %v19083_v56, %v17480_v57  ;;  %v8329_v57 = vld [vmem:[#allocation2 + $0xf9] sm:$0xff] }
 0x501   : > { %13518 = vmatmul.mubr.bf16.gmra.mxu0 %v8676_v16  ;;  %13477 = vmatprep.mubr.bf16.mxu1 %v8357_v29  ;;  %v8328_v16 = vld [vmem:[#allocation2 + $0xf1] sm:$0xff] }
 0x502   : > { %13521 = vmatprep.mubr.bf16.mxu0 %v8677_v14  ;;  %13598 = vmatpush3.bf16.msra.mxu0 %v14052_v10  ;;  %v8326_v10 = vld [vmem:[#allocation2 + $0xe1] sm:$0xff]  ;;  %v17635_v39 = vpack.c.bf16 %v8328_v16, %v8327_v45  ;;  %v8680_v14 = vmul.bf16 %v19084_v24, %v17482_v5  ;;  %v8943_v16 = vld [vmem:[#allocation2 + $0x18] sm:$0xff]  ;;  %v8682_v5 = vmul.bf16 %v19086_v13, %v17495_v0 }
 0x503   : > { %13599 = vmatprep.subr.bf16.mxu0 %v14054_v3  ;;  %v17633_v29 = vpack.c.bf16 %v8326_v10, %v8325_v61  ;;  %v8944_v61 = vld [vmem:[#allocation2 + $0x20] sm:$0xff]  ;;  %v19105_v10 = vld [vmem:[#allocation36_spill] sm:$0xff]  ;;  %v8683_v24 = vmul.bf16 %v19087_v27, %v17507_v37  ;;  %v14057_v37 = vld [vmem:[%s18512_s11 + $0x1b0] sm:$0xff]  }
 0x504   : > { %v8361_v62 = vmul.bf16 %v19104_v35, %v17635_v39  ;;  %v8975_v45 = vpack.c.bf16 %v8944_v61, %v8943_v16  ;;  %v8947_v61 = vld [vmem:[#allocation2 + $0x38] sm:$0xff]  ;;  %v14059_v16 = vld [vmem:[%s18512_s11 + $0x1a8] sm:$0xff]  }
 0x506   : > { %13600 = vmatpush3.bf16.msra.mxu0 %v14054_v3  ;;  %v8360_v3 = vmul.bf16 %v19103_v18, %v17633_v29 }
 0x507   : > { %13681 = vmatprep.subr.bf16.mxu0 %v17622_v42 }
 0x508   : > { %13478 = vmatmul.mubr.bf16.gmra.mxu1 %v8358_v32  ;;  %v8330_v32 = vld [vmem:[#allocation2 + $0x101] sm:$0xff] }
 0x509   : > { %13522 = vmatmul.mubr.bf16.gmra.mxu0 %v8678_v11  ;;  %13481 = vmatprep.mubr.bf16.mxu1 %v8359_v54  ;;  %v8681_v11 = vmul.bf16 %v19085_v7, %v17493_v26  ;;  %v17645_v54 = vpack.c.bf16 %v8330_v32, %v8329_v57  ;;  %v8651_v26 = vld [vmem:[#allocation2 + $0x107] sm:$0xff] }
 0x50a   : > { %13525 = vmatprep.mubr.bf16.mxu0 %v8679_v58  ;;  %v8945_v57 = vld [vmem:[#allocation2 + $0x28] sm:$0xff]  ;;  %v8948_v32 = vld [vmem:[#allocation2 + $0x40] sm:$0xff] }
 0x50b   : > { %v8362_v58 = vmul.bf16 %v19105_v10, %v17645_v54 }
 0x510   : > { %13482 = vmatmul.mubr.bf16.gmra.mxu1 %v8360_v3  ;;  %v8652_v3 = vld [vmem:[#allocation2 + $0x10f] sm:$0xff] }
 0x511   : > { %13526 = vmatmul.mubr.bf16.gmra.mxu0 %v8680_v14  ;;  %13485 = vmatprep.mubr.bf16.mxu1 %v8361_v62  ;;  %v17653_v14 = vpack.c.bf16 %v8652_v3, %v8651_v26  ;;  %v8946_v62 = vld [vmem:[#allocation2 + $0x30] sm:$0xff]  ;;  %v8949_v26 = vld [vmem:[#allocation2 + $0x48] sm:$0xff]  ;;  %v8951_v3 = vld [vmem:[#allocation2 + $0x58] sm:$0xff] }
 0x512   : > { %13529 = vmatprep.mubr.bf16.mxu0 %v8681_v11  ;;  %v17655_v11 = vpack.c.bf16 %v8946_v62, %v8945_v57  ;;  %v9298_v62 = vmul.bf16 %v19089_v44, %v17505_v4  ;;  %v14058_v57 = vld [vmem:[%s18512_s11 + $0x1f0] sm:$0xff]  }
 0x513   : > { %v8684_v0 = vmul.bf16 %v19090_v15, %v17653_v14  ;;  %v8954_v4 = vld [vmem:[#allocation2 + $0x70] sm:$0xff] }
 0x518   : > { %13486 = vmatmul.mubr.bf16.gmra.mxu1 %v8362_v58  ;;  %v9297_v58 = vmul.bf16 %v19088_v21, %v17503_v30 }
 0x519   : > { %13530 = vmatmul.mubr.bf16.gmra.mxu0 %v8682_v5  ;;  %13553 = vmatprep.mubr.bf16.mxu1 %v8975_v45  ;;  %v8950_v5 = vld [vmem:[#allocation2 + $0x50] sm:$0xff]  ;;  %v8952_v45 = vld [vmem:[#allocation2 + $0x60] sm:$0xff] }
 0x51a   : > { %13533 = vmatprep.mubr.bf16.mxu0 %v8683_v24  ;;  %v17665_v24 = vpack.c.bf16 %v8948_v32, %v8947_v61  ;;  %v17672_v30 = vpack.c.bf16 %v8950_v5, %v8949_v26  ;;  %v9299_v32 = vmul.bf16 %v19092_v43, %v17521_v33  ;;  %v14060_v61 = vld [vmem:[%s18512_s11 + $0x1e8] sm:$0xff]   ;;  %v8956_v33 = vld [vmem:[#allocation2 + $0x80] sm:$0xff] }
 0x520   : > { %13554 = vmatmul.mubr.bf16.vlgmr.msra.gmra.mxu1 %v17655_v11 }
 0x521   : > { %13534 = vmatmul.mubr.bf16.gmra.mxu0 %v8684_v0  ;;  %13634 = vmatpush3.bf16.msra.mxu1 %v17601_v8  ;;  %v17676_v8 = vpack.c.bf16 %v8952_v45, %v8951_v3  ;;  %v14061_v0 = vld [vmem:[%s18512_s11 + $0x1a0] sm:$0xff]   ;;  %v8955_v45 = vld [vmem:[#allocation2 + $0x78] sm:$0xff]  ;;  %v9301_v3 = vmul.bf16 %v19094_v59, %v17543_v60 }
 0x522   : > { %13601 = vmatprep.mubr.bf16.mxu0 %v9297_v58  ;;  %13557 = vmatprep.mubr.bf16.mxu1 %v17665_v24  ;;  %v8953_v58 = vld [vmem:[#allocation2 + $0x68] sm:$0xff]  ;;  %v17699_v26 = vpack.c.bf16 %v8956_v33, %v8955_v45  ;;  %v8960_v60 = vld [vmem:[#allocation2 + $0xa0] sm:$0xff]  ;;  %v8959_v33 = vld [vmem:[#allocation2 + $0x98] sm:$0xff]  ;;  %v9303_v45 = vmul.bf16 %v19096_v17, %v17567_v50 }
 0x523   : > { %13635 = vmatprep.subr.bf16.mxu1 %v14057_v37  ;;  %v17695_v5 = vpack.c.bf16 %v8954_v4, %v8953_v58  ;;  %v17721_v58 = vpack.c.bf16 %v8960_v60, %v8959_v33  ;;  %v8964_v50 = vld [vmem:[#allocation2 + $0xc0] sm:$0xff]  ;;  %v8963_v60 = vld [vmem:[#allocation2 + $0xb8] sm:$0xff]  ;;  %v9305_v33 = vmul.bf16 %v19098_v25, %v17591_v63 }
 0x524   : > { %v8967_v63 = vld [vmem:[#allocation2 + $0xd8] sm:$0xff] }
 0x525   : > { %13636 = vmatpush3.bf16.msra.mxu1 %v14057_v37  ;;  %v14063_v37 = vld [vmem:[%s18512_s11 + $0x198] sm:$0xff]  }
 0x526   : > { %13637 = vmatprep.subr.bf16.mxu1 %v14059_v16 }
 0x528   : > { %13558 = vmatmul.mubr.bf16.gmra.mxu1 %v17672_v30 }
 0x529   : > { %13602 = vmatmul.mubr.bf16.vlgmr.msra.gmra.mxu0 %v9298_v62  ;;  %13561 = vmatprep.mubr.bf16.mxu1 %v17676_v8  ;;  %v14065_v62 = vld [vmem:[%s18512_s11 + $0x190] sm:$0xff]  }
 0x52a   : > { %13605 = vmatprep.mubr.bf16.mxu0 %v9299_v32  ;;  %13682 = vmatpush3.bf16.msra.mxu0 %v17622_v42  ;;  %v9300_v42 = vmul.bf16 %v19093_v51, %v17526_v48  ;;  %v8958_v48 = vld [vmem:[#allocation2 + $0x90] sm:$0xff]  ;;  %v14067_v32 = vld [vmem:[%s18512_s11 + $0x188] sm:$0xff]  }
 0x52b   : > { %13683 = vmatprep.subr.bf16.mxu0 %v14058_v57  ;;  %13638 = vmatpush3.bf16.msra.mxu1 %v14059_v16  ;;  %v14062_v16 = vld [vmem:[%s18512_s11 + $0x1e0] sm:$0xff]  }
 0x52c   : > { %13639 = vmatprep.subr.bf16.mxu1 %v14061_v0 }
 0x52e   : > { %13684 = vmatpush3.bf16.msra.mxu0 %v14058_v57  ;;  %v14064_v57 = vld [vmem:[%s18512_s11 + $0x1d8] sm:$0xff]  }
 0x52f   : > { %13685 = vmatprep.subr.bf16.mxu0 %v14060_v61  ;;  %13640 = vmatpush3.bf16.msra.mxu1 %v14061_v0  ;;  %v8957_v0 = vld [vmem:[#allocation2 + $0x88] sm:$0xff] }
 0x530   : > { %13562 = vmatmul.mubr.bf16.gmra.mxu1 %v17695_v5  ;;  %13641 = vmatprep.subr.bf16.mxu1 %v14063_v37  ;;  %v17717_v4 = vpack.c.bf16 %v8958_v48, %v8957_v0  ;;  %v14070_v0 = vld [vmem:[%s18512_s11 + $0x1c0] sm:$0xff]  }
 0x531   : > { %13606 = vmatmul.mubr.bf16.gmra.mxu0 %v9300_v42  ;;  %13565 = vmatprep.mubr.bf16.mxu1 %v17699_v26  ;;  %v14069_v42 = vld [vmem:[%s18512_s11 + $0x180] sm:$0xff]  }
 0x532   : > { %13609 = vmatprep.mubr.bf16.mxu0 %v9301_v3  ;;  %13686 = vmatpush3.bf16.msra.mxu0 %v14060_v61  ;;  %v9302_v61 = vmul.bf16 %v19095_v31, %v17545_v55  ;;  %v8962_v55 = vld [vmem:[#allocation2 + $0xb0] sm:$0xff]  ;;  %v17739_v3 = vld [vmem:[%s18512_s11 + $0x238] sm:$0xff]  }
 0x533   : > { %13687 = vmatprep.subr.bf16.mxu0 %v14062_v16  ;;  %13642 = vmatpush3.bf16.msra.mxu1 %v14063_v37  ;;  %v14066_v37 = vld [vmem:[%s18512_s11 + $0x1d0] sm:$0xff]  }
 0x534   : > { %13643 = vmatprep.subr.bf16.mxu1 %v14065_v62 }
 0x536   : > { %13688 = vmatpush3.bf16.msra.mxu0 %v14062_v16  ;;  %v14068_v16 = vld [vmem:[%s18512_s11 + $0x1c8] sm:$0xff]  }
 0x537   : > { %13689 = vmatprep.subr.bf16.mxu0 %v14064_v57  ;;  %13644 = vmatpush3.bf16.msra.mxu1 %v14065_v62  ;;  %v8961_v62 = vld [vmem:[#allocation2 + $0xa8] sm:$0xff] }
 0x538   : > { %13566 = vmatmul.mubr.bf16.gmra.mxu1 %v17717_v4  ;;  %13645 = vmatprep.subr.bf16.mxu1 %v14067_v32  ;;  %v17741_v48 = vpack.c.bf16 %v8962_v55, %v8961_v62  ;;  %v9306_v55 = vmul.bf16 %v19099_v23, %v17593_v12  ;;  %v8970_v62 = vld [vmem:[#allocation2 + $0xf0] sm:$0xff]  ;;  %v9308_v12 = vmul.bf16 %v19101_v46, %v17617_v34 }
 0x539   : > { %13610 = vmatmul.mubr.bf16.gmra.mxu0 %v9302_v61  ;;  %13569 = vmatprep.mubr.bf16.mxu1 %v17721_v58  ;;  %v17758_v61 = vld [vmem:[%s18504_s3 + $0x38] sm:$0xff]   ;;  %v9310_v34 = vmul.bf16 %v19103_v18, %v17635_v39 }
 0x53a   : > { %13613 = vmatprep.mubr.bf16.mxu0 %v9303_v45  ;;  %13690 = vmatpush3.bf16.msra.mxu0 %v14064_v57  ;;  %v9304_v57 = vmul.bf16 %v19097_v52, %v17569_v1  ;;  %v8966_v1 = vld [vmem:[#allocation2 + $0xd0] sm:$0xff]  ;;  %v8965_v45 = vld [vmem:[#allocation2 + $0xc8] sm:$0xff] }
 0x53b   : > { %13691 = vmatprep.subr.bf16.mxu0 %v14066_v37  ;;  %13646 = vmatpush3.bf16.msra.mxu1 %v14067_v32  ;;  %v17745_v32 = vpack.c.bf16 %v8964_v50, %v8963_v60  ;;  %v17771_v60 = vld [vmem:[#allocation2 + $0xf8] sm:$0xff] }
 0x53c   : > { %13647 = vmatprep.subr.bf16.mxu1 %v14069_v42 }
 0x53e   : > { %13692 = vmatpush3.bf16.msra.mxu0 %v14066_v37  ;;  %v8968_v37 = vld [vmem:[#allocation2 + $0xe0] sm:$0xff] }
 0x53f   : > { %13693 = vmatprep.subr.bf16.mxu0 %v14068_v16  ;;  %13648 = vmatpush3.bf16.msra.mxu1 %v14069_v42  ;;  %v17760_v42 = vpack.c.bf16 %v8966_v1, %v8965_v45  ;;  %v17764_v50 = vpack.c.bf16 %v8968_v37, %v8967_v63  ;;  %v9571_v1 = vld [vmem:[#allocation2 + $0x27] sm:$0xff]  ;;  %v9572_v37 = vld [vmem:[#allocation2 + $0x2f] sm:$0xff] }
 0x540   : > { %13570 = vmatmul.mubr.bf16.gmra.mxu1 %v17741_v48  ;;  %13729 = vmatprep.subr.bf16.mxu1 %v17739_v3  ;;  %v8974_v45 = vld [vmem:[#allocation2 + $0x110] sm:$0xff]  ;;  %v9603_v63 = vpack.c.bf16 %v9572_v37, %v9571_v1 }
 0x541   : > { %13614 = vmatmul.mubr.bf16.gmra.mxu0 %v9304_v57  ;;  %13573 = vmatprep.mubr.bf16.mxu1 %v17745_v32  ;;  %v8969_v57 = vld [vmem:[#allocation2 + $0xe8] sm:$0xff] }
 0x542   : > { %13617 = vmatprep.mubr.bf16.mxu0 %v9305_v33  ;;  %13694 = vmatpush3.bf16.msra.mxu0 %v14068_v16  ;;  %v9307_v16 = vmul.bf16 %v19100_v36, %v17615_v47  ;;  %v8989_v33 = vpack.c.bf16 %v17490_v19, %v17771_v60  ;;  %v9309_v47 = vmul.bf16 %v19102_v2, %v17633_v29 }
 0x543   : > { %13695 = vmatprep.subr.bf16.mxu0 %v14070_v0  ;;  %v9619_v19 = vmul.bf16 %v19091_v6, %v9603_v63  ;;  %v9311_v29 = vmul.bf16 %v19104_v35, %v17645_v54  ;;  %v14073_v54 = vld [vmem:[%s18512_s11 + $0x230] sm:$0xff]   ;;  %v9578_v35 = vld [vmem:[#allocation2 + $0x5f] sm:$0xff] }
 0x546   : > { %13696 = vmatpush3.bf16.msra.mxu0 %v14070_v0  ;;  %v17773_v0 = vpack.c.bf16 %v8970_v62, %v8969_v57  ;;  %v9574_v62 = vld [vmem:[#allocation2 + $0x3f] sm:$0xff]  ;;  %v9279_v57 = vld [vmem:[#allocation2 + $0x109] sm:$0xff] }
 0x547   : > { %13777 = vmatprep.subr.bf16.mxu0 %v17758_v61 }
 0x548   : > { %13574 = vmatmul.mubr.bf16.gmra.mxu1 %v17760_v42 }
 0x549   : > { %13618 = vmatmul.mubr.bf16.gmra.mxu0 %v9306_v55  ;;  %13577 = vmatprep.mubr.bf16.mxu1 %v17764_v50  ;;  %v8973_v55 = vld [vmem:[#allocation2 + $0x108] sm:$0xff] }
 0x54a   : > { %13621 = vmatprep.mubr.bf16.mxu0 %v9307_v16  ;;  %v17782_v16 = vpack.c.bf16 %v8974_v45, %v8973_v55  ;;  %v9576_v45 = vld [vmem:[#allocation2 + $0x4f] sm:$0xff] }
 0x550   : > { %13578 = vmatmul.mubr.bf16.gmra.mxu1 %v17773_v0 }
 0x551   : > { %13622 = vmatmul.mubr.bf16.gmra.mxu0 %v9308_v12  ;;  %13581 = vmatprep.mubr.bf16.mxu1 %v8989_v33  ;;  %v9280_v12 = vld [vmem:[#allocation2 + $0x111] sm:$0xff] }
 0x552   : > { %13625 = vmatprep.mubr.bf16.mxu0 %v9309_v47  ;;  %v9573_v33 = vld [vmem:[#allocation2 + $0x37] sm:$0xff]  ;;  %v9575_v47 = vld [vmem:[#allocation2 + $0x47] sm:$0xff]  ;;  %v9296_v37 = vpack.c.bf16 %v9280_v12, %v9279_v57  ;;  %v9580_v57 = vld [vmem:[#allocation2 + $0x6f] sm:$0xff] }
 0x553   : > { %v9604_v1 = vpack.c.bf16 %v9574_v62, %v9573_v33  ;;  %v9605_v55 = vpack.c.bf16 %v9576_v45, %v9575_v47  ;;  %v14075_v12 = vld [vmem:[%s18512_s11 + $0x228] sm:$0xff]  }
 0x554   : > { %v9312_v6 = vmul.bf16 %v19105_v10, %v9296_v37  ;;  %v9583_v45 = vld [vmem:[#allocation2 + $0x87] sm:$0xff] }
 0x555   : > { %v9620_v39 = vmul.bf16 %v19024_v40, %v9604_v1 }
 0x558   : > { %13582 = vmatmul.mubr.bf16.gmra.mxu1 %v17782_v16 }
 0x559   : > { %13626 = vmatmul.mubr.bf16.gmra.mxu0 %v9310_v34  ;;  %13649 = vmatprep.mubr.bf16.mxu1 %v9619_v19  ;;  %v9621_v34 = vmul.bf16 %v19030_v41, %v9605_v55  ;;  %v9579_v19 = vld [vmem:[#allocation2 + $0x67] sm:$0xff] }
 0x55a   : > { %13629 = vmatprep.mubr.bf16.mxu0 %v9311_v29  ;;  %v9577_v29 = vld [vmem:[#allocation2 + $0x57] sm:$0xff]  ;;  %v9607_v47 = vpack.c.bf16 %v9580_v57, %v9579_v19  ;;  %v14077_v55 = vld [vmem:[%s18512_s11 + $0x220] sm:$0xff]  }
 0x55b   : > { %v9606_v40 = vpack.c.bf16 %v9578_v35, %v9577_v29  ;;  %v9582_v35 = vld [vmem:[#allocation2 + $0x7f] sm:$0xff] }
 0x55d   : > { %v13363_v63 = vpop.f32.mrf.mxu1  ;;  %v9622_v41 = vmul.bf16 %v19042_v38, %v9606_v40  ;;  %v9581_v38 = vld [vmem:[#allocation2 + $0x77] sm:$0xff]  ;;  %v14076_v40 = vld [vmem:[%s18504_s3 + $0x28] sm:$0xff]  }
 0x55f   : > { %v7963_v62 = vpop.f32.mrf.mxu1 }
 0x560   : > { %13650 = vmatmul.mubr.bf16.vlgmr.msra.gmra.mxu1 %v9620_v39 }
 0x561   : > { %13630 = vmatmul.mubr.bf16.gmra.mxu0 %v9312_v6  ;;  %13730 = vmatpush3.bf16.msra.mxu1 %v17739_v3  ;;  %v13364_v33 = vpop.f32.mrf.mxu1  ;;  %v9623_v3 = vmul.bf16 %v19046_v28, %v9607_v47 }
 0x562   : > { %13697 = vmatprep.mubr.bf16.mxu0 %v17655_v11  ;;  %13653 = vmatprep.mubr.bf16.mxu1 %v9621_v34  ;;  %v14074_v11 = vld [vmem:[%s18504_s3 + $0x30] sm:$0xff]  }
 0x563   : > { %13731 = vmatprep.subr.bf16.mxu1 %v14073_v54  ;;  %v7966_v1 = vpop.f32.mrf.mxu1  ;;  %v9584_v34 = vld [vmem:[#allocation2 + $0x8f] sm:$0xff] }
 0x564   : > { %v9609_v29 = vpack.c.bf16 %v9584_v34, %v9583_v45 }
 0x565   : > { %13732 = vmatpush3.bf16.msra.mxu1 %v14073_v54  ;;  %v9608_v54 = vpack.c.bf16 %v9582_v35, %v9581_v38  ;;  %v9586_v35 = vld [vmem:[#allocation2 + $0x9f] sm:$0xff] }
 0x566   : > { %13733 = vmatprep.subr.bf16.mxu1 %v14075_v12  ;;  %v13367_v37 = vpop.f32.mrf.mxu1 }
 0x567   : > { %v13411_v39 = vpop.f32.mrf.mxu0 }
 0x568   : > { %13654 = vmatmul.mubr.bf16.gmra.mxu1 %v9622_v41  ;;  %v17810_v6 = vadd.f32 %v13411_v39, %v13363_v63  ;;  %v7979_v28 = vpop.f32.mrf.mxu1 }
 0x569   : > { %13698 = vmatmul.mubr.bf16.vlgmr.msra.gmra.mxu0 %v17665_v24  ;;  %13657 = vmatprep.mubr.bf16.mxu1 %v9623_v3  ;;  %v8172_v19 = vpop.f32.mrf.mxu0  ;;  %v9625_v3 = vmul.bf16 %v19058_v53, %v9609_v29  ;;  %v9585_v53 = vld [vmem:[#allocation2 + $0x97] sm:$0xff] }
 0x56a   : > { %13701 = vmatprep.mubr.bf16.mxu0 %v17672_v30  ;;  %13778 = vmatpush3.bf16.msra.mxu0 %v17758_v61  ;;  %v17817_v24 = vadd.f32 %v8172_v19, %v7963_v62  ;;  %v13368_v57 = vpop.f32.mrf.mxu1  ;;  %v14079_v30 = vld [vmem:[%s18512_s11 + $0x218] sm:$0xff]   ;;  %v14078_v62 = vld [vmem:[%s18504_s3 + $0x20] sm:$0xff]  }
 0x56b   : > { %13779 = vmatprep.subr.bf16.mxu0 %v14074_v11  ;;  %13734 = vmatpush3.bf16.msra.mxu1 %v14075_v12  ;;  %v13412_v61 = vpop.f32.mrf.mxu0  ;;  %v9624_v12 = vmul.bf16 %v19054_v9, %v9608_v54  ;;  %v14081_v9 = vld [vmem:[%s18512_s11 + $0x210] sm:$0xff]   ;;  %v14080_v29 = vld [vmem:[%s18504_s3 + $0x18] sm:$0xff]  }
 0x56c   : > { %13735 = vmatprep.subr.bf16.mxu1 %v14077_v55  ;;  %v17822_v63 = vadd.f32 %v13412_v61, %v13364_v33  ;;  %v7982_v47 = vpop.f32.mrf.mxu1  ;;  %v9587_v33 = vld [vmem:[#allocation2 + $0xa7] sm:$0xff]  ;;  %v9588_v54 = vld [vmem:[#allocation2 + $0xaf] sm:$0xff] }
 0x56d   : > { %v8175_v41 = vpop.f32.mrf.mxu0  ;;  %v9611_v19 = vpack.c.bf16 %v9588_v54, %v9587_v33 }
 0x56e   : > { %13780 = vmatpush3.bf16.msra.mxu0 %v14074_v11  ;;  %v17829_v45 = vadd.f32 %v8175_v41, %v7966_v1  ;;  %v9610_v1 = vpack.c.bf16 %v9586_v35, %v9585_v53  ;;  %v9590_v35 = vld [vmem:[#allocation2 + $0xbf] sm:$0xff] }
 0x56f   : > { %13781 = vmatprep.subr.bf16.mxu0 %v14076_v40  ;;  %13736 = vmatpush3.bf16.msra.mxu1 %v14077_v55  ;;  %v13371_v39 = vpop.f32.mrf.mxu1 }
 0x570   : > { %13658 = vmatmul.mubr.bf16.gmra.mxu1 %v9624_v12  ;;  %13737 = vmatprep.subr.bf16.mxu1 %v14079_v30  ;;  %v13415_v11 = vpop.f32.mrf.mxu0  ;;  %v9626_v41 = vmul.bf16 %v19067_v22, %v9610_v1  ;;  %v14085_v22 = vld [vmem:[%s18512_s11 + $0x200] sm:$0xff]   ;;  %v9592_v1 = vld [vmem:[#allocation2 + $0xcf] sm:$0xff] }
 0x571   : > { %13702 = vmatmul.mubr.bf16.gmra.mxu0 %v17676_v8  ;;  %13661 = vmatprep.mubr.bf16.mxu1 %v9625_v3  ;;  %v17835_v55 = vadd.f32 %v13415_v11, %v13367_v37  ;;  %v7995_v38 = vpop.f32.mrf.mxu1  ;;  %v9627_v3 = vmul.bf16 %v19070_v49, %v9611_v19  ;;  %v9589_v49 = vld [vmem:[#allocation2 + $0xb7] sm:$0xff]  ;;  %v14084_v19 = vld [vmem:[%s18504_s3 + $0x8] sm:$0xff]  }
 0x572   : > { %13705 = vmatprep.mubr.bf16.mxu0 %v17695_v5  ;;  %13782 = vmatpush3.bf16.msra.mxu0 %v14076_v40  ;;  %v8188_v34 = vpop.f32.mrf.mxu0  ;;  %v14083_v5 = vld [vmem:[%s18512_s11 + $0x208] sm:$0xff]  }
 0x573   : > { %13783 = vmatprep.subr.bf16.mxu0 %v14078_v62  ;;  %13738 = vmatpush3.bf16.msra.mxu1 %v14079_v30  ;;  %v17841_v61 = vadd.f32 %v8188_v34, %v7979_v28  ;;  %v13372_v8 = vpop.f32.mrf.mxu1  ;;  %v14082_v28 = vld [vmem:[%s18504_s3 + $0x10] sm:$0xff]  }
 0x574   : > { %13739 = vmatprep.subr.bf16.mxu1 %v14081_v9  ;;  %v13416_v37 = vpop.f32.mrf.mxu0 }
 0x575   : > { %v17846_v40 = vadd.f32 %v13416_v37, %v13368_v57  ;;  %v7998_v12 = vpop.f32.mrf.mxu1  ;;  %v9591_v57 = vld [vmem:[#allocation2 + $0xc7] sm:$0xff] }
 0x576   : > { %13784 = vmatpush3.bf16.msra.mxu0 %v14078_v62  ;;  %v8191_v30 = vpop.f32.mrf.mxu0  ;;  %v9613_v34 = vpack.c.bf16 %v9592_v1, %v9591_v57 }
 0x577   : > { %13785 = vmatprep.subr.bf16.mxu0 %v14080_v29  ;;  %13740 = vmatpush3.bf16.msra.mxu1 %v14081_v9  ;;  %v17853_v33 = vadd.f32 %v8191_v30, %v7982_v47  ;;  %v9612_v47 = vpack.c.bf16 %v9590_v35, %v9589_v49  ;;  %v9594_v35 = vld [vmem:[#allocation2 + $0xdf] sm:$0xff]  ;;  %v9596_v49 = vld [vmem:[#allocation2 + $0xef] sm:$0xff] }
 0x578   : > { %v13375_v11 = vpop.f32.mrf.mxu1  ;;  %13662 = vmatmul.mubr.bf16.gmra.mxu1 %v9626_v41  ;;  %13741 = vmatprep.subr.bf16.mxu1 %v14083_v5 }
 0x579   : > { %v13419_v62 = vpop.f32.mrf.mxu0  ;;  %13706 = vmatmul.mubr.bf16.gmra.mxu0 %v17699_v26  ;;  %13665 = vmatprep.mubr.bf16.mxu1 %v9627_v3  ;;  %v9628_v30 = vmul.bf16 %v19080_v20, %v9612_v47  ;;  %v9629_v3 = vmul.bf16 %v19083_v56, %v9613_v34  ;;  %v9593_v20 = vld [vmem:[#allocation2 + $0xd7] sm:$0xff] }
 0x57a   : > { %v17859_v9 = vadd.f32 %v13419_v62, %v13371_v39  ;;  %13709 = vmatprep.mubr.bf16.mxu0 %v17717_v4  ;;  %v8011_v53 = vpop.f32.mrf.mxu1  ;;  %13786 = vmatpush3.bf16.msra.mxu0 %v14080_v29 }
 0x57b   : > { %v8204_v54 = vpop.f32.mrf.mxu0  ;;  %13787 = vmatprep.subr.bf16.mxu0 %v14082_v28  ;;  %13742 = vmatpush3.bf16.msra.mxu1 %v14083_v5 }
 0x57c   : > { %v17865_v37 = vadd.f32 %v8204_v54, %v7995_v38  ;;  %v13376_v26 = vpop.f32.mrf.mxu1  ;;  %13743 = vmatprep.subr.bf16.mxu1 %v14085_v22  ;;  %v14086_v38 = vld [vmem:[%s18504_s3] sm:$0xff]  }
 0x57d   : > { %v13420_v39 = vpop.f32.mrf.mxu0 }
 0x57e   : > { %v17867_v41 = vadd.f32 %v13420_v39, %v13372_v8  ;;  %v8014_v4 = vpop.f32.mrf.mxu1  ;;  %13788 = vmatpush3.bf16.msra.mxu0 %v14082_v28  ;;  %v9595_v8 = vld [vmem:[#allocation2 + $0xe7] sm:$0xff] }
 0x57f   : > { %v8207_v29 = vpop.f32.mrf.mxu0  ;;  %13789 = vmatprep.subr.bf16.mxu0 %v14084_v19  ;;  %13744 = vmatpush3.bf16.msra.mxu1 %v14085_v22  ;;  %v9614_v22 = vpack.c.bf16 %v9594_v35, %v9593_v20  ;;  %v9615_v1 = vpack.c.bf16 %v9596_v49, %v9595_v8 }
 0x580   : > { %v17874_v5 = vadd.f32 %v8207_v29, %v7998_v12  ;;  %v13379_v57 = vpop.f32.mrf.mxu1  ;;  %13666 = vmatmul.mubr.bf16.gmra.mxu1 %v9628_v30  ;;  %v19106_v30 = vld [vmem:[#allocation30_spill] sm:$0xff] }
 0x581   : > { %v13423_v62 = vpop.f32.mrf.mxu0  ;;  %13710 = vmatmul.mubr.bf16.gmra.mxu0 %v17721_v58  ;;  %13669 = vmatprep.mubr.bf16.mxu1 %v9629_v3  ;;  %v9630_v29 = vmul.bf16 %v19106_v30, %v9614_v22  ;;  %v9598_v3 = vld [vmem:[#allocation2 + $0xff] sm:$0xff] }
 0x582   : > { %v17877_v28 = vadd.f32 %v13423_v62, %v13375_v11  ;;  %13713 = vmatprep.mubr.bf16.mxu0 %v17741_v48  ;;  %v8027_v56 = vpop.f32.mrf.mxu1  ;;  %13790 = vmatpush3.bf16.msra.mxu0 %v14084_v19  ;;  %v9631_v48 = vmul.bf16 %v19085_v7, %v9615_v1  ;;  %v9602_v30 = vld [vmem:[#allocation2 + $0x11f] sm:$0xff] }
 0x583   : > { %v8220_v47 = vpop.f32.mrf.mxu0  ;;  %13791 = vmatprep.subr.bf16.mxu0 %v14086_v38 }
 0x584   : > { %v17880_v12 = vadd.f32 %v8220_v47, %v8011_v53  ;;  %v13380_v54 = vpop.f32.mrf.mxu1  ;;  %v9597_v53 = vld [vmem:[#allocation2 + $0xf7] sm:$0xff] }
 0x585   : > { %v13424_v34 = vpop.f32.mrf.mxu0  ;;  %v9616_v20 = vpack.c.bf16 %v9598_v3, %v9597_v53  ;;  %v10199_v3 = vld [vmem:[#allocation2 + $0x29] sm:$0xff] }
 0x586   : > { %v17882_v39 = vadd.f32 %v13424_v34, %v13376_v26  ;;  %v8030_v58 = vpop.f32.mrf.mxu1  ;;  %13792 = vmatpush3.bf16.msra.mxu0 %v14086_v38 }
 0x587   : > { %v8223_v11 = vpop.f32.mrf.mxu0  ;;  %v9632_v1 = vmul.bf16 %v19086_v13, %v9616_v20 }
 0x588   : > { %v17886_v35 = vadd.f32 %v8223_v11, %v8014_v4  ;;  %v13383_v19 = vpop.f32.mrf.mxu1  ;;  %13670 = vmatmul.mubr.bf16.gmra.mxu1 %v9630_v29  ;;  %v10200_v11 = vld [vmem:[#allocation2 + $0x31] sm:$0xff] }
 0x589   : > { %v13427_v8 = vpop.f32.mrf.mxu0  ;;  %13714 = vmatmul.mubr.bf16.gmra.mxu0 %v17745_v32  ;;  %13673 = vmatprep.mubr.bf16.mxu1 %v9631_v48  ;;  %v9633_v32 = vmul.bf16 %v19087_v27, %v17653_v14  ;;  %v10231_v27 = vpack.c.bf16 %v10200_v11, %v10199_v3 }
 0x58a   : > { %v17889_v62 = vadd.f32 %v13427_v8, %v13379_v57  ;;  %13717 = vmatprep.mubr.bf16.mxu0 %v17760_v42  ;;  %v8043_v26 = vpop.f32.mrf.mxu1  ;;  %v9601_v57 = vld [vmem:[#allocation2 + $0x117] sm:$0xff] }
 0x58b   : > { %v8236_v38 = vpop.f32.mrf.mxu0  ;;  %v9618_v48 = vpack.c.bf16 %v9602_v30, %v9601_v57 }
 0x58c   : > { %v17892_v22 = vadd.f32 %v8236_v38, %v8027_v56  ;;  %v13384_v7 = vpop.f32.mrf.mxu1 }
 0x58d   : > { %v13428_v49 = vpop.f32.mrf.mxu0 }
 0x58e   : > { %v17894_v4 = vadd.f32 %v13428_v49, %v13380_v54  ;;  %v8046_v47 = vpop.f32.mrf.mxu1 }
 0x58f   : > { %v8239_v34 = vpop.f32.mrf.mxu0 }
 0x590   : > { %v17899_v29 = vadd.f32 %v8239_v34, %v8030_v58  ;;  %v13387_v42 = vpop.f32.mrf.mxu1  ;;  %13674 = vmatmul.mubr.bf16.gmra.mxu1 %v9632_v1  ;;  %v9920_v58 = vld [vmem:[#allocation2 + $0x100] sm:$0xff] }
 0x591   : > { %v13431_v56 = vpop.f32.mrf.mxu0  ;;  %13718 = vmatmul.mubr.bf16.gmra.mxu0 %v17764_v50  ;;  %13677 = vmatprep.mubr.bf16.mxu1 %v9633_v32  ;;  %v9634_v50 = vmul.bf16 %v19090_v15, %v9618_v48  ;;  %v10201_v34 = vld [vmem:[#allocation2 + $0x39] sm:$0xff]  ;;  %v10202_v32 = vld [vmem:[#allocation2 + $0x41] sm:$0xff] }
 0x592   : > { %v17902_v54 = vadd.f32 %v13431_v56, %v13383_v19  ;;  %13721 = vmatprep.mubr.bf16.mxu0 %v17773_v0  ;;  %v8059_v13 = vpop.f32.mrf.mxu1  ;;  %v9938_v19 = vpack.c.bf16 %v9920_v58, %v17771_v60  ;;  %v10247_v0 = vmul.bf16 %v19088_v21, %v10231_v27  ;;  %v10232_v60 = vpack.c.bf16 %v10202_v32, %v10201_v34  ;;  %v10203_v56 = vld [vmem:[#allocation2 + $0x49] sm:$0xff]  ;;  %v14104_v27 = vld [vmem:[#allocation2] sm:$0xff] }
 0x593   : > { %v8252_v8 = vpop.f32.mrf.mxu0  ;;  %v9940_v58 = vpack.c.bf16 %v14104_v27, %v14104_v27  ;;  %v10205_v32 = vld [vmem:[#allocation2 + $0x59] sm:$0xff] }
 0x594   : > { %v17905_v14 = vadd.f32 %v8252_v8, %v8043_v26  ;;  %v13388_v53 = vpop.f32.mrf.mxu1  ;;  %v10204_v26 = vld [vmem:[#allocation2 + $0x51] sm:$0xff] }
 0x595   : > { %v13432_v20 = vpop.f32.mrf.mxu0  ;;  %v10233_v48 = vpack.c.bf16 %v10204_v26, %v10203_v56  ;;  %v10208_v56 = vld [vmem:[#allocation2 + $0x71] sm:$0xff] }
 0x596   : > { %v17907_v38 = vadd.f32 %v13432_v20, %v13384_v7  ;;  %v8062_v49 = vpop.f32.mrf.mxu1 }
 0x597   : > { %v8255_v1 = vpop.f32.mrf.mxu0  ;;  %v10249_v34 = vmul.bf16 %v19092_v43, %v10233_v48  ;;  %v10207_v43 = vld [vmem:[#allocation2 + $0x69] sm:$0xff] }
 0x598   : > { %v17912_v57 = vadd.f32 %v8255_v1, %v8046_v47  ;;  %v13391_v30 = vpop.f32.mrf.mxu1  ;;  %13678 = vmatmul.mubr.bf16.gmra.mxu1 %v9634_v50  ;;  %v14105_v1 = vld [vmem:[%s14269_s22] sm:$0xf]  ;;  %v10235_v27 = vpack.c.bf16 %v10208_v56, %v10207_v43  ;;  %v19107_v43 = vld [vmem:[#allocation3_spill] sm:$0xff] }
 0x599   : > { %v13435_v11 = vpop.f32.mrf.mxu0  ;;  %13722 = vmatmul.mubr.bf16.gmra.mxu0 %v9938_v19  ;;  %13745 = vmatprep.mubr.bf16.mxu1 %v10247_v0  ;;  %v14106_v19 = vld [vmem:[%s14269_s22 + $0x4] sm:$0xf]  ;;  %v10209_v56 = vld [vmem:[#allocation2 + $0x79] sm:$0xff] }
 0x59a   : > { %v17914_v7 = vadd.f32 %v13435_v11, %v13387_v42  ;;  %13725 = vmatprep.mubr.bf16.mxu0 %v17782_v16  ;;  %v8075_v15 = vpop.f32.mrf.mxu1  ;;  %v10248_v42 = vmul.bf16 %v19089_v44, %v10232_v60  ;;  %v11709_v0 = vcombine.low %v14105_v1, %v14106_v19  ;;  %v10206_v11 = vld [vmem:[#allocation2 + $0x61] sm:$0xff] }
 0x59b   : > { %v8268_v21 = vpop.f32.mrf.mxu0 }
 0x59c   : > { %v17917_v3 = vadd.f32 %v8268_v21, %v8059_v13  ;;  %v13392_v47 = vpop.f32.mrf.mxu1 }
 0x59d   : > { %v13436_v8 = vpop.f32.mrf.mxu0 }
 0x59e   : > { %v17919_v20 = vadd.f32 %v13436_v8, %v13388_v53  ;;  %v8078_v50 = vpop.f32.mrf.mxu1  ;;  %v10234_v8 = vpack.c.bf16 %v10206_v11, %v10205_v32 }
 0x59f   : > { %v8271_v16 = vpop.f32.mrf.mxu0 }
 0x5a0   : > { %v17925_v26 = vadd.f32 %v8271_v16, %v8062_v49  ;;  %v13459_v13 = vpop.f32.mrf.mxu1  ;;  %13746 = vmatmul.mubr.bf16.vlgmr.msra.gmra.mxu1 %v10248_v42 }
 0x5a1   : > { %v13439_v21 = vpop.f32.mrf.mxu0  ;;  %13726 = vmatmul.mubr.bf16.gmra.mxu0 %v9940_v58  ;;  %v8591_v53 = vadd.f32 %v13459_v13, %v17810_v6  ;;  %13749 = vmatprep.mubr.bf16.mxu1 %v10249_v34  ;;  %v14107_v34 = vld [vmem:[%s14269_s22 + $0x10] sm:$0xf] }
 0x5a2   : > { %v17928_v44 = vadd.f32 %v13439_v21, %v13391_v30  ;;  %13793 = vmatprep.mubr.bf16.mxu0 %v11709_v0  ;;  %v8462_v60 = vpop.f32.mrf.mxu1  ;;  %v10250_v30 = vmul.bf16 %v19093_v51, %v10234_v8  ;;  %v14108_v0 = vld [vmem:[%s14269_s22 + $0x14] sm:$0xf] }
 0x5a3   : > { %v8284_v48 = vpop.f32.mrf.mxu0  ;;  %v8589_v49 = vadd.f32 %v8462_v60, %v17817_v24  ;;  %v11711_v13 = vcombine.low %v14107_v34, %v14108_v0  ;;  %v10251_v24 = vmul.bf16 %v19094_v59, %v10235_v27  ;;  %v10211_v27 = vld [vmem:[#allocation2 + $0x89] sm:$0xff] }
 0x5a4   : > { %v17931_v1 = vadd.f32 %v8284_v48, %v8075_v15  ;;  %v13460_v42 = vpop.f32.mrf.mxu1  ;;  %v10210_v15 = vld [vmem:[#allocation2 + $0x81] sm:$0xff]  ;;  %v19108_v48 = vld [vmem:[#allocation4_spill] sm:$0xff] }
 0x5a5   : > { %v13440_v19 = vpop.f32.mrf.mxu0  ;;  %v8592_v58 = vadd.f32 %v13460_v42, %v17822_v63  ;;  %v10212_v63 = vld [vmem:[#allocation2 + $0x91] sm:$0xff]  ;;  %v19109_v51 = vcombine.low %v19107_v43, %v19108_v48  ;;  %v14110_v43 = vld [vmem:[%s14269_s22 + $0x1c] sm:$0xf] }
 0x5a6   : > { %v17934_v6 = vadd.f32 %v13440_v19, %v13392_v47  ;;  %v8465_v16 = vpop.f32.mrf.mxu1 }
 0x5a7   : > { %v8287_v32 = vpop.f32.mrf.mxu0  ;;  %v8590_v11 = vadd.f32 %v8465_v16, %v17829_v45  ;;  %v10237_v16 = vpack.c.bf16 %v10212_v63, %v10211_v27  ;;  %v10213_v63 = vld [vmem:[#allocation2 + $0x99] sm:$0xff] }
 0x5a8   : > { %v17941_v21 = vadd.f32 %v8287_v32, %v8078_v50  ;;  %v13463_v60 = vpop.f32.mrf.mxu1  ;;  %13750 = vmatmul.mubr.bf16.gmra.mxu1 %v10250_v30  ;;  %v10236_v50 = vpack.c.bf16 %v10210_v15, %v10209_v56  ;;  %v14109_v32 = vld [vmem:[%s14269_s22 + $0x18] sm:$0xf]  ;;  %v14111_v15 = vld [vmem:[%s14269_s22 + $0x20] sm:$0xf] }
 0x5a9   : > { %v13507_v47 = vpop.f32.mrf.mxu0  ;;  %13794 = vmatmul.mubr.bf16.vlgmr.msra.gmra.mxu0 %v19109_v51  ;;  %v8595_v8 = vadd.f32 %v13463_v60, %v17835_v55  ;;  %13753 = vmatprep.mubr.bf16.mxu1 %v10251_v24  ;;  %v11712_v55 = vcombine.low %v14109_v32, %v14110_v43  ;;  %v14112_v60 = vld [vmem:[%s14269_s22 + $0x24] sm:$0xf] }
 0x5aa   : > { %v17947_v45 = vadd.f32 %v13507_v47, %v8591_v53  ;;  %13797 = vmatprep.mubr.bf16.mxu0 %v11711_v13  ;;  %v8478_v59 = vpop.f32.mrf.mxu1  ;;  %v10252_v56 = vmul.bf16 %v19095_v31, %v10236_v50  ;;  %v11713_v47 = vcombine.low %v14111_v15, %v14112_v60  ;;  %v10214_v51 = vld [vmem:[#allocation2 + $0xa1] sm:$0xff] }
 0x5ab   : > { %v8784_v42 = vpop.f32.mrf.mxu0  ;;  %v8593_v19 = vadd.f32 %v8478_v59, %v17841_v61 }
 0x5ac   : > { %v17950_v30 = vadd.f32 %v8784_v42, %v8589_v49  ;;  %v13464_v34 = vpop.f32.mrf.mxu1  ;;  %v10253_v49 = vmul.bf16 %v19096_v17, %v10237_v16  ;;  %v10238_v17 = vpack.c.bf16 %v10214_v51, %v10213_v63  ;;  %v10215_v42 = vld [vmem:[#allocation2 + $0xa9] sm:$0xff]  ;;  %v10217_v51 = vld [vmem:[#allocation2 + $0xb9] sm:$0xff] }
 0x5ad   : > { %v13508_v0 = vpop.f32.mrf.mxu0  ;;  %v8596_v53 = vadd.f32 %v13464_v34, %v17846_v40  ;;  %v10216_v40 = vld [vmem:[#allocation2 + $0xb1] sm:$0xff] }
 0x5ae   : > { %v17955_v24 = vadd.f32 %v13508_v0, %v8592_v58  ;;  %v8481_v13 = vpop.f32.mrf.mxu1  ;;  %v10239_v34 = vpack.c.bf16 %v10216_v40, %v10215_v42  ;;  %v10254_v60 = vmul.bf16 %v19097_v52, %v10238_v17  ;;  %v10219_v17 = vld [vmem:[#allocation2 + $0xc9] sm:$0xff] }
 0x5af   : > { %v8787_v48 = vpop.f32.mrf.mxu0  ;;  %v8594_v61 = vadd.f32 %v8481_v13, %v17853_v33  ;;  %v14114_v13 = vld [vmem:[%s14269_s22 + $0x2c] sm:$0xf] }
 0x5b0   : > { %v17962_v59 = vadd.f32 %v8787_v48, %v8590_v11  ;;  %v13467_v27 = vpop.f32.mrf.mxu1  ;;  %13754 = vmatmul.mubr.bf16.gmra.mxu1 %v10252_v56  ;;  %v14116_v48 = vld [vmem:[%s14269_s22 + $0x34] sm:$0xf] }
 0x5b1   : > { %v13511_v58 = vpop.f32.mrf.mxu0  ;;  %13798 = vmatmul.mubr.bf16.gmra.mxu0 %v11712_v55  ;;  %v8599_v31 = vadd.f32 %v13467_v27, %v17859_v9  ;;  %13757 = vmatprep.mubr.bf16.mxu1 %v10253_v49  ;;  %v14113_v55 = vld [vmem:[%s14269_s22 + $0x28] sm:$0xf] }
 0x5b2   : > { %v17965_v50 = vadd.f32 %v13511_v58, %v8595_v8  ;;  %13801 = vmatprep.mubr.bf16.mxu0 %v11713_v47  ;;  %v8494_v33 = vpop.f32.mrf.mxu1  ;;  %v11714_v9 = vcombine.low %v14113_v55, %v14114_v13  ;;  %v14115_v47 = vld [vmem:[%s14269_s22 + $0x30] sm:$0xf]  ;;  %v10218_v27 = vld [vmem:[#allocation2 + $0xc1] sm:$0xff]  ;;  %v14117_v55 = vld [vmem:[%s14269_s22 + $0x38] sm:$0xf] }
 0x5b3   : > { %v8800_v11 = vpop.f32.mrf.mxu0  ;;  %v8597_v16 = vadd.f32 %v8494_v33, %v17865_v37  ;;  %v11715_v49 = vcombine.low %v14115_v47, %v14116_v48  ;;  %v14118_v13 = vld [vmem:[%s14269_s22 + $0x3c] sm:$0xf]  ;;  %v14119_v47 = vld [vmem:[%s14269_s22 + $0x40] sm:$0xf]  ;;  %v14120_v48 = vld [vmem:[%s14269_s22 + $0x44] sm:$0xf] }
 0x5b4   : > { %v17968_v0 = vadd.f32 %v8800_v11, %v8593_v19  ;;  %v13468_v32 = vpop.f32.mrf.mxu1  ;;  %v10255_v19 = vmul.bf16 %v19098_v25, %v10239_v34  ;;  %v10240_v25 = vpack.c.bf16 %v10218_v27, %v10217_v51  ;;  %v10222_v51 = vld [vmem:[#allocation2 + $0xe1] sm:$0xff] }
 0x5b5   : > { %v13512_v43 = vpop.f32.mrf.mxu0  ;;  %v8600_v8 = vadd.f32 %v13468_v32, %v17867_v41  ;;  %v10220_v41 = vld [vmem:[#allocation2 + $0xd1] sm:$0xff] }
 0x5b6   : > { %v17973_v56 = vadd.f32 %v13512_v43, %v8596_v53  ;;  %v8497_v15 = vpop.f32.mrf.mxu1  ;;  %v10241_v11 = vpack.c.bf16 %v10220_v41, %v10219_v17 }
 0x5b7   : > { %v8803_v63 = vpop.f32.mrf.mxu0  ;;  %v8598_v37 = vadd.f32 %v8497_v15, %v17874_v5 }
 0x5b8   : > { %v17980_v40 = vadd.f32 %v8803_v63, %v8594_v61  ;;  %v13471_v58 = vpop.f32.mrf.mxu1  ;;  %13758 = vmatmul.mubr.bf16.gmra.mxu1 %v10254_v60  ;;  %v10256_v60 = vmul.bf16 %v19099_v23, %v10240_v25 }
 0x5b9   : > { %v13515_v53 = vpop.f32.mrf.mxu0  ;;  %13802 = vmatmul.mubr.bf16.gmra.mxu0 %v11714_v9  ;;  %v8603_v52 = vadd.f32 %v13471_v58, %v17877_v28  ;;  %13761 = vmatprep.mubr.bf16.mxu1 %v10255_v19  ;;  %v11716_v28 = vcombine.low %v14117_v55, %v14118_v13  ;;  %v10221_v19 = vld [vmem:[#allocation2 + $0xd9] sm:$0xff] }
 0x5ba   : > { %v17983_v33 = vadd.f32 %v13515_v53, %v8599_v31  ;;  %13805 = vmatprep.mubr.bf16.mxu0 %v11715_v49  ;;  %v8510_v5 = vpop.f32.mrf.mxu1  ;;  %v11717_v49 = vcombine.low %v14119_v47, %v14120_v48  ;;  %v10223_v53 = vld [vmem:[#allocation2 + $0xe9] sm:$0xff] }
 0x5bb   : > { %v8816_v61 = vpop.f32.mrf.mxu0  ;;  %v8601_v42 = vadd.f32 %v8510_v5, %v17880_v12 }
 0x5bc   : > { %v17986_v34 = vadd.f32 %v8816_v61, %v8597_v16  ;;  %v13472_v32 = vpop.f32.mrf.mxu1  ;;  %v10257_v16 = vmul.bf16 %v19100_v36, %v10241_v11  ;;  %v10242_v36 = vpack.c.bf16 %v10222_v51, %v10221_v19 }
 0x5bd   : > { %v13516_v43 = vpop.f32.mrf.mxu0  ;;  %v8604_v31 = vadd.f32 %v13472_v32, %v17882_v39  ;;  %v10224_v39 = vld [vmem:[#allocation2 + $0xf1] sm:$0xff]  ;;  %v14121_v32 = vld [vmem:[%s14269_s22 + $0x48] sm:$0xf] }
 0x5be   : > { %v17991_v9 = vadd.f32 %v13516_v43, %v8600_v8  ;;  %v8513_v15 = vpop.f32.mrf.mxu1  ;;  %v10243_v25 = vpack.c.bf16 %v10224_v39, %v10223_v53  ;;  %v14122_v43 = vld [vmem:[%s14269_s22 + $0x4c] sm:$0xf] }
 0x5bf   : > { %v8819_v63 = vpop.f32.mrf.mxu0  ;;  %v8602_v12 = vadd.f32 %v8513_v15, %v17886_v35  ;;  %v14123_v15 = vld [vmem:[%s14269_s22 + $0x50] sm:$0xf] }
 0x5c0   : > { %v17998_v27 = vadd.f32 %v8819_v63, %v8598_v37  ;;  %v13475_v58 = vpop.f32.mrf.mxu1  ;;  %13762 = vmatmul.mubr.bf16.gmra.mxu1 %v10256_v60  ;;  %v14124_v60 = vld [vmem:[%s14269_s22 + $0x54] sm:$0xf]  ;;  %v10226_v63 = vld [vmem:[#allocation2 + $0x101] sm:$0xff] }
 0x5c1   : > { %v13519_v8 = vpop.f32.mrf.mxu0  ;;  %13806 = vmatmul.mubr.bf16.gmra.mxu0 %v11716_v28  ;;  %v8607_v23 = vadd.f32 %v13475_v58, %v17889_v62  ;;  %13765 = vmatprep.mubr.bf16.mxu1 %v10257_v16  ;;  %v11718_v62 = vcombine.low %v14121_v32, %v14122_v43  ;;  %v10258_v28 = vmul.bf16 %v19101_v46, %v10242_v36  ;;  %v14127_v43 = vld [vmem:[%s14269_s22 + $0x60] sm:$0xf] }
 0x5c2   : > { %v18001_v41 = vadd.f32 %v13519_v8, %v8603_v52  ;;  %13809 = vmatprep.mubr.bf16.mxu0 %v11717_v49  ;;  %v8526_v35 = vpop.f32.mrf.mxu1  ;;  %v11719_v47 = vcombine.low %v14123_v15, %v14124_v60  ;;  %v10225_v49 = vld [vmem:[#allocation2 + $0xf9] sm:$0xff] }
 0x5c3   : > { %v8832_v37 = vpop.f32.mrf.mxu0  ;;  %v8605_v5 = vadd.f32 %v8526_v35, %v17892_v22  ;;  %v10229_v60 = vld [vmem:[#allocation2 + $0x119] sm:$0xff] }
 0x5c4   : > { %v18004_v17 = vadd.f32 %v8832_v37, %v8601_v42  ;;  %v13476_v61 = vpop.f32.mrf.mxu1  ;;  %v10259_v42 = vmul.bf16 %v19102_v2, %v10243_v25  ;;  %v14125_v37 = vld [vmem:[%s14269_s22 + $0x58] sm:$0xf]  ;;  %v14126_v25 = vld [vmem:[%s14269_s22 + $0x5c] sm:$0xf] }
 0x5c5   : > { %v13520_v11 = vpop.f32.mrf.mxu0  ;;  %v8608_v52 = vadd.f32 %v13476_v61, %v17894_v4  ;;  %v10227_v4 = vld [vmem:[#allocation2 + $0x109] sm:$0xff]  ;;  %v11720_v61 = vcombine.low %v14125_v37, %v14126_v25 }
 0x5c6   : > { %v18009_v55 = vadd.f32 %v13520_v11, %v8604_v31  ;;  %v8529_v13 = vpop.f32.mrf.mxu1  ;;  %v10228_v31 = vld [vmem:[#allocation2 + $0x111] sm:$0xff] }
 0x5c7   : > { %v8835_v48 = vpop.f32.mrf.mxu0  ;;  %v8606_v22 = vadd.f32 %v8529_v13, %v17899_v29  ;;  %v10244_v29 = vpack.c.bf16 %v10226_v63, %v10225_v49  ;;  %v10245_v8 = vpack.c.bf16 %v10228_v31, %v10227_v4 }
 0x5c8   : > { %v18016_v16 = vadd.f32 %v8835_v48, %v8602_v12  ;;  %v13479_v19 = vpop.f32.mrf.mxu1  ;;  %13766 = vmatmul.mubr.bf16.gmra.mxu1 %v10258_v28 }
 0x5c9   : > { %v13523_v51 = vpop.f32.mrf.mxu0  ;;  %13810 = vmatmul.mubr.bf16.gmra.mxu0 %v11718_v62  ;;  %v8611_v46 = vadd.f32 %v13479_v19, %v17902_v54  ;;  %13769 = vmatprep.mubr.bf16.mxu1 %v10259_v42  ;;  %v10260_v32 = vmul.bf16 %v19103_v18, %v10244_v29  ;;  %v14128_v62 = vld [vmem:[%s14269_s22 + $0x64] sm:$0xf] }
 0x5ca   : > { %v18019_v58 = vadd.f32 %v13523_v51, %v8607_v23  ;;  %13813 = vmatprep.mubr.bf16.mxu0 %v11719_v47  ;;  %v8542_v2 = vpop.f32.mrf.mxu1  ;;  %v11721_v13 = vcombine.low %v14127_v43, %v14128_v62  ;;  %v10230_v47 = vld [vmem:[#allocation2 + $0x121] sm:$0xff] }
 0x5cb   : > { %v8848_v12 = vpop.f32.mrf.mxu0  ;;  %v8609_v39 = vadd.f32 %v8542_v2, %v17905_v14  ;;  %v10246_v49 = vpack.c.bf16 %v10230_v47, %v10229_v60  ;;  %v14129_v51 = vld [vmem:[%s14269_s22 + $0x68] sm:$0xf]  ;;  %v14130_v2 = vld [vmem:[%s14269_s22 + $0x6c] sm:$0xf] }
 0x5cc   : > { %v18022_v35 = vadd.f32 %v8848_v12, %v8605_v5  ;;  %v13480_v36 = vpop.f32.mrf.mxu1  ;;  %v19110_v5 = vld [vmem:[#allocation35_spill] sm:$0xff]  ;;  %v11722_v29 = vcombine.low %v14129_v51, %v14130_v2 }
 0x5cd   : > { %v13524_v53 = vpop.f32.mrf.mxu0  ;;  %v8612_v54 = vadd.f32 %v13480_v36, %v17907_v38  ;;  %v10261_v15 = vmul.bf16 %v19110_v5, %v10245_v8  ;;  %v10262_v8 = vmul.bf16 %v19105_v10, %v10246_v49  ;;  %v14131_v36 = vld [vmem:[%s14269_s22 + $0x70] sm:$0xf] }
 0x5ce   : > { %v18027_v23 = vadd.f32 %v13524_v53, %v8608_v52  ;;  %v8545_v11 = vpop.f32.mrf.mxu1  ;;  %v14132_v53 = vld [vmem:[%s14269_s22 + $0x74] sm:$0xf] }
 0x5cf   : > { %v8851_v28 = vpop.f32.mrf.mxu0  ;;  %v8610_v14 = vadd.f32 %v8545_v11, %v17912_v57  ;;  %v11723_v37 = vcombine.low %v14131_v36, %v14132_v53 }
 0x5d0   : > { %v18034_v48 = vadd.f32 %v8851_v28, %v8606_v22  ;;  %v13483_v42 = vpop.f32.mrf.mxu1  ;;  %13770 = vmatmul.mubr.bf16.gmra.mxu1 %v10260_v32  ;;  %v14133_v28 = vld [vmem:[%s14269_s22 + $0x78] sm:$0xf] }
 0x5d1   : > { %v13527_v38 = vpop.f32.mrf.mxu0  ;;  %13814 = vmatmul.mubr.bf16.gmra.mxu0 %v11720_v61  ;;  %v8615_v18 = vadd.f32 %v13483_v42, %v17914_v7  ;;  %13773 = vmatprep.mubr.bf16.mxu1 %v10261_v15 }
 0x5d2   : > { %v18037_v52 = vadd.f32 %v13527_v38, %v8611_v46  ;;  %13817 = vmatprep.mubr.bf16.mxu0 %v11721_v13  ;;  %v8558_v57 = vpop.f32.mrf.mxu1 }
 0x5d3   : > { %v8864_v63 = vpop.f32.mrf.mxu0  ;;  %v8613_v22 = vadd.f32 %v8558_v57, %v17917_v3 }
 0x5d4   : > { %v18040_v19 = vadd.f32 %v8864_v63, %v8609_v39  ;;  %v13484_v4 = vpop.f32.mrf.mxu1 }
 0x5d5   : > { %v13528_v31 = vpop.f32.mrf.mxu0  ;;  %v8616_v7 = vadd.f32 %v13484_v4, %v17919_v20 }
 0x5d6   : > { %v18045_v12 = vadd.f32 %v13528_v31, %v8612_v54  ;;  %v8561_v46 = vpop.f32.mrf.mxu1 }
 0x5d7   : > { %v8867_v25 = vpop.f32.mrf.mxu0  ;;  %v8614_v3 = vadd.f32 %v8561_v46, %v17925_v26 }
 0x5d8   : > { %v18051_v39 = vadd.f32 %v8867_v25, %v8610_v14  ;;  %v13487_v61 = vpop.f32.mrf.mxu1  ;;  %13774 = vmatmul.mubr.bf16.gmra.mxu1 %v10262_v8  ;;  %v14134_v14 = vld [vmem:[%s14269_s22 + $0x7c] sm:$0xf] }
 0x5d9   : > { %v13531_v11 = vpop.f32.mrf.mxu0  ;;  %13818 = vmatmul.mubr.bf16.gmra.mxu0 %v11722_v29  ;;  %v8619_v20 = vadd.f32 %v13487_v61, %v17928_v44  ;;  %v11724_v5 = vcombine.low %v14133_v28, %v14134_v14 }
 0x5da   : > { %v18054_v54 = vadd.f32 %v13531_v11, %v8615_v18  ;;  %13821 = vmatprep.mubr.bf16.mxu0 %v11723_v37  ;;  %v8574_v10 = vpop.f32.mrf.mxu1 }
 0x5db   : > { %v8880_v32 = vpop.f32.mrf.mxu0  ;;  %v8617_v43 = vadd.f32 %v8574_v10, %v17931_v1 }
 0x5dc   : > { %v18057_v62 = vadd.f32 %v8880_v32, %v8613_v22  ;;  %v13488_v13 = vpop.f32.mrf.mxu1 }
 0x5dd   : > { %v13532_v26 = vpop.f32.mrf.mxu0  ;;  %v8620_v15 = vadd.f32 %v13488_v13, %v17934_v6 }
 0x5de   : > { %v18062_v60 = vadd.f32 %v13532_v26, %v8616_v7  ;;  %v8577_v47 = vpop.f32.mrf.mxu1 }
 0x5df   : > { %v8883_v44 = vpop.f32.mrf.mxu0  ;;  %v8618_v42 = vadd.f32 %v8577_v47, %v17941_v21 }
 0x5e0   : > { %v18065_v38 = vadd.f32 %v8883_v44, %v8614_v3  ;;  %v13555_v18 = vpop.f32.mrf.mxu1 }
 0x5e1   : > { %v13535_v57 = vpop.f32.mrf.mxu0  ;;  %13822 = vmatmul.mubr.bf16.gmra.mxu0 %v11724_v5  ;;  %v9219_v1 = vadd.f32 %v13555_v18, %v17947_v45 }
 0x5e2   : > { %v18068_v49 = vadd.f32 %v13535_v57, %v8619_v20  ;;  %v9090_v63 = vpop.f32.mrf.mxu1 }
 0x5e3   : > { %v8896_v22 = vpop.f32.mrf.mxu0  ;;  %v9217_v4 = vadd.f32 %v9090_v63, %v17950_v30 }
 0x5e4   : > { %v18071_v6 = vadd.f32 %v8896_v22, %v8617_v43  ;;  %v13556_v31 = vpop.f32.mrf.mxu1 }
 0x5e5   : > { %v13536_v51 = vpop.f32.mrf.mxu0  ;;  %v9220_v2 = vadd.f32 %v13556_v31, %v17955_v24 }
 0x5e6   : > { %v18074_v21 = vadd.f32 %v13536_v51, %v8620_v15  ;;  %v9093_v29 = vpop.f32.mrf.mxu1 }
 0x5e7   : > { %v8899_v7 = vpop.f32.mrf.mxu0  ;;  %v9218_v46 = vadd.f32 %v9093_v29, %v17962_v59 }
 0x5e8   : > { %v18077_v8 = vadd.f32 %v8899_v7, %v8618_v42  ;;  %v13559_v45 = vpop.f32.mrf.mxu1 }
 0x5e9   : > { %v13603_v36 = vpop.f32.mrf.mxu0  ;;  %v9223_v53 = vadd.f32 %v13559_v45, %v17965_v50 }
 0x5ea   : > { %v18080_v37 = vadd.f32 %v13603_v36, %v9219_v1  ;;  %v9106_v30 = vpop.f32.mrf.mxu1 }
 0x5eb   : > { %v9412_v25 = vpop.f32.mrf.mxu0  ;;  %v9221_v3 = vadd.f32 %v9106_v30, %v17968_v0 }
 0x5ec   : > { %v18083_v61 = vadd.f32 %v9412_v25, %v9217_v4  ;;  %v13560_v24 = vpop.f32.mrf.mxu1 }
 0x5ed   : > { %v13604_v11 = vpop.f32.mrf.mxu0  ;;  %v9224_v20 = vadd.f32 %v13560_v24, %v17973_v56 }
 0x5ee   : > { %v18086_v10 = vadd.f32 %v13604_v11, %v9220_v2  ;;  %v9109_v59 = vpop.f32.mrf.mxu1 }
 0x5ef   : > { %v9415_v32 = vpop.f32.mrf.mxu0  ;;  %v9222_v43 = vadd.f32 %v9109_v59, %v17980_v40 }
 0x5f0   : > { %v18089_v13 = vadd.f32 %v9415_v32, %v9218_v46  ;;  %v13563_v50 = vpop.f32.mrf.mxu1 }
 0x5f1   : > { %v13607_v26 = vpop.f32.mrf.mxu0  ;;  %v9227_v28 = vadd.f32 %v13563_v50, %v17983_v33 }
 0x5f2   : > { %v18092_v14 = vadd.f32 %v13607_v26, %v9223_v53  ;;  %v9122_v0 = vpop.f32.mrf.mxu1 }
 0x5f3   : > { %v9428_v5 = vpop.f32.mrf.mxu0  ;;  %v9225_v15 = vadd.f32 %v9122_v0, %v17986_v34 }
 0x5f4   : > { %v18095_v47 = vadd.f32 %v9428_v5, %v9221_v3  ;;  %v13564_v56 = vpop.f32.mrf.mxu1 }
 0x5f5   : > { %v13608_v44 = vpop.f32.mrf.mxu0  ;;  %v9228_v42 = vadd.f32 %v13564_v56, %v17991_v9 }
 0x5f6   : > { %v18098_v18 = vadd.f32 %v13608_v44, %v9224_v20  ;;  %v9125_v40 = vpop.f32.mrf.mxu1 }
 0x5f7   : > { %v9431_v57 = vpop.f32.mrf.mxu0  ;;  %v9226_v1 = vadd.f32 %v9125_v40, %v17998_v27 }
 0x5f8   : > { %v18101_v63 = vadd.f32 %v9431_v57, %v9222_v43  ;;  %v13567_v33 = vpop.f32.mrf.mxu1 }
 0x5f9   : > { %v13611_v22 = vpop.f32.mrf.mxu0  ;;  %v9231_v4 = vadd.f32 %v13567_v33, %v18001_v41 }
 0x5fa   : > { %v18104_v31 = vadd.f32 %v13611_v22, %v9227_v28  ;;  %v9138_v34 = vpop.f32.mrf.mxu1 }
 0x5fb   : > { %v9444_v51 = vpop.f32.mrf.mxu0  ;;  %v9229_v2 = vadd.f32 %v9138_v34, %v18004_v17 }
 0x5fc   : > { %v18107_v29 = vadd.f32 %v9444_v51, %v9225_v15  ;;  %v13568_v9 = vpop.f32.mrf.mxu1 }
 0x5fd   : > { %v13612_v7 = vpop.f32.mrf.mxu0  ;;  %v9232_v46 = vadd.f32 %v13568_v9, %v18009_v55 }
 0x5fe   : > { %v18110_v45 = vadd.f32 %v13612_v7, %v9228_v42  ;;  %v9141_v27 = vpop.f32.mrf.mxu1 }
 0x5ff   : > { %v9447_v36 = vpop.f32.mrf.mxu0  ;;  %v9230_v53 = vadd.f32 %v9141_v27, %v18016_v16 }
 0x600   : > { %v18113_v30 = vadd.f32 %v9447_v36, %v9226_v1  ;;  %v13571_v41 = vpop.f32.mrf.mxu1 }
 0x601   : > { %v13615_v25 = vpop.f32.mrf.mxu0  ;;  %v9235_v3 = vadd.f32 %v13571_v41, %v18019_v58 }
 0x602   : > { %v18116_v24 = vadd.f32 %v13615_v25, %v9231_v4  ;;  %v9154_v17 = vpop.f32.mrf.mxu1 }
 0x603   : > { %v9460_v11 = vpop.f32.mrf.mxu0  ;;  %v9233_v20 = vadd.f32 %v9154_v17, %v18022_v35 }
 0x604   : > { %v18119_v59 = vadd.f32 %v9460_v11, %v9229_v2  ;;  %v13572_v55 = vpop.f32.mrf.mxu1 }
 0x605   : > { %v13616_v32 = vpop.f32.mrf.mxu0  ;;  %v9236_v43 = vadd.f32 %v13572_v55, %v18027_v23 }
 0x606   : > { %v18122_v50 = vadd.f32 %v13616_v32, %v9232_v46  ;;  %v9157_v16 = vpop.f32.mrf.mxu1 }
 0x607   : > { %v9463_v26 = vpop.f32.mrf.mxu0  ;;  %v9234_v28 = vadd.f32 %v9157_v16, %v18034_v48 }
 0x608   : > { %v18125_v0 = vadd.f32 %v9463_v26, %v9230_v53  ;;  %v13575_v58 = vpop.f32.mrf.mxu1 }
 0x609   : > { %v13619_v5 = vpop.f32.mrf.mxu0  ;;  %v9239_v15 = vadd.f32 %v13575_v58, %v18037_v52 }
 0x60a   : > { %v18128_v56 = vadd.f32 %v13619_v5, %v9235_v3  ;;  %v9170_v35 = vpop.f32.mrf.mxu1 }
 0x60b   : > { %v9476_v44 = vpop.f32.mrf.mxu0  ;;  %v9237_v42 = vadd.f32 %v9170_v35, %v18040_v19 }
 0x60c   : > { %v18131_v40 = vadd.f32 %v9476_v44, %v9233_v20  ;;  %v13576_v23 = vpop.f32.mrf.mxu1 }
 0x60d   : > { %v13620_v57 = vpop.f32.mrf.mxu0  ;;  %v9240_v1 = vadd.f32 %v13576_v23, %v18045_v12 }
 0x60e   : > { %v18134_v33 = vadd.f32 %v13620_v57, %v9236_v43  ;;  %v9173_v48 = vpop.f32.mrf.mxu1 }
 0x60f   : > { %v9479_v22 = vpop.f32.mrf.mxu0  ;;  %v9238_v4 = vadd.f32 %v9173_v48, %v18051_v39 }
 0x610   : > { %19111 = vst [vmem:[#allocation39_spill] sm:$0xff] %v18134_v33  ;;  %v18137_v34 = vadd.f32 %v9479_v22, %v9234_v28  ;;  %v13579_v52 = vpop.f32.mrf.mxu1 }
 0x611   : > { %v13623_v51 = vpop.f32.mrf.mxu0  ;;  %v9243_v2 = vadd.f32 %v13579_v52, %v18054_v54 }
 0x612   : > { %19112 = vst [vmem:[#allocation37_spill] sm:$0xff] %v18137_v34  ;;  %v18140_v9 = vadd.f32 %v13623_v51, %v9239_v15  ;;  %v9186_v19 = vpop.f32.mrf.mxu1 }
 0x613   : > { %v9492_v7 = vpop.f32.mrf.mxu0  ;;  %v9241_v46 = vadd.f32 %v9186_v19, %v18057_v62 }
 0x614   : > { %19113 = vst [vmem:[#allocation40_spill] sm:$0xff] %v18140_v9  ;;  %v18143_v27 = vadd.f32 %v9492_v7, %v9237_v42  ;;  %v13580_v12 = vpop.f32.mrf.mxu1 }
 0x615   : > { %v13624_v36 = vpop.f32.mrf.mxu0  ;;  %v9244_v53 = vadd.f32 %v13580_v12, %v18062_v60 }
 0x616   : > { %19114 = vst [vmem:[#allocation38_spill] sm:$0xff] %v18143_v27  ;;  %v18146_v41 = vadd.f32 %v13624_v36, %v9240_v1  ;;  %v9189_v39 = vpop.f32.mrf.mxu1 }
 0x617   : > { %v9495_v25 = vpop.f32.mrf.mxu0  ;;  %v9242_v3 = vadd.f32 %v9189_v39, %v18065_v38 }
 0x618   : > { %19115 = vst [vmem:[#allocation46_spill] sm:$0xff] %v18146_v41  ;;  %v18149_v17 = vadd.f32 %v9495_v25, %v9238_v4  ;;  %v13583_v54 = vpop.f32.mrf.mxu1 }
 0x619   : > { %v13627_v11 = vpop.f32.mrf.mxu0  ;;  %v9247_v20 = vadd.f32 %v13583_v54, %v18068_v49 }
 0x61a   : > { %19116 = vst [vmem:[#allocation41_spill] sm:$0xff] %v18149_v17  ;;  %v18152_v55 = vadd.f32 %v13627_v11, %v9243_v2  ;;  %v9202_v62 = vpop.f32.mrf.mxu1 }
 0x61b   : > { %v9508_v32 = vpop.f32.mrf.mxu0  ;;  %v9245_v43 = vadd.f32 %v9202_v62, %v18071_v6 }
 0x61c   : > { %19117 = vst [vmem:[#allocation42_spill] sm:$0xff] %v18152_v55  ;;  %v18155_v16 = vadd.f32 %v9508_v32, %v9241_v46  ;;  %v13584_v60 = vpop.f32.mrf.mxu1 }
 0x61d   : > { %v13628_v26 = vpop.f32.mrf.mxu0  ;;  %v9248_v28 = vadd.f32 %v13584_v60, %v18074_v21 }
 0x61e   : > { %19118 = vst [vmem:[#allocation94_spill] sm:$0xff] %v18155_v16  ;;  %v18158_v58 = vadd.f32 %v13628_v26, %v9244_v53  ;;  %v9205_v38 = vpop.f32.mrf.mxu1 }
 0x61f   : > { %v9511_v5 = vpop.f32.mrf.mxu0  ;;  %v9246_v15 = vadd.f32 %v9205_v38, %v18077_v8 }
 0x620   : > { %19119 = vst [vmem:[#allocation64_spill] sm:$0xff] %v18158_v58  ;;  %v18161_v35 = vadd.f32 %v9511_v5, %v9242_v3  ;;  %v18163_v49 = vpop.f32.mrf.mxu1 }
 0x621   : > { %v13631_v44 = vpop.f32.mrf.mxu0 }
 0x622   : > { %19120 = vst [vmem:[#allocation75_spill] sm:$0xff] %v18161_v35  ;;  %v18165_v42 = vadd.f32 %v13631_v44, %v9247_v20  ;;  %v18167_v6 = vpop.f32.mrf.mxu1 }
 0x623   : > { %v9524_v23 = vpop.f32.mrf.mxu0 }
 0x624   : > { %19121 = vst [vmem:[#allocation89_spill] sm:$0xff] %v18165_v42  ;;  %v18169_v57 = vadd.f32 %v9524_v23, %v9245_v43  ;;  %v18171_v1 = vpop.f32.mrf.mxu1 }
 0x625   : > { %v13632_v21 = vpop.f32.mrf.mxu0 }
 0x626   : > { %19122 = vst [vmem:[#allocation50_spill] sm:$0xff] %v18169_v57  ;;  %v18173_v48 = vadd.f32 %v13632_v21, %v9248_v28  ;;  %v18175_v22 = vpop.f32.mrf.mxu1 }
 0x627   : > { %v9527_v8 = vpop.f32.mrf.mxu0 }
 0x628   : > { %19123 = vst [vmem:[#allocation44_spill] sm:$0xff] %v18173_v48  ;;  %v18177_v4 = vadd.f32 %v9527_v8, %v9246_v15  ;;  %v18179_v52 = vpop.f32.mrf.mxu1 }
 0x629   : > { %v13699_v51 = vpop.f32.mrf.mxu0 }
 0x62a   : > { %19124 = vst [vmem:[#allocation51_spill] sm:$0xff] %v18177_v4  ;;  %v18181_v2 = vpop.f32.mrf.mxu1 }
 0x62b   : > { %v10040_v19 = vpop.f32.mrf.mxu0 }
 0x62c   : > { %v18183_v7 = vpop.f32.mrf.mxu1 }
 0x62d   : > { %v13700_v46 = vpop.f32.mrf.mxu0 }
 0x62e   : > { %v18185_v12 = vpop.f32.mrf.mxu1 }
 0x62f   : > { %v18187_v36 = vpop.f32.mrf.mxu0 }
 0x630   : > { %v18189_v53 = vpop.f32.mrf.mxu1 }
 0x631   : > { %v18191_v39 = vpop.f32.mrf.mxu0 }
 0x632   : > { %v18193_v25 = vpop.f32.mrf.mxu1 }
 0x633   : > { %v18195_v3 = vpop.f32.mrf.mxu0 }
 0x634   : > { %v18197_v54 = vpop.f32.mrf.mxu1 }
 0x635   : > { %v18199_v11 = vpop.f32.mrf.mxu0 }
 0x636   : > { %v18201_v20 = vpop.f32.mrf.mxu1 }
 0x637   : > { %v18203_v62 = vpop.f32.mrf.mxu0 }
 0x638   : > { %v18205_v32 = vpop.f32.mrf.mxu1 }
 0x639   : > { %v18207_v43 = vpop.f32.mrf.mxu0 }
 0x63a   : > { %v18209_v60 = vpop.f32.mrf.mxu1 }
 0x63b   : > { %v18211_v26 = vpop.f32.mrf.mxu0 }
 0x63c   : > { %v18213_v28 = vpop.f32.mrf.mxu1 }
 0x63d   : > { %v18215_v38 = vpop.f32.mrf.mxu0 }
 0x63e   : > { %v18217_v5 = vpop.f32.mrf.mxu1 }
 0x63f   : > { %v18219_v15 = vpop.f32.mrf.mxu0 }
 0x640   : > { %v18221_v44 = vpop.f32.mrf.mxu1 }
 0x641   : > { %v18223_v23 = vpop.f32.mrf.mxu0 }
 0x642   : > { %v18225_v21 = vpop.f32.mrf.mxu1 }
 0x643   : > { %v18227_v8 = vpop.f32.mrf.mxu0 }
 0x644   : > { %v18229_v4 = vpop.f32.mrf.mxu1 }
 0x645   : > { %19125 = vst [vmem:[#allocation73_spill] sm:$0xff] %v18229_v4  ;;  %v18231_v48 = vpop.f32.mrf.mxu0 }
 0x646   : > { %v18233_v57 = vpop.f32.mrf.mxu1 }
 0x647   : > { %19126 = vst [vmem:[#allocation77_spill] sm:$0xff] %v18233_v57  ;;  %v18235_v42 = vpop.f32.mrf.mxu0 }
 0x648   : > { %v18237_v35 = vpop.f32.mrf.mxu1 }
 0x649   : > { %19127 = vst [vmem:[#allocation43_spill] sm:$0xff] %v18237_v35  ;;  %v18239_v58 = vpop.f32.mrf.mxu0 }
 0x64a   : > { %v18241_v16 = vpop.f32.mrf.mxu1 }
 0x64b   : > { %19128 = vst [vmem:[#allocation53_spill] sm:$0xff] %v18241_v16  ;;  %v18243_v55 = vpop.f32.mrf.mxu0 }
 0x64c   : > { %19129 = vst [vmem:[#allocation49_spill] sm:$0xff] %v18243_v55  ;;  %v18245_v17 = vpop.f32.mrf.mxu1 }
 0x64d   : > { %19130 = vst [vmem:[#allocation100_spill] sm:$0xff] %v18245_v17  ;;  %v18247_v41 = vpop.f32.mrf.mxu0 }
 0x64e   : > { %19131 = vst [vmem:[#allocation74_spill] sm:$0xff] %v18247_v41  ;;  %v18249_v27 = vpop.f32.mrf.mxu1 }
 0x64f   : > { %19132 = vst [vmem:[#allocation97_spill] sm:$0xff] %v18249_v27  ;;  %v18251_v9 = vpop.f32.mrf.mxu0 }
 0x650   : > { %19133 = vst [vmem:[#allocation79_spill] sm:$0xff] %v18251_v9  ;;  %v18253_v34 = vpop.f32.mrf.mxu1 }
 0x651   : > { %19134 = vst [vmem:[#allocation90_spill] sm:$0xff] %v18253_v34  ;;  %v18255_v57 = vpop.f32.mrf.mxu0 }
 0x652   : > { %19135 = vst [vmem:[#allocation55_spill] sm:$0xff] %v18255_v57  ;;  %v18257_v4 = vpop.f32.mrf.mxu1 }
 0x653   : > { %19136 = vst [vmem:[#allocation57_spill] sm:$0xff] %v18257_v4  ;;  %v18259_v35 = vpop.f32.mrf.mxu0 }
 0x654   : > { %19137 = vst [vmem:[#allocation105_spill] sm:$0xff] %v18259_v35  ;;  %v18261_v33 = vpop.f32.mrf.mxu1 }
 0x655   : > { %19138 = vst [vmem:[#allocation110_spill] sm:$0xff] %v18261_v33  ;;  %v18263_v16 = vpop.f32.mrf.mxu0  ;;  %v9863_v33 = vadd.f32 %v18163_v49, %v18080_v37  ;;  %v9862_v37 = vadd.f32 %v18175_v22, %v18089_v13  ;;  %v18313_v22 = vld [vmem:[%s18505_s4] ss:$0 sm:$0xff] }
 0x656   : > { %19139 = vst [vmem:[#allocation92_spill] sm:$0xff] %v18263_v16  ;;  %v18265_v55 = vpop.f32.mrf.mxu1 }
 0x657   : > { %19140 = vst [vmem:[#allocation91_spill] sm:$0xff] %v18265_v55  ;;  %v18267_v17 = vpop.f32.mrf.mxu0 }
 0x658   : > { %19141 = vst [vmem:[#allocation103_spill] sm:$0xff] %v18267_v17  ;;  %v18269_v41 = vpop.f32.mrf.mxu1  ;;  %v10169_v17 = vadd.f32 %v13699_v51, %v9863_v33 }
 0x659   : > { %19142 = vst [vmem:[#allocation107_spill] sm:$0xff] %v18269_v41  ;;  %v18271_v27 = vpop.f32.mrf.mxu0  ;;  %v9861_v41 = vadd.f32 %v18167_v6, %v18083_v61  ;;  %v18300_v61 = vld [vmem:[%s18513_s12] ss:$0 sm:$0xff] }
 0x65a   : > { %19143 = vst [vmem:[#allocation113_spill] sm:$0xff] %v18271_v27  ;;  %v18273_v9 = vpop.f32.mrf.mxu1 }
 0x65b   : > { %19144 = vst [vmem:[#allocation108_spill] sm:$0xff] %v18273_v9  ;;  %v18275_v34 = vpop.f32.mrf.mxu0  ;;  %v9864_v9 = vadd.f32 %v18171_v1, %v18086_v10  ;;  %v10168_v10 = vadd.f32 %v18187_v36, %v9862_v37 }
 0x65c   : > { %19145 = vst [vmem:[#allocation82_spill] sm:$0xff] %v18275_v34  ;;  %v18277_v57 = vpop.f32.mrf.mxu1 }
 0x65d   : > { %19146 = vst [vmem:[#allocation19_spill] sm:$0xff] %v18277_v57  ;;  %v18279_v4 = vpop.f32.mrf.mxu0  ;;  %v10167_v57 = vadd.f32 %v10040_v19, %v9861_v41  ;;  %v10170_v49 = vadd.f32 %v13700_v46, %v9864_v9  ;;  %v9867_v41 = vadd.f32 %v18179_v52, %v18092_v14 }
 0x65e   : > { %19147 = vst [vmem:[#allocation45_spill] sm:$0xff] %v18279_v4  ;;  %v18283_v16 = vpop.f32.mrf.mxu1 }
 0x65f   : > { %19148 = vst [vmem:[#allocation58_spill] sm:$0xff] %v18283_v16  ;;  %v18285_v55 = vpop.f32.mrf.mxu0  ;;  %v10173_v51 = vadd.f32 %v18191_v39, %v9867_v41 }
 0x660   : > { %v13747_v27 = vpop.f32.mrf.mxu1 }
 0x661   : > { %v18291_v34 = vpop.f32.mrf.mxu0  ;;  %v10491_v35 = vadd.f32 %v13747_v27, %v10169_v17 }
 0x662   : > { %v10362_v4 = vpop.f32.mrf.mxu1 }
 0x663   : > { %v18295_v16 = vpop.f32.mrf.mxu0  ;;  %v10489_v33 = vadd.f32 %v10362_v4, %v10167_v57  ;;  %v10530_v13 = vadd.f32 %v18300_v61, %v10491_v35  ;;  %v9865_v4 = vadd.f32 %v18181_v2, %v18095_v47  ;;  %v9868_v35 = vadd.f32 %v18183_v7, %v18098_v18 }
 0x664   : > { %v13748_v6 = vpop.f32.mrf.mxu1  ;;  %v9866_v47 = vadd.f32 %v18185_v12, %v18101_v63  ;;  %v9871_v63 = vadd.f32 %v18189_v53, %v18104_v31 }
 0x665   : > { %v18303_v1 = vpop.f32.mrf.mxu0  ;;  %v10492_v27 = vadd.f32 %v13748_v6, %v10170_v49  ;;  %v10528_v19 = vadd.f32 %v18300_v61, %v10489_v33  ;;  %v10171_v36 = vadd.f32 %v18195_v3, %v9865_v4  ;;  %v10890_v37 = vmul.f32 0.25, %v10530_v13 }
 0x666   : > { %v10365_v9 = vpop.f32.mrf.mxu1  ;;  %v10174_v2 = vadd.f32 %v18199_v11, %v9868_v35  ;;  %v10172_v12 = vadd.f32 %v18203_v62, %v9866_v47  ;;  %v10177_v35 = vadd.f32 %v18207_v43, %v9871_v63  ;;  %v9875_v63 = vadd.f32 %v18205_v32, %v18116_v24 }
 0x667   : > { %v18308_v17 = vpop.f32.mrf.mxu0  ;;  %v10490_v57 = vadd.f32 %v10365_v9, %v10168_v10  ;;  %v10531_v46 = vadd.f32 %v18300_v61, %v10492_v27  ;;  %v10888_v39 = vmul.f32 0.25, %v10528_v19 }
 0x668   : > { %v13751_v14 = vpop.f32.mrf.mxu1 }
 0x669   : > { %v13795_v52 = vpop.f32.mrf.mxu0  ;;  %v10495_v6 = vadd.f32 %v13751_v14, %v10173_v51  ;;  %v10529_v7 = vadd.f32 %v18300_v61, %v10490_v57  ;;  %v10891_v11 = vmul.f32 0.25, %v10531_v46  ;;  %v9869_v14 = vadd.f32 %v18193_v25, %v18107_v29 }
 0x66a   : > { %v10770_v49 = vadd.f32 %v13795_v52, %v18313_v22  ;;  %v10378_v10 = vpop.f32.mrf.mxu1 }
 0x66b   : > { %v10761_v18 = vpop.f32.mrf.mxu0  ;;  %v10493_v27 = vadd.f32 %v10378_v10, %v10171_v36  ;;  %v10534_v57 = vadd.f32 %v18300_v61, %v10495_v6  ;;  %v10889_v52 = vmul.f32 0.25, %v10529_v7  ;;  %v10175_v6 = vadd.f32 %v18211_v26, %v9869_v14 }
 0x66c   : > { %v10922_v3 = vadd.f32 %v10890_v37, %v10770_v49  ;;  %v10762_v33 = vadd.f32 %v18313_v22, %v10761_v18  ;;  %v13752_v41 = vpop.f32.mrf.mxu1  ;;  %v9872_v49 = vadd.f32 %v18197_v54, %v18110_v45  ;;  %v9870_v7 = vadd.f32 %v18201_v20, %v18113_v30 }
 0x66d   : > { %v13796_v13 = vpop.f32.mrf.mxu0  ;;  %v10496_v51 = vadd.f32 %v13752_v41, %v10174_v2  ;;  %v10532_v46 = vadd.f32 %v18300_v61, %v10493_v27  ;;  %v10894_v25 = vmul.f32 0.25, %v10534_v57  ;;  %v9873_v57 = vadd.f32 %v18209_v60, %v18119_v59 }
 0x66e   : > { %10954 = vst [vmem:[%s18331_s30 + $0x10] sm:$0xff] %v10922_v3  ;;  %v10920_v9 = vadd.f32 %v10888_v39, %v10762_v33  ;;  %v10773_v4 = vadd.f32 %v13796_v13, %v18313_v22  ;;  %v10381_v19 = vpop.f32.mrf.mxu1  ;;  %v10178_v39 = vadd.f32 %v18215_v38, %v9872_v49  ;;  %v9874_v49 = vadd.f32 %v18217_v5, %v18125_v0 }
 0x66f   : > { %v10764_v31 = vpop.f32.mrf.mxu0  ;;  %v10494_v36 = vadd.f32 %v10381_v19, %v10172_v12  ;;  %v10535_v2 = vadd.f32 %v18300_v61, %v10496_v51  ;;  %v10892_v54 = vmul.f32 0.25, %v10532_v46  ;;  %v10176_v12 = vadd.f32 %v18219_v15, %v9870_v7 }
 0x670   : > { %10952 = vst [vmem:[%s18331_s30] sm:$0xff] %v10920_v9  ;;  %v10923_v53 = vadd.f32 %v10891_v11, %v10773_v4  ;;  %v10765_v62 = vadd.f32 %v18313_v22, %v10764_v31  ;;  %v13755_v37 = vpop.f32.mrf.mxu1  ;;  %v10181_v51 = vadd.f32 %v18223_v23, %v9875_v63  ;;  %v9876_v31 = vadd.f32 %v18213_v28, %v18122_v50  ;;  %v19149_v63 = vld [vmem:[#allocation39_spill] sm:$0xff] }
 0x671   : > { %v13799_v10 = vpop.f32.mrf.mxu0  ;;  %v10499_v29 = vadd.f32 %v13755_v37, %v10177_v35  ;;  %v10533_v27 = vadd.f32 %v18300_v61, %v10494_v36  ;;  %v10895_v20 = vmul.f32 0.25, %v10535_v2  ;;  %v10180_v2 = vadd.f32 %v18235_v42, %v9874_v49 }
 0x672   : > { %10955 = vst [vmem:[%s18331_s30 + $0x18] sm:$0xff] %v10923_v53  ;;  %v10921_v43 = vadd.f32 %v10889_v52, %v10765_v62  ;;  %v10786_v47 = vadd.f32 %v13799_v10, %v18313_v22  ;;  %v10394_v18 = vpop.f32.mrf.mxu1  ;;  %v10179_v53 = vadd.f32 %v18227_v8, %v9873_v57  ;;  %v19152_v57 = vld [vmem:[#allocation37_spill] sm:$0xff] }
 0x673   : > { %v10777_v3 = vpop.f32.mrf.mxu0  ;;  %v10497_v45 = vadd.f32 %v10394_v18, %v10175_v6  ;;  %v10538_v30 = vadd.f32 %v18300_v61, %v10499_v29  ;;  %v10893_v32 = vmul.f32 0.25, %v10533_v27  ;;  %v10182_v6 = vadd.f32 %v18231_v48, %v9876_v31 }
 0x674   : > { %10953 = vst [vmem:[%s18331_s30 + $0x8] sm:$0xff] %v10921_v43  ;;  %v10926_v26 = vadd.f32 %v10894_v25, %v10786_v47  ;;  %v10778_v33 = vadd.f32 %v18313_v22, %v10777_v3  ;;  %v13756_v41 = vpop.f32.mrf.mxu1  ;;  %v9879_v47 = vadd.f32 %v18221_v44, %v18128_v56 }
 0x675   : > { %v13800_v11 = vpop.f32.mrf.mxu0  ;;  %v10500_v9 = vadd.f32 %v13756_v41, %v10178_v39  ;;  %v10536_v24 = vadd.f32 %v18300_v61, %v10497_v45  ;;  %v10898_v62 = vmul.f32 0.25, %v10538_v30  ;;  %v9877_v45 = vadd.f32 %v18225_v21, %v18131_v40  ;;  %v19151_v30 = vld [vmem:[#allocation49_spill] sm:$0xff] }
 0x676   : > { %10958 = vst [vmem:[%s18331_s30 + $0x30] sm:$0xff] %v10926_v26  ;;  %v10924_v38 = vadd.f32 %v10892_v54, %v10778_v33  ;;  %v10789_v13 = vadd.f32 %v13800_v11, %v18313_v22  ;;  %v10397_v4 = vpop.f32.mrf.mxu1  ;;  %v10185_v54 = vadd.f32 %v18239_v58, %v9879_v47  ;;  %v19160_v47 = vld [vmem:[#allocation55_spill] sm:$0xff] }
 0x677   : > { %v10780_v19 = vpop.f32.mrf.mxu0  ;;  %v10498_v35 = vadd.f32 %v10397_v4, %v10176_v12  ;;  %v10539_v46 = vadd.f32 %v18300_v61, %v10500_v9  ;;  %v10896_v10 = vmul.f32 0.25, %v10536_v24  ;;  %v19150_v12 = vld [vmem:[#allocation73_spill] sm:$0xff]  ;;  %v19154_v24 = vld [vmem:[#allocation74_spill] sm:$0xff] }
 0x678   : > { %10956 = vst [vmem:[%s18331_s30 + $0x20] sm:$0xff] %v10924_v38  ;;  %v10927_v15 = vadd.f32 %v10895_v20, %v10789_v13  ;;  %v10781_v14 = vadd.f32 %v18313_v22, %v10780_v19  ;;  %v13759_v52 = vpop.f32.mrf.mxu1  ;;  %v9880_v11 = vadd.f32 %v19150_v12, %v19149_v63  ;;  %v10183_v20 = vadd.f32 %v19151_v30, %v9877_v45  ;;  %v19161_v45 = vld [vmem:[#allocation46_spill] sm:$0xff]  ;;  %v19164_v30 = vld [vmem:[#allocation41_spill] sm:$0xff] }
 0x679   : > { %v13803_v59 = vpop.f32.mrf.mxu0  ;;  %v10503_v36 = vadd.f32 %v13759_v52, %v10181_v51  ;;  %v10537_v29 = vadd.f32 %v18300_v61, %v10498_v35  ;;  %v10899_v48 = vmul.f32 0.25, %v10539_v46  ;;  %v19153_v51 = vld [vmem:[#allocation77_spill] sm:$0xff]  ;;  %v19157_v46 = vld [vmem:[#allocation79_spill] sm:$0xff] }
 0x67a   : > { %10959 = vst [vmem:[%s18331_s30 + $0x38] sm:$0xff] %v10927_v15  ;;  %v10925_v60 = vadd.f32 %v10893_v32, %v10781_v14  ;;  %v10802_v23 = vadd.f32 %v13803_v59, %v18313_v22  ;;  %v10410_v37 = vpop.f32.mrf.mxu1  ;;  %v9878_v19 = vadd.f32 %v19153_v51, %v19152_v57  ;;  %v10186_v32 = vadd.f32 %v19154_v24, %v9880_v11  ;;  %v19155_v59 = vld [vmem:[#allocation40_spill] sm:$0xff]  ;;  %v19167_v24 = vld [vmem:[#allocation42_spill] sm:$0xff] }
 0x67b   : > { %v10793_v50 = vpop.f32.mrf.mxu0  ;;  %v10501_v25 = vadd.f32 %v10410_v37, %v10179_v53  ;;  %v10542_v39 = vadd.f32 %v18300_v61, %v10503_v36  ;;  %v10897_v42 = vmul.f32 0.25, %v10537_v29  ;;  %v19158_v29 = vld [vmem:[#allocation38_spill] sm:$0xff] }
 0x67c   : > { %10957 = vst [vmem:[%s18331_s30 + $0x28] sm:$0xff] %v10925_v60  ;;  %v10930_v28 = vadd.f32 %v10898_v62, %v10802_v23  ;;  %v10794_v8 = vadd.f32 %v18313_v22, %v10793_v50  ;;  %v13760_v43 = vpop.f32.mrf.mxu1  ;;  %v19156_v60 = vld [vmem:[#allocation43_spill] sm:$0xff]  ;;  %v10184_v36 = vadd.f32 %v19157_v46, %v9878_v19  ;;  %v19170_v46 = vld [vmem:[#allocation94_spill] sm:$0xff] }
 0x67d   : > { %v13804_v18 = vpop.f32.mrf.mxu0  ;;  %v10504_v0 = vadd.f32 %v13760_v43, %v10182_v6  ;;  %v10540_v27 = vadd.f32 %v18300_v61, %v10501_v25  ;;  %v10902_v58 = vmul.f32 0.25, %v10542_v39  ;;  %v9883_v23 = vadd.f32 %v19156_v60, %v19155_v59  ;;  %v19159_v25 = vld [vmem:[#allocation53_spill] sm:$0xff] }
 0x67e   : > { %10962 = vst [vmem:[%s18331_s30 + $0x50] sm:$0xff] %v10930_v28  ;;  %v10928_v5 = vadd.f32 %v10896_v10, %v10794_v8  ;;  %v10805_v7 = vadd.f32 %v13804_v18, %v18313_v22  ;;  %v10413_v3 = vpop.f32.mrf.mxu1  ;;  %v9881_v43 = vadd.f32 %v19159_v25, %v19158_v29 }
 0x67f   : > { %v10796_v26 = vpop.f32.mrf.mxu0  ;;  %v10502_v56 = vadd.f32 %v10413_v3, %v10180_v2  ;;  %v10543_v40 = vadd.f32 %v18300_v61, %v10504_v0  ;;  %v10900_v35 = vmul.f32 0.25, %v10540_v27  ;;  %v10189_v2 = vadd.f32 %v19160_v47, %v9883_v23  ;;  %v19173_v47 = vld [vmem:[#allocation64_spill] sm:$0xff] }
 0x680   : > { %10960 = vst [vmem:[%s18331_s30 + $0x40] sm:$0xff] %v10928_v5  ;;  %v10931_v44 = vadd.f32 %v10899_v48, %v10805_v7  ;;  %v10797_v33 = vadd.f32 %v18313_v22, %v10796_v26  ;;  %v13763_v41 = vpop.f32.mrf.mxu1 }
 0x681   : > { %v13807_v38 = vpop.f32.mrf.mxu0  ;;  %v10507_v9 = vadd.f32 %v13763_v41, %v10185_v54  ;;  %v10541_v14 = vadd.f32 %v18300_v61, %v10502_v56  ;;  %v10903_v37 = vmul.f32 0.25, %v10543_v40  ;;  %v19162_v54 = vld [vmem:[#allocation100_spill] sm:$0xff]  ;;  %v19163_v56 = vld [vmem:[#allocation105_spill] sm:$0xff] }
 0x682   : > { %10963 = vst [vmem:[%s18331_s30 + $0x58] sm:$0xff] %v10931_v44  ;;  %v10929_v21 = vadd.f32 %v10897_v42, %v10797_v33  ;;  %v10818_v13 = vadd.f32 %v13807_v38, %v18313_v22  ;;  %v10426_v4 = vpop.f32.mrf.mxu1  ;;  %v9884_v26 = vadd.f32 %v19162_v54, %v19161_v45  ;;  %v10187_v42 = vadd.f32 %v19163_v56, %v9881_v43  ;;  %v19166_v40 = vld [vmem:[#allocation92_spill] sm:$0xff]  ;;  %v19176_v56 = vld [vmem:[#allocation75_spill] sm:$0xff] }
 0x683   : > { %v10809_v15 = vpop.f32.mrf.mxu0  ;;  %v10505_v53 = vadd.f32 %v10426_v4, %v10183_v20  ;;  %v10546_v50 = vadd.f32 %v18300_v61, %v10507_v9  ;;  %v10901_v18 = vmul.f32 0.25, %v10541_v14  ;;  %v19165_v20 = vld [vmem:[#allocation97_spill] sm:$0xff]  ;;  %v19169_v14 = vld [vmem:[#allocation103_spill] sm:$0xff] }
 0x684   : > { %10961 = vst [vmem:[%s18331_s30 + $0x48] sm:$0xff] %v10929_v21  ;;  %v10934_v52 = vadd.f32 %v10902_v58, %v10818_v13  ;;  %v10810_v31 = vadd.f32 %v18313_v22, %v10809_v15  ;;  %v13764_v62 = vpop.f32.mrf.mxu1  ;;  %v9882_v38 = vadd.f32 %v19165_v20, %v19164_v30  ;;  %v10190_v58 = vadd.f32 %v19166_v40, %v9884_v26  ;;  %v19179_v40 = vld [vmem:[#allocation89_spill] sm:$0xff] }
 0x685   : > { %v13808_v49 = vpop.f32.mrf.mxu0  ;;  %v10508_v28 = vadd.f32 %v13764_v62, %v10186_v32  ;;  %v10544_v7 = vadd.f32 %v18300_v61, %v10505_v53  ;;  %v10906_v27 = vmul.f32 0.25, %v10546_v50  ;;  %v19168_v32 = vld [vmem:[#allocation90_spill] sm:$0xff] }
 0x686   : > { %10966 = vst [vmem:[%s18331_s30 + $0x70] sm:$0xff] %v10934_v52  ;;  %v10932_v6 = vadd.f32 %v10900_v35, %v10810_v31  ;;  %v10821_v10 = vadd.f32 %v13808_v49, %v18313_v22  ;;  %v10429_v8 = vpop.f32.mrf.mxu1  ;;  %v9887_v15 = vadd.f32 %v19168_v32, %v19167_v24  ;;  %v10188_v35 = vadd.f32 %v19169_v14, %v9882_v38  ;;  %v19172_v49 = vld [vmem:[#allocation113_spill] sm:$0xff]  ;;  %v19182_v14 = vld [vmem:[#allocation108_spill] sm:$0xff] }
 0x687   : > { %v10812_v0 = vpop.f32.mrf.mxu0  ;;  %v10506_v39 = vadd.f32 %v10429_v8, %v10184_v36  ;;  %v10547_v12 = vadd.f32 %v18300_v61, %v10508_v28  ;;  %v10904_v9 = vmul.f32 0.25, %v10544_v7  ;;  %v19171_v36 = vld [vmem:[#allocation57_spill] sm:$0xff] }
 0x688   : > { %10964 = vst [vmem:[%s18331_s30 + $0x60] sm:$0xff] %v10932_v6  ;;  %v10935_v48 = vadd.f32 %v10903_v37, %v10821_v10  ;;  %v10813_v5 = vadd.f32 %v18313_v22, %v10812_v0  ;;  %v13767_v3 = vpop.f32.mrf.mxu1  ;;  %v9885_v37 = vadd.f32 %v19171_v36, %v19170_v46  ;;  %v10193_v6 = vadd.f32 %v19172_v49, %v9887_v15  ;;  %v19175_v0 = vld [vmem:[#allocation82_spill] sm:$0xff]  ;;  %v19183_v46 = vld [vmem:[#allocation44_spill] sm:$0xff]  ;;  %v19184_v36 = vld [vmem:[#allocation19_spill] sm:$0xff] }
 0x689   : > { %v13811_v44 = vpop.f32.mrf.mxu0  ;;  %v10511_v33 = vadd.f32 %v13767_v3, %v10189_v2  ;;  %v10545_v51 = vadd.f32 %v18300_v61, %v10506_v39  ;;  %v10907_v53 = vmul.f32 0.25, %v10547_v12  ;;  %v19174_v2 = vld [vmem:[#allocation110_spill] sm:$0xff] }
 0x68a   : > { %10967 = vst [vmem:[%s18331_s30 + $0x78] sm:$0xff] %v10935_v48  ;;  %v10933_v41 = vadd.f32 %v10901_v18, %v10813_v5  ;;  %v10834_v63 = vadd.f32 %v13811_v44, %v18313_v22  ;;  %v10442_v11 = vpop.f32.mrf.mxu1  ;;  %v9888_v18 = vadd.f32 %v19174_v2, %v19173_v47  ;;  %v10191_v48 = vadd.f32 %v19175_v0, %v9885_v37  ;;  %v19181_v15 = vld [vmem:[#allocation50_spill] sm:$0xff] }
 0x68b   : > { %v10825_v21 = vpop.f32.mrf.mxu0  ;;  %v10509_v13 = vadd.f32 %v10442_v11, %v10187_v42  ;;  %v10550_v31 = vadd.f32 %v18300_v61, %v10511_v33  ;;  %v10905_v28 = vmul.f32 0.25, %v10545_v51  ;;  %v19177_v42 = vld [vmem:[#allocation91_spill] sm:$0xff]  ;;  %v19178_v33 = vld [vmem:[#allocation45_spill] sm:$0xff]  ;;  %v9892_v37 = vadd.f32 %v19184_v36, %v19183_v46 }
 0x68c   : > { %10965 = vst [vmem:[%s18331_s30 + $0x68] sm:$0xff] %v10933_v41  ;;  %v10938_v4 = vadd.f32 %v10906_v27, %v10834_v63  ;;  %v10826_v57 = vadd.f32 %v18313_v22, %v10825_v21  ;;  %v13768_v19 = vpop.f32.mrf.mxu1  ;;  %v9886_v44 = vadd.f32 %v19177_v42, %v19176_v56  ;;  %v10194_v27 = vadd.f32 %v19178_v33, %v9888_v18 }
 0x68d   : > { %v13812_v52 = vpop.f32.mrf.mxu0  ;;  %v10512_v60 = vadd.f32 %v13768_v19, %v10190_v58  ;;  %v10548_v50 = vadd.f32 %v18300_v61, %v10509_v13  ;;  %v10910_v5 = vmul.f32 0.25, %v10550_v31  ;;  %v19180_v58 = vld [vmem:[#allocation107_spill] sm:$0xff]  ;;  %v10198_v2 = vadd.f32 %v18303_v1, %v9892_v37 }
 0x68e   : > { %10970 = vst [vmem:[%s18331_s30 + $0x90] sm:$0xff] %v10938_v4  ;;  %v10936_v62 = vadd.f32 %v10904_v9, %v10826_v57  ;;  %v10837_v59 = vadd.f32 %v13812_v52, %v18313_v22  ;;  %v10445_v23 = vpop.f32.mrf.mxu1  ;;  %v9891_v21 = vadd.f32 %v19180_v58, %v19179_v40  ;;  %v10192_v13 = vadd.f32 %v18285_v55, %v9886_v44 }
 0x68f   : > { %v10828_v10 = vpop.f32.mrf.mxu0  ;;  %v10510_v25 = vadd.f32 %v10445_v23, %v10188_v35  ;;  %v10551_v45 = vadd.f32 %v18300_v61, %v10512_v60  ;;  %v10908_v41 = vmul.f32 0.25, %v10548_v50  ;;  %v9889_v35 = vadd.f32 %v19182_v14, %v19181_v15 }
 0x690   : > { %10968 = vst [vmem:[%s18331_s30 + $0x80] sm:$0xff] %v10936_v62  ;;  %v10939_v8 = vadd.f32 %v10907_v53, %v10837_v59  ;;  %v10829_v29 = vadd.f32 %v18313_v22, %v10828_v10  ;;  %v13771_v43 = vpop.f32.mrf.mxu1  ;;  %v10197_v52 = vadd.f32 %v18291_v34, %v9891_v21 }
 0x691   : > { %v13815_v7 = vpop.f32.mrf.mxu0  ;;  %v10515_v54 = vadd.f32 %v13771_v43, %v10193_v6  ;;  %v10549_v30 = vadd.f32 %v18300_v61, %v10510_v25  ;;  %v10911_v57 = vmul.f32 0.25, %v10551_v45  ;;  %v10195_v49 = vadd.f32 %v18295_v16, %v9889_v35  ;;  %v19185_v25 = vld [vmem:[#allocation51_spill] sm:$0xff]  ;;  %v19186_v43 = vld [vmem:[#allocation58_spill] sm:$0xff] }
 0x692   : > { %10971 = vst [vmem:[%s18331_s30 + $0x98] sm:$0xff] %v10939_v8  ;;  %v10937_v39 = vadd.f32 %v10905_v28, %v10829_v29  ;;  %v10850_v3 = vadd.f32 %v13815_v7, %v18313_v22  ;;  %v10458_v26 = vpop.f32.mrf.mxu1  ;;  %v9890_v47 = vadd.f32 %v19186_v43, %v19185_v25 }
 0x693   : > { %v10841_v63 = vpop.f32.mrf.mxu0  ;;  %v10513_v20 = vadd.f32 %v10458_v26, %v10191_v48  ;;  %v10554_v24 = vadd.f32 %v18300_v61, %v10515_v54  ;;  %v10909_v55 = vmul.f32 0.25, %v10549_v30 }
 0x694   : > { %10969 = vst [vmem:[%s18331_s30 + $0x88] sm:$0xff] %v10937_v39  ;;  %v10942_v12 = vadd.f32 %v10910_v5, %v10850_v3  ;;  %v10842_v11 = vadd.f32 %v18313_v22, %v10841_v63  ;;  %v13772_v38 = vpop.f32.mrf.mxu1  ;;  %v10196_v3 = vadd.f32 %v18308_v17, %v9890_v47 }
 0x695   : > { %v13816_v9 = vpop.f32.mrf.mxu0  ;;  %v10516_v4 = vadd.f32 %v13772_v38, %v10194_v27  ;;  %v10552_v60 = vadd.f32 %v18300_v61, %v10513_v20  ;;  %v10914_v34 = vmul.f32 0.25, %v10554_v24 }
 0x696   : > { %10974 = vst [vmem:[%s18331_s30 + $0xb0] sm:$0xff] %v10942_v12  ;;  %v10940_v51 = vadd.f32 %v10908_v41, %v10842_v11  ;;  %v10853_v19 = vadd.f32 %v13816_v9, %v18313_v22  ;;  %v10461_v32 = vpop.f32.mrf.mxu1 }
 0x697   : > { %v10844_v31 = vpop.f32.mrf.mxu0  ;;  %v10514_v53 = vadd.f32 %v10461_v32, %v10192_v13  ;;  %v10555_v10 = vadd.f32 %v18300_v61, %v10516_v4  ;;  %v10912_v16 = vmul.f32 0.25, %v10552_v60 }
 0x698   : > { %10972 = vst [vmem:[%s18331_s30 + $0xa0] sm:$0xff] %v10940_v51  ;;  %v10943_v62 = vadd.f32 %v10911_v57, %v10853_v19  ;;  %v10845_v59 = vadd.f32 %v18313_v22, %v10844_v31  ;;  %v13775_v23 = vpop.f32.mrf.mxu1 }
 0x699   : > { %v13819_v6 = vpop.f32.mrf.mxu0  ;;  %v10519_v8 = vadd.f32 %v13775_v23, %v10197_v52  ;;  %v10553_v0 = vadd.f32 %v18300_v61, %v10514_v53  ;;  %v10915_v45 = vmul.f32 0.25, %v10555_v10 }
 0x69a   : > { %10975 = vst [vmem:[%s18331_s30 + $0xb8] sm:$0xff] %v10943_v62  ;;  %v10941_v50 = vadd.f32 %v10909_v55, %v10845_v59  ;;  %v10866_v28 = vadd.f32 %v13819_v6, %v18313_v22  ;;  %v10474_v29 = vpop.f32.mrf.mxu1 }
 0x69b   : > { %v10857_v18 = vpop.f32.mrf.mxu0  ;;  %v10517_v7 = vadd.f32 %v10474_v29, %v10195_v49  ;;  %v10558_v56 = vadd.f32 %v18300_v61, %v10519_v8  ;;  %v10913_v33 = vmul.f32 0.25, %v10553_v0 }
 0x69c   : > { %10973 = vst [vmem:[%s18331_s30 + $0xa8] sm:$0xff] %v10941_v50  ;;  %v10946_v48 = vadd.f32 %v10914_v34, %v10866_v28  ;;  %v10858_v5 = vadd.f32 %v18313_v22, %v10857_v18  ;;  %v13776_v39 = vpop.f32.mrf.mxu1 }
 0x69d   : > { %v13820_v54 = vpop.f32.mrf.mxu0  ;;  %v10520_v42 = vadd.f32 %v13776_v39, %v10198_v2  ;;  %v10556_v17 = vadd.f32 %v18300_v61, %v10517_v7  ;;  %v10918_v30 = vmul.f32 0.25, %v10558_v56 }
 0x69e   : > { %10978 = vst [vmem:[%s18331_s30 + $0xd0] sm:$0xff] %v10946_v48  ;;  %v10944_v26 = vadd.f32 %v10912_v16, %v10858_v5  ;;  %v10869_v1 = vadd.f32 %v13820_v54, %v18313_v22  ;;  %v10477_v44 = vpop.f32.mrf.mxu1 }
 0x69f   : > { %v10860_v27 = vpop.f32.mrf.mxu0  ;;  %v10518_v12 = vadd.f32 %v10477_v44, %v10196_v3  ;;  %v10559_v40 = vadd.f32 %v18300_v61, %v10520_v42  ;;  %v10916_v21 = vmul.f32 0.25, %v10556_v17 }
 0x6a0   : > { %10976 = vst [vmem:[%s18331_s30 + $0xc0] sm:$0xff] %v10944_v26  ;;  %v10947_v41 = vadd.f32 %v10915_v45, %v10869_v1  ;;  %v10861_v63 = vadd.f32 %v18313_v22, %v10860_v27 }
 0x6a1   : > { %v13823_v11 = vpop.f32.mrf.mxu0  ;;  %v10557_v4 = vadd.f32 %v18300_v61, %v10518_v12  ;;  %v10919_v51 = vmul.f32 0.25, %v10559_v40 }
 0x6a2   : > { %10979 = vst [vmem:[%s18331_s30 + $0xd8] sm:$0xff] %v10947_v41  ;;  %v10945_v20 = vadd.f32 %v10913_v33, %v10861_v63  ;;  %v10882_v38 = vadd.f32 %v13823_v11, %v18313_v22 }
 0x6a3   : > { %v10873_v58 = vpop.f32.mrf.mxu0  ;;  %v10917_v15 = vmul.f32 0.25, %v10557_v4 }
 0x6a4   : > { %10977 = vst [vmem:[%s18331_s30 + $0xc8] sm:$0xff] %v10945_v20  ;;  %v10950_v13 = vadd.f32 %v10918_v30, %v10882_v38  ;;  %v10874_v9 = vadd.f32 %v18313_v22, %v10873_v58 }
 0x6a5   : > { %v13824_v57 = vpop.f32.mrf.mxu0 }
 0x6a6   : > { %10982 = vst [vmem:[%s18331_s30 + $0xf0] sm:$0xff] %v10950_v13  ;;  %v10948_v19 = vadd.f32 %v10916_v21, %v10874_v9  ;;  %v10885_v24 = vadd.f32 %v13824_v57, %v18313_v22 }
 0x6a7   : > { %v10876_v32 = vpop.f32.mrf.mxu0 }
 0x6a8   : > { %10980 = vst [vmem:[%s18331_s30 + $0xe0] sm:$0xff] %v10948_v19  ;;  %v10951_v14 = vadd.f32 %v10919_v51, %v10885_v24  ;;  %v10877_v35 = vadd.f32 %v18313_v22, %v10876_v32 }
 0x6aa   : > { %10983 = vst [vmem:[%s18331_s30 + $0xf8] sm:$0xff] %v10951_v14  ;;  %v10949_v52 = vadd.f32 %v10917_v15, %v10877_v35 }
 0x6ac   : > { %10981 = vst [vmem:[%s18331_s30 + $0xe8] sm:$0xff] %v10949_v52 }
 0x6ad PF: > { %s23_s25 = sadd.s32 1, %s14141_s25  }
 0x6ae   : > { %p20_p4 = scmp.ge.s32.totalorder %s23_s25, 4  }
 0x6b0   :  { %22 = sbr.rel (!%p20_p4) target bundleno = 1 (0x1), region = 126 }

</bundles_post_ra>
